<compile_context>
chip_gen: v7x
topology: tpu7x:2x2x1
jax: 0.10.0
libtpu: 0.0.40
codegen_flags: <defaults>
</compile_context>

<pallas_src>
from functools import partial

import jax
import jax.numpy as jnp
from jax.experimental import pallas as pl
from jax.experimental.pallas import tpu as pltpu

LANE = 128
_VMEM_LIMIT = 32 * 1024 * 1024


def _round_up(v, m):
    return (v + m - 1) // m * m


# ---------------------------------------------------------------------------
# Fused conv (k=3, s=2, p=1) + bias + ReLU on a space-to-depth phase image.
# ---------------------------------------------------------------------------
def _conv_s2d_kernel(x_ref, w_ref, b_ref, o_ref, *, ho, wo):
    # x_ref: (1, ho+1, wo+1, 4*Cin)  bf16 phase image (pad+2x2 space-to-depth)
    # w_ref: (2, 2, 4*Cin, 128)      bf16 rearranged conv weights
    # b_ref: (1, 128)                f32 bias (zero-padded)
    # o_ref: (1, ho, wo, 128)        bf16 output (lane-dense, Cout padded to 128)
    bias = b_ref[...]                                   # (1, 128) f32
    for oh in range(ho):                                # static unrolled loop
        acc = None
        for dh in range(2):
            for dw in range(2):
                lhs = x_ref[0, oh + dh, dw:dw + wo, :]  # (wo, 4*Cin) contiguous
                rhs = w_ref[dh, dw, :, :]               # (4*Cin, 128)
                d = jnp.dot(lhs, rhs, preferred_element_type=jnp.float32)
                acc = d if acc is None else acc + d
        acc = jnp.maximum(acc + bias, 0.0)              # f32 epilogue
        o_ref[0, oh, :, :] = acc.astype(o_ref.dtype)


def conv3x3_s2_relu(phase, w2, b2):
    n, hp2, wp2, k4 = phase.shape
    ho, wo = hp2 - 1, wp2 - 1
    assert w2.shape[2] == k4, (w2.shape, k4)
    cout = w2.shape[-1]
    return pl.pallas_call(
        partial(_conv_s2d_kernel, ho=ho, wo=wo),
        out_shape=jax.ShapeDtypeStruct((n, ho, wo, cout), jnp.bfloat16),
        grid=(n,),
        in_specs=[
            pl.BlockSpec((1, hp2, wp2, k4), lambda i: (i, 0, 0, 0)),
            pl.BlockSpec((2, 2, k4, cout), lambda i: (0, 0, 0, 0)),
            pl.BlockSpec((1, cout), lambda i: (0, 0)),
        ],
        out_specs=pl.BlockSpec((1, ho, wo, cout), lambda i: (i, 0, 0, 0)),
        compiler_params=pltpu.CompilerParams(
            dimension_semantics=("parallel",),
            vmem_limit_bytes=_VMEM_LIMIT),
    )(phase, w2, b2)


# ---------------------------------------------------------------------------
# Tiled matmul + bias (+ optional ReLU): M parallel, K reduction with scratch.
# ---------------------------------------------------------------------------
def _matmul_bias_kernel(x_ref, w_ref, b_ref, o_ref, acc_ref, *, apply_relu):
    k = pl.program_id(1)

    @pl.when(k == 0)
    def _():
        acc_ref[...] = jnp.zeros_like(acc_ref)

    acc_ref[...] += jnp.dot(x_ref[...], w_ref[...],
                            preferred_element_type=jnp.float32)

    @pl.when(k == pl.num_programs(1) - 1)
    def _():
        res = acc_ref[...] + b_ref[...]
        if apply_relu:
            res = jnp.maximum(res, 0.0)
        o_ref[...] = res.astype(o_ref.dtype)


def matmul_bias(x, w, b, *, apply_relu=False, out_dtype=jnp.float32,
                tm=256, tk=256):
    m, kdim = x.shape
    k2, npad = w.shape
    assert kdim == k2 and npad % LANE == 0 and b.shape == (1, npad)
    tm = m if (m < tm or m % tm != 0) else tm
    tk = kdim if (kdim < tk or kdim % tk != 0) else tk
    grid = (m // tm, kdim // tk)
    return pl.pallas_call(
        partial(_matmul_bias_kernel, apply_relu=apply_relu),
        out_shape=jax.ShapeDtypeStruct((m, npad), out_dtype),
        grid=grid,
        in_specs=[
            pl.BlockSpec((tm, tk), lambda i, k: (i, k)),
            pl.BlockSpec((tk, npad), lambda i, k: (k, 0)),
            pl.BlockSpec((1, npad), lambda i, k: (0, 0)),
        ],
        out_specs=pl.BlockSpec((tm, npad), lambda i, k: (i, 0)),
        scratch_shapes=[pltpu.VMEM((tm, npad), jnp.float32)],
        compiler_params=pltpu.CompilerParams(
            dimension_semantics=("parallel", "arbitrary"),
            vmem_limit_bytes=_VMEM_LIMIT),
    )(x, w, b)


# ---------------------------------------------------------------------------
# Host-side glue: pad + 2x2 space-to-depth (one cheap pass, replaces im2col).
# ---------------------------------------------------------------------------
def _pad_space_to_depth(x_nhwc):
    n, h, w, c = x_nhwc.shape
    assert h % 2 == 0 and w % 2 == 0
    xp = jnp.pad(x_nhwc, ((0, 0), (1, 1), (1, 1), (0, 0)))
    hp, wp = h + 2, w + 2
    xr = xp.reshape(n, hp // 2, 2, wp // 2, 2, c)
    xr = jnp.transpose(xr, (0, 1, 3, 2, 4, 5))      # (n, hp/2, wp/2, dr, dc, c)
    return xr.reshape(n, hp // 2, wp // 2, 4 * c)


# ---------------------------------------------------------------------------
# Encoder forward (all heavy compute inside Pallas kernels)
# ---------------------------------------------------------------------------
def encoder_forward(x_nchw, p, *, embedding_dim):
    x = jnp.transpose(x_nchw, (0, 2, 3, 1)).astype(jnp.bfloat16)   # NHWC bf16
    for name in ("conv1", "conv2", "conv3"):
        phase = _pad_space_to_depth(x)
        x = conv3x3_s2_relu(phase, p[name + "_w2"], p[name + "_b2"])
    flat = x.reshape(x.shape[0], -1)        # NHWC flatten (fc weight pre-permuted)
    out = matmul_bias(flat, p["fc_w2"], p["fc_b2"], apply_relu=False)
    return out[:, :embedding_dim]


# ---------------------------------------------------------------------------
# Parameters: PyTorch-layout init, then ONE-TIME rearrangement for the kernels.
# ---------------------------------------------------------------------------
def init_params(key, image_size, channels, embedding_dim):
    flattened_size = (image_size // 8) * (image_size // 8) * 128
    ks = jax.random.split(key, 8)
    s = 0.05
    return {
        "conv1_w": s * jax.random.normal(ks[0], (32, channels, 3, 3), jnp.float32),
        "conv1_b": s * jax.random.normal(ks[1], (32,), jnp.float32),
        "conv2_w": s * jax.random.normal(ks[2], (64, 32, 3, 3), jnp.float32),
        "conv2_b": s * jax.random.normal(ks[3], (64,), jnp.float32),
        "conv3_w": s * jax.random.normal(ks[4], (128, 64, 3, 3), jnp.float32),
        "conv3_b": s * jax.random.normal(ks[5], (128,), jnp.float32),
        "fc_w": s * jax.random.normal(ks[6], (embedding_dim, flattened_size), jnp.float32),
        "fc_b": s * jax.random.normal(ks[7], (embedding_dim,), jnp.float32),
    }


def _prep_conv(w_oihw, b, cin_store):
    # (Cout, Cin, 3, 3) torch weight -> (2, 2, 4*cin_store, 128) phase weight.
    cout, cin, kh, kw = w_oihw.shape
    assert (kh, kw) == (3, 3) and cin_store >= cin and cout <= LANE
    cout_p = _round_up(cout, LANE)
    whw = jnp.transpose(w_oihw.astype(jnp.float32), (2, 3, 1, 0))   # (3,3,cin,cout)
    w2 = jnp.zeros((2, 2, 4, cin_store, cout_p), jnp.float32)
    for kh_i in range(3):
        dh, rh = divmod(kh_i, 2)
        for kw_i in range(3):
            dw, rw = divmod(kw_i, 2)
            w2 = w2.at[dh, dw, 2 * rh + rw, :cin, :cout].set(whw[kh_i, kw_i])
    w2 = w2.reshape(2, 2, 4 * cin_store, cout_p).astype(jnp.bfloat16)
    b2 = jnp.zeros((1, cout_p), jnp.float32).at[0, :cout].set(b.astype(jnp.float32))
    return w2, b2


def _prep_fc(fc_w, fc_b, c, hf, wf):
    # torch fc: y = x_nchw_flat @ W.T ; re-index columns to NHWC flatten order,
    # transpose to (K, N) and pad N to a 128-lane multiple -- done once at init.
    e, f = fc_w.shape
    assert f == c * hf * wf
    e_p = _round_up(e, LANE)
    w = fc_w.astype(jnp.float32).reshape(e, c, hf, wf)
    w = jnp.transpose(w, (2, 3, 1, 0)).reshape(hf * wf * c, e)
    w = jnp.pad(w, ((0, 0), (0, e_p - e))).astype(jnp.bfloat16)
    b2 = jnp.zeros((1, e_p), jnp.float32).at[0, :e].set(fc_b.astype(jnp.float32))
    return w, b2


def prepare_params(params, image_size, channels):
    hf = wf = image_size // 8
    c1w, c1b = _prep_conv(params["conv1_w"], params["conv1_b"], cin_store=channels)
    c2w, c2b = _prep_conv(params["conv2_w"], params["conv2_b"], cin_store=LANE)
    c3w, c3b = _prep_conv(params["conv3_w"], params["conv3_b"], cin_store=LANE)
    fcw, fcb = _prep_fc(params["fc_w"], params["fc_b"], c=128, hf=hf, wf=wf)
    return {"conv1_w2": c1w, "conv1_b2": c1b,
            "conv2_w2": c2w, "conv2_b2": c2b,
            "conv3_w2": c3w, "conv3_b2": c3b,
            "fc_w2": fcw, "fc_b2": fcb}


# ---------------------------------------------------------------------------
# Pure-JAX reference (f32) for a correctness sanity check.
# ---------------------------------------------------------------------------
def reference_forward(x_nchw, params):
    x = x_nchw.astype(jnp.float32)
    for name in ("conv1", "conv2", "conv3"):
        w = params[name + "_w"].astype(jnp.float32)
        b = params[name + "_b"].astype(jnp.float32)
        x = jax.lax.conv_general_dilated(
            x, w, window_strides=(2, 2), padding=((1, 1), (1, 1)),
            dimension_numbers=("NCHW", "OIHW", "NCHW"))
        x = jax.nn.relu(x + b[None, :, None, None])
    flat = x.reshape(x.shape[0], -1)
    return flat @ params["fc_w"].astype(jnp.float32).T + params["fc_b"].astype(jnp.float32)


if __name__ == "__main__":
    batch, channels, image_size, embedding_dim = 2, 4, 16, 32

    key = jax.random.PRNGKey(0)
    k_x, k_p = jax.random.split(key)
    x = jax.random.normal(k_x, (batch, channels, image_size, image_size), jnp.float32)
    params = init_params(k_p, image_size, channels, embedding_dim)
    prepped = prepare_params(params, image_size, channels)

    fwd = jax.jit(partial(encoder_forward, embedding_dim=embedding_dim))
    out = jax.block_until_ready(fwd(x, prepped))

    assert out.shape == (batch, embedding_dim), out.shape
    assert out.dtype == jnp.float32

    ref = jax.block_until_ready(reference_forward(x, params))
    max_err = float(jnp.max(jnp.abs(out - ref)))
    assert max_err < 5e-2, f"max abs err vs f32 reference: {max_err}"

    print("KERNEL_OK")
</pallas_src>

<mosaic_0001>
module attributes {stable_mosaic.version = 11 : i64} {
  func.func @_conv_s2d_kernel(%arg0: i32, %arg1: memref<1x9x9x16xbf16, #tpu.memory_space<vmem>>, %arg2: memref<2x2x16x128xbf16, #tpu.memory_space<vmem>>, %arg3: memref<1x128xf32, #tpu.memory_space<vmem>>, %arg4: memref<1x8x8x128xbf16, #tpu.memory_space<vmem>>) attributes {dimension_semantics = [#tpu.dimension_semantics<parallel>], iteration_bounds = array<i64: 2>, scalar_prefetch = 0 : i64, scratch_operands = 0 : i64, tpu.core_type = #tpu.core_type<tc>, window_params = [{transform_indices = @transform_0, window_bounds = array<i64: 1, 9, 9, 16>}, {pipeline_mode = #tpu.pipeline_mode<synchronous>, transform_indices = @transform_1, window_bounds = array<i64: 2, 2, 16, 128>}, {pipeline_mode = #tpu.pipeline_mode<synchronous>, transform_indices = @transform_2, window_bounds = array<i64: 1, 128>}, {transform_indices = @transform_3, window_bounds = array<i64: 1, 8, 8, 128>}]} {
    %c0 = arith.constant 0 : index
    %c0_0 = arith.constant 0 : index
    %0 = vector.load %arg3[%c0, %c0_0] : memref<1x128xf32, #tpu.memory_space<vmem>>, vector<1x128xf32>
    %c0_1 = arith.constant 0 : index
    %c0_2 = arith.constant 0 : index
    %c0_3 = arith.constant 0 : index
    %c0_4 = arith.constant 0 : index
    %1 = vector.load %arg1[%c0_1, %c0_2, %c0_3, %c0_4] : memref<1x9x9x16xbf16, #tpu.memory_space<vmem>>, vector<1x1x8x16xbf16>
    %2 = vector.shape_cast %1 : vector<1x1x8x16xbf16> to vector<8x16xbf16>
    %c0_5 = arith.constant 0 : index
    %c0_6 = arith.constant 0 : index
    %c0_7 = arith.constant 0 : index
    %c0_8 = arith.constant 0 : index
    %3 = vector.load %arg2[%c0_5, %c0_6, %c0_7, %c0_8] : memref<2x2x16x128xbf16, #tpu.memory_space<vmem>>, vector<1x1x16x128xbf16>
    %4 = vector.shape_cast %3 : vector<1x1x16x128xbf16> to vector<16x128xbf16>
    %cst = arith.constant dense<0.000000e+00> : vector<8x128xf32>
    %5 = tpu.matmul %2, %4, %cst {dimension_numbers = #tpu.dot_dimension_numbers<[1], [0], [0], [1], [0, 0, 1, 1], [], []>} : vector<8x16xbf16>, vector<16x128xbf16>, vector<8x128xf32> -> vector<8x128xf32>
    %c0_9 = arith.constant 0 : index
    %c0_10 = arith.constant 0 : index
    %c1 = arith.constant 1 : index
    %c0_11 = arith.constant 0 : index
    %6 = vector.load %arg1[%c0_9, %c0_10, %c1, %c0_11] : memref<1x9x9x16xbf16, #tpu.memory_space<vmem>>, vector<1x1x8x16xbf16>
    %7 = vector.shape_cast %6 : vector<1x1x8x16xbf16> to vector<8x16xbf16>
    %c0_12 = arith.constant 0 : index
    %c1_13 = arith.constant 1 : index
    %c0_14 = arith.constant 0 : index
    %c0_15 = arith.constant 0 : index
    %8 = vector.load %arg2[%c0_12, %c1_13, %c0_14, %c0_15] : memref<2x2x16x128xbf16, #tpu.memory_space<vmem>>, vector<1x1x16x128xbf16>
    %9 = vector.shape_cast %8 : vector<1x1x16x128xbf16> to vector<16x128xbf16>
    %cst_16 = arith.constant dense<0.000000e+00> : vector<8x128xf32>
    %10 = tpu.matmul %7, %9, %cst_16 {dimension_numbers = #tpu.dot_dimension_numbers<[1], [0], [0], [1], [0, 0, 1, 1], [], []>} : vector<8x16xbf16>, vector<16x128xbf16>, vector<8x128xf32> -> vector<8x128xf32>
    %11 = arith.addf %5, %10 : vector<8x128xf32>
    %c0_17 = arith.constant 0 : index
    %c1_18 = arith.constant 1 : index
    %c0_19 = arith.constant 0 : index
    %c0_20 = arith.constant 0 : index
    %12 = vector.load %arg1[%c0_17, %c1_18, %c0_19, %c0_20] : memref<1x9x9x16xbf16, #tpu.memory_space<vmem>>, vector<1x1x8x16xbf16>
    %13 = vector.shape_cast %12 : vector<1x1x8x16xbf16> to vector<8x16xbf16>
    %c1_21 = arith.constant 1 : index
    %c0_22 = arith.constant 0 : index
    %c0_23 = arith.constant 0 : index
    %c0_24 = arith.constant 0 : index
    %14 = vector.load %arg2[%c1_21, %c0_22, %c0_23, %c0_24] : memref<2x2x16x128xbf16, #tpu.memory_space<vmem>>, vector<1x1x16x128xbf16>
    %15 = vector.shape_cast %14 : vector<1x1x16x128xbf16> to vector<16x128xbf16>
    %cst_25 = arith.constant dense<0.000000e+00> : vector<8x128xf32>
    %16 = tpu.matmul %13, %15, %cst_25 {dimension_numbers = #tpu.dot_dimension_numbers<[1], [0], [0], [1], [0, 0, 1, 1], [], []>} : vector<8x16xbf16>, vector<16x128xbf16>, vector<8x128xf32> -> vector<8x128xf32>
    %17 = arith.addf %11, %16 : vector<8x128xf32>
    %c0_26 = arith.constant 0 : index
    %c1_27 = arith.constant 1 : index
    %c1_28 = arith.constant 1 : index
    %c0_29 = arith.constant 0 : index
    %18 = vector.load %arg1[%c0_26, %c1_27, %c1_28, %c0_29] : memref<1x9x9x16xbf16, #tpu.memory_space<vmem>>, vector<1x1x8x16xbf16>
    %19 = vector.shape_cast %18 : vector<1x1x8x16xbf16> to vector<8x16xbf16>
    %c1_30 = arith.constant 1 : index
    %c1_31 = arith.constant 1 : index
    %c0_32 = arith.constant 0 : index
    %c0_33 = arith.constant 0 : index
    %20 = vector.load %arg2[%c1_30, %c1_31, %c0_32, %c0_33] : memref<2x2x16x128xbf16, #tpu.memory_space<vmem>>, vector<1x1x16x128xbf16>
    %21 = vector.shape_cast %20 : vector<1x1x16x128xbf16> to vector<16x128xbf16>
    %cst_34 = arith.constant dense<0.000000e+00> : vector<8x128xf32>
    %22 = tpu.matmul %19, %21, %cst_34 {dimension_numbers = #tpu.dot_dimension_numbers<[1], [0], [0], [1], [0, 0, 1, 1], [], []>} : vector<8x16xbf16>, vector<16x128xbf16>, vector<8x128xf32> -> vector<8x128xf32>
    %23 = arith.addf %17, %22 : vector<8x128xf32>
    %24 = vector.broadcast %0 : vector<1x128xf32> to vector<8x128xf32>
    %25 = arith.addf %23, %24 : vector<8x128xf32>
    %cst_35 = arith.constant 0.000000e+00 : f32
    %26 = vector.broadcast %cst_35 : f32 to vector<8x128xf32>
    %27 = arith.maximumf %25, %26 : vector<8x128xf32>
    %28 = arith.truncf %27 : vector<8x128xf32> to vector<8x128xbf16>
    %c0_36 = arith.constant 0 : index
    %c0_37 = arith.constant 0 : index
    %c0_38 = arith.constant 0 : index
    %c0_39 = arith.constant 0 : index
    %29 = vector.load %arg4[%c0_36, %c0_37, %c0_38, %c0_39] : memref<1x8x8x128xbf16, #tpu.memory_space<vmem>>, vector<1x1x8x128xbf16>
    %30 = vector.shape_cast %29 : vector<1x1x8x128xbf16> to vector<8x128xbf16>
    %31 = vector.shape_cast %28 : vector<8x128xbf16> to vector<1x1x8x128xbf16>
    tpu.vector_store %arg4[%c0_36, %c0_37, %c0_38, %c0_39], %31 {strides = array<i32>} : memref<1x8x8x128xbf16, #tpu.memory_space<vmem>>, vector<1x1x8x128xbf16>,
    %c0_40 = arith.constant 0 : index
    %c1_41 = arith.constant 1 : index
    %c0_42 = arith.constant 0 : index
    %c0_43 = arith.constant 0 : index
    %32 = vector.load %arg1[%c0_40, %c1_41, %c0_42, %c0_43] : memref<1x9x9x16xbf16, #tpu.memory_space<vmem>>, vector<1x1x8x16xbf16>
    %33 = vector.shape_cast %32 : vector<1x1x8x16xbf16> to vector<8x16xbf16>
    %c0_44 = arith.constant 0 : index
    %c0_45 = arith.constant 0 : index
    %c0_46 = arith.constant 0 : index
    %c0_47 = arith.constant 0 : index
    %34 = vector.load %arg2[%c0_44, %c0_45, %c0_46, %c0_47] : memref<2x2x16x128xbf16, #tpu.memory_space<vmem>>, vector<1x1x16x128xbf16>
    %35 = vector.shape_cast %34 : vector<1x1x16x128xbf16> to vector<16x128xbf16>
    %cst_48 = arith.constant dense<0.000000e+00> : vector<8x128xf32>
    %36 = tpu.matmul %33, %35, %cst_48 {dimension_numbers = #tpu.dot_dimension_numbers<[1], [0], [0], [1], [0, 0, 1, 1], [], []>} : vector<8x16xbf16>, vector<16x128xbf16>, vector<8x128xf32> -> vector<8x128xf32>
    %c0_49 = arith.constant 0 : index
    %c1_50 = arith.constant 1 : index
    %c1_51 = arith.constant 1 : index
    %c0_52 = arith.constant 0 : index
    %37 = vector.load %arg1[%c0_49, %c1_50, %c1_51, %c0_52] : memref<1x9x9x16xbf16, #tpu.memory_space<vmem>>, vector<1x1x8x16xbf16>
    %38 = vector.shape_cast %37 : vector<1x1x8x16xbf16> to vector<8x16xbf16>
    %c0_53 = arith.constant 0 : index
    %c1_54 = arith.constant 1 : index
    %c0_55 = arith.constant 0 : index
    %c0_56 = arith.constant 0 : index
    %39 = vector.load %arg2[%c0_53, %c1_54, %c0_55, %c0_56] : memref<2x2x16x128xbf16, #tpu.memory_space<vmem>>, vector<1x1x16x128xbf16>
    %40 = vector.shape_cast %39 : vector<1x1x16x128xbf16> to vector<16x128xbf16>
    %cst_57 = arith.constant dense<0.000000e+00> : vector<8x128xf32>
    %41 = tpu.matmul %38, %40, %cst_57 {dimension_numbers = #tpu.dot_dimension_numbers<[1], [0], [0], [1], [0, 0, 1, 1], [], []>} : vector<8x16xbf16>, vector<16x128xbf16>, vector<8x128xf32> -> vector<8x128xf32>
    %42 = arith.addf %36, %41 : vector<8x128xf32>
    %c0_58 = arith.constant 0 : index
    %c2 = arith.constant 2 : index
    %c0_59 = arith.constant 0 : index
    %c0_60 = arith.constant 0 : index
    %43 = vector.load %arg1[%c0_58, %c2, %c0_59, %c0_60] : memref<1x9x9x16xbf16, #tpu.memory_space<vmem>>, vector<1x1x8x16xbf16>
    %44 = vector.shape_cast %43 : vector<1x1x8x16xbf16> to vector<8x16xbf16>
    %c1_61 = arith.constant 1 : index
    %c0_62 = arith.constant 0 : index
    %c0_63 = arith.constant 0 : index
    %c0_64 = arith.constant 0 : index
    %45 = vector.load %arg2[%c1_61, %c0_62, %c0_63, %c0_64] : memref<2x2x16x128xbf16, #tpu.memory_space<vmem>>, vector<1x1x16x128xbf16>
    %46 = vector.shape_cast %45 : vector<1x1x16x128xbf16> to vector<16x128xbf16>
    %cst_65 = arith.constant dense<0.000000e+00> : vector<8x128xf32>
    %47 = tpu.matmul %44, %46, %cst_65 {dimension_numbers = #tpu.dot_dimension_numbers<[1], [0], [0], [1], [0, 0, 1, 1], [], []>} : vector<8x16xbf16>, vector<16x128xbf16>, vector<8x128xf32> -> vector<8x128xf32>
    %48 = arith.addf %42, %47 : vector<8x128xf32>
    %c0_66 = arith.constant 0 : index
    %c2_67 = arith.constant 2 : index
    %c1_68 = arith.constant 1 : index
    %c0_69 = arith.constant 0 : index
    %49 = vector.load %arg1[%c0_66, %c2_67, %c1_68, %c0_69] : memref<1x9x9x16xbf16, #tpu.memory_space<vmem>>, vector<1x1x8x16xbf16>
    %50 = vector.shape_cast %49 : vector<1x1x8x16xbf16> to vector<8x16xbf16>
    %c1_70 = arith.constant 1 : index
    %c1_71 = arith.constant 1 : index
    %c0_72 = arith.constant 0 : index
    %c0_73 = arith.constant 0 : index
    %51 = vector.load %arg2[%c1_70, %c1_71, %c0_72, %c0_73] : memref<2x2x16x128xbf16, #tpu.memory_space<vmem>>, vector<1x1x16x128xbf16>
    %52 = vector.shape_cast %51 : vector<1x1x16x128xbf16> to vector<16x128xbf16>
    %cst_74 = arith.constant dense<0.000000e+00> : vector<8x128xf32>
    %53 = tpu.matmul %50, %52, %cst_74 {dimension_numbers = #tpu.dot_dimension_numbers<[1], [0], [0], [1], [0, 0, 1, 1], [], []>} : vector<8x16xbf16>, vector<16x128xbf16>, vector<8x128xf32> -> vector<8x128xf32>
    %54 = arith.addf %48, %53 : vector<8x128xf32>
    %55 = vector.broadcast %0 : vector<1x128xf32> to vector<8x128xf32>
    %56 = arith.addf %54, %55 : vector<8x128xf32>
    %cst_75 = arith.constant 0.000000e+00 : f32
    %57 = vector.broadcast %cst_75 : f32 to vector<8x128xf32>
    %58 = arith.maximumf %56, %57 : vector<8x128xf32>
    %59 = arith.truncf %58 : vector<8x128xf32> to vector<8x128xbf16>
    %c0_76 = arith.constant 0 : index
    %c1_77 = arith.constant 1 : index
    %c0_78 = arith.constant 0 : index
    %c0_79 = arith.constant 0 : index
    %60 = vector.load %arg4[%c0_76, %c1_77, %c0_78, %c0_79] : memref<1x8x8x128xbf16, #tpu.memory_space<vmem>>, vector<1x1x8x128xbf16>
    %61 = vector.shape_cast %60 : vector<1x1x8x128xbf16> to vector<8x128xbf16>
    %62 = vector.shape_cast %59 : vector<8x128xbf16> to vector<1x1x8x128xbf16>
    tpu.vector_store %arg4[%c0_76, %c1_77, %c0_78, %c0_79], %62 {strides = array<i32>} : memref<1x8x8x128xbf16, #tpu.memory_space<vmem>>, vector<1x1x8x128xbf16>,
    %c0_80 = arith.constant 0 : index
    %c2_81 = arith.constant 2 : index
    %c0_82 = arith.constant 0 : index
    %c0_83 = arith.constant 0 : index
    %63 = vector.load %arg1[%c0_80, %c2_81, %c0_82, %c0_83] : memref<1x9x9x16xbf16, #tpu.memory_space<vmem>>, vector<1x1x8x16xbf16>
    %64 = vector.shape_cast %63 : vector<1x1x8x16xbf16> to vector<8x16xbf16>
    %c0_84 = arith.constant 0 : index
    %c0_85 = arith.constant 0 : index
    %c0_86 = arith.constant 0 : index
    %c0_87 = arith.constant 0 : index
    %65 = vector.load %arg2[%c0_84, %c0_85, %c0_86, %c0_87] : memref<2x2x16x128xbf16, #tpu.memory_space<vmem>>, vector<1x1x16x128xbf16>
    %66 = vector.shape_cast %65 : vector<1x1x16x128xbf16> to vector<16x128xbf16>
    %cst_88 = arith.constant dense<0.000000e+00> : vector<8x128xf32>
    %67 = tpu.matmul %64, %66, %cst_88 {dimension_numbers = #tpu.dot_dimension_numbers<[1], [0], [0], [1], [0, 0, 1, 1], [], []>} : vector<8x16xbf16>, vector<16x128xbf16>, vector<8x128xf32> -> vector<8x128xf32>
    %c0_89 = arith.constant 0 : index
    %c2_90 = arith.constant 2 : index
    %c1_91 = arith.constant 1 : index
    %c0_92 = arith.constant 0 : index
    %68 = vector.load %arg1[%c0_89, %c2_90, %c1_91, %c0_92] : memref<1x9x9x16xbf16, #tpu.memory_space<vmem>>, vector<1x1x8x16xbf16>
    %69 = vector.shape_cast %68 : vector<1x1x8x16xbf16> to vector<8x16xbf16>
    %c0_93 = arith.constant 0 : index
    %c1_94 = arith.constant 1 : index
    %c0_95 = arith.constant 0 : index
    %c0_96 = arith.constant 0 : index
    %70 = vector.load %arg2[%c0_93, %c1_94, %c0_95, %c0_96] : memref<2x2x16x128xbf16, #tpu.memory_space<vmem>>, vector<1x1x16x128xbf16>
    %71 = vector.shape_cast %70 : vector<1x1x16x128xbf16> to vector<16x128xbf16>
    %cst_97 = arith.constant dense<0.000000e+00> : vector<8x128xf32>
    %72 = tpu.matmul %69, %71, %cst_97 {dimension_numbers = #tpu.dot_dimension_numbers<[1], [0], [0], [1], [0, 0, 1, 1], [], []>} : vector<8x16xbf16>, vector<16x128xbf16>, vector<8x128xf32> -> vector<8x128xf32>
    %73 = arith.addf %67, %72 : vector<8x128xf32>
    %c0_98 = arith.constant 0 : index
    %c3 = arith.constant 3 : index
    %c0_99 = arith.constant 0 : index
    %c0_100 = arith.constant 0 : index
    %74 = vector.load %arg1[%c0_98, %c3, %c0_99, %c0_100] : memref<1x9x9x16xbf16, #tpu.memory_space<vmem>>, vector<1x1x8x16xbf16>
    %75 = vector.shape_cast %74 : vector<1x1x8x16xbf16> to vector<8x16xbf16>
    %c1_101 = arith.constant 1 : index
    %c0_102 = arith.constant 0 : index
    %c0_103 = arith.constant 0 : index
    %c0_104 = arith.constant 0 : index
    %76 = vector.load %arg2[%c1_101, %c0_102, %c0_103, %c0_104] : memref<2x2x16x128xbf16, #tpu.memory_space<vmem>>, vector<1x1x16x128xbf16>
    %77 = vector.shape_cast %76 : vector<1x1x16x128xbf16> to vector<16x128xbf16>
    %cst_105 = arith.constant dense<0.000000e+00> : vector<8x128xf32>
    %78 = tpu.matmul %75, %77, %cst_105 {dimension_numbers = #tpu.dot_dimension_numbers<[1], [0], [0], [1], [0, 0, 1, 1], [], []>} : vector<8x16xbf16>, vector<16x128xbf16>, vector<8x128xf32> -> vector<8x128xf32>
    %79 = arith.addf %73, %78 : vector<8x128xf32>
    %c0_106 = arith.constant 0 : index
    %c3_107 = arith.constant 3 : index
    %c1_108 = arith.constant 1 : index
    %c0_109 = arith.constant 0 : index
    %80 = vector.load %arg1[%c0_106, %c3_107, %c1_108, %c0_109] : memref<1x9x9x16xbf16, #tpu.memory_space<vmem>>, vector<1x1x8x16xbf16>
    %81 = vector.shape_cast %80 : vector<1x1x8x16xbf16> to vector<8x16xbf16>
    %c1_110 = arith.constant 1 : index
    %c1_111 = arith.constant 1 : index
    %c0_112 = arith.constant 0 : index
    %c0_113 = arith.constant 0 : index
    %82 = vector.load %arg2[%c1_110, %c1_111, %c0_112, %c0_113] : memref<2x2x16x128xbf16, #tpu.memory_space<vmem>>, vector<1x1x16x128xbf16>
    %83 = vector.shape_cast %82 : vector<1x1x16x128xbf16> to vector<16x128xbf16>
    %cst_114 = arith.constant dense<0.000000e+00> : vector<8x128xf32>
    %84 = tpu.matmul %81, %83, %cst_114 {dimension_numbers = #tpu.dot_dimension_numbers<[1], [0], [0], [1], [0, 0, 1, 1], [], []>} : vector<8x16xbf16>, vector<16x128xbf16>, vector<8x128xf32> -> vector<8x128xf32>
    %85 = arith.addf %79, %84 : vector<8x128xf32>
    %86 = vector.broadcast %0 : vector<1x128xf32> to vector<8x128xf32>
    %87 = arith.addf %85, %86 : vector<8x128xf32>
    %cst_115 = arith.constant 0.000000e+00 : f32
    %88 = vector.broadcast %cst_115 : f32 to vector<8x128xf32>
    %89 = arith.maximumf %87, %88 : vector<8x128xf32>
    %90 = arith.truncf %89 : vector<8x128xf32> to vector<8x128xbf16>
    %c0_116 = arith.constant 0 : index
    %c2_117 = arith.constant 2 : index
    %c0_118 = arith.constant 0 : index
    %c0_119 = arith.constant 0 : index
    %91 = vector.load %arg4[%c0_116, %c2_117, %c0_118, %c0_119] : memref<1x8x8x128xbf16, #tpu.memory_space<vmem>>, vector<1x1x8x128xbf16>
    %92 = vector.shape_cast %91 : vector<1x1x8x128xbf16> to vector<8x128xbf16>
    %93 = vector.shape_cast %90 : vector<8x128xbf16> to vector<1x1x8x128xbf16>
    tpu.vector_store %arg4[%c0_116, %c2_117, %c0_118, %c0_119], %93 {strides = array<i32>} : memref<1x8x8x128xbf16, #tpu.memory_space<vmem>>, vector<1x1x8x128xbf16>,
    %c0_120 = arith.constant 0 : index
    %c3_121 = arith.constant 3 : index
    %c0_122 = arith.constant 0 : index
    %c0_123 = arith.constant 0 : index
    %94 = vector.load %arg1[%c0_120, %c3_121, %c0_122, %c0_123] : memref<1x9x9x16xbf16, #tpu.memory_space<vmem>>, vector<1x1x8x16xbf16>
    %95 = vector.shape_cast %94 : vector<1x1x8x16xbf16> to vector<8x16xbf16>
    %c0_124 = arith.constant 0 : index
    %c0_125 = arith.constant 0 : index
    %c0_126 = arith.constant 0 : index
    %c0_127 = arith.constant 0 : index
    %96 = vector.load %arg2[%c0_124, %c0_125, %c0_126, %c0_127] : memref<2x2x16x128xbf16, #tpu.memory_space<vmem>>, vector<1x1x16x128xbf16>
    %97 = vector.shape_cast %96 : vector<1x1x16x128xbf16> to vector<16x128xbf16>
    %cst_128 = arith.constant dense<0.000000e+00> : vector<8x128xf32>
    %98 = tpu.matmul %95, %97, %cst_128 {dimension_numbers = #tpu.dot_dimension_numbers<[1], [0], [0], [1], [0, 0, 1, 1], [], []>} : vector<8x16xbf16>, vector<16x128xbf16>, vector<8x128xf32> -> vector<8x128xf32>
    %c0_129 = arith.constant 0 : index
    %c3_130 = arith.constant 3 : index
    %c1_131 = arith.constant 1 : index
    %c0_132 = arith.constant 0 : index
    %99 = vector.load %arg1[%c0_129, %c3_130, %c1_131, %c0_132] : memref<1x9x9x16xbf16, #tpu.memory_space<vmem>>, vector<1x1x8x16xbf16>
    %100 = vector.shape_cast %99 : vector<1x1x8x16xbf16> to vector<8x16xbf16>
    %c0_133 = arith.constant 0 : index
    %c1_134 = arith.constant 1 : index
    %c0_135 = arith.constant 0 : index
    %c0_136 = arith.constant 0 : index
    %101 = vector.load %arg2[%c0_133, %c1_134, %c0_135, %c0_136] : memref<2x2x16x128xbf16, #tpu.memory_space<vmem>>, vector<1x1x16x128xbf16>
    %102 = vector.shape_cast %101 : vector<1x1x16x128xbf16> to vector<16x128xbf16>
    %cst_137 = arith.constant dense<0.000000e+00> : vector<8x128xf32>
    %103 = tpu.matmul %100, %102, %cst_137 {dimension_numbers = #tpu.dot_dimension_numbers<[1], [0], [0], [1], [0, 0, 1, 1], [], []>} : vector<8x16xbf16>, vector<16x128xbf16>, vector<8x128xf32> -> vector<8x128xf32>
    %104 = arith.addf %98, %103 : vector<8x128xf32>
    %c0_138 = arith.constant 0 : index
    %c4 = arith.constant 4 : index
    %c0_139 = arith.constant 0 : index
    %c0_140 = arith.constant 0 : index
    %105 = vector.load %arg1[%c0_138, %c4, %c0_139, %c0_140] : memref<1x9x9x16xbf16, #tpu.memory_space<vmem>>, vector<1x1x8x16xbf16>
    %106 = vector.shape_cast %105 : vector<1x1x8x16xbf16> to vector<8x16xbf16>
    %c1_141 = arith.constant 1 : index
    %c0_142 = arith.constant 0 : index
    %c0_143 = arith.constant 0 : index
    %c0_144 = arith.constant 0 : index
    %107 = vector.load %arg2[%c1_141, %c0_142, %c0_143, %c0_144] : memref<2x2x16x128xbf16, #tpu.memory_space<vmem>>, vector<1x1x16x128xbf16>
    %108 = vector.shape_cast %107 : vector<1x1x16x128xbf16> to vector<16x128xbf16>
    %cst_145 = arith.constant dense<0.000000e+00> : vector<8x128xf32>
    %109 = tpu.matmul %106, %108, %cst_145 {dimension_numbers = #tpu.dot_dimension_numbers<[1], [0], [0], [1], [0, 0, 1, 1], [], []>} : vector<8x16xbf16>, vector<16x128xbf16>, vector<8x128xf32> -> vector<8x128xf32>
    %110 = arith.addf %104, %109 : vector<8x128xf32>
    %c0_146 = arith.constant 0 : index
    %c4_147 = arith.constant 4 : index
    %c1_148 = arith.constant 1 : index
    %c0_149 = arith.constant 0 : index
    %111 = vector.load %arg1[%c0_146, %c4_147, %c1_148, %c0_149] : memref<1x9x9x16xbf16, #tpu.memory_space<vmem>>, vector<1x1x8x16xbf16>
    %112 = vector.shape_cast %111 : vector<1x1x8x16xbf16> to vector<8x16xbf16>
    %c1_150 = arith.constant 1 : index
    %c1_151 = arith.constant 1 : index
    %c0_152 = arith.constant 0 : index
    %c0_153 = arith.constant 0 : index
    %113 = vector.load %arg2[%c1_150, %c1_151, %c0_152, %c0_153] : memref<2x2x16x128xbf16, #tpu.memory_space<vmem>>, vector<1x1x16x128xbf16>
    %114 = vector.shape_cast %113 : vector<1x1x16x128xbf16> to vector<16x128xbf16>
    %cst_154 = arith.constant dense<0.000000e+00> : vector<8x128xf32>
    %115 = tpu.matmul %112, %114, %cst_154 {dimension_numbers = #tpu.dot_dimension_numbers<[1], [0], [0], [1], [0, 0, 1, 1], [], []>} : vector<8x16xbf16>, vector<16x128xbf16>, vector<8x128xf32> -> vector<8x128xf32>
    %116 = arith.addf %110, %115 : vector<8x128xf32>
    %117 = vector.broadcast %0 : vector<1x128xf32> to vector<8x128xf32>
    %118 = arith.addf %116, %117 : vector<8x128xf32>
    %cst_155 = arith.constant 0.000000e+00 : f32
    %119 = vector.broadcast %cst_155 : f32 to vector<8x128xf32>
    %120 = arith.maximumf %118, %119 : vector<8x128xf32>
    %121 = arith.truncf %120 : vector<8x128xf32> to vector<8x128xbf16>
    %c0_156 = arith.constant 0 : index
    %c3_157 = arith.constant 3 : index
    %c0_158 = arith.constant 0 : index
    %c0_159 = arith.constant 0 : index
    %122 = vector.load %arg4[%c0_156, %c3_157, %c0_158, %c0_159] : memref<1x8x8x128xbf16, #tpu.memory_space<vmem>>, vector<1x1x8x128xbf16>
    %123 = vector.shape_cast %122 : vector<1x1x8x128xbf16> to vector<8x128xbf16>
    %124 = vector.shape_cast %121 : vector<8x128xbf16> to vector<1x1x8x128xbf16>
    tpu.vector_store %arg4[%c0_156, %c3_157, %c0_158, %c0_159], %124 {strides = array<i32>} : memref<1x8x8x128xbf16, #tpu.memory_space<vmem>>, vector<1x1x8x128xbf16>,
    %c0_160 = arith.constant 0 : index
    %c4_161 = arith.constant 4 : index
    %c0_162 = arith.constant 0 : index
    %c0_163 = arith.constant 0 : index
    %125 = vector.load %arg1[%c0_160, %c4_161, %c0_162, %c0_163] : memref<1x9x9x16xbf16, #tpu.memory_space<vmem>>, vector<1x1x8x16xbf16>
    %126 = vector.shape_cast %125 : vector<1x1x8x16xbf16> to vector<8x16xbf16>
    %c0_164 = arith.constant 0 : index
    %c0_165 = arith.constant 0 : index
    %c0_166 = arith.constant 0 : index
    %c0_167 = arith.constant 0 : index
    %127 = vector.load %arg2[%c0_164, %c0_165, %c0_166, %c0_167] : memref<2x2x16x128xbf16, #tpu.memory_space<vmem>>, vector<1x1x16x128xbf16>
    %128 = vector.shape_cast %127 : vector<1x1x16x128xbf16> to vector<16x128xbf16>
    %cst_168 = arith.constant dense<0.000000e+00> : vector<8x128xf32>
    %129 = tpu.matmul %126, %128, %cst_168 {dimension_numbers = #tpu.dot_dimension_numbers<[1], [0], [0], [1], [0, 0, 1, 1], [], []>} : vector<8x16xbf16>, vector<16x128xbf16>, vector<8x128xf32> -> vector<8x128xf32>
    %c0_169 = arith.constant 0 : index
    %c4_170 = arith.constant 4 : index
    %c1_171 = arith.constant 1 : index
    %c0_172 = arith.constant 0 : index
    %130 = vector.load %arg1[%c0_169, %c4_170, %c1_171, %c0_172] : memref<1x9x9x16xbf16, #tpu.memory_space<vmem>>, vector<1x1x8x16xbf16>
    %131 = vector.shape_cast %130 : vector<1x1x8x16xbf16> to vector<8x16xbf16>
    %c0_173 = arith.constant 0 : index
    %c1_174 = arith.constant 1 : index
    %c0_175 = arith.constant 0 : index
    %c0_176 = arith.constant 0 : index
    %132 = vector.load %arg2[%c0_173, %c1_174, %c0_175, %c0_176] : memref<2x2x16x128xbf16, #tpu.memory_space<vmem>>, vector<1x1x16x128xbf16>
    %133 = vector.shape_cast %132 : vector<1x1x16x128xbf16> to vector<16x128xbf16>
    %cst_177 = arith.constant dense<0.000000e+00> : vector<8x128xf32>
    %134 = tpu.matmul %131, %133, %cst_177 {dimension_numbers = #tpu.dot_dimension_numbers<[1], [0], [0], [1], [0, 0, 1, 1], [], []>} : vector<8x16xbf16>, vector<16x128xbf16>, vector<8x128xf32> -> vector<8x128xf32>
    %135 = arith.addf %129, %134 : vector<8x128xf32>
    %c0_178 = arith.constant 0 : index
    %c5 = arith.constant 5 : index
    %c0_179 = arith.constant 0 : index
    %c0_180 = arith.constant 0 : index
    %136 = vector.load %arg1[%c0_178, %c5, %c0_179, %c0_180] : memref<1x9x9x16xbf16, #tpu.memory_space<vmem>>, vector<1x1x8x16xbf16>
    %137 = vector.shape_cast %136 : vector<1x1x8x16xbf16> to vector<8x16xbf16>
    %c1_181 = arith.constant 1 : index
    %c0_182 = arith.constant 0 : index
    %c0_183 = arith.constant 0 : index
    %c0_184 = arith.constant 0 : index
    %138 = vector.load %arg2[%c1_181, %c0_182, %c0_183, %c0_184] : memref<2x2x16x128xbf16, #tpu.memory_space<vmem>>, vector<1x1x16x128xbf16>
    %139 = vector.shape_cast %138 : vector<1x1x16x128xbf16> to vector<16x128xbf16>
    %cst_185 = arith.constant dense<0.000000e+00> : vector<8x128xf32>
    %140 = tpu.matmul %137, %139, %cst_185 {dimension_numbers = #tpu.dot_dimension_numbers<[1], [0], [0], [1], [0, 0, 1, 1], [], []>} : vector<8x16xbf16>, vector<16x128xbf16>, vector<8x128xf32> -> vector<8x128xf32>
    %141 = arith.addf %135, %140 : vector<8x128xf32>
    %c0_186 = arith.constant 0 : index
    %c5_187 = arith.constant 5 : index
    %c1_188 = arith.constant 1 : index
    %c0_189 = arith.constant 0 : index
    %142 = vector.load %arg1[%c0_186, %c5_187, %c1_188, %c0_189] : memref<1x9x9x16xbf16, #tpu.memory_space<vmem>>, vector<1x1x8x16xbf16>
    %143 = vector.shape_cast %142 : vector<1x1x8x16xbf16> to vector<8x16xbf16>
    %c1_190 = arith.constant 1 : index
    %c1_191 = arith.constant 1 : index
    %c0_192 = arith.constant 0 : index
    %c0_193 = arith.constant 0 : index
    %144 = vector.load %arg2[%c1_190, %c1_191, %c0_192, %c0_193] : memref<2x2x16x128xbf16, #tpu.memory_space<vmem>>, vector<1x1x16x128xbf16>
    %145 = vector.shape_cast %144 : vector<1x1x16x128xbf16> to vector<16x128xbf16>
    %cst_194 = arith.constant dense<0.000000e+00> : vector<8x128xf32>
    %146 = tpu.matmul %143, %145, %cst_194 {dimension_numbers = #tpu.dot_dimension_numbers<[1], [0], [0], [1], [0, 0, 1, 1], [], []>} : vector<8x16xbf16>, vector<16x128xbf16>, vector<8x128xf32> -> vector<8x128xf32>
    %147 = arith.addf %141, %146 : vector<8x128xf32>
    %148 = vector.broadcast %0 : vector<1x128xf32> to vector<8x128xf32>
    %149 = arith.addf %147, %148 : vector<8x128xf32>
    %cst_195 = arith.constant 0.000000e+00 : f32
    %150 = vector.broadcast %cst_195 : f32 to vector<8x128xf32>
    %151 = arith.maximumf %149, %150 : vector<8x128xf32>
    %152 = arith.truncf %151 : vector<8x128xf32> to vector<8x128xbf16>
    %c0_196 = arith.constant 0 : index
    %c4_197 = arith.constant 4 : index
    %c0_198 = arith.constant 0 : index
    %c0_199 = arith.constant 0 : index
    %153 = vector.load %arg4[%c0_196, %c4_197, %c0_198, %c0_199] : memref<1x8x8x128xbf16, #tpu.memory_space<vmem>>, vector<1x1x8x128xbf16>
    %154 = vector.shape_cast %153 : vector<1x1x8x128xbf16> to vector<8x128xbf16>
    %155 = vector.shape_cast %152 : vector<8x128xbf16> to vector<1x1x8x128xbf16>
    tpu.vector_store %arg4[%c0_196, %c4_197, %c0_198, %c0_199], %155 {strides = array<i32>} : memref<1x8x8x128xbf16, #tpu.memory_space<vmem>>, vector<1x1x8x128xbf16>,
    %c0_200 = arith.constant 0 : index
    %c5_201 = arith.constant 5 : index
    %c0_202 = arith.constant 0 : index
    %c0_203 = arith.constant 0 : index
    %156 = vector.load %arg1[%c0_200, %c5_201, %c0_202, %c0_203] : memref<1x9x9x16xbf16, #tpu.memory_space<vmem>>, vector<1x1x8x16xbf16>
    %157 = vector.shape_cast %156 : vector<1x1x8x16xbf16> to vector<8x16xbf16>
    %c0_204 = arith.constant 0 : index
    %c0_205 = arith.constant 0 : index
    %c0_206 = arith.constant 0 : index
    %c0_207 = arith.constant 0 : index
    %158 = vector.load %arg2[%c0_204, %c0_205, %c0_206, %c0_207] : memref<2x2x16x128xbf16, #tpu.memory_space<vmem>>, vector<1x1x16x128xbf16>
    %159 = vector.shape_cast %158 : vector<1x1x16x128xbf16> to vector<16x128xbf16>
    %cst_208 = arith.constant dense<0.000000e+00> : vector<8x128xf32>
    %160 = tpu.matmul %157, %159, %cst_208 {dimension_numbers = #tpu.dot_dimension_numbers<[1], [0], [0], [1], [0, 0, 1, 1], [], []>} : vector<8x16xbf16>, vector<16x128xbf16>, vector<8x128xf32> -> vector<8x128xf32>
    %c0_209 = arith.constant 0 : index
    %c5_210 = arith.constant 5 : index
    %c1_211 = arith.constant 1 : index
    %c0_212 = arith.constant 0 : index
    %161 = vector.load %arg1[%c0_209, %c5_210, %c1_211, %c0_212] : memref<1x9x9x16xbf16, #tpu.memory_space<vmem>>, vector<1x1x8x16xbf16>
    %162 = vector.shape_cast %161 : vector<1x1x8x16xbf16> to vector<8x16xbf16>
    %c0_213 = arith.constant 0 : index
    %c1_214 = arith.constant 1 : index
    %c0_215 = arith.constant 0 : index
    %c0_216 = arith.constant 0 : index
    %163 = vector.load %arg2[%c0_213, %c1_214, %c0_215, %c0_216] : memref<2x2x16x128xbf16, #tpu.memory_space<vmem>>, vector<1x1x16x128xbf16>
    %164 = vector.shape_cast %163 : vector<1x1x16x128xbf16> to vector<16x128xbf16>
    %cst_217 = arith.constant dense<0.000000e+00> : vector<8x128xf32>
    %165 = tpu.matmul %162, %164, %cst_217 {dimension_numbers = #tpu.dot_dimension_numbers<[1], [0], [0], [1], [0, 0, 1, 1], [], []>} : vector<8x16xbf16>, vector<16x128xbf16>, vector<8x128xf32> -> vector<8x128xf32>
    %166 = arith.addf %160, %165 : vector<8x128xf32>
    %c0_218 = arith.constant 0 : index
    %c6 = arith.constant 6 : index
    %c0_219 = arith.constant 0 : index
    %c0_220 = arith.constant 0 : index
    %167 = vector.load %arg1[%c0_218, %c6, %c0_219, %c0_220] : memref<1x9x9x16xbf16, #tpu.memory_space<vmem>>, vector<1x1x8x16xbf16>
    %168 = vector.shape_cast %167 : vector<1x1x8x16xbf16> to vector<8x16xbf16>
    %c1_221 = arith.constant 1 : index
    %c0_222 = arith.constant 0 : index
    %c0_223 = arith.constant 0 : index
    %c0_224 = arith.constant 0 : index
    %169 = vector.load %arg2[%c1_221, %c0_222, %c0_223, %c0_224] : memref<2x2x16x128xbf16, #tpu.memory_space<vmem>>, vector<1x1x16x128xbf16>
    %170 = vector.shape_cast %169 : vector<1x1x16x128xbf16> to vector<16x128xbf16>
    %cst_225 = arith.constant dense<0.000000e+00> : vector<8x128xf32>
    %171 = tpu.matmul %168, %170, %cst_225 {dimension_numbers = #tpu.dot_dimension_numbers<[1], [0], [0], [1], [0, 0, 1, 1], [], []>} : vector<8x16xbf16>, vector<16x128xbf16>, vector<8x128xf32> -> vector<8x128xf32>
    %172 = arith.addf %166, %171 : vector<8x128xf32>
    %c0_226 = arith.constant 0 : index
    %c6_227 = arith.constant 6 : index
    %c1_228 = arith.constant 1 : index
    %c0_229 = arith.constant 0 : index
    %173 = vector.load %arg1[%c0_226, %c6_227, %c1_228, %c0_229] : memref<1x9x9x16xbf16, #tpu.memory_space<vmem>>, vector<1x1x8x16xbf16>
    %174 = vector.shape_cast %173 : vector<1x1x8x16xbf16> to vector<8x16xbf16>
    %c1_230 = arith.constant 1 : index
    %c1_231 = arith.constant 1 : index
    %c0_232 = arith.constant 0 : index
    %c0_233 = arith.constant 0 : index
    %175 = vector.load %arg2[%c1_230, %c1_231, %c0_232, %c0_233] : memref<2x2x16x128xbf16, #tpu.memory_space<vmem>>, vector<1x1x16x128xbf16>
    %176 = vector.shape_cast %175 : vector<1x1x16x128xbf16> to vector<16x128xbf16>
    %cst_234 = arith.constant dense<0.000000e+00> : vector<8x128xf32>
    %177 = tpu.matmul %174, %176, %cst_234 {dimension_numbers = #tpu.dot_dimension_numbers<[1], [0], [0], [1], [0, 0, 1, 1], [], []>} : vector<8x16xbf16>, vector<16x128xbf16>, vector<8x128xf32> -> vector<8x128xf32>
    %178 = arith.addf %172, %177 : vector<8x128xf32>
    %179 = vector.broadcast %0 : vector<1x128xf32> to vector<8x128xf32>
    %180 = arith.addf %178, %179 : vector<8x128xf32>
    %cst_235 = arith.constant 0.000000e+00 : f32
    %181 = vector.broadcast %cst_235 : f32 to vector<8x128xf32>
    %182 = arith.maximumf %180, %181 : vector<8x128xf32>
    %183 = arith.truncf %182 : vector<8x128xf32> to vector<8x128xbf16>
    %c0_236 = arith.constant 0 : index
    %c5_237 = arith.constant 5 : index
    %c0_238 = arith.constant 0 : index
    %c0_239 = arith.constant 0 : index
    %184 = vector.load %arg4[%c0_236, %c5_237, %c0_238, %c0_239] : memref<1x8x8x128xbf16, #tpu.memory_space<vmem>>, vector<1x1x8x128xbf16>
    %185 = vector.shape_cast %184 : vector<1x1x8x128xbf16> to vector<8x128xbf16>
    %186 = vector.shape_cast %183 : vector<8x128xbf16> to vector<1x1x8x128xbf16>
    tpu.vector_store %arg4[%c0_236, %c5_237, %c0_238, %c0_239], %186 {strides = array<i32>} : memref<1x8x8x128xbf16, #tpu.memory_space<vmem>>, vector<1x1x8x128xbf16>,
    %c0_240 = arith.constant 0 : index
    %c6_241 = arith.constant 6 : index
    %c0_242 = arith.constant 0 : index
    %c0_243 = arith.constant 0 : index
    %187 = vector.load %arg1[%c0_240, %c6_241, %c0_242, %c0_243] : memref<1x9x9x16xbf16, #tpu.memory_space<vmem>>, vector<1x1x8x16xbf16>
    %188 = vector.shape_cast %187 : vector<1x1x8x16xbf16> to vector<8x16xbf16>
    %c0_244 = arith.constant 0 : index
    %c0_245 = arith.constant 0 : index
    %c0_246 = arith.constant 0 : index
    %c0_247 = arith.constant 0 : index
    %189 = vector.load %arg2[%c0_244, %c0_245, %c0_246, %c0_247] : memref<2x2x16x128xbf16, #tpu.memory_space<vmem>>, vector<1x1x16x128xbf16>
    %190 = vector.shape_cast %189 : vector<1x1x16x128xbf16> to vector<16x128xbf16>
    %cst_248 = arith.constant dense<0.000000e+00> : vector<8x128xf32>
    %191 = tpu.matmul %188, %190, %cst_248 {dimension_numbers = #tpu.dot_dimension_numbers<[1], [0], [0], [1], [0, 0, 1, 1], [], []>} : vector<8x16xbf16>, vector<16x128xbf16>, vector<8x128xf32> -> vector<8x128xf32>
    %c0_249 = arith.constant 0 : index
    %c6_250 = arith.constant 6 : index
    %c1_251 = arith.constant 1 : index
    %c0_252 = arith.constant 0 : index
    %192 = vector.load %arg1[%c0_249, %c6_250, %c1_251, %c0_252] : memref<1x9x9x16xbf16, #tpu.memory_space<vmem>>, vector<1x1x8x16xbf16>
    %193 = vector.shape_cast %192 : vector<1x1x8x16xbf16> to vector<8x16xbf16>
    %c0_253 = arith.constant 0 : index
    %c1_254 = arith.constant 1 : index
    %c0_255 = arith.constant 0 : index
    %c0_256 = arith.constant 0 : index
    %194 = vector.load %arg2[%c0_253, %c1_254, %c0_255, %c0_256] : memref<2x2x16x128xbf16, #tpu.memory_space<vmem>>, vector<1x1x16x128xbf16>
    %195 = vector.shape_cast %194 : vector<1x1x16x128xbf16> to vector<16x128xbf16>
    %cst_257 = arith.constant dense<0.000000e+00> : vector<8x128xf32>
    %196 = tpu.matmul %193, %195, %cst_257 {dimension_numbers = #tpu.dot_dimension_numbers<[1], [0], [0], [1], [0, 0, 1, 1], [], []>} : vector<8x16xbf16>, vector<16x128xbf16>, vector<8x128xf32> -> vector<8x128xf32>
    %197 = arith.addf %191, %196 : vector<8x128xf32>
    %c0_258 = arith.constant 0 : index
    %c7 = arith.constant 7 : index
    %c0_259 = arith.constant 0 : index
    %c0_260 = arith.constant 0 : index
    %198 = vector.load %arg1[%c0_258, %c7, %c0_259, %c0_260] : memref<1x9x9x16xbf16, #tpu.memory_space<vmem>>, vector<1x1x8x16xbf16>
    %199 = vector.shape_cast %198 : vector<1x1x8x16xbf16> to vector<8x16xbf16>
    %c1_261 = arith.constant 1 : index
    %c0_262 = arith.constant 0 : index
    %c0_263 = arith.constant 0 : index
    %c0_264 = arith.constant 0 : index
    %200 = vector.load %arg2[%c1_261, %c0_262, %c0_263, %c0_264] : memref<2x2x16x128xbf16, #tpu.memory_space<vmem>>, vector<1x1x16x128xbf16>
    %201 = vector.shape_cast %200 : vector<1x1x16x128xbf16> to vector<16x128xbf16>
    %cst_265 = arith.constant dense<0.000000e+00> : vector<8x128xf32>
    %202 = tpu.matmul %199, %201, %cst_265 {dimension_numbers = #tpu.dot_dimension_numbers<[1], [0], [0], [1], [0, 0, 1, 1], [], []>} : vector<8x16xbf16>, vector<16x128xbf16>, vector<8x128xf32> -> vector<8x128xf32>
    %203 = arith.addf %197, %202 : vector<8x128xf32>
    %c0_266 = arith.constant 0 : index
    %c7_267 = arith.constant 7 : index
    %c1_268 = arith.constant 1 : index
    %c0_269 = arith.constant 0 : index
    %204 = vector.load %arg1[%c0_266, %c7_267, %c1_268, %c0_269] : memref<1x9x9x16xbf16, #tpu.memory_space<vmem>>, vector<1x1x8x16xbf16>
    %205 = vector.shape_cast %204 : vector<1x1x8x16xbf16> to vector<8x16xbf16>
    %c1_270 = arith.constant 1 : index
    %c1_271 = arith.constant 1 : index
    %c0_272 = arith.constant 0 : index
    %c0_273 = arith.constant 0 : index
    %206 = vector.load %arg2[%c1_270, %c1_271, %c0_272, %c0_273] : memref<2x2x16x128xbf16, #tpu.memory_space<vmem>>, vector<1x1x16x128xbf16>
    %207 = vector.shape_cast %206 : vector<1x1x16x128xbf16> to vector<16x128xbf16>
    %cst_274 = arith.constant dense<0.000000e+00> : vector<8x128xf32>
    %208 = tpu.matmul %205, %207, %cst_274 {dimension_numbers = #tpu.dot_dimension_numbers<[1], [0], [0], [1], [0, 0, 1, 1], [], []>} : vector<8x16xbf16>, vector<16x128xbf16>, vector<8x128xf32> -> vector<8x128xf32>
    %209 = arith.addf %203, %208 : vector<8x128xf32>
    %210 = vector.broadcast %0 : vector<1x128xf32> to vector<8x128xf32>
    %211 = arith.addf %209, %210 : vector<8x128xf32>
    %cst_275 = arith.constant 0.000000e+00 : f32
    %212 = vector.broadcast %cst_275 : f32 to vector<8x128xf32>
    %213 = arith.maximumf %211, %212 : vector<8x128xf32>
    %214 = arith.truncf %213 : vector<8x128xf32> to vector<8x128xbf16>
    %c0_276 = arith.constant 0 : index
    %c6_277 = arith.constant 6 : index
    %c0_278 = arith.constant 0 : index
    %c0_279 = arith.constant 0 : index
    %215 = vector.load %arg4[%c0_276, %c6_277, %c0_278, %c0_279] : memref<1x8x8x128xbf16, #tpu.memory_space<vmem>>, vector<1x1x8x128xbf16>
    %216 = vector.shape_cast %215 : vector<1x1x8x128xbf16> to vector<8x128xbf16>
    %217 = vector.shape_cast %214 : vector<8x128xbf16> to vector<1x1x8x128xbf16>
    tpu.vector_store %arg4[%c0_276, %c6_277, %c0_278, %c0_279], %217 {strides = array<i32>} : memref<1x8x8x128xbf16, #tpu.memory_space<vmem>>, vector<1x1x8x128xbf16>,
    %c0_280 = arith.constant 0 : index
    %c7_281 = arith.constant 7 : index
    %c0_282 = arith.constant 0 : index
    %c0_283 = arith.constant 0 : index
    %218 = vector.load %arg1[%c0_280, %c7_281, %c0_282, %c0_283] : memref<1x9x9x16xbf16, #tpu.memory_space<vmem>>, vector<1x1x8x16xbf16>
    %219 = vector.shape_cast %218 : vector<1x1x8x16xbf16> to vector<8x16xbf16>
    %c0_284 = arith.constant 0 : index
    %c0_285 = arith.constant 0 : index
    %c0_286 = arith.constant 0 : index
    %c0_287 = arith.constant 0 : index
    %220 = vector.load %arg2[%c0_284, %c0_285, %c0_286, %c0_287] : memref<2x2x16x128xbf16, #tpu.memory_space<vmem>>, vector<1x1x16x128xbf16>
    %221 = vector.shape_cast %220 : vector<1x1x16x128xbf16> to vector<16x128xbf16>
    %cst_288 = arith.constant dense<0.000000e+00> : vector<8x128xf32>
    %222 = tpu.matmul %219, %221, %cst_288 {dimension_numbers = #tpu.dot_dimension_numbers<[1], [0], [0], [1], [0, 0, 1, 1], [], []>} : vector<8x16xbf16>, vector<16x128xbf16>, vector<8x128xf32> -> vector<8x128xf32>
    %c0_289 = arith.constant 0 : index
    %c7_290 = arith.constant 7 : index
    %c1_291 = arith.constant 1 : index
    %c0_292 = arith.constant 0 : index
    %223 = vector.load %arg1[%c0_289, %c7_290, %c1_291, %c0_292] : memref<1x9x9x16xbf16, #tpu.memory_space<vmem>>, vector<1x1x8x16xbf16>
    %224 = vector.shape_cast %223 : vector<1x1x8x16xbf16> to vector<8x16xbf16>
    %c0_293 = arith.constant 0 : index
    %c1_294 = arith.constant 1 : index
    %c0_295 = arith.constant 0 : index
    %c0_296 = arith.constant 0 : index
    %225 = vector.load %arg2[%c0_293, %c1_294, %c0_295, %c0_296] : memref<2x2x16x128xbf16, #tpu.memory_space<vmem>>, vector<1x1x16x128xbf16>
    %226 = vector.shape_cast %225 : vector<1x1x16x128xbf16> to vector<16x128xbf16>
    %cst_297 = arith.constant dense<0.000000e+00> : vector<8x128xf32>
    %227 = tpu.matmul %224, %226, %cst_297 {dimension_numbers = #tpu.dot_dimension_numbers<[1], [0], [0], [1], [0, 0, 1, 1], [], []>} : vector<8x16xbf16>, vector<16x128xbf16>, vector<8x128xf32> -> vector<8x128xf32>
    %228 = arith.addf %222, %227 : vector<8x128xf32>
    %c0_298 = arith.constant 0 : index
    %c8 = arith.constant 8 : index
    %c0_299 = arith.constant 0 : index
    %c0_300 = arith.constant 0 : index
    %229 = vector.load %arg1[%c0_298, %c8, %c0_299, %c0_300] : memref<1x9x9x16xbf16, #tpu.memory_space<vmem>>, vector<1x1x8x16xbf16>
    %230 = vector.shape_cast %229 : vector<1x1x8x16xbf16> to vector<8x16xbf16>
    %c1_301 = arith.constant 1 : index
    %c0_302 = arith.constant 0 : index
    %c0_303 = arith.constant 0 : index
    %c0_304 = arith.constant 0 : index
    %231 = vector.load %arg2[%c1_301, %c0_302, %c0_303, %c0_304] : memref<2x2x16x128xbf16, #tpu.memory_space<vmem>>, vector<1x1x16x128xbf16>
    %232 = vector.shape_cast %231 : vector<1x1x16x128xbf16> to vector<16x128xbf16>
    %cst_305 = arith.constant dense<0.000000e+00> : vector<8x128xf32>
    %233 = tpu.matmul %230, %232, %cst_305 {dimension_numbers = #tpu.dot_dimension_numbers<[1], [0], [0], [1], [0, 0, 1, 1], [], []>} : vector<8x16xbf16>, vector<16x128xbf16>, vector<8x128xf32> -> vector<8x128xf32>
    %234 = arith.addf %228, %233 : vector<8x128xf32>
    %c0_306 = arith.constant 0 : index
    %c8_307 = arith.constant 8 : index
    %c1_308 = arith.constant 1 : index
    %c0_309 = arith.constant 0 : index
    %235 = vector.load %arg1[%c0_306, %c8_307, %c1_308, %c0_309] : memref<1x9x9x16xbf16, #tpu.memory_space<vmem>>, vector<1x1x8x16xbf16>
    %236 = vector.shape_cast %235 : vector<1x1x8x16xbf16> to vector<8x16xbf16>
    %c1_310 = arith.constant 1 : index
    %c1_311 = arith.constant 1 : index
    %c0_312 = arith.constant 0 : index
    %c0_313 = arith.constant 0 : index
    %237 = vector.load %arg2[%c1_310, %c1_311, %c0_312, %c0_313] : memref<2x2x16x128xbf16, #tpu.memory_space<vmem>>, vector<1x1x16x128xbf16>
    %238 = vector.shape_cast %237 : vector<1x1x16x128xbf16> to vector<16x128xbf16>
    %cst_314 = arith.constant dense<0.000000e+00> : vector<8x128xf32>
    %239 = tpu.matmul %236, %238, %cst_314 {dimension_numbers = #tpu.dot_dimension_numbers<[1], [0], [0], [1], [0, 0, 1, 1], [], []>} : vector<8x16xbf16>, vector<16x128xbf16>, vector<8x128xf32> -> vector<8x128xf32>
    %240 = arith.addf %234, %239 : vector<8x128xf32>
    %241 = vector.broadcast %0 : vector<1x128xf32> to vector<8x128xf32>
    %242 = arith.addf %240, %241 : vector<8x128xf32>
    %cst_315 = arith.constant 0.000000e+00 : f32
    %243 = vector.broadcast %cst_315 : f32 to vector<8x128xf32>
    %244 = arith.maximumf %242, %243 : vector<8x128xf32>
    %245 = arith.truncf %244 : vector<8x128xf32> to vector<8x128xbf16>
    %c0_316 = arith.constant 0 : index
    %c7_317 = arith.constant 7 : index
    %c0_318 = arith.constant 0 : index
    %c0_319 = arith.constant 0 : index
    %246 = vector.load %arg4[%c0_316, %c7_317, %c0_318, %c0_319] : memref<1x8x8x128xbf16, #tpu.memory_space<vmem>>, vector<1x1x8x128xbf16>
    %247 = vector.shape_cast %246 : vector<1x1x8x128xbf16> to vector<8x128xbf16>
    %248 = vector.shape_cast %245 : vector<8x128xbf16> to vector<1x1x8x128xbf16>
    tpu.vector_store %arg4[%c0_316, %c7_317, %c0_318, %c0_319], %248 {strides = array<i32>} : memref<1x8x8x128xbf16, #tpu.memory_space<vmem>>, vector<1x1x8x128xbf16>,
    return
  }
  func.func @transform_0(%arg0: i32) -> (i32, i32, i32, i32) {
    %c0_i32 = arith.constant 0 : i32
    %c0_i32_0 = arith.constant 0 : i32
    %c0_i32_1 = arith.constant 0 : i32
    %c0_i32_2 = arith.constant 0 : i32
    return %arg0, %c0_i32, %c0_i32_0, %c0_i32_1 : i32, i32, i32, i32
  }
  func.func @transform_1(%arg0: i32) -> (i32, i32, i32, i32) {
    %c0_i32 = arith.constant 0 : i32
    %c0_i32_0 = arith.constant 0 : i32
    %c0_i32_1 = arith.constant 0 : i32
    %c0_i32_2 = arith.constant 0 : i32
    %c0_i32_3 = arith.constant 0 : i32
    return %c0_i32, %c0_i32_0, %c0_i32_1, %c0_i32_2 : i32, i32, i32, i32
  }
  func.func @transform_2(%arg0: i32) -> (i32, i32) {
    %c0_i32 = arith.constant 0 : i32
    %c0_i32_0 = arith.constant 0 : i32
    %c0_i32_1 = arith.constant 0 : i32
    return %c0_i32, %c0_i32_0 : i32, i32
  }
  func.func @transform_3(%arg0: i32) -> (i32, i32, i32, i32) {
    %c0_i32 = arith.constant 0 : i32
    %c0_i32_0 = arith.constant 0 : i32
    %c0_i32_1 = arith.constant 0 : i32
    %c0_i32_2 = arith.constant 0 : i32
    return %arg0, %c0_i32, %c0_i32_0, %c0_i32_1 : i32, i32, i32, i32
  }
}

module attributes {stable_mosaic.version = 11 : i64} {
  func.func @_conv_s2d_kernel(%arg0: i32, %arg1: memref<1x5x5x512xbf16, #tpu.memory_space<vmem>>, %arg2: memref<2x2x512x128xbf16, #tpu.memory_space<vmem>>, %arg3: memref<1x128xf32, #tpu.memory_space<vmem>>, %arg4: memref<1x4x4x128xbf16, #tpu.memory_space<vmem>>) attributes {dimension_semantics = [#tpu.dimension_semantics<parallel>], iteration_bounds = array<i64: 2>, scalar_prefetch = 0 : i64, scratch_operands = 0 : i64, tpu.core_type = #tpu.core_type<tc>, window_params = [{transform_indices = @transform_0, window_bounds = array<i64: 1, 5, 5, 512>}, {pipeline_mode = #tpu.pipeline_mode<synchronous>, transform_indices = @transform_1, window_bounds = array<i64: 2, 2, 512, 128>}, {pipeline_mode = #tpu.pipeline_mode<synchronous>, transform_indices = @transform_2, window_bounds = array<i64: 1, 128>}, {transform_indices = @transform_3, window_bounds = array<i64: 1, 4, 4, 128>}]} {
    %c0 = arith.constant 0 : index
    %c0_0 = arith.constant 0 : index
    %0 = vector.load %arg3[%c0, %c0_0] : memref<1x128xf32, #tpu.memory_space<vmem>>, vector<1x128xf32>
    %c0_1 = arith.constant 0 : index
    %c0_2 = arith.constant 0 : index
    %c0_3 = arith.constant 0 : index
    %c0_4 = arith.constant 0 : index
    %1 = vector.load %arg1[%c0_1, %c0_2, %c0_3, %c0_4] : memref<1x5x5x512xbf16, #tpu.memory_space<vmem>>, vector<1x1x4x512xbf16>
    %2 = vector.shape_cast %1 : vector<1x1x4x512xbf16> to vector<4x512xbf16>
    %c0_5 = arith.constant 0 : index
    %c0_6 = arith.constant 0 : index
    %c0_7 = arith.constant 0 : index
    %c0_8 = arith.constant 0 : index
    %3 = vector.load %arg2[%c0_5, %c0_6, %c0_7, %c0_8] : memref<2x2x512x128xbf16, #tpu.memory_space<vmem>>, vector<1x1x512x128xbf16>
    %4 = vector.shape_cast %3 : vector<1x1x512x128xbf16> to vector<512x128xbf16>
    %cst = arith.constant dense<0.000000e+00> : vector<4x128xf32>
    %5 = tpu.matmul %2, %4, %cst {dimension_numbers = #tpu.dot_dimension_numbers<[1], [0], [0], [1], [0, 0, 1, 1], [], []>} : vector<4x512xbf16>, vector<512x128xbf16>, vector<4x128xf32> -> vector<4x128xf32>
    %c0_9 = arith.constant 0 : index
    %c0_10 = arith.constant 0 : index
    %c1 = arith.constant 1 : index
    %c0_11 = arith.constant 0 : index
    %6 = vector.load %arg1[%c0_9, %c0_10, %c1, %c0_11] : memref<1x5x5x512xbf16, #tpu.memory_space<vmem>>, vector<1x1x4x512xbf16>
    %7 = vector.shape_cast %6 : vector<1x1x4x512xbf16> to vector<4x512xbf16>
    %c0_12 = arith.constant 0 : index
    %c1_13 = arith.constant 1 : index
    %c0_14 = arith.constant 0 : index
    %c0_15 = arith.constant 0 : index
    %8 = vector.load %arg2[%c0_12, %c1_13, %c0_14, %c0_15] : memref<2x2x512x128xbf16, #tpu.memory_space<vmem>>, vector<1x1x512x128xbf16>
    %9 = vector.shape_cast %8 : vector<1x1x512x128xbf16> to vector<512x128xbf16>
    %cst_16 = arith.constant dense<0.000000e+00> : vector<4x128xf32>
    %10 = tpu.matmul %7, %9, %cst_16 {dimension_numbers = #tpu.dot_dimension_numbers<[1], [0], [0], [1], [0, 0, 1, 1], [], []>} : vector<4x512xbf16>, vector<512x128xbf16>, vector<4x128xf32> -> vector<4x128xf32>
    %11 = arith.addf %5, %10 : vector<4x128xf32>
    %c0_17 = arith.constant 0 : index
    %c1_18 = arith.constant 1 : index
    %c0_19 = arith.constant 0 : index
    %c0_20 = arith.constant 0 : index
    %12 = vector.load %arg1[%c0_17, %c1_18, %c0_19, %c0_20] : memref<1x5x5x512xbf16, #tpu.memory_space<vmem>>, vector<1x1x4x512xbf16>
    %13 = vector.shape_cast %12 : vector<1x1x4x512xbf16> to vector<4x512xbf16>
    %c1_21 = arith.constant 1 : index
    %c0_22 = arith.constant 0 : index
    %c0_23 = arith.constant 0 : index
    %c0_24 = arith.constant 0 : index
    %14 = vector.load %arg2[%c1_21, %c0_22, %c0_23, %c0_24] : memref<2x2x512x128xbf16, #tpu.memory_space<vmem>>, vector<1x1x512x128xbf16>
    %15 = vector.shape_cast %14 : vector<1x1x512x128xbf16> to vector<512x128xbf16>
    %cst_25 = arith.constant dense<0.000000e+00> : vector<4x128xf32>
    %16 = tpu.matmul %13, %15, %cst_25 {dimension_numbers = #tpu.dot_dimension_numbers<[1], [0], [0], [1], [0, 0, 1, 1], [], []>} : vector<4x512xbf16>, vector<512x128xbf16>, vector<4x128xf32> -> vector<4x128xf32>
    %17 = arith.addf %11, %16 : vector<4x128xf32>
    %c0_26 = arith.constant 0 : index
    %c1_27 = arith.constant 1 : index
    %c1_28 = arith.constant 1 : index
    %c0_29 = arith.constant 0 : index
    %18 = vector.load %arg1[%c0_26, %c1_27, %c1_28, %c0_29] : memref<1x5x5x512xbf16, #tpu.memory_space<vmem>>, vector<1x1x4x512xbf16>
    %19 = vector.shape_cast %18 : vector<1x1x4x512xbf16> to vector<4x512xbf16>
    %c1_30 = arith.constant 1 : index
    %c1_31 = arith.constant 1 : index
    %c0_32 = arith.constant 0 : index
    %c0_33 = arith.constant 0 : index
    %20 = vector.load %arg2[%c1_30, %c1_31, %c0_32, %c0_33] : memref<2x2x512x128xbf16, #tpu.memory_space<vmem>>, vector<1x1x512x128xbf16>
    %21 = vector.shape_cast %20 : vector<1x1x512x128xbf16> to vector<512x128xbf16>
    %cst_34 = arith.constant dense<0.000000e+00> : vector<4x128xf32>
    %22 = tpu.matmul %19, %21, %cst_34 {dimension_numbers = #tpu.dot_dimension_numbers<[1], [0], [0], [1], [0, 0, 1, 1], [], []>} : vector<4x512xbf16>, vector<512x128xbf16>, vector<4x128xf32> -> vector<4x128xf32>
    %23 = arith.addf %17, %22 : vector<4x128xf32>
    %24 = vector.broadcast %0 : vector<1x128xf32> to vector<4x128xf32>
    %25 = arith.addf %23, %24 : vector<4x128xf32>
    %cst_35 = arith.constant 0.000000e+00 : f32
    %26 = vector.broadcast %cst_35 : f32 to vector<4x128xf32>
    %27 = arith.maximumf %25, %26 : vector<4x128xf32>
    %28 = arith.truncf %27 : vector<4x128xf32> to vector<4x128xbf16>
    %c0_36 = arith.constant 0 : index
    %c0_37 = arith.constant 0 : index
    %c0_38 = arith.constant 0 : index
    %c0_39 = arith.constant 0 : index
    %29 = vector.load %arg4[%c0_36, %c0_37, %c0_38, %c0_39] : memref<1x4x4x128xbf16, #tpu.memory_space<vmem>>, vector<1x1x4x128xbf16>
    %30 = vector.shape_cast %29 : vector<1x1x4x128xbf16> to vector<4x128xbf16>
    %31 = vector.shape_cast %28 : vector<4x128xbf16> to vector<1x1x4x128xbf16>
    tpu.vector_store %arg4[%c0_36, %c0_37, %c0_38, %c0_39], %31 {strides = array<i32>} : memref<1x4x4x128xbf16, #tpu.memory_space<vmem>>, vector<1x1x4x128xbf16>,
    %c0_40 = arith.constant 0 : index
    %c1_41 = arith.constant 1 : index
    %c0_42 = arith.constant 0 : index
    %c0_43 = arith.constant 0 : index
    %32 = vector.load %arg1[%c0_40, %c1_41, %c0_42, %c0_43] : memref<1x5x5x512xbf16, #tpu.memory_space<vmem>>, vector<1x1x4x512xbf16>
    %33 = vector.shape_cast %32 : vector<1x1x4x512xbf16> to vector<4x512xbf16>
    %c0_44 = arith.constant 0 : index
    %c0_45 = arith.constant 0 : index
    %c0_46 = arith.constant 0 : index
    %c0_47 = arith.constant 0 : index
    %34 = vector.load %arg2[%c0_44, %c0_45, %c0_46, %c0_47] : memref<2x2x512x128xbf16, #tpu.memory_space<vmem>>, vector<1x1x512x128xbf16>
    %35 = vector.shape_cast %34 : vector<1x1x512x128xbf16> to vector<512x128xbf16>
    %cst_48 = arith.constant dense<0.000000e+00> : vector<4x128xf32>
    %36 = tpu.matmul %33, %35, %cst_48 {dimension_numbers = #tpu.dot_dimension_numbers<[1], [0], [0], [1], [0, 0, 1, 1], [], []>} : vector<4x512xbf16>, vector<512x128xbf16>, vector<4x128xf32> -> vector<4x128xf32>
    %c0_49 = arith.constant 0 : index
    %c1_50 = arith.constant 1 : index
    %c1_51 = arith.constant 1 : index
    %c0_52 = arith.constant 0 : index
    %37 = vector.load %arg1[%c0_49, %c1_50, %c1_51, %c0_52] : memref<1x5x5x512xbf16, #tpu.memory_space<vmem>>, vector<1x1x4x512xbf16>
    %38 = vector.shape_cast %37 : vector<1x1x4x512xbf16> to vector<4x512xbf16>
    %c0_53 = arith.constant 0 : index
    %c1_54 = arith.constant 1 : index
    %c0_55 = arith.constant 0 : index
    %c0_56 = arith.constant 0 : index
    %39 = vector.load %arg2[%c0_53, %c1_54, %c0_55, %c0_56] : memref<2x2x512x128xbf16, #tpu.memory_space<vmem>>, vector<1x1x512x128xbf16>
    %40 = vector.shape_cast %39 : vector<1x1x512x128xbf16> to vector<512x128xbf16>
    %cst_57 = arith.constant dense<0.000000e+00> : vector<4x128xf32>
    %41 = tpu.matmul %38, %40, %cst_57 {dimension_numbers = #tpu.dot_dimension_numbers<[1], [0], [0], [1], [0, 0, 1, 1], [], []>} : vector<4x512xbf16>, vector<512x128xbf16>, vector<4x128xf32> -> vector<4x128xf32>
    %42 = arith.addf %36, %41 : vector<4x128xf32>
    %c0_58 = arith.constant 0 : index
    %c2 = arith.constant 2 : index
    %c0_59 = arith.constant 0 : index
    %c0_60 = arith.constant 0 : index
    %43 = vector.load %arg1[%c0_58, %c2, %c0_59, %c0_60] : memref<1x5x5x512xbf16, #tpu.memory_space<vmem>>, vector<1x1x4x512xbf16>
    %44 = vector.shape_cast %43 : vector<1x1x4x512xbf16> to vector<4x512xbf16>
    %c1_61 = arith.constant 1 : index
    %c0_62 = arith.constant 0 : index
    %c0_63 = arith.constant 0 : index
    %c0_64 = arith.constant 0 : index
    %45 = vector.load %arg2[%c1_61, %c0_62, %c0_63, %c0_64] : memref<2x2x512x128xbf16, #tpu.memory_space<vmem>>, vector<1x1x512x128xbf16>
    %46 = vector.shape_cast %45 : vector<1x1x512x128xbf16> to vector<512x128xbf16>
    %cst_65 = arith.constant dense<0.000000e+00> : vector<4x128xf32>
    %47 = tpu.matmul %44, %46, %cst_65 {dimension_numbers = #tpu.dot_dimension_numbers<[1], [0], [0], [1], [0, 0, 1, 1], [], []>} : vector<4x512xbf16>, vector<512x128xbf16>, vector<4x128xf32> -> vector<4x128xf32>
    %48 = arith.addf %42, %47 : vector<4x128xf32>
    %c0_66 = arith.constant 0 : index
    %c2_67 = arith.constant 2 : index
    %c1_68 = arith.constant 1 : index
    %c0_69 = arith.constant 0 : index
    %49 = vector.load %arg1[%c0_66, %c2_67, %c1_68, %c0_69] : memref<1x5x5x512xbf16, #tpu.memory_space<vmem>>, vector<1x1x4x512xbf16>
    %50 = vector.shape_cast %49 : vector<1x1x4x512xbf16> to vector<4x512xbf16>
    %c1_70 = arith.constant 1 : index
    %c1_71 = arith.constant 1 : index
    %c0_72 = arith.constant 0 : index
    %c0_73 = arith.constant 0 : index
    %51 = vector.load %arg2[%c1_70, %c1_71, %c0_72, %c0_73] : memref<2x2x512x128xbf16, #tpu.memory_space<vmem>>, vector<1x1x512x128xbf16>
    %52 = vector.shape_cast %51 : vector<1x1x512x128xbf16> to vector<512x128xbf16>
    %cst_74 = arith.constant dense<0.000000e+00> : vector<4x128xf32>
    %53 = tpu.matmul %50, %52, %cst_74 {dimension_numbers = #tpu.dot_dimension_numbers<[1], [0], [0], [1], [0, 0, 1, 1], [], []>} : vector<4x512xbf16>, vector<512x128xbf16>, vector<4x128xf32> -> vector<4x128xf32>
    %54 = arith.addf %48, %53 : vector<4x128xf32>
    %55 = vector.broadcast %0 : vector<1x128xf32> to vector<4x128xf32>
    %56 = arith.addf %54, %55 : vector<4x128xf32>
    %cst_75 = arith.constant 0.000000e+00 : f32
    %57 = vector.broadcast %cst_75 : f32 to vector<4x128xf32>
    %58 = arith.maximumf %56, %57 : vector<4x128xf32>
    %59 = arith.truncf %58 : vector<4x128xf32> to vector<4x128xbf16>
    %c0_76 = arith.constant 0 : index
    %c1_77 = arith.constant 1 : index
    %c0_78 = arith.constant 0 : index
    %c0_79 = arith.constant 0 : index
    %60 = vector.load %arg4[%c0_76, %c1_77, %c0_78, %c0_79] : memref<1x4x4x128xbf16, #tpu.memory_space<vmem>>, vector<1x1x4x128xbf16>
    %61 = vector.shape_cast %60 : vector<1x1x4x128xbf16> to vector<4x128xbf16>
    %62 = vector.shape_cast %59 : vector<4x128xbf16> to vector<1x1x4x128xbf16>
    tpu.vector_store %arg4[%c0_76, %c1_77, %c0_78, %c0_79], %62 {strides = array<i32>} : memref<1x4x4x128xbf16, #tpu.memory_space<vmem>>, vector<1x1x4x128xbf16>,
    %c0_80 = arith.constant 0 : index
    %c2_81 = arith.constant 2 : index
    %c0_82 = arith.constant 0 : index
    %c0_83 = arith.constant 0 : index
    %63 = vector.load %arg1[%c0_80, %c2_81, %c0_82, %c0_83] : memref<1x5x5x512xbf16, #tpu.memory_space<vmem>>, vector<1x1x4x512xbf16>
    %64 = vector.shape_cast %63 : vector<1x1x4x512xbf16> to vector<4x512xbf16>
    %c0_84 = arith.constant 0 : index
    %c0_85 = arith.constant 0 : index
    %c0_86 = arith.constant 0 : index
    %c0_87 = arith.constant 0 : index
    %65 = vector.load %arg2[%c0_84, %c0_85, %c0_86, %c0_87] : memref<2x2x512x128xbf16, #tpu.memory_space<vmem>>, vector<1x1x512x128xbf16>
    %66 = vector.shape_cast %65 : vector<1x1x512x128xbf16> to vector<512x128xbf16>
    %cst_88 = arith.constant dense<0.000000e+00> : vector<4x128xf32>
    %67 = tpu.matmul %64, %66, %cst_88 {dimension_numbers = #tpu.dot_dimension_numbers<[1], [0], [0], [1], [0, 0, 1, 1], [], []>} : vector<4x512xbf16>, vector<512x128xbf16>, vector<4x128xf32> -> vector<4x128xf32>
    %c0_89 = arith.constant 0 : index
    %c2_90 = arith.constant 2 : index
    %c1_91 = arith.constant 1 : index
    %c0_92 = arith.constant 0 : index
    %68 = vector.load %arg1[%c0_89, %c2_90, %c1_91, %c0_92] : memref<1x5x5x512xbf16, #tpu.memory_space<vmem>>, vector<1x1x4x512xbf16>
    %69 = vector.shape_cast %68 : vector<1x1x4x512xbf16> to vector<4x512xbf16>
    %c0_93 = arith.constant 0 : index
    %c1_94 = arith.constant 1 : index
    %c0_95 = arith.constant 0 : index
    %c0_96 = arith.constant 0 : index
    %70 = vector.load %arg2[%c0_93, %c1_94, %c0_95, %c0_96] : memref<2x2x512x128xbf16, #tpu.memory_space<vmem>>, vector<1x1x512x128xbf16>
    %71 = vector.shape_cast %70 : vector<1x1x512x128xbf16> to vector<512x128xbf16>
    %cst_97 = arith.constant dense<0.000000e+00> : vector<4x128xf32>
    %72 = tpu.matmul %69, %71, %cst_97 {dimension_numbers = #tpu.dot_dimension_numbers<[1], [0], [0], [1], [0, 0, 1, 1], [], []>} : vector<4x512xbf16>, vector<512x128xbf16>, vector<4x128xf32> -> vector<4x128xf32>
    %73 = arith.addf %67, %72 : vector<4x128xf32>
    %c0_98 = arith.constant 0 : index
    %c3 = arith.constant 3 : index
    %c0_99 = arith.constant 0 : index
    %c0_100 = arith.constant 0 : index
    %74 = vector.load %arg1[%c0_98, %c3, %c0_99, %c0_100] : memref<1x5x5x512xbf16, #tpu.memory_space<vmem>>, vector<1x1x4x512xbf16>
    %75 = vector.shape_cast %74 : vector<1x1x4x512xbf16> to vector<4x512xbf16>
    %c1_101 = arith.constant 1 : index
    %c0_102 = arith.constant 0 : index
    %c0_103 = arith.constant 0 : index
    %c0_104 = arith.constant 0 : index
    %76 = vector.load %arg2[%c1_101, %c0_102, %c0_103, %c0_104] : memref<2x2x512x128xbf16, #tpu.memory_space<vmem>>, vector<1x1x512x128xbf16>
    %77 = vector.shape_cast %76 : vector<1x1x512x128xbf16> to vector<512x128xbf16>
    %cst_105 = arith.constant dense<0.000000e+00> : vector<4x128xf32>
    %78 = tpu.matmul %75, %77, %cst_105 {dimension_numbers = #tpu.dot_dimension_numbers<[1], [0], [0], [1], [0, 0, 1, 1], [], []>} : vector<4x512xbf16>, vector<512x128xbf16>, vector<4x128xf32> -> vector<4x128xf32>
    %79 = arith.addf %73, %78 : vector<4x128xf32>
    %c0_106 = arith.constant 0 : index
    %c3_107 = arith.constant 3 : index
    %c1_108 = arith.constant 1 : index
    %c0_109 = arith.constant 0 : index
    %80 = vector.load %arg1[%c0_106, %c3_107, %c1_108, %c0_109] : memref<1x5x5x512xbf16, #tpu.memory_space<vmem>>, vector<1x1x4x512xbf16>
    %81 = vector.shape_cast %80 : vector<1x1x4x512xbf16> to vector<4x512xbf16>
    %c1_110 = arith.constant 1 : index
    %c1_111 = arith.constant 1 : index
    %c0_112 = arith.constant 0 : index
    %c0_113 = arith.constant 0 : index
    %82 = vector.load %arg2[%c1_110, %c1_111, %c0_112, %c0_113] : memref<2x2x512x128xbf16, #tpu.memory_space<vmem>>, vector<1x1x512x128xbf16>
    %83 = vector.shape_cast %82 : vector<1x1x512x128xbf16> to vector<512x128xbf16>
    %cst_114 = arith.constant dense<0.000000e+00> : vector<4x128xf32>
    %84 = tpu.matmul %81, %83, %cst_114 {dimension_numbers = #tpu.dot_dimension_numbers<[1], [0], [0], [1], [0, 0, 1, 1], [], []>} : vector<4x512xbf16>, vector<512x128xbf16>, vector<4x128xf32> -> vector<4x128xf32>
    %85 = arith.addf %79, %84 : vector<4x128xf32>
    %86 = vector.broadcast %0 : vector<1x128xf32> to vector<4x128xf32>
    %87 = arith.addf %85, %86 : vector<4x128xf32>
    %cst_115 = arith.constant 0.000000e+00 : f32
    %88 = vector.broadcast %cst_115 : f32 to vector<4x128xf32>
    %89 = arith.maximumf %87, %88 : vector<4x128xf32>
    %90 = arith.truncf %89 : vector<4x128xf32> to vector<4x128xbf16>
    %c0_116 = arith.constant 0 : index
    %c2_117 = arith.constant 2 : index
    %c0_118 = arith.constant 0 : index
    %c0_119 = arith.constant 0 : index
    %91 = vector.load %arg4[%c0_116, %c2_117, %c0_118, %c0_119] : memref<1x4x4x128xbf16, #tpu.memory_space<vmem>>, vector<1x1x4x128xbf16>
    %92 = vector.shape_cast %91 : vector<1x1x4x128xbf16> to vector<4x128xbf16>
    %93 = vector.shape_cast %90 : vector<4x128xbf16> to vector<1x1x4x128xbf16>
    tpu.vector_store %arg4[%c0_116, %c2_117, %c0_118, %c0_119], %93 {strides = array<i32>} : memref<1x4x4x128xbf16, #tpu.memory_space<vmem>>, vector<1x1x4x128xbf16>,
    %c0_120 = arith.constant 0 : index
    %c3_121 = arith.constant 3 : index
    %c0_122 = arith.constant 0 : index
    %c0_123 = arith.constant 0 : index
    %94 = vector.load %arg1[%c0_120, %c3_121, %c0_122, %c0_123] : memref<1x5x5x512xbf16, #tpu.memory_space<vmem>>, vector<1x1x4x512xbf16>
    %95 = vector.shape_cast %94 : vector<1x1x4x512xbf16> to vector<4x512xbf16>
    %c0_124 = arith.constant 0 : index
    %c0_125 = arith.constant 0 : index
    %c0_126 = arith.constant 0 : index
    %c0_127 = arith.constant 0 : index
    %96 = vector.load %arg2[%c0_124, %c0_125, %c0_126, %c0_127] : memref<2x2x512x128xbf16, #tpu.memory_space<vmem>>, vector<1x1x512x128xbf16>
    %97 = vector.shape_cast %96 : vector<1x1x512x128xbf16> to vector<512x128xbf16>
    %cst_128 = arith.constant dense<0.000000e+00> : vector<4x128xf32>
    %98 = tpu.matmul %95, %97, %cst_128 {dimension_numbers = #tpu.dot_dimension_numbers<[1], [0], [0], [1], [0, 0, 1, 1], [], []>} : vector<4x512xbf16>, vector<512x128xbf16>, vector<4x128xf32> -> vector<4x128xf32>
    %c0_129 = arith.constant 0 : index
    %c3_130 = arith.constant 3 : index
    %c1_131 = arith.constant 1 : index
    %c0_132 = arith.constant 0 : index
    %99 = vector.load %arg1[%c0_129, %c3_130, %c1_131, %c0_132] : memref<1x5x5x512xbf16, #tpu.memory_space<vmem>>, vector<1x1x4x512xbf16>
    %100 = vector.shape_cast %99 : vector<1x1x4x512xbf16> to vector<4x512xbf16>
    %c0_133 = arith.constant 0 : index
    %c1_134 = arith.constant 1 : index
    %c0_135 = arith.constant 0 : index
    %c0_136 = arith.constant 0 : index
    %101 = vector.load %arg2[%c0_133, %c1_134, %c0_135, %c0_136] : memref<2x2x512x128xbf16, #tpu.memory_space<vmem>>, vector<1x1x512x128xbf16>
    %102 = vector.shape_cast %101 : vector<1x1x512x128xbf16> to vector<512x128xbf16>
    %cst_137 = arith.constant dense<0.000000e+00> : vector<4x128xf32>
    %103 = tpu.matmul %100, %102, %cst_137 {dimension_numbers = #tpu.dot_dimension_numbers<[1], [0], [0], [1], [0, 0, 1, 1], [], []>} : vector<4x512xbf16>, vector<512x128xbf16>, vector<4x128xf32> -> vector<4x128xf32>
    %104 = arith.addf %98, %103 : vector<4x128xf32>
    %c0_138 = arith.constant 0 : index
    %c4 = arith.constant 4 : index
    %c0_139 = arith.constant 0 : index
    %c0_140 = arith.constant 0 : index
    %105 = vector.load %arg1[%c0_138, %c4, %c0_139, %c0_140] : memref<1x5x5x512xbf16, #tpu.memory_space<vmem>>, vector<1x1x4x512xbf16>
    %106 = vector.shape_cast %105 : vector<1x1x4x512xbf16> to vector<4x512xbf16>
    %c1_141 = arith.constant 1 : index
    %c0_142 = arith.constant 0 : index
    %c0_143 = arith.constant 0 : index
    %c0_144 = arith.constant 0 : index
    %107 = vector.load %arg2[%c1_141, %c0_142, %c0_143, %c0_144] : memref<2x2x512x128xbf16, #tpu.memory_space<vmem>>, vector<1x1x512x128xbf16>
    %108 = vector.shape_cast %107 : vector<1x1x512x128xbf16> to vector<512x128xbf16>
    %cst_145 = arith.constant dense<0.000000e+00> : vector<4x128xf32>
    %109 = tpu.matmul %106, %108, %cst_145 {dimension_numbers = #tpu.dot_dimension_numbers<[1], [0], [0], [1], [0, 0, 1, 1], [], []>} : vector<4x512xbf16>, vector<512x128xbf16>, vector<4x128xf32> -> vector<4x128xf32>
    %110 = arith.addf %104, %109 : vector<4x128xf32>
    %c0_146 = arith.constant 0 : index
    %c4_147 = arith.constant 4 : index
    %c1_148 = arith.constant 1 : index
    %c0_149 = arith.constant 0 : index
    %111 = vector.load %arg1[%c0_146, %c4_147, %c1_148, %c0_149] : memref<1x5x5x512xbf16, #tpu.memory_space<vmem>>, vector<1x1x4x512xbf16>
    %112 = vector.shape_cast %111 : vector<1x1x4x512xbf16> to vector<4x512xbf16>
    %c1_150 = arith.constant 1 : index
    %c1_151 = arith.constant 1 : index
    %c0_152 = arith.constant 0 : index
    %c0_153 = arith.constant 0 : index
    %113 = vector.load %arg2[%c1_150, %c1_151, %c0_152, %c0_153] : memref<2x2x512x128xbf16, #tpu.memory_space<vmem>>, vector<1x1x512x128xbf16>
    %114 = vector.shape_cast %113 : vector<1x1x512x128xbf16> to vector<512x128xbf16>
    %cst_154 = arith.constant dense<0.000000e+00> : vector<4x128xf32>
    %115 = tpu.matmul %112, %114, %cst_154 {dimension_numbers = #tpu.dot_dimension_numbers<[1], [0], [0], [1], [0, 0, 1, 1], [], []>} : vector<4x512xbf16>, vector<512x128xbf16>, vector<4x128xf32> -> vector<4x128xf32>
    %116 = arith.addf %110, %115 : vector<4x128xf32>
    %117 = vector.broadcast %0 : vector<1x128xf32> to vector<4x128xf32>
    %118 = arith.addf %116, %117 : vector<4x128xf32>
    %cst_155 = arith.constant 0.000000e+00 : f32
    %119 = vector.broadcast %cst_155 : f32 to vector<4x128xf32>
    %120 = arith.maximumf %118, %119 : vector<4x128xf32>
    %121 = arith.truncf %120 : vector<4x128xf32> to vector<4x128xbf16>
    %c0_156 = arith.constant 0 : index
    %c3_157 = arith.constant 3 : index
    %c0_158 = arith.constant 0 : index
    %c0_159 = arith.constant 0 : index
    %122 = vector.load %arg4[%c0_156, %c3_157, %c0_158, %c0_159] : memref<1x4x4x128xbf16, #tpu.memory_space<vmem>>, vector<1x1x4x128xbf16>
    %123 = vector.shape_cast %122 : vector<1x1x4x128xbf16> to vector<4x128xbf16>
    %124 = vector.shape_cast %121 : vector<4x128xbf16> to vector<1x1x4x128xbf16>
    tpu.vector_store %arg4[%c0_156, %c3_157, %c0_158, %c0_159], %124 {strides = array<i32>} : memref<1x4x4x128xbf16, #tpu.memory_space<vmem>>, vector<1x1x4x128xbf16>,
    return
  }
  func.func @transform_0(%arg0: i32) -> (i32, i32, i32, i32) {
    %c0_i32 = arith.constant 0 : i32
    %c0_i32_0 = arith.constant 0 : i32
    %c0_i32_1 = arith.constant 0 : i32
    %c0_i32_2 = arith.constant 0 : i32
    return %arg0, %c0_i32, %c0_i32_0, %c0_i32_1 : i32, i32, i32, i32
  }
  func.func @transform_1(%arg0: i32) -> (i32, i32, i32, i32) {
    %c0_i32 = arith.constant 0 : i32
    %c0_i32_0 = arith.constant 0 : i32
    %c0_i32_1 = arith.constant 0 : i32
    %c0_i32_2 = arith.constant 0 : i32
    %c0_i32_3 = arith.constant 0 : i32
    return %c0_i32, %c0_i32_0, %c0_i32_1, %c0_i32_2 : i32, i32, i32, i32
  }
  func.func @transform_2(%arg0: i32) -> (i32, i32) {
    %c0_i32 = arith.constant 0 : i32
    %c0_i32_0 = arith.constant 0 : i32
    %c0_i32_1 = arith.constant 0 : i32
    return %c0_i32, %c0_i32_0 : i32, i32
  }
  func.func @transform_3(%arg0: i32) -> (i32, i32, i32, i32) {
    %c0_i32 = arith.constant 0 : i32
    %c0_i32_0 = arith.constant 0 : i32
    %c0_i32_1 = arith.constant 0 : i32
    %c0_i32_2 = arith.constant 0 : i32
    return %arg0, %c0_i32, %c0_i32_0, %c0_i32_1 : i32, i32, i32, i32
  }
}

module attributes {stable_mosaic.version = 11 : i64} {
  func.func @_conv_s2d_kernel(%arg0: i32, %arg1: memref<1x3x3x512xbf16, #tpu.memory_space<vmem>>, %arg2: memref<2x2x512x128xbf16, #tpu.memory_space<vmem>>, %arg3: memref<1x128xf32, #tpu.memory_space<vmem>>, %arg4: memref<1x2x2x128xbf16, #tpu.memory_space<vmem>>) attributes {dimension_semantics = [#tpu.dimension_semantics<parallel>], iteration_bounds = array<i64: 2>, scalar_prefetch = 0 : i64, scratch_operands = 0 : i64, tpu.core_type = #tpu.core_type<tc>, window_params = [{transform_indices = @transform_0, window_bounds = array<i64: 1, 3, 3, 512>}, {pipeline_mode = #tpu.pipeline_mode<synchronous>, transform_indices = @transform_1, window_bounds = array<i64: 2, 2, 512, 128>}, {pipeline_mode = #tpu.pipeline_mode<synchronous>, transform_indices = @transform_2, window_bounds = array<i64: 1, 128>}, {transform_indices = @transform_3, window_bounds = array<i64: 1, 2, 2, 128>}]} {
    %c0 = arith.constant 0 : index
    %c0_0 = arith.constant 0 : index
    %0 = vector.load %arg3[%c0, %c0_0] : memref<1x128xf32, #tpu.memory_space<vmem>>, vector<1x128xf32>
    %c0_1 = arith.constant 0 : index
    %c0_2 = arith.constant 0 : index
    %c0_3 = arith.constant 0 : index
    %c0_4 = arith.constant 0 : index
    %1 = vector.load %arg1[%c0_1, %c0_2, %c0_3, %c0_4] : memref<1x3x3x512xbf16, #tpu.memory_space<vmem>>, vector<1x1x2x512xbf16>
    %2 = vector.shape_cast %1 : vector<1x1x2x512xbf16> to vector<2x512xbf16>
    %c0_5 = arith.constant 0 : index
    %c0_6 = arith.constant 0 : index
    %c0_7 = arith.constant 0 : index
    %c0_8 = arith.constant 0 : index
    %3 = vector.load %arg2[%c0_5, %c0_6, %c0_7, %c0_8] : memref<2x2x512x128xbf16, #tpu.memory_space<vmem>>, vector<1x1x512x128xbf16>
    %4 = vector.shape_cast %3 : vector<1x1x512x128xbf16> to vector<512x128xbf16>
    %cst = arith.constant dense<0.000000e+00> : vector<2x128xf32>
    %5 = tpu.matmul %2, %4, %cst {dimension_numbers = #tpu.dot_dimension_numbers<[1], [0], [0], [1], [0, 0, 1, 1], [], []>} : vector<2x512xbf16>, vector<512x128xbf16>, vector<2x128xf32> -> vector<2x128xf32>
    %c0_9 = arith.constant 0 : index
    %c0_10 = arith.constant 0 : index
    %c1 = arith.constant 1 : index
    %c0_11 = arith.constant 0 : index
    %6 = vector.load %arg1[%c0_9, %c0_10, %c1, %c0_11] : memref<1x3x3x512xbf16, #tpu.memory_space<vmem>>, vector<1x1x2x512xbf16>
    %7 = vector.shape_cast %6 : vector<1x1x2x512xbf16> to vector<2x512xbf16>
    %c0_12 = arith.constant 0 : index
    %c1_13 = arith.constant 1 : index
    %c0_14 = arith.constant 0 : index
    %c0_15 = arith.constant 0 : index
    %8 = vector.load %arg2[%c0_12, %c1_13, %c0_14, %c0_15] : memref<2x2x512x128xbf16, #tpu.memory_space<vmem>>, vector<1x1x512x128xbf16>
    %9 = vector.shape_cast %8 : vector<1x1x512x128xbf16> to vector<512x128xbf16>
    %cst_16 = arith.constant dense<0.000000e+00> : vector<2x128xf32>
    %10 = tpu.matmul %7, %9, %cst_16 {dimension_numbers = #tpu.dot_dimension_numbers<[1], [0], [0], [1], [0, 0, 1, 1], [], []>} : vector<2x512xbf16>, vector<512x128xbf16>, vector<2x128xf32> -> vector<2x128xf32>
    %11 = arith.addf %5, %10 : vector<2x128xf32>
    %c0_17 = arith.constant 0 : index
    %c1_18 = arith.constant 1 : index
    %c0_19 = arith.constant 0 : index
    %c0_20 = arith.constant 0 : index
    %12 = vector.load %arg1[%c0_17, %c1_18, %c0_19, %c0_20] : memref<1x3x3x512xbf16, #tpu.memory_space<vmem>>, vector<1x1x2x512xbf16>
    %13 = vector.shape_cast %12 : vector<1x1x2x512xbf16> to vector<2x512xbf16>
    %c1_21 = arith.constant 1 : index
    %c0_22 = arith.constant 0 : index
    %c0_23 = arith.constant 0 : index
    %c0_24 = arith.constant 0 : index
    %14 = vector.load %arg2[%c1_21, %c0_22, %c0_23, %c0_24] : memref<2x2x512x128xbf16, #tpu.memory_space<vmem>>, vector<1x1x512x128xbf16>
    %15 = vector.shape_cast %14 : vector<1x1x512x128xbf16> to vector<512x128xbf16>
    %cst_25 = arith.constant dense<0.000000e+00> : vector<2x128xf32>
    %16 = tpu.matmul %13, %15, %cst_25 {dimension_numbers = #tpu.dot_dimension_numbers<[1], [0], [0], [1], [0, 0, 1, 1], [], []>} : vector<2x512xbf16>, vector<512x128xbf16>, vector<2x128xf32> -> vector<2x128xf32>
    %17 = arith.addf %11, %16 : vector<2x128xf32>
    %c0_26 = arith.constant 0 : index
    %c1_27 = arith.constant 1 : index
    %c1_28 = arith.constant 1 : index
    %c0_29 = arith.constant 0 : index
    %18 = vector.load %arg1[%c0_26, %c1_27, %c1_28, %c0_29] : memref<1x3x3x512xbf16, #tpu.memory_space<vmem>>, vector<1x1x2x512xbf16>
    %19 = vector.shape_cast %18 : vector<1x1x2x512xbf16> to vector<2x512xbf16>
    %c1_30 = arith.constant 1 : index
    %c1_31 = arith.constant 1 : index
    %c0_32 = arith.constant 0 : index
    %c0_33 = arith.constant 0 : index
    %20 = vector.load %arg2[%c1_30, %c1_31, %c0_32, %c0_33] : memref<2x2x512x128xbf16, #tpu.memory_space<vmem>>, vector<1x1x512x128xbf16>
    %21 = vector.shape_cast %20 : vector<1x1x512x128xbf16> to vector<512x128xbf16>
    %cst_34 = arith.constant dense<0.000000e+00> : vector<2x128xf32>
    %22 = tpu.matmul %19, %21, %cst_34 {dimension_numbers = #tpu.dot_dimension_numbers<[1], [0], [0], [1], [0, 0, 1, 1], [], []>} : vector<2x512xbf16>, vector<512x128xbf16>, vector<2x128xf32> -> vector<2x128xf32>
    %23 = arith.addf %17, %22 : vector<2x128xf32>
    %24 = vector.broadcast %0 : vector<1x128xf32> to vector<2x128xf32>
    %25 = arith.addf %23, %24 : vector<2x128xf32>
    %cst_35 = arith.constant 0.000000e+00 : f32
    %26 = vector.broadcast %cst_35 : f32 to vector<2x128xf32>
    %27 = arith.maximumf %25, %26 : vector<2x128xf32>
    %28 = arith.truncf %27 : vector<2x128xf32> to vector<2x128xbf16>
    %c0_36 = arith.constant 0 : index
    %c0_37 = arith.constant 0 : index
    %c0_38 = arith.constant 0 : index
    %c0_39 = arith.constant 0 : index
    %29 = vector.load %arg4[%c0_36, %c0_37, %c0_38, %c0_39] : memref<1x2x2x128xbf16, #tpu.memory_space<vmem>>, vector<1x1x2x128xbf16>
    %30 = vector.shape_cast %29 : vector<1x1x2x128xbf16> to vector<2x128xbf16>
    %31 = vector.shape_cast %28 : vector<2x128xbf16> to vector<1x1x2x128xbf16>
    tpu.vector_store %arg4[%c0_36, %c0_37, %c0_38, %c0_39], %31 {strides = array<i32>} : memref<1x2x2x128xbf16, #tpu.memory_space<vmem>>, vector<1x1x2x128xbf16>,
    %c0_40 = arith.constant 0 : index
    %c1_41 = arith.constant 1 : index
    %c0_42 = arith.constant 0 : index
    %c0_43 = arith.constant 0 : index
    %32 = vector.load %arg1[%c0_40, %c1_41, %c0_42, %c0_43] : memref<1x3x3x512xbf16, #tpu.memory_space<vmem>>, vector<1x1x2x512xbf16>
    %33 = vector.shape_cast %32 : vector<1x1x2x512xbf16> to vector<2x512xbf16>
    %c0_44 = arith.constant 0 : index
    %c0_45 = arith.constant 0 : index
    %c0_46 = arith.constant 0 : index
    %c0_47 = arith.constant 0 : index
    %34 = vector.load %arg2[%c0_44, %c0_45, %c0_46, %c0_47] : memref<2x2x512x128xbf16, #tpu.memory_space<vmem>>, vector<1x1x512x128xbf16>
    %35 = vector.shape_cast %34 : vector<1x1x512x128xbf16> to vector<512x128xbf16>
    %cst_48 = arith.constant dense<0.000000e+00> : vector<2x128xf32>
    %36 = tpu.matmul %33, %35, %cst_48 {dimension_numbers = #tpu.dot_dimension_numbers<[1], [0], [0], [1], [0, 0, 1, 1], [], []>} : vector<2x512xbf16>, vector<512x128xbf16>, vector<2x128xf32> -> vector<2x128xf32>
    %c0_49 = arith.constant 0 : index
    %c1_50 = arith.constant 1 : index
    %c1_51 = arith.constant 1 : index
    %c0_52 = arith.constant 0 : index
    %37 = vector.load %arg1[%c0_49, %c1_50, %c1_51, %c0_52] : memref<1x3x3x512xbf16, #tpu.memory_space<vmem>>, vector<1x1x2x512xbf16>
    %38 = vector.shape_cast %37 : vector<1x1x2x512xbf16> to vector<2x512xbf16>
    %c0_53 = arith.constant 0 : index
    %c1_54 = arith.constant 1 : index
    %c0_55 = arith.constant 0 : index
    %c0_56 = arith.constant 0 : index
    %39 = vector.load %arg2[%c0_53, %c1_54, %c0_55, %c0_56] : memref<2x2x512x128xbf16, #tpu.memory_space<vmem>>, vector<1x1x512x128xbf16>
    %40 = vector.shape_cast %39 : vector<1x1x512x128xbf16> to vector<512x128xbf16>
    %cst_57 = arith.constant dense<0.000000e+00> : vector<2x128xf32>
    %41 = tpu.matmul %38, %40, %cst_57 {dimension_numbers = #tpu.dot_dimension_numbers<[1], [0], [0], [1], [0, 0, 1, 1], [], []>} : vector<2x512xbf16>, vector<512x128xbf16>, vector<2x128xf32> -> vector<2x128xf32>
    %42 = arith.addf %36, %41 : vector<2x128xf32>
    %c0_58 = arith.constant 0 : index
    %c2 = arith.constant 2 : index
    %c0_59 = arith.constant 0 : index
    %c0_60 = arith.constant 0 : index
    %43 = vector.load %arg1[%c0_58, %c2, %c0_59, %c0_60] : memref<1x3x3x512xbf16, #tpu.memory_space<vmem>>, vector<1x1x2x512xbf16>
    %44 = vector.shape_cast %43 : vector<1x1x2x512xbf16> to vector<2x512xbf16>
    %c1_61 = arith.constant 1 : index
    %c0_62 = arith.constant 0 : index
    %c0_63 = arith.constant 0 : index
    %c0_64 = arith.constant 0 : index
    %45 = vector.load %arg2[%c1_61, %c0_62, %c0_63, %c0_64] : memref<2x2x512x128xbf16, #tpu.memory_space<vmem>>, vector<1x1x512x128xbf16>
    %46 = vector.shape_cast %45 : vector<1x1x512x128xbf16> to vector<512x128xbf16>
    %cst_65 = arith.constant dense<0.000000e+00> : vector<2x128xf32>
    %47 = tpu.matmul %44, %46, %cst_65 {dimension_numbers = #tpu.dot_dimension_numbers<[1], [0], [0], [1], [0, 0, 1, 1], [], []>} : vector<2x512xbf16>, vector<512x128xbf16>, vector<2x128xf32> -> vector<2x128xf32>
    %48 = arith.addf %42, %47 : vector<2x128xf32>
    %c0_66 = arith.constant 0 : index
    %c2_67 = arith.constant 2 : index
    %c1_68 = arith.constant 1 : index
    %c0_69 = arith.constant 0 : index
    %49 = vector.load %arg1[%c0_66, %c2_67, %c1_68, %c0_69] : memref<1x3x3x512xbf16, #tpu.memory_space<vmem>>, vector<1x1x2x512xbf16>
    %50 = vector.shape_cast %49 : vector<1x1x2x512xbf16> to vector<2x512xbf16>
    %c1_70 = arith.constant 1 : index
    %c1_71 = arith.constant 1 : index
    %c0_72 = arith.constant 0 : index
    %c0_73 = arith.constant 0 : index
    %51 = vector.load %arg2[%c1_70, %c1_71, %c0_72, %c0_73] : memref<2x2x512x128xbf16, #tpu.memory_space<vmem>>, vector<1x1x512x128xbf16>
    %52 = vector.shape_cast %51 : vector<1x1x512x128xbf16> to vector<512x128xbf16>
    %cst_74 = arith.constant dense<0.000000e+00> : vector<2x128xf32>
    %53 = tpu.matmul %50, %52, %cst_74 {dimension_numbers = #tpu.dot_dimension_numbers<[1], [0], [0], [1], [0, 0, 1, 1], [], []>} : vector<2x512xbf16>, vector<512x128xbf16>, vector<2x128xf32> -> vector<2x128xf32>
    %54 = arith.addf %48, %53 : vector<2x128xf32>
    %55 = vector.broadcast %0 : vector<1x128xf32> to vector<2x128xf32>
    %56 = arith.addf %54, %55 : vector<2x128xf32>
    %cst_75 = arith.constant 0.000000e+00 : f32
    %57 = vector.broadcast %cst_75 : f32 to vector<2x128xf32>
    %58 = arith.maximumf %56, %57 : vector<2x128xf32>
    %59 = arith.truncf %58 : vector<2x128xf32> to vector<2x128xbf16>
    %c0_76 = arith.constant 0 : index
    %c1_77 = arith.constant 1 : index
    %c0_78 = arith.constant 0 : index
    %c0_79 = arith.constant 0 : index
    %60 = vector.load %arg4[%c0_76, %c1_77, %c0_78, %c0_79] : memref<1x2x2x128xbf16, #tpu.memory_space<vmem>>, vector<1x1x2x128xbf16>
    %61 = vector.shape_cast %60 : vector<1x1x2x128xbf16> to vector<2x128xbf16>
    %62 = vector.shape_cast %59 : vector<2x128xbf16> to vector<1x1x2x128xbf16>
    tpu.vector_store %arg4[%c0_76, %c1_77, %c0_78, %c0_79], %62 {strides = array<i32>} : memref<1x2x2x128xbf16, #tpu.memory_space<vmem>>, vector<1x1x2x128xbf16>,
    return
  }
  func.func @transform_0(%arg0: i32) -> (i32, i32, i32, i32) {
    %c0_i32 = arith.constant 0 : i32
    %c0_i32_0 = arith.constant 0 : i32
    %c0_i32_1 = arith.constant 0 : i32
    %c0_i32_2 = arith.constant 0 : i32
    return %arg0, %c0_i32, %c0_i32_0, %c0_i32_1 : i32, i32, i32, i32
  }
  func.func @transform_1(%arg0: i32) -> (i32, i32, i32, i32) {
    %c0_i32 = arith.constant 0 : i32
    %c0_i32_0 = arith.constant 0 : i32
    %c0_i32_1 = arith.constant 0 : i32
    %c0_i32_2 = arith.constant 0 : i32
    %c0_i32_3 = arith.constant 0 : i32
    return %c0_i32, %c0_i32_0, %c0_i32_1, %c0_i32_2 : i32, i32, i32, i32
  }
  func.func @transform_2(%arg0: i32) -> (i32, i32) {
    %c0_i32 = arith.constant 0 : i32
    %c0_i32_0 = arith.constant 0 : i32
    %c0_i32_1 = arith.constant 0 : i32
    return %c0_i32, %c0_i32_0 : i32, i32
  }
  func.func @transform_3(%arg0: i32) -> (i32, i32, i32, i32) {
    %c0_i32 = arith.constant 0 : i32
    %c0_i32_0 = arith.constant 0 : i32
    %c0_i32_1 = arith.constant 0 : i32
    %c0_i32_2 = arith.constant 0 : i32
    return %arg0, %c0_i32, %c0_i32_0, %c0_i32_1 : i32, i32, i32, i32
  }
}

module attributes {stable_mosaic.version = 11 : i64} {
  func.func @_matmul_bias_kernel(%arg0: i32, %arg1: i32, %arg2: memref<2x256xbf16, #tpu.memory_space<vmem>>, %arg3: memref<256x128xbf16, #tpu.memory_space<vmem>>, %arg4: memref<1x128xf32, #tpu.memory_space<vmem>>, %arg5: memref<2x128xf32, #tpu.memory_space<vmem>>, %arg6: memref<2x128xf32, #tpu.memory_space<vmem>>) attributes {dimension_semantics = [#tpu.dimension_semantics<parallel>, #tpu.dimension_semantics<arbitrary>], iteration_bounds = array<i64: 1, 2>, scalar_prefetch = 0 : i64, scratch_operands = 1 : i64, tpu.core_type = #tpu.core_type<tc>, window_params = [{transform_indices = @transform_0, window_bounds = array<i64: 2, 256>}, {transform_indices = @transform_1, window_bounds = array<i64: 256, 128>}, {pipeline_mode = #tpu.pipeline_mode<synchronous>, transform_indices = @transform_2, window_bounds = array<i64: 1, 128>}, {transform_indices = @transform_3, window_bounds = array<i64: 2, 128>}]} {
    %c0_i32 = arith.constant 0 : i32
    %0 = arith.cmpi eq, %arg1, %c0_i32 : i32
    %1 = arith.extui %0 : i1 to i32
    %c0_i32_0 = arith.constant 0 : i32
    %2 = arith.cmpi ne, %1, %c0_i32_0 : i32
    scf.if %2 {
      %cst_9 = arith.constant 0.000000e+00 : f32
      %12 = vector.broadcast %cst_9 : f32 to vector<2x128xf32>
      %c0_10 = arith.constant 0 : index
      %c0_11 = arith.constant 0 : index
      %13 = vector.load %arg6[%c0_10, %c0_11] : memref<2x128xf32, #tpu.memory_space<vmem>>, vector<2x128xf32>
      tpu.vector_store %arg6[%c0_10, %c0_11], %12 {strides = array<i32>} : memref<2x128xf32, #tpu.memory_space<vmem>>, vector<2x128xf32>,
    } else {
    }
    %c0 = arith.constant 0 : index
    %c0_1 = arith.constant 0 : index
    %3 = vector.load %arg6[%c0, %c0_1] : memref<2x128xf32, #tpu.memory_space<vmem>>, vector<2x128xf32>
    %c0_2 = arith.constant 0 : index
    %c0_3 = arith.constant 0 : index
    %4 = vector.load %arg2[%c0_2, %c0_3] : memref<2x256xbf16, #tpu.memory_space<vmem>>, vector<2x256xbf16>
    %c0_4 = arith.constant 0 : index
    %c0_5 = arith.constant 0 : index
    %5 = vector.load %arg3[%c0_4, %c0_5] : memref<256x128xbf16, #tpu.memory_space<vmem>>, vector<256x128xbf16>
    %cst = arith.constant dense<0.000000e+00> : vector<2x128xf32>
    %6 = tpu.matmul %4, %5, %cst {dimension_numbers = #tpu.dot_dimension_numbers<[1], [0], [0], [1], [0, 0, 1, 1], [], []>} : vector<2x256xbf16>, vector<256x128xbf16>, vector<2x128xf32> -> vector<2x128xf32>
    %7 = arith.addf %3, %6 : vector<2x128xf32>
    %c0_6 = arith.constant 0 : index
    %c0_7 = arith.constant 0 : index
    %8 = vector.load %arg6[%c0_6, %c0_7] : memref<2x128xf32, #tpu.memory_space<vmem>>, vector<2x128xf32>
    tpu.vector_store %arg6[%c0_6, %c0_7], %7 {strides = array<i32>} : memref<2x128xf32, #tpu.memory_space<vmem>>, vector<2x128xf32>,
    %c1_i32 = arith.constant 1 : i32
    %9 = arith.cmpi eq, %arg1, %c1_i32 : i32
    %10 = arith.extui %9 : i1 to i32
    %c0_i32_8 = arith.constant 0 : i32
    %11 = arith.cmpi ne, %10, %c0_i32_8 : i32
    scf.if %11 {
      %c0_9 = arith.constant 0 : index
      %c0_10 = arith.constant 0 : index
      %12 = vector.load %arg6[%c0_9, %c0_10] : memref<2x128xf32, #tpu.memory_space<vmem>>, vector<2x128xf32>
      %c0_11 = arith.constant 0 : index
      %c0_12 = arith.constant 0 : index
      %13 = vector.load %arg4[%c0_11, %c0_12] : memref<1x128xf32, #tpu.memory_space<vmem>>, vector<1x128xf32>
      %14 = vector.broadcast %13 : vector<1x128xf32> to vector<2x128xf32>
      %15 = arith.addf %12, %14 : vector<2x128xf32>
      %c0_13 = arith.constant 0 : index
      %c0_14 = arith.constant 0 : index
      %16 = vector.load %arg5[%c0_13, %c0_14] : memref<2x128xf32, #tpu.memory_space<vmem>>, vector<2x128xf32>
      tpu.vector_store %arg5[%c0_13, %c0_14], %15 {strides = array<i32>} : memref<2x128xf32, #tpu.memory_space<vmem>>, vector<2x128xf32>,
    } else {
    }
    return
  }
  func.func @transform_0(%arg0: i32, %arg1: i32) -> (i32, i32) {
    %c0_i32 = arith.constant 0 : i32
    return %arg0, %arg1 : i32, i32
  }
  func.func @transform_1(%arg0: i32, %arg1: i32) -> (i32, i32) {
    %c0_i32 = arith.constant 0 : i32
    %c0_i32_0 = arith.constant 0 : i32
    return %arg1, %c0_i32 : i32, i32
  }
  func.func @transform_2(%arg0: i32, %arg1: i32) -> (i32, i32) {
    %c0_i32 = arith.constant 0 : i32
    %c0_i32_0 = arith.constant 0 : i32
    %c0_i32_1 = arith.constant 0 : i32
    return %c0_i32, %c0_i32_0 : i32, i32
  }
  func.func @transform_3(%arg0: i32, %arg1: i32) -> (i32, i32) {
    %c0_i32 = arith.constant 0 : i32
    %c0_i32_0 = arith.constant 0 : i32
    return %arg0, %c0_i32 : i32, i32
  }
}

</mosaic_0001>

<bundles_post_ra>
// kernel: encoder_forward.7
= control target key start
LH: loop header
LB: loop body
LE: loop exit
PB: predicated region body
PF: predicated region fallthrough
CT: control target
= control target key end

     0   :  { %8 = vsyncpa [#allocation4], 0  ;;  %s679_s12 = smov 0   ;;  %s681_s13 = smov 0   ;;  %s771_s0 = inlined_call_operand.vmem [shape: bf16[2,512], index: 0, kind: input, shape index: {}]   ;;  %s772_s1 = inlined_call_operand.vmem [shape: bf16[512,128], index: 1, kind: input, shape index: {}]   ;;  %s773_s2 = inlined_call_operand.vmem [shape: f32[1,128], index: 2, kind: input, shape index: {}]   ;;  %s774_s3 = inlined_call_operand.hbm [shape: f32[2,128], index: 3, kind: output, shape index: {}]  }
   0x1   :  { %s683_s14 = smov 0  }
   0x2 LB: > { %s500_s15 = sadd.s32 4294967295, %s654_s14   ;;  %s23_s16 = sadd.s32 1, %s650_s13  ;;  %s654_s14 = sphi %s683_s14, %s14_s14   ;;  %s650_s13 = sphi %s681_s13, %s777_s13   ;;  %s646_s12 = sphi %s679_s12, %s776_s12  }
   0x3   : > { %p24_p0 = scmp.ge.s32.totalorder %s23_s16, 2  ;;  %p503_p1 = scmp.ge.s32.totalorder %s654_s14, 1 }
   0x4   : > { %p167_p2 = scmp.lt.s32.totalorder %s654_s14, 3 }
   0x5   : > { %s779_s16 = smov (%p24_p0, %s23_s16), 0 }
   0x6   : > { %p168_p3 = pnand %p503_p1, %p167_p2 }
   0x7   : > { %s504_s17 = sshll.u32 (!%p168_p3), %s646_s12, 1  ;;  %s505_s18 = sshll.u32 (!%p168_p3), %s646_s12, 5 }
   0x8   : > { %171 = sbr.rel (%p168_p3) target bundleno = 310 (0x136), region = 32  ;;  %p197_p4 = scmp.lt.s32.totalorder (!%p168_p3), %s504_s17, 3 }
   0x9   : > { %p204_p5 = scmp.lt.s32.totalorder (!%p168_p3), %s505_s18, 63  ;;  %p507_p6 = scmp.ne.s32.totalorder (!%p168_p3), %s646_s12, 0 }
   0xf   : > { %s781_s17 = smov (!%p197_p4, %s504_s17), 3  ;;  %s783_s18 = smov (!%p204_p5, %s505_s18), 63 }
  0x10   : > { %s201_s21 = scalar_lea.vmem %s771_s0, %s781_s17  ;;  %s506_s22 = sshll.u32 %s783_s18, 2  ;;  %v656_v0 = vmov (!%p507_p6), 0.0  }
  0x11   : > { %s711_s25 = scalar_lea.vmem %s772_s1, %s506_s22  ;;  %213 = sbr.rel (%p507_p6) target bundleno = 24 (0x18), region = 36  ;;  %214 = vst [vmem:[#allocation2] sm:$0x3] (!%p507_p6), %v656_v0 }
  0x18 PF: > { %v586_v1 = vld [vmem:[%s711_s25 + $0x40] sm:$0xff]   ;;  %v588_v3 = vld [vmem:[%s711_s25 + $0x48] sm:$0xff]   ;;  %v590_v5 = vld [vmem:[%s711_s25 + $0x50] sm:$0xff]   ;;  %v261_v10 = vlaneseq  ;;  %v657_v14 = vmov 1966171168   ;;  %p525_p7 = scmp.ne.s32.totalorder %s646_s12, 1 }
  0x19   : > { %v587_v2 = vld [vmem:[%s711_s25] sm:$0xff]   ;;  %531 = vmatprep.subr.bf16.mxu0 %v586_v1  ;;  %v589_v4 = vld [vmem:[%s711_s25 + $0x8] sm:$0xff]   ;;  %v591_v6 = vld [vmem:[%s711_s25 + $0x10] sm:$0xff]   ;;  %v259_v15 = vunpack.c.l.s4 %v657_v14 }
  0x1a   : > { %532 = vmatpush3.bf16.msra.mxu0 %v587_v2  ;;  %v592_v7 = vld [vmem:[%s711_s25 + $0x58] sm:$0xff]   ;;  %v594_v9 = vld [vmem:[%s711_s25 + $0x60] sm:$0xff]   ;;  %v596_v12 = vld [vmem:[%s711_s25 + $0x68] sm:$0xff]   ;;  %v262_v16 = vshrl.u32 %v261_v10, 7 }
  0x1b   : > { %533 = vmatprep.subr.bf16.mxu0 %v588_v3  ;;  %v593_v8 = vld [vmem:[%s711_s25 + $0x18] sm:$0xff]   ;;  %v595_v11 = vld [vmem:[%s711_s25 + $0x20] sm:$0xff]   ;;  %v597_v17 = vld [vmem:[%s711_s25 + $0x28] sm:$0xff]   ;;  %v260_v19 = vunpack.c.0.s8 %v259_v15 }
  0x1c   : > { %v508_v13 = vld.sshfl [vmem:[%s201_s21] sm:$0x11 pattern:$0x75316420]  ;;  %v598_v20 = vld [vmem:[%s711_s25 + $0x70] sm:$0xff]   ;;  %v600_v24 = vld [vmem:[%s711_s25 + $0x78] sm:$0xff]  }
  0x1d   : > { %v257_v18 = vcombine.high %v508_v13, %v508_v13  ;;  %v263_v21 = vsub.s32 %v260_v19, %v262_v16  ;;  %v599_v22 = vld [vmem:[%s711_s25 + $0x30] sm:$0xff]   ;;  %v601_v25 = vld [vmem:[%s711_s25 + $0x38] sm:$0xff]   ;;  %v215_v28 = vld [vmem:[#allocation2] sm:$0x3] }
  0x1e   : > { %534 = vmatpush3.bf16.msra.mxu0 %v589_v4  ;;  %v526_v35 = vld [vmem:[%s773_s2] ss:$0 sm:$0xff] (!%p525_p7) }
  0x1f   : > { %535 = vmatprep.subr.bf16.mxu0 %v590_v5  ;;  %v271_v23 = vrot.slane %v257_v18, %v263_v21  ;;  %v264_v26 = vrot.slane %v508_v13, %v263_v21 }
  0x21   : > { %402 = vmatprep.mubr.bf16.mxu0 %v271_v23 }
  0x22   : > { %536 = vmatpush3.bf16.msra.mxu0 %v591_v6 }
  0x23   : > { %537 = vmatprep.subr.bf16.mxu0 %v592_v7 }
  0x26   : > { %538 = vmatpush3.bf16.msra.mxu0 %v593_v8 }
  0x27   : > { %539 = vmatprep.subr.bf16.mxu0 %v594_v9 }
  0x2a   : > { %540 = vmatpush3.bf16.msra.mxu0 %v595_v11 }
  0x2b   : > { %541 = vmatprep.subr.bf16.mxu0 %v596_v12 }
  0x2e   : > { %542 = vmatpush3.bf16.msra.mxu0 %v597_v17 }
  0x2f   : > { %543 = vmatprep.subr.bf16.mxu0 %v598_v20 }
  0x32   : > { %544 = vmatpush3.bf16.msra.mxu0 %v599_v22 }
  0x33   : > { %545 = vmatprep.subr.bf16.mxu0 %v600_v24 }
  0x36   : > { %546 = vmatpush3.bf16.msra.mxu0 %v601_v25 }
  0x39   : > { %403 = vmatmul.mubr.bf16.vlgmr.msra.gmra.mrb[0].mxu0 %v264_v26 }
 0x10c   : > { %v547_v27 = vpop.f32.mrb[0].mxu0  ;;  %415 = sbr.rel (%p525_p7) target bundleno = 285 (0x11d), region = 40 }
 0x10d   : > { %v548_v29 = vpop.f32.mrb[1].mxu0 }
 0x10e   : > { %v549_v30 = vadd.f32 %v548_v29, %v547_v27  ;;  %v550_v31 = vpop.f32.mrb[2].mxu0 }
 0x10f   : > { %v551_v32 = vpop.f32.mrb[3].mxu0 }
 0x110   : > { %v410_v33 = vadd.f32 %v549_v30, %v215_v28 }
 0x112   : > { %411 = vst [vmem:[#allocation2] sm:$0x3] %v410_v33 }
 0x119   : > { %v416_v34 = vld [vmem:[#allocation2] sm:$0x3] }
 0x11a   : > { %v424_v36 = vadd.f32 %v526_v35, %v416_v34 }
 0x11c   : > { %425 = vst [vmem:[#allocation3] sm:$0x3] %v424_v36 }
 0x11d PF: > { %p736_p8 = scmp.eq.s32.totalorder %s500_s15, 1  ;;  %s658_s29 = smov [#allocation3]  }
 0x11e   : > { %s435_s30 = sshll.u32 %s658_s29, 4  ;;  %s436_s30 = int_to_ptr.vmem [resolvable:$true] %s435_s30 }
 0x11f   : > { %s602_s4 = scalar_lea.vmem %s436_s30, 32  ;;  %p609_p12 = scmp.lt.s32.totalorder %s436_s30, %s436_s30 }
 0x120   : > { %p603_p9 = scmp.ne.s32.totalorder %s436_s30, %s602_s4  ;;  %p610_p13 = scmp.lt.s32.totalorder %s602_s4, %s602_s4 }
 0x122   : > { %p604_p10 = pnand %p603_p9, %p736_p8  ;;  %p611_p0 = por %p610_p13, %p609_p12 }
 0x124   : > { %p605_p11 = pneg %p604_p10 }
 0x126   : > { %p612_p1 = pnand %p611_p0, %p605_p11 }
 0x128   : > { %615 = shalt.err (!%p612_p1)
}
 0x129   : > { %s616_s7 = scalar_lea.hbm %s774_s3, 32 }
 0x12a   : > { %p617_p2 = scmp.ne.s32.totalorder %s774_s3, %s616_s7  ;;  %p622_p5 = scmp.lt.u32.totalorder %s616_s7, %s774_s3 }
 0x12c   : > { %p618_p3 = pnand %p617_p2, %p736_p8 }
 0x12e   : > { %p619_p4 = pneg %p618_p3 }
 0x130   : > { %p624_p6 = pnand %p622_p5, %p619_p4 }
 0x132   : > { %627 = shalt.err (!%p624_p6)
}
 0x133   : > { %554 = dma.vmem_to_hbm [thread:$0]  (%p736_p8), %s436_s30, 32, %s774_s3, [#allocation4]  }
 0x134   : > { %641 = dma.done.wait (%p736_p8), [#allocation4], 32  }
 0x135   : > { %643 = vsyncadd (%p736_p8), [#allocation4], 4294967264 }
 0x136 PF: > { %s14_s14 = sadd.s32 1, %s654_s14   ;;  %s776_s12 = smov %s650_s13 }
 0x137   : > { %p11_p7 = scmp.ge.s32.totalorder %s14_s14, 4   ;;  %s777_s13 = smov %s779_s16 }
 0x139   :  { %13 = sbr.rel (!%p11_p7) target bundleno = 2 (0x2), region = 71 }
 0x140   :  { %448 = vsyncpa [#allocation4], 1 }
 0x141   :  { %450 = vsyncpa [#allocation4 + $0x1], 1 }

// kernel: encoder_forward.4
= control target key start
LH: loop header
LB: loop body
LE: loop exit
PB: predicated region body
PF: predicated region fallthrough
CT: control target
= control target key end

     0   :  { %s2695_s12 = smov 0   ;;  %s2997_s0 = inlined_call_operand.vmem [shape: bf16[2,9,9,16], index: 0, kind: input, shape index: {}]   ;;  %s2998_s1 = inlined_call_operand.vmem [shape: bf16[2,2,16,128], index: 1, kind: input, shape index: {}]   ;;  %s2999_s2 = inlined_call_operand.vmem [shape: f32[1,128], index: 2, kind: input, shape index: {}]   ;;  %s3000_s3 = inlined_call_operand.vmem [shape: bf16[2,8,8,128], index: 3, kind: output, shape index: {}]  }
   0x1 LB: > { %s2165_s13 = sadd.s32 4294967295, %s2671_s12   ;;  %p2169_p0 = scmp.ge.s32.totalorder %s2671_s12, 1  ;;  %s2671_s12 = sphi %s2695_s12, %s13_s12  }
   0x2   : > { %p137_p1 = scmp.lt.s32.totalorder %s2671_s12, 3 }
   0x4   : > { %p138_p2 = pnand %p2169_p0, %p137_p1 }
   0x5   : > { %v2617_v0 = vld [vmem:[%s2998_s1 + $0x8] sm:$0xff] (!%p138_p2)   ;;  %v2673_v1 = vmov (!%p138_p2), 0.0   ;;  %v2618_v2 = vld [vmem:[%s2998_s1] sm:$0xff] (!%p138_p2)   ;;  %vm2674_vm0 = vmmov (!%p138_p2), 0   ;;  %p161_p3 = scmp.lt.s32.totalorder (!%p138_p2), %s2165_s13, 1  ;;  %vm198_vm1 = vcmask (!%p138_p2), 130048  }
   0x6   : > { %141 = sbr.rel (%p138_p2) target bundleno = 369 (0x171), region = 32  ;;  %2414 = vmatprep.subr.bf16.mxu0 (!%p138_p2), %v2673_v1  ;;  %2420 = vmatprep.subr.bf16.mxu1 (!%p138_p2), %v2673_v1  ;;  %v2621_v3 = vld [vmem:[%s2998_s1 + $0x18] sm:$0xff] (!%p138_p2)   ;;  %v2620_v14 = vld [vmem:[%s2998_s1 + $0x10] sm:$0xff] (!%p138_p2)   ;;  %v2624_v19 = vld [vmem:[%s2998_s1] sm:$0xff] (!%p138_p2)  }
   0x7   : > { %2415 = vmatpush3.bf16.msra.mxu0 (!%p138_p2), %v2617_v0  ;;  %2422 = vmatprep.mubr.msk.bf16.mxu1 (!%p138_p2), %vm2674_vm0, %v2673_v1  ;;  %v2623_v22 = vld [vmem:[%s2998_s1 + $0x8] sm:$0xff] (!%p138_p2)   ;;  %v2627_v26 = vld [vmem:[%s2998_s1 + $0x18] sm:$0xff] (!%p138_p2)   ;;  %v2626_v35 = vld [vmem:[%s2998_s1 + $0x10] sm:$0xff] (!%p138_p2)  }
   0x8   : > { %2421 = vmatpush3.bf16.msra.mxu1 (!%p138_p2), %v2618_v2  ;;  %2416 = vmatprep.mubr.msk.bf16.mxu0 (!%p138_p2), %vm2674_vm0, %v2673_v1  ;;  %v2630_v36 = vld [vmem:[%s2998_s1] sm:$0xff] (!%p138_p2)   ;;  %v2629_v42 = vld [vmem:[%s2998_s1 + $0x8] sm:$0xff] (!%p138_p2)   ;;  %v2633_v43 = vld [vmem:[%s2998_s1 + $0x18] sm:$0xff] (!%p138_p2)  }
   0x9   : > { %2426 = vmatprep.subr.bf16.mxu0 (!%p138_p2), %v2673_v1  ;;  %2432 = vmatprep.subr.bf16.mxu1 (!%p138_p2), %v2673_v1  ;;  %v2632_v49 = vld [vmem:[%s2998_s1 + $0x10] sm:$0xff] (!%p138_p2)   ;;  %v2636_v53 = vld [vmem:[%s2998_s1] sm:$0xff] (!%p138_p2)   ;;  %v2635_v59 = vld [vmem:[%s2998_s1 + $0x8] sm:$0xff] (!%p138_p2)  }
   0xa   : > { %v2639_v60 = vld [vmem:[%s2998_s1 + $0x18] sm:$0xff] (!%p138_p2)  }
   0xd   : > { %s3002_s13 = smov (!%p161_p3, %s2165_s13), 1 }
   0xe   : > { %s2606_s18 = smul.u32 72, %s3002_s13  ;;  %s2349_s8 = sshll.u32 %s3002_s13, 5 }
   0xf   : > { %s2977_s11 = scalar_lea.vmem %s3000_s3, %s2349_s8 }
  0x10   : > { %s2726_s23 = scalar_lea.vmem %s2997_s0, %s2606_s18 }
  0x11   : > { %v173_v4 = vld [vmem:[%s2726_s23] sm:$0xf]  ;;  %v176_v5 = vld [vmem:[%s2726_s23 + $0x4] sm:$0x1]  ;;  %v2622_v7 = vld [vmem:[%s2726_s23 + $0x8] sm:$0x1f]  }
  0x12   : > { %v2175_v6 = vcombine.low %v173_v4, %v176_v5  ;;  %2423 = vmatmul.mubr.msk.bf16.vlgmr.msra.gmra.mrb[0].mxu1 %vm198_vm1, %v173_v4  ;;  %v357_v10 = vshrl.u32 %v2622_v7, 16  ;;  %v359_v11 = vshll.u32 %v2622_v7, 16  ;;  %v2193_v15 = vld [vmem:[%s2726_s23 + $0x8] sm:$0xf]  ;;  %v2194_v16 = vld [vmem:[%s2726_s23 + $0xc] sm:$0x1] }
  0x13   : > { %2433 = vmatpush3.bf16.msra.mxu1 %v2621_v3  ;;  %2434 = vmatprep.mubr.msk.bf16.mxu1 %vm2674_vm0, %v2673_v1  ;;  %v2197_v20 = vcombine.low %v2193_v15, %v2194_v16  ;;  %v2628_v21 = vld [vmem:[%s2726_s23 + $0x10] sm:$0x1f]   ;;  %v2180_v25 = vld [vmem:[%s2726_s23 + $0x8] sm:$0xf]  ;;  %v2634_v38 = vld [vmem:[%s2726_s23 + $0x18] sm:$0x1f]  }
  0x14   : > { %v186_v8 = vshrl.u32 %v2175_v6, 16  ;;  %v188_v9 = vshll.u32 %v2175_v6, 16  ;;  %2444 = vmatprep.subr.bf16.mxu1 %v2673_v1  ;;  %v361_v13 = vrot.slane %v359_v11, 1  ;;  %v605_v24 = vshll.u32 %v2628_v21, 16  ;;  %v2215_v31 = vld [vmem:[%s2726_s23 + $0x10] sm:$0xf] }
  0x15   : > { %v437_v23 = vshll.u32 %v2197_v20, 16  ;;  %v435_v27 = vshrl.u32 %v2197_v20, 16  ;;  %v603_v29 = vshrl.u32 %v2628_v21, 16  ;;  %v2216_v34 = vld [vmem:[%s2726_s23 + $0x14] sm:$0x1]  ;;  %v846_v40 = vshll.u32 %v2634_v38, 16 }
  0x16   : > { %v190_v12 = vrot.slane %v188_v9, 1  ;;  %v362_v18 = vor.u32 %v361_v13, %v357_v10  ;;  %v607_v30 = vrot.slane %v605_v24, 1  ;;  %v2219_v37 = vcombine.low %v2215_v31, %v2216_v34  ;;  %v2202_v41 = vld [vmem:[%s2726_s23 + $0x10] sm:$0xf]  ;;  %v2237_v51 = vld [vmem:[%s2726_s23 + $0x18] sm:$0xf] }
  0x17   : > { %v439_v28 = vrot.slane %v437_v23, 1  ;;  %v844_v46 = vshrl.u32 %v2634_v38, 16  ;;  %v848_v47 = vrot.slane %v846_v40, 1  ;;  %v2238_v52 = vld [vmem:[%s2726_s23 + $0x1c] sm:$0x1]  ;;  %v2638_v4 = vld [vmem:[%s2998_s1 + $0x10] sm:$0xff]  }
  0x18   : > { %v191_v17 = vor.u32 %v190_v12, %v186_v8  ;;  %v608_v33 = vor.u32 %v607_v30, %v603_v29  ;;  %v678_v39 = vshll.u32 %v2219_v37, 16  ;;  %v676_v44 = vshrl.u32 %v2219_v37, 16  ;;  %v2640_v55 = vld [vmem:[%s2726_s23 + $0x20] sm:$0x1f]   ;;  %v2224_v58 = vld [vmem:[%s2726_s23 + $0x18] sm:$0xf] }
  0x19   : > { %v440_v32 = vor.u32 %v439_v28, %v435_v27  ;;  %v849_v50 = vor.u32 %v848_v47, %v844_v46  ;;  %v2241_v54 = vcombine.low %v2237_v51, %v2238_v52  ;;  %v1087_v57 = vshll.u32 %v2640_v55, 16  ;;  %v2259_v5 = vld [vmem:[%s2726_s23 + $0x20] sm:$0xf]  ;;  %v2260_v6 = vld [vmem:[%s2726_s23 + $0x24] sm:$0x1]  ;;  %v2641_v13 = vld [vmem:[%s2998_s1 + $0x8] sm:$0xff]  }
  0x1a   : > { %2417 = vmatmul.mubr.msk.bf16.vlgmr.msra.gmra.mrb[0].mxu0 %vm198_vm1, %v191_v17  ;;  %2435 = vmatmul.mubr.msk.bf16.vlgmr.msra.gmra.mrb[4].mxu1 %vm198_vm1, %v362_v18  ;;  %v680_v45 = vrot.slane %v678_v39, 1  ;;  %v1085_v63 = vshrl.u32 %v2640_v55, 16  ;;  %v2642_v7 = vld [vmem:[%s2998_s1] sm:$0xff]   ;;  %v2263_v8 = vcombine.low %v2259_v5, %v2260_v6  ;;  %v2646_v9 = vld [vmem:[%s2726_s23 + $0x28] sm:$0x1f]   ;;  %v2644_v21 = vld [vmem:[%s2998_s1 + $0x10] sm:$0xff]  }
  0x1b   : > { %2427 = vmatpush3.bf16.msra.mxu0 %v2620_v14  ;;  %2428 = vmatprep.mubr.msk.bf16.mxu0 %vm2674_vm0, %v2673_v1  ;;  %v919_v56 = vshll.u32 %v2241_v54, 16  ;;  %v917_v61 = vshrl.u32 %v2241_v54, 16  ;;  %v1089_v0 = vrot.slane %v1087_v57, 1  ;;  %v1328_v11 = vshll.u32 %v2646_v9, 16  ;;  %v2246_v12 = vld [vmem:[%s2726_s23 + $0x20] sm:$0xf] }
  0x1c   : > { %2438 = vmatprep.subr.bf16.mxu0 %v2673_v1  ;;  %2445 = vmatpush3.bf16.msra.mxu1 %v2624_v19  ;;  %v681_v48 = vor.u32 %v680_v45, %v676_v44  ;;  %v1160_v10 = vshll.u32 %v2263_v8, 16  ;;  %v2645_v14 = vld [vmem:[%s2998_s1 + $0x18] sm:$0xff]   ;;  %v1326_v17 = vshrl.u32 %v2646_v9, 16  ;;  %v2282_v23 = vld [vmem:[%s2726_s23 + $0x2c] sm:$0x1]  ;;  %v2648_v24 = vld [vmem:[%s2998_s1] sm:$0xff]  }
  0x1d   : > { %2446 = vmatprep.mubr.msk.bf16.mxu1 %vm2674_vm0, %v2673_v1  ;;  %2456 = vmatprep.subr.bf16.mxu1 %v2673_v1  ;;  %v921_v62 = vrot.slane %v919_v56, 1  ;;  %v1090_v3 = vor.u32 %v1089_v0, %v1085_v63  ;;  %v1330_v18 = vrot.slane %v1328_v11, 1  ;;  %v2268_v29 = vld [vmem:[%s2726_s23 + $0x28] sm:$0xf]  ;;  %v2650_v38 = vld [vmem:[%s2998_s1 + $0x10] sm:$0xff]  }
  0x1e   : > { %v1162_v16 = vrot.slane %v1160_v10, 1  ;;  %v2647_v30 = vld [vmem:[%s2998_s1 + $0x8] sm:$0xff]   ;;  %v2303_v39 = vld [vmem:[%s2726_s23 + $0x30] sm:$0xf]  ;;  %v2304_v40 = vld [vmem:[%s2726_s23 + $0x34] sm:$0x1] }
  0x1f   : > { %v922_v2 = vor.u32 %v921_v62, %v917_v61  ;;  %v1331_v20 = vor.u32 %v1330_v18, %v1326_v17  ;;  %v2290_v46 = vld [vmem:[%s2726_s23 + $0x30] sm:$0xf]  ;;  %v2653_v47 = vld [vmem:[%s2998_s1 + $0x8] sm:$0xff]   ;;  %v2325_v56 = vld [vmem:[%s2726_s23 + $0x38] sm:$0xf] }
  0x20   : > { %v2656_v55 = vld [vmem:[%s2998_s1 + $0x10] sm:$0xff]   ;;  %v2326_v57 = vld [vmem:[%s2726_s23 + $0x3c] sm:$0x1]  ;;  %v2312_v63 = vld [vmem:[%s2726_s23 + $0x38] sm:$0xf] }
  0x21   : > { %v2659_v0 = vld [vmem:[%s2998_s1 + $0x8] sm:$0xff]   ;;  %v2662_v9 = vld [vmem:[%s2998_s1 + $0x10] sm:$0xff]   ;;  %v2334_v10 = vld [vmem:[%s2726_s23 + $0x40] sm:$0xf] }
  0x22   : > { %2429 = vmatmul.mubr.msk.bf16.vlgmr.msra.gmra.mrb[4].mxu0 %vm198_vm1, %v2180_v25  ;;  %2447 = vmatmul.mubr.msk.bf16.vlgmr.msra.gmra.mrb[8].mxu1 %vm198_vm1, %v2193_v15  ;;  %v1158_v15 = vshrl.u32 %v2263_v8, 16 }
  0x23   : > { %2439 = vmatpush3.bf16.msra.mxu0 %v2623_v22  ;;  %2440 = vmatprep.mubr.msk.bf16.mxu0 %vm2674_vm0, %v2673_v1  ;;  %v2281_v22 = vld [vmem:[%s2726_s23 + $0x28] sm:$0xf] }
  0x24   : > { %2450 = vmatprep.subr.bf16.mxu0 %v2673_v1  ;;  %2457 = vmatpush3.bf16.msra.mxu1 %v2627_v26  ;;  %v1163_v19 = vor.u32 %v1162_v16, %v1158_v15  ;;  %v2285_v25 = vcombine.low %v2281_v22, %v2282_v23  ;;  %v2652_v26 = vld [vmem:[%s2726_s23 + $0x30] sm:$0x1f]  }
  0x25   : > { %2458 = vmatprep.mubr.msk.bf16.mxu1 %vm2674_vm0, %v2673_v1  ;;  %2468 = vmatprep.subr.bf16.mxu1 %v2673_v1  ;;  %v1569_v28 = vshll.u32 %v2652_v26, 16  ;;  %v1567_v34 = vshrl.u32 %v2652_v26, 16 }
  0x26   : > { %v1401_v27 = vshll.u32 %v2285_v25, 16 }
  0x2a   : > { %2441 = vmatmul.mubr.msk.bf16.vlgmr.msra.gmra.mrb[8].mxu0 %vm198_vm1, %v440_v32  ;;  %2459 = vmatmul.mubr.msk.bf16.vlgmr.msra.gmra.mrb[12].mxu1 %vm198_vm1, %v608_v33  ;;  %v1399_v32 = vshrl.u32 %v2285_v25, 16  ;;  %v1403_v33 = vrot.slane %v1401_v27, 1 }
  0x2b   : > { %2451 = vmatpush3.bf16.msra.mxu0 %v2626_v35  ;;  %2452 = vmatprep.mubr.msk.bf16.mxu0 %vm2674_vm0, %v2673_v1  ;;  %v1571_v35 = vrot.slane %v1569_v28, 1  ;;  %v2970_v28 = vld [vmem:[%s2999_s2] ss:$0 sm:$0xff] }
  0x2c   : > { %2462 = vmatprep.subr.bf16.mxu0 %v2673_v1  ;;  %2469 = vmatpush3.bf16.msra.mxu1 %v2630_v36  ;;  %v1404_v36 = vor.u32 %v1403_v33, %v1399_v32 }
  0x2d   : > { %2470 = vmatprep.mubr.msk.bf16.mxu1 %vm2674_vm0, %v2673_v1  ;;  %2480 = vmatprep.subr.bf16.mxu1 %v2673_v1  ;;  %v1572_v37 = vor.u32 %v1571_v35, %v1567_v34 }
  0x32   : > { %2453 = vmatmul.mubr.msk.bf16.vlgmr.msra.gmra.mrb[12].mxu0 %vm198_vm1, %v2202_v41  ;;  %2471 = vmatmul.mubr.msk.bf16.vlgmr.msra.gmra.mrb[16].mxu1 %vm198_vm1, %v2215_v31  ;;  %v2651_v31 = vld [vmem:[%s2998_s1 + $0x18] sm:$0xff]   ;;  %v2654_v41 = vld [vmem:[%s2998_s1] sm:$0xff]  }
  0x33   : > { %2463 = vmatpush3.bf16.msra.mxu0 %v2629_v42  ;;  %2464 = vmatprep.mubr.msk.bf16.mxu0 %vm2674_vm0, %v2673_v1  ;;  %v2307_v42 = vcombine.low %v2303_v39, %v2304_v40 }
  0x34   : > { %2474 = vmatprep.subr.bf16.mxu0 %v2673_v1  ;;  %2481 = vmatpush3.bf16.msra.mxu1 %v2633_v43  ;;  %v2658_v43 = vld [vmem:[%s2726_s23 + $0x38] sm:$0x1f]  }
  0x35   : > { %2482 = vmatprep.mubr.msk.bf16.mxu1 %vm2674_vm0, %v2673_v1  ;;  %2492 = vmatprep.subr.bf16.mxu1 %v2673_v1  ;;  %v1642_v44 = vshll.u32 %v2307_v42, 16  ;;  %v1810_v45 = vshll.u32 %v2658_v43, 16 }
  0x37   : > { %v1812_v52 = vrot.slane %v1810_v45, 1 }
  0x3a   : > { %2465 = vmatmul.mubr.msk.bf16.vlgmr.msra.gmra.mrb[16].mxu0 %vm198_vm1, %v681_v48  ;;  %2483 = vmatmul.mubr.msk.bf16.vlgmr.msra.gmra.mrb[20].mxu1 %vm198_vm1, %v849_v50  ;;  %v2657_v48 = vld [vmem:[%s2998_s1 + $0x18] sm:$0xff]   ;;  %v1644_v50 = vrot.slane %v1642_v44, 1 }
  0x3b   : > { %2475 = vmatpush3.bf16.msra.mxu0 %v2632_v49  ;;  %2476 = vmatprep.mubr.msk.bf16.mxu0 %vm2674_vm0, %v2673_v1  ;;  %v1640_v49 = vshrl.u32 %v2307_v42, 16 }
  0x3c   : > { %2486 = vmatprep.subr.bf16.mxu0 %v2673_v1  ;;  %2493 = vmatpush3.bf16.msra.mxu1 %v2636_v53 }
  0x3d   : > { %2494 = vmatprep.mubr.msk.bf16.mxu1 %vm2674_vm0, %v2673_v1  ;;  %2504 = vmatprep.subr.bf16.mxu1 %v2673_v1  ;;  %v1645_v53 = vor.u32 %v1644_v50, %v1640_v49 }
  0x42   : > { %2477 = vmatmul.mubr.msk.bf16.vlgmr.msra.gmra.mrb[20].mxu0 %vm198_vm1, %v2224_v58  ;;  %2495 = vmatmul.mubr.msk.bf16.vlgmr.msra.gmra.mrb[24].mxu1 %vm198_vm1, %v2237_v51  ;;  %v1808_v51 = vshrl.u32 %v2658_v43, 16  ;;  %v2660_v58 = vld [vmem:[%s2998_s1] sm:$0xff]  }
  0x43   : > { %2487 = vmatpush3.bf16.msra.mxu0 %v2635_v59  ;;  %2488 = vmatprep.mubr.msk.bf16.mxu0 %vm2674_vm0, %v2673_v1  ;;  %v2329_v59 = vcombine.low %v2325_v56, %v2326_v57 }
  0x44   : > { %2498 = vmatprep.subr.bf16.mxu0 %v2673_v1  ;;  %2505 = vmatpush3.bf16.msra.mxu1 %v2639_v60  ;;  %v1813_v54 = vor.u32 %v1812_v52, %v1808_v51  ;;  %v2664_v60 = vld [vmem:[%s2726_s23 + $0x40] sm:$0x1f]  }
  0x45   : > { %2506 = vmatprep.mubr.msk.bf16.mxu1 %vm2674_vm0, %v2673_v1  ;;  %2516 = vmatprep.subr.bf16.mxu1 %v2673_v1  ;;  %v1883_v61 = vshll.u32 %v2329_v59, 16  ;;  %v2051_v62 = vshll.u32 %v2664_v60, 16 }
  0x47   : > { %v2053_v6 = vrot.slane %v2051_v62, 1 }
  0x4a   : > { %2489 = vmatmul.mubr.msk.bf16.vlgmr.msra.gmra.mrb[24].mxu0 %vm198_vm1, %v922_v2  ;;  %2507 = vmatmul.mubr.msk.bf16.vlgmr.msra.gmra.mrb[28].mxu1 %vm198_vm1, %v1090_v3  ;;  %v2663_v2 = vld [vmem:[%s2998_s1 + $0x18] sm:$0xff]   ;;  %v1881_v3 = vshrl.u32 %v2329_v59, 16 }
  0x4b   : > { %2499 = vmatpush3.bf16.msra.mxu0 %v2638_v4  ;;  %2500 = vmatprep.mubr.msk.bf16.mxu0 %vm2674_vm0, %v2673_v1  ;;  %v1885_v4 = vrot.slane %v1883_v61, 1 }
  0x4c   : > { %2510 = vmatprep.subr.bf16.mxu0 %v2673_v1  ;;  %2517 = vmatpush3.bf16.msra.mxu1 %v2642_v7 }
  0x4d   : > { %2518 = vmatprep.mubr.msk.bf16.mxu1 %vm2674_vm0, %v2673_v1  ;;  %2528 = vmatprep.subr.bf16.mxu1 %v2673_v1  ;;  %v1886_v7 = vor.u32 %v1885_v4, %v1881_v3 }
  0x52   : > { %2501 = vmatmul.mubr.msk.bf16.vlgmr.msra.gmra.mrb[28].mxu0 %vm198_vm1, %v2246_v12  ;;  %2519 = vmatmul.mubr.msk.bf16.vlgmr.msra.gmra.mrb[32].mxu1 %vm198_vm1, %v2259_v5  ;;  %v2049_v5 = vshrl.u32 %v2664_v60, 16 }
  0x53   : > { %2511 = vmatpush3.bf16.msra.mxu0 %v2641_v13  ;;  %2512 = vmatprep.mubr.msk.bf16.mxu0 %vm2674_vm0, %v2673_v1 }
  0x54   : > { %2522 = vmatprep.subr.bf16.mxu0 %v2673_v1  ;;  %2529 = vmatpush3.bf16.msra.mxu1 %v2645_v14  ;;  %v2054_v8 = vor.u32 %v2053_v6, %v2049_v5 }
  0x55   : > { %2530 = vmatprep.mubr.msk.bf16.mxu1 %vm2674_vm0, %v2673_v1  ;;  %2540 = vmatprep.subr.bf16.mxu1 %v2673_v1 }
  0x5a   : > { %2513 = vmatmul.mubr.msk.bf16.vlgmr.msra.gmra.mrb[32].mxu0 %vm198_vm1, %v1163_v19  ;;  %2531 = vmatmul.mubr.msk.bf16.vlgmr.msra.gmra.mrb[36].mxu1 %vm198_vm1, %v1331_v20 }
  0x5b   : > { %2523 = vmatpush3.bf16.msra.mxu0 %v2644_v21  ;;  %2524 = vmatprep.mubr.msk.bf16.mxu0 %vm2674_vm0, %v2673_v1 }
  0x5c   : > { %2534 = vmatprep.subr.bf16.mxu0 %v2673_v1  ;;  %2541 = vmatpush3.bf16.msra.mxu1 %v2648_v24 }
  0x5d   : > { %2542 = vmatprep.mubr.msk.bf16.mxu1 %vm2674_vm0, %v2673_v1  ;;  %2552 = vmatprep.subr.bf16.mxu1 %v2673_v1 }
  0x62   : > { %2525 = vmatmul.mubr.msk.bf16.vlgmr.msra.gmra.mrb[36].mxu0 %vm198_vm1, %v2268_v29  ;;  %2543 = vmatmul.mubr.msk.bf16.vlgmr.msra.gmra.mrb[40].mxu1 %vm198_vm1, %v2281_v22 }
  0x63   : > { %2535 = vmatpush3.bf16.msra.mxu0 %v2647_v30  ;;  %2536 = vmatprep.mubr.msk.bf16.mxu0 %vm2674_vm0, %v2673_v1 }
  0x64   : > { %2546 = vmatprep.subr.bf16.mxu0 %v2673_v1  ;;  %2553 = vmatpush3.bf16.msra.mxu1 %v2651_v31 }
  0x65   : > { %2554 = vmatprep.mubr.msk.bf16.mxu1 %vm2674_vm0, %v2673_v1  ;;  %2564 = vmatprep.subr.bf16.mxu1 %v2673_v1 }
  0x6a   : > { %2537 = vmatmul.mubr.msk.bf16.vlgmr.msra.gmra.mrb[40].mxu0 %vm198_vm1, %v1404_v36  ;;  %2555 = vmatmul.mubr.msk.bf16.vlgmr.msra.gmra.mrb[44].mxu1 %vm198_vm1, %v1572_v37 }
  0x6b   : > { %2547 = vmatpush3.bf16.msra.mxu0 %v2650_v38  ;;  %2548 = vmatprep.mubr.msk.bf16.mxu0 %vm2674_vm0, %v2673_v1 }
  0x6c   : > { %2558 = vmatprep.subr.bf16.mxu0 %v2673_v1  ;;  %2565 = vmatpush3.bf16.msra.mxu1 %v2654_v41 }
  0x6d   : > { %2566 = vmatprep.mubr.msk.bf16.mxu1 %vm2674_vm0, %v2673_v1  ;;  %2576 = vmatprep.subr.bf16.mxu1 %v2673_v1 }
  0x72   : > { %2549 = vmatmul.mubr.msk.bf16.vlgmr.msra.gmra.mrb[44].mxu0 %vm198_vm1, %v2290_v46  ;;  %2567 = vmatmul.mubr.msk.bf16.vlgmr.msra.gmra.mrb[48].mxu1 %vm198_vm1, %v2303_v39 }
  0x73   : > { %2559 = vmatpush3.bf16.msra.mxu0 %v2653_v47  ;;  %2560 = vmatprep.mubr.msk.bf16.mxu0 %vm2674_vm0, %v2673_v1 }
  0x74   : > { %2570 = vmatprep.subr.bf16.mxu0 %v2673_v1  ;;  %2577 = vmatpush3.bf16.msra.mxu1 %v2657_v48 }
  0x75   : > { %2578 = vmatprep.mubr.msk.bf16.mxu1 %vm2674_vm0, %v2673_v1  ;;  %2588 = vmatprep.subr.bf16.mxu1 %v2673_v1 }
  0x7a   : > { %2561 = vmatmul.mubr.msk.bf16.vlgmr.msra.gmra.mrb[48].mxu0 %vm198_vm1, %v1645_v53  ;;  %2579 = vmatmul.mubr.msk.bf16.vlgmr.msra.gmra.mrb[52].mxu1 %vm198_vm1, %v1813_v54 }
  0x7b   : > { %2571 = vmatpush3.bf16.msra.mxu0 %v2656_v55  ;;  %2572 = vmatprep.mubr.msk.bf16.mxu0 %vm2674_vm0, %v2673_v1 }
  0x7c   : > { %2582 = vmatprep.subr.bf16.mxu0 %v2673_v1  ;;  %2589 = vmatpush3.bf16.msra.mxu1 %v2660_v58 }
  0x7d   : > { %2590 = vmatprep.mubr.msk.bf16.mxu1 %vm2674_vm0, %v2673_v1  ;;  %2600 = vmatprep.subr.bf16.mxu1 %v2673_v1 }
  0x82   : > { %2573 = vmatmul.mubr.msk.bf16.vlgmr.msra.gmra.mrb[52].mxu0 %vm198_vm1, %v2312_v63  ;;  %2591 = vmatmul.mubr.msk.bf16.vlgmr.msra.gmra.mrb[56].mxu1 %vm198_vm1, %v2325_v56 }
  0x83   : > { %2583 = vmatpush3.bf16.msra.mxu0 %v2659_v0  ;;  %2584 = vmatprep.mubr.msk.bf16.mxu0 %vm2674_vm0, %v2673_v1 }
  0x84   : > { %2594 = vmatprep.subr.bf16.mxu0 %v2673_v1  ;;  %2601 = vmatpush3.bf16.msra.mxu1 %v2663_v2 }
  0x85   : > { %2602 = vmatprep.mubr.msk.bf16.mxu1 %vm2674_vm0, %v2673_v1 }
  0x8a   : > { %2585 = vmatmul.mubr.msk.bf16.vlgmr.msra.gmra.mrb[56].mxu0 %vm198_vm1, %v1886_v7  ;;  %2603 = vmatmul.mubr.msk.bf16.vlgmr.msra.gmra.mrb[60].mxu1 %vm198_vm1, %v2054_v8 }
  0x8b   : > { %2595 = vmatpush3.bf16.msra.mxu0 %v2662_v9  ;;  %2596 = vmatprep.mubr.msk.bf16.mxu0 %vm2674_vm0, %v2673_v1 }
  0x92   : > { %2597 = vmatmul.mubr.msk.bf16.vlgmr.msra.gmra.mrb[60].mxu0 %vm198_vm1, %v2334_v10 }
  0xe5   : > { %v285_v11 = vpop.f32.mrb[0].mxu1 }
  0xe6   : > { %v2424_v12 = vpop.f32.mrb[1].mxu1 }
  0xe7   : > { %v288_v13 = vpop.f32.mrb[2].mxu1 }
  0xe8   : > { %v2425_v14 = vpop.f32.mrb[3].mxu1 }
  0xed   : > { %v236_v15 = vpop.f32.mrb[0].mxu0  ;;  %v406_v16 = vpop.f32.mrb[4].mxu1 }
  0xee   : > { %v286_v17 = vadd.f32 %v285_v11, %v236_v15  ;;  %v2418_v18 = vpop.f32.mrb[1].mxu0  ;;  %v2436_v19 = vpop.f32.mrb[5].mxu1 }
  0xef   : > { %v239_v20 = vpop.f32.mrb[2].mxu0  ;;  %v409_v21 = vpop.f32.mrb[6].mxu1 }
  0xf0   : > { %v2419_v22 = vpop.f32.mrb[3].mxu0  ;;  %v2437_v23 = vpop.f32.mrb[7].mxu1 }
  0xf5   : > { %v339_v24 = vpop.f32.mrb[4].mxu0  ;;  %v533_v25 = vpop.f32.mrb[8].mxu1 }
  0xf6   : > { %v345_v1 = vadd.f32 %v339_v24, %v286_v17  ;;  %v2430_v26 = vpop.f32.mrb[5].mxu0  ;;  %v2448_v27 = vpop.f32.mrb[9].mxu1 }
  0xf7   : > { %v342_v29 = vpop.f32.mrb[6].mxu0  ;;  %v536_v30 = vpop.f32.mrb[10].mxu1 }
  0xf8   : > { %v412_v31 = vadd.f32 %v406_v16, %v345_v1  ;;  %v2431_v32 = vpop.f32.mrb[7].mxu0  ;;  %v2449_v33 = vpop.f32.mrb[11].mxu1 }
  0xfa   : > { %v419_v34 = vadd.f32 %v2970_v28, %v412_v31 }
  0xfc   : > { %v420_v35 = vmax.f32 %v419_v34, 0.0 }
  0xfd   : > { %v484_v36 = vpop.f32.mrb[8].mxu0  ;;  %v652_v37 = vpop.f32.mrb[12].mxu1 }
  0xfe   : > { %v421_v38 = vpack.c.bf16 %v420_v35, %v420_v35  ;;  %v534_v39 = vadd.f32 %v533_v25, %v484_v36  ;;  %v2442_v40 = vpop.f32.mrb[9].mxu0  ;;  %v2460_v41 = vpop.f32.mrb[13].mxu1 }
  0xff   : > { %v487_v42 = vpop.f32.mrb[10].mxu0  ;;  %v655_v43 = vpop.f32.mrb[14].mxu1 }
 0x100   : > { %422 = vst [vmem:[%s2977_s11] sm:$0xf] %v421_v38  ;;  %v2443_v44 = vpop.f32.mrb[11].mxu0  ;;  %v2461_v45 = vpop.f32.mrb[15].mxu1 }
 0x105   : > { %v586_v46 = vpop.f32.mrb[12].mxu0  ;;  %v774_v47 = vpop.f32.mrb[16].mxu1 }
 0x106   : > { %v592_v48 = vadd.f32 %v586_v46, %v534_v39  ;;  %v2454_v49 = vpop.f32.mrb[13].mxu0  ;;  %v2472_v50 = vpop.f32.mrb[17].mxu1 }
 0x107   : > { %v589_v51 = vpop.f32.mrb[14].mxu0  ;;  %v777_v52 = vpop.f32.mrb[18].mxu1 }
 0x108   : > { %v658_v53 = vadd.f32 %v652_v37, %v592_v48  ;;  %v2455_v54 = vpop.f32.mrb[15].mxu0  ;;  %v2473_v55 = vpop.f32.mrb[19].mxu1 }
 0x10a   : > { %v659_v56 = vadd.f32 %v2970_v28, %v658_v53 }
 0x10c   : > { %v660_v57 = vmax.f32 %v659_v56, 0.0 }
 0x10d   : > { %v725_v58 = vpop.f32.mrb[16].mxu0  ;;  %v893_v59 = vpop.f32.mrb[20].mxu1 }
 0x10e   : > { %v661_v60 = vpack.c.bf16 %v660_v57, %v660_v57  ;;  %v775_v61 = vadd.f32 %v774_v47, %v725_v58  ;;  %v2466_v62 = vpop.f32.mrb[17].mxu0  ;;  %v2484_v63 = vpop.f32.mrb[21].mxu1 }
 0x10f   : > { %v728_v0 = vpop.f32.mrb[18].mxu0  ;;  %v896_v2 = vpop.f32.mrb[22].mxu1 }
 0x110   : > { %2214 = vst [vmem:[%s2977_s11 + $0x4] sm:$0xf] %v661_v60  ;;  %v2467_v3 = vpop.f32.mrb[19].mxu0  ;;  %v2485_v4 = vpop.f32.mrb[23].mxu1 }
 0x115   : > { %v827_v5 = vpop.f32.mrb[20].mxu0  ;;  %v1015_v6 = vpop.f32.mrb[24].mxu1 }
 0x116   : > { %v833_v7 = vadd.f32 %v827_v5, %v775_v61  ;;  %v2478_v8 = vpop.f32.mrb[21].mxu0  ;;  %v2496_v9 = vpop.f32.mrb[25].mxu1 }
 0x117   : > { %v830_v10 = vpop.f32.mrb[22].mxu0  ;;  %v1018_v11 = vpop.f32.mrb[26].mxu1 }
 0x118   : > { %v899_v12 = vadd.f32 %v893_v59, %v833_v7  ;;  %v2479_v13 = vpop.f32.mrb[23].mxu0  ;;  %v2497_v14 = vpop.f32.mrb[27].mxu1 }
 0x11a   : > { %v900_v15 = vadd.f32 %v2970_v28, %v899_v12 }
 0x11c   : > { %v901_v16 = vmax.f32 %v900_v15, 0.0 }
 0x11d   : > { %v966_v17 = vpop.f32.mrb[24].mxu0  ;;  %v1134_v18 = vpop.f32.mrb[28].mxu1 }
 0x11e   : > { %v902_v19 = vpack.c.bf16 %v901_v16, %v901_v16  ;;  %v1016_v20 = vadd.f32 %v1015_v6, %v966_v17  ;;  %v2490_v21 = vpop.f32.mrb[25].mxu0  ;;  %v2508_v22 = vpop.f32.mrb[29].mxu1 }
 0x11f   : > { %v969_v23 = vpop.f32.mrb[26].mxu0  ;;  %v1137_v24 = vpop.f32.mrb[30].mxu1 }
 0x120   : > { %2236 = vst [vmem:[%s2977_s11 + $0x8] sm:$0xf] %v902_v19  ;;  %v2491_v25 = vpop.f32.mrb[27].mxu0  ;;  %v2509_v1 = vpop.f32.mrb[31].mxu1 }
 0x125   : > { %v1068_v26 = vpop.f32.mrb[28].mxu0  ;;  %v1256_v27 = vpop.f32.mrb[32].mxu1 }
 0x126   : > { %v1074_v29 = vadd.f32 %v1068_v26, %v1016_v20  ;;  %v2502_v30 = vpop.f32.mrb[29].mxu0  ;;  %v2520_v31 = vpop.f32.mrb[33].mxu1 }
 0x127   : > { %v1071_v32 = vpop.f32.mrb[30].mxu0  ;;  %v1259_v33 = vpop.f32.mrb[34].mxu1 }
 0x128   : > { %v1140_v34 = vadd.f32 %v1134_v18, %v1074_v29  ;;  %v2503_v35 = vpop.f32.mrb[31].mxu0  ;;  %v2521_v36 = vpop.f32.mrb[35].mxu1 }
 0x12a   : > { %v1141_v37 = vadd.f32 %v2970_v28, %v1140_v34 }
 0x12c   : > { %v1142_v38 = vmax.f32 %v1141_v37, 0.0 }
 0x12d   : > { %v1207_v39 = vpop.f32.mrb[32].mxu0  ;;  %v1375_v40 = vpop.f32.mrb[36].mxu1 }
 0x12e   : > { %v1143_v41 = vpack.c.bf16 %v1142_v38, %v1142_v38  ;;  %v1257_v42 = vadd.f32 %v1256_v27, %v1207_v39  ;;  %v2514_v43 = vpop.f32.mrb[33].mxu0  ;;  %v2532_v44 = vpop.f32.mrb[37].mxu1 }
 0x12f   : > { %v1210_v45 = vpop.f32.mrb[34].mxu0  ;;  %v1378_v46 = vpop.f32.mrb[38].mxu1 }
 0x130   : > { %2258 = vst [vmem:[%s2977_s11 + $0xc] sm:$0xf] %v1143_v41  ;;  %v2515_v47 = vpop.f32.mrb[35].mxu0  ;;  %v2533_v48 = vpop.f32.mrb[39].mxu1 }
 0x135   : > { %v1309_v49 = vpop.f32.mrb[36].mxu0  ;;  %v1497_v50 = vpop.f32.mrb[40].mxu1 }
 0x136   : > { %v1315_v51 = vadd.f32 %v1309_v49, %v1257_v42  ;;  %v2526_v52 = vpop.f32.mrb[37].mxu0  ;;  %v2544_v53 = vpop.f32.mrb[41].mxu1 }
 0x137   : > { %v1312_v54 = vpop.f32.mrb[38].mxu0  ;;  %v1500_v55 = vpop.f32.mrb[42].mxu1 }
 0x138   : > { %v1381_v56 = vadd.f32 %v1375_v40, %v1315_v51  ;;  %v2527_v57 = vpop.f32.mrb[39].mxu0  ;;  %v2545_v58 = vpop.f32.mrb[43].mxu1 }
 0x13a   : > { %v1382_v59 = vadd.f32 %v2970_v28, %v1381_v56 }
 0x13c   : > { %v1383_v60 = vmax.f32 %v1382_v59, 0.0 }
 0x13d   : > { %v1448_v61 = vpop.f32.mrb[40].mxu0  ;;  %v1616_v62 = vpop.f32.mrb[44].mxu1 }
 0x13e   : > { %v1384_v63 = vpack.c.bf16 %v1383_v60, %v1383_v60  ;;  %v1498_v0 = vadd.f32 %v1497_v50, %v1448_v61  ;;  %v2538_v2 = vpop.f32.mrb[41].mxu0  ;;  %v2556_v3 = vpop.f32.mrb[45].mxu1 }
 0x13f   : > { %v1451_v4 = vpop.f32.mrb[42].mxu0  ;;  %v1619_v5 = vpop.f32.mrb[46].mxu1 }
 0x140   : > { %2280 = vst [vmem:[%s2977_s11 + $0x10] sm:$0xf] %v1384_v63  ;;  %v2539_v6 = vpop.f32.mrb[43].mxu0  ;;  %v2557_v7 = vpop.f32.mrb[47].mxu1 }
 0x145   : > { %v1550_v8 = vpop.f32.mrb[44].mxu0  ;;  %v1738_v9 = vpop.f32.mrb[48].mxu1 }
 0x146   : > { %v1556_v10 = vadd.f32 %v1550_v8, %v1498_v0  ;;  %v2550_v11 = vpop.f32.mrb[45].mxu0  ;;  %v2568_v12 = vpop.f32.mrb[49].mxu1 }
 0x147   : > { %v1553_v13 = vpop.f32.mrb[46].mxu0  ;;  %v1741_v14 = vpop.f32.mrb[50].mxu1 }
 0x148   : > { %v1622_v15 = vadd.f32 %v1616_v62, %v1556_v10  ;;  %v2551_v16 = vpop.f32.mrb[47].mxu0  ;;  %v2569_v17 = vpop.f32.mrb[51].mxu1 }
 0x14a   : > { %v1623_v18 = vadd.f32 %v2970_v28, %v1622_v15 }
 0x14c   : > { %v1624_v19 = vmax.f32 %v1623_v18, 0.0 }
 0x14d   : > { %v1689_v20 = vpop.f32.mrb[48].mxu0  ;;  %v1857_v21 = vpop.f32.mrb[52].mxu1 }
 0x14e   : > { %v1625_v22 = vpack.c.bf16 %v1624_v19, %v1624_v19  ;;  %v1739_v23 = vadd.f32 %v1738_v9, %v1689_v20  ;;  %v2562_v24 = vpop.f32.mrb[49].mxu0  ;;  %v2580_v25 = vpop.f32.mrb[53].mxu1 }
 0x14f   : > { %v1692_v1 = vpop.f32.mrb[50].mxu0  ;;  %v1860_v26 = vpop.f32.mrb[54].mxu1 }
 0x150   : > { %2302 = vst [vmem:[%s2977_s11 + $0x14] sm:$0xf] %v1625_v22  ;;  %v2563_v27 = vpop.f32.mrb[51].mxu0  ;;  %v2581_v29 = vpop.f32.mrb[55].mxu1 }
 0x155   : > { %v1791_v30 = vpop.f32.mrb[52].mxu0  ;;  %v1979_v31 = vpop.f32.mrb[56].mxu1 }
 0x156   : > { %v1797_v32 = vadd.f32 %v1791_v30, %v1739_v23  ;;  %v2574_v33 = vpop.f32.mrb[53].mxu0  ;;  %v2592_v34 = vpop.f32.mrb[57].mxu1 }
 0x157   : > { %v1794_v35 = vpop.f32.mrb[54].mxu0  ;;  %v1982_v36 = vpop.f32.mrb[58].mxu1 }
 0x158   : > { %v1863_v37 = vadd.f32 %v1857_v21, %v1797_v32  ;;  %v2575_v38 = vpop.f32.mrb[55].mxu0  ;;  %v2593_v39 = vpop.f32.mrb[59].mxu1 }
 0x15a   : > { %v1864_v40 = vadd.f32 %v2970_v28, %v1863_v37 }
 0x15c   : > { %v1865_v41 = vmax.f32 %v1864_v40, 0.0 }
 0x15d   : > { %v1930_v42 = vpop.f32.mrb[56].mxu0  ;;  %v2098_v43 = vpop.f32.mrb[60].mxu1 }
 0x15e   : > { %v1866_v44 = vpack.c.bf16 %v1865_v41, %v1865_v41  ;;  %v1980_v45 = vadd.f32 %v1979_v31, %v1930_v42  ;;  %v2586_v46 = vpop.f32.mrb[57].mxu0  ;;  %v2604_v47 = vpop.f32.mrb[61].mxu1 }
 0x15f   : > { %v1933_v48 = vpop.f32.mrb[58].mxu0  ;;  %v2101_v49 = vpop.f32.mrb[62].mxu1 }
 0x160   : > { %2324 = vst [vmem:[%s2977_s11 + $0x18] sm:$0xf] %v1866_v44  ;;  %v2587_v50 = vpop.f32.mrb[59].mxu0  ;;  %v2605_v51 = vpop.f32.mrb[63].mxu1 }
 0x165   : > { %v2032_v52 = vpop.f32.mrb[60].mxu0 }
 0x166   : > { %v2038_v53 = vadd.f32 %v2032_v52, %v1980_v45  ;;  %v2598_v54 = vpop.f32.mrb[61].mxu0 }
 0x167   : > { %v2035_v55 = vpop.f32.mrb[62].mxu0 }
 0x168   : > { %v2104_v56 = vadd.f32 %v2098_v43, %v2038_v53  ;;  %v2599_v57 = vpop.f32.mrb[63].mxu0 }
 0x16a   : > { %v2105_v58 = vadd.f32 %v2970_v28, %v2104_v56 }
 0x16c   : > { %v2106_v59 = vmax.f32 %v2105_v58, 0.0 }
 0x16e   : > { %v2107_v60 = vpack.c.bf16 %v2106_v59, %v2106_v59 }
 0x170   : > { %2346 = vst [vmem:[%s2977_s11 + $0x1c] sm:$0xf] %v2107_v60 }
 0x171 PF: > { %s13_s12 = sadd.s32 1, %s2671_s12  }
 0x172   : > { %p10_p4 = scmp.ge.s32.totalorder %s13_s12, 4  }
 0x174   :  { %12 = sbr.rel (!%p10_p4) target bundleno = 1 (0x1), region = 80 }

// kernel: encoder_forward.6
= control target key start
LH: loop header
LB: loop body
LE: loop exit
PB: predicated region body
PF: predicated region fallthrough
CT: control target
= control target key end

     0   :  { %s4543_s12 = smov 0   ;;  %s5376_s0 = inlined_call_operand.vmem [shape: bf16[2,3,3,512], index: 0, kind: input, shape index: {}]   ;;  %s5377_s1 = inlined_call_operand.vmem [shape: bf16[2,2,512,128], index: 1, kind: input, shape index: {}]   ;;  %s5378_s2 = inlined_call_operand.vmem [shape: f32[1,128], index: 2, kind: input, shape index: {}]   ;;  %s5379_s3 = inlined_call_operand.vmem [shape: bf16[2,2,2,128], index: 3, kind: output, shape index: {}]  }
   0x1 LB: > { %s3232_s13 = sadd.s32 4294967295, %s4520_s12   ;;  %p3236_p0 = scmp.ge.s32.totalorder %s4520_s12, 1  ;;  %s4520_s12 = sphi %s4543_s12, %s13_s12  }
   0x2   : > { %p137_p1 = scmp.lt.s32.totalorder %s4520_s12, 3 }
   0x4   : > { %p138_p2 = pnand %p3236_p0, %p137_p1 }
   0x5   : > { %v4251_v0 = vld [vmem:[%s5377_s1 + $0x140] sm:$0xff] (!%p138_p2)   ;;  %v4255_v4 = vld [vmem:[%s5377_s1 + $0x148] sm:$0xff] (!%p138_p2)   ;;  %v4259_v8 = vld [vmem:[%s5377_s1 + $0x150] sm:$0xff] (!%p138_p2)   ;;  %p160_p3 = scmp.lt.s32.totalorder (!%p138_p2), %s3232_s13, 1  ;;  %v307_v28 = vlaneseq (!%p138_p2)  ;;  %v4522_v36 = vmov (!%p138_p2), 1983009808  }
   0x6   : > { %141 = sbr.rel (%p138_p2) target bundleno = 490 (0x1ea), region = 32  ;;  %v4252_v1 = vld [vmem:[%s5377_s1 + $0x1c0] sm:$0xff] (!%p138_p2)   ;;  %3889 = vmatprep.subr.bf16.mxu0 (!%p138_p2), %v4251_v0  ;;  %v4256_v5 = vld [vmem:[%s5377_s1 + $0x1c8] sm:$0xff] (!%p138_p2)   ;;  %v4260_v9 = vld [vmem:[%s5377_s1 + $0x1d0] sm:$0xff] (!%p138_p2)   ;;  %v305_v37 = vunpack.c.l.s4 (!%p138_p2), %v4522_v36 }
   0x7   : > { %v4253_v2 = vld [vmem:[%s5377_s1 + $0x100] sm:$0xff] (!%p138_p2)   ;;  %3911 = vmatprep.subr.bf16.mxu1 (!%p138_p2), %v4252_v1  ;;  %v4257_v6 = vld [vmem:[%s5377_s1 + $0x108] sm:$0xff] (!%p138_p2)   ;;  %v4261_v10 = vld [vmem:[%s5377_s1 + $0x110] sm:$0xff] (!%p138_p2)   ;;  %v308_v33 = vshrl.u32 (!%p138_p2), %v307_v28, 7 }
   0x8   : > { %v4254_v3 = vld [vmem:[%s5377_s1 + $0x180] sm:$0xff] (!%p138_p2)   ;;  %3890 = vmatpush3.bf16.msra.mxu0 (!%p138_p2), %v4253_v2  ;;  %v4258_v7 = vld [vmem:[%s5377_s1 + $0x188] sm:$0xff] (!%p138_p2)   ;;  %v4262_v11 = vld [vmem:[%s5377_s1 + $0x190] sm:$0xff] (!%p138_p2)   ;;  %v306_v39 = vunpack.c.0.s8 (!%p138_p2), %v305_v37 }
   0x9   : > { %3912 = vmatpush3.bf16.msra.mxu1 (!%p138_p2), %v4254_v3  ;;  %3891 = vmatprep.subr.bf16.mxu0 (!%p138_p2), %v4255_v4  ;;  %v4263_v12 = vld [vmem:[%s5377_s1 + $0x158] sm:$0xff] (!%p138_p2)   ;;  %v4267_v16 = vld [vmem:[%s5377_s1 + $0x160] sm:$0xff] (!%p138_p2)   ;;  %v4271_v20 = vld [vmem:[%s5377_s1 + $0x168] sm:$0xff] (!%p138_p2)  }
   0xa   : > { %3913 = vmatprep.subr.bf16.mxu1 (!%p138_p2), %v4256_v5  ;;  %v4264_v13 = vld [vmem:[%s5377_s1 + $0x1d8] sm:$0xff] (!%p138_p2)   ;;  %v4268_v17 = vld [vmem:[%s5377_s1 + $0x1e0] sm:$0xff] (!%p138_p2)   ;;  %v4272_v21 = vld [vmem:[%s5377_s1 + $0x1e8] sm:$0xff] (!%p138_p2)   ;;  %v4666_v41 = vsub.s32 (!%p138_p2), %v306_v39, %v308_v33 }
   0xb   : > { %v4265_v14 = vld [vmem:[%s5377_s1 + $0x118] sm:$0xff] (!%p138_p2)   ;;  %v4269_v18 = vld [vmem:[%s5377_s1 + $0x120] sm:$0xff] (!%p138_p2)   ;;  %v4273_v22 = vld [vmem:[%s5377_s1 + $0x128] sm:$0xff] (!%p138_p2)  }
   0xc   : > { %3892 = vmatpush3.bf16.msra.mxu0 (!%p138_p2), %v4257_v6  ;;  %v4266_v15 = vld [vmem:[%s5377_s1 + $0x198] sm:$0xff] (!%p138_p2)   ;;  %v4270_v19 = vld [vmem:[%s5377_s1 + $0x1a0] sm:$0xff] (!%p138_p2)   ;;  %v4274_v23 = vld [vmem:[%s5377_s1 + $0x1a8] sm:$0xff] (!%p138_p2)  }
   0xd   : > { %3914 = vmatpush3.bf16.msra.mxu1 %v4258_v7  ;;  %3893 = vmatprep.subr.bf16.mxu0 %v4259_v8  ;;  %s5381_s13 = smov (!%p160_p3, %s3232_s13), 1  ;;  %v4275_v24 = vld [vmem:[%s5377_s1 + $0x170] sm:$0xff]   ;;  %v4279_v29 = vld [vmem:[%s5377_s1 + $0x178] sm:$0xff]   ;;  %v4284_v35 = vld [vmem:[%s5377_s1 + $0x40] sm:$0xff]  }
   0xe   : > { %3915 = vmatprep.subr.bf16.mxu1 %v4260_v9  ;;  %v4276_v25 = vld [vmem:[%s5377_s1 + $0x1f0] sm:$0xff]   ;;  %s4241_s16 = smul.u32 24, %s5381_s13  ;;  %v4280_v30 = vld [vmem:[%s5377_s1 + $0x1f8] sm:$0xff]   ;;  %v4285_v38 = vld [vmem:[%s5377_s1 + $0xc0] sm:$0xff]   ;;  %s3238_s24 = sshll.u32 %s5381_s13, 1 }
   0xf   : > { %v4277_v26 = vld [vmem:[%s5377_s1 + $0x130] sm:$0xff]   ;;  %v4281_v31 = vld [vmem:[%s5377_s1 + $0x138] sm:$0xff]   ;;  %v4286_v58 = vld [vmem:[%s5377_s1] sm:$0xff]   ;;  %s5369_s28 = scalar_lea.vmem %s5379_s3, %s3238_s24 }
  0x10   : > { %3894 = vmatpush3.bf16.msra.mxu0 %v4261_v10  ;;  %v4278_v27 = vld [vmem:[%s5377_s1 + $0x1b0] sm:$0xff]   ;;  %s4651_s27 = scalar_lea.vmem %s5376_s0, %s4241_s16  ;;  %v4282_v32 = vld [vmem:[%s5377_s1 + $0x1b8] sm:$0xff]   ;;  %v4287_v61 = vld [vmem:[%s5377_s1 + $0x80] sm:$0xff]  }
  0x11   : > { %3916 = vmatpush3.bf16.msra.mxu1 %v4262_v11  ;;  %3895 = vmatprep.subr.bf16.mxu0 %v4263_v12  ;;  %v236_v34 = vld [vmem:[%s4651_s27] sm:$0xff]  ;;  %v4288_v0 = vld [vmem:[%s5377_s1 + $0x48] sm:$0xff]   ;;  %v4292_v4 = vld [vmem:[%s5377_s1 + $0x50] sm:$0xff]  }
  0x12   : > { %3917 = vmatprep.subr.bf16.mxu1 %v4264_v13  ;;  %v303_v40 = vcombine.high %v236_v34, %v236_v34  ;;  %v310_v42 = vrot.slane %v236_v34, %v4666_v41  ;;  %v4289_v1 = vld [vmem:[%s5377_s1 + $0xc8] sm:$0xff]   ;;  %v4293_v5 = vld [vmem:[%s5377_s1 + $0xd0] sm:$0xff]   ;;  %v4296_v8 = vld [vmem:[%s5377_s1 + $0x58] sm:$0xff]  }
  0x13   : > { %v4290_v2 = vld [vmem:[%s5377_s1 + $0x8] sm:$0xff]   ;;  %v4294_v6 = vld [vmem:[%s5377_s1 + $0x10] sm:$0xff]   ;;  %v4297_v9 = vld [vmem:[%s5377_s1 + $0xd8] sm:$0xff]  }
  0x14   : > { %3896 = vmatpush3.bf16.msra.mxu0 %v4265_v14  ;;  %v317_v43 = vrot.slane %v303_v40, %v4666_v41  ;;  %v318_v44 = vcombine.high %v310_v42, %v310_v42  ;;  %v321_v46 = vshrl.u32 %v310_v42, 16  ;;  %v323_v47 = vshll.u32 %v310_v42, 16  ;;  %v4291_v3 = vld [vmem:[%s5377_s1 + $0x88] sm:$0xff]   ;;  %v4295_v7 = vld [vmem:[%s5377_s1 + $0x90] sm:$0xff]   ;;  %v4298_v10 = vld [vmem:[%s5377_s1 + $0x18] sm:$0xff]  }
  0x15   : > { %3918 = vmatpush3.bf16.msra.mxu1 %v4266_v15  ;;  %3897 = vmatprep.subr.bf16.mxu0 %v4267_v16  ;;  %v4299_v11 = vld [vmem:[%s5377_s1 + $0x98] sm:$0xff]   ;;  %v4300_v12 = vld [vmem:[%s5377_s1 + $0x60] sm:$0xff]   ;;  %v4304_v16 = vld [vmem:[%s5377_s1 + $0x68] sm:$0xff]  }
  0x16   : > { %3919 = vmatprep.subr.bf16.mxu1 %v4268_v17  ;;  %v319_v45 = vcombine.high %v317_v43, %v317_v43  ;;  %v335_v48 = vshrl.u32 %v317_v43, 16  ;;  %v337_v49 = vshll.u32 %v317_v43, 16  ;;  %v328_v50 = vshrl.u32 %v318_v44, 16  ;;  %v4301_v13 = vld [vmem:[%s5377_s1 + $0xe0] sm:$0xff]   ;;  %v4305_v17 = vld [vmem:[%s5377_s1 + $0xe8] sm:$0xff]   ;;  %v4311_v28 = vld [vmem:[%s5377_s1 + $0xb0] sm:$0xff]  }
  0x17   : > { %v330_v51 = vshll.u32 %v318_v44, 16  ;;  %v325_v54 = vrot.slane %v323_v47, 1  ;;  %v4302_v14 = vld [vmem:[%s5377_s1 + $0x20] sm:$0xff]   ;;  %v4315_v33 = vld [vmem:[%s5377_s1 + $0xb8] sm:$0xff]   ;;  %v4322_v39 = vld [vmem:[%s5377_s1 + $0x2c8] sm:$0xff]  }
  0x18   : > { %3898 = vmatpush3.bf16.msra.mxu0 %v4269_v18  ;;  %v342_v52 = vshrl.u32 %v319_v45, 16  ;;  %v344_v53 = vshll.u32 %v319_v45, 16  ;;  %v339_v55 = vrot.slane %v337_v49, 1  ;;  %v4303_v15 = vld [vmem:[%s5377_s1 + $0xa0] sm:$0xff]   ;;  %v4306_v18 = vld [vmem:[%s5377_s1 + $0x28] sm:$0xff]   ;;  %v4325_v43 = vld [vmem:[%s5377_s1 + $0x250] sm:$0xff]  }
  0x19   : > { %3920 = vmatpush3.bf16.msra.mxu1 %v4270_v19  ;;  %3899 = vmatprep.subr.bf16.mxu0 %v4271_v20  ;;  %v332_v56 = vrot.slane %v330_v51, 1  ;;  %v326_v59 = vor.u32 %v325_v54, %v321_v46  ;;  %v171_v19 = vld [vmem:[%s4651_s27] sm:$0x55]  ;;  %v4307_v20 = vld [vmem:[%s5377_s1 + $0xa8] sm:$0xff]   ;;  %v4326_v44 = vld [vmem:[%s5377_s1 + $0x2d0] sm:$0xff]  }
  0x1a   : > { %3921 = vmatprep.subr.bf16.mxu1 %v4272_v21  ;;  %v346_v57 = vrot.slane %v344_v53, 1  ;;  %v340_v60 = vor.u32 %v339_v55, %v335_v48  ;;  %v632_v21 = vrot.slane %v171_v19, %v4666_v41  ;;  %v4317_v34 = vld [vmem:[%s5377_s1 + $0x240] sm:$0xff]   ;;  %v4323_v40 = vld [vmem:[%s5377_s1 + $0x208] sm:$0xff]   ;;  %v4327_v45 = vld [vmem:[%s5377_s1 + $0x210] sm:$0xff]  }
  0x1b   : > { %v333_v62 = vor.u32 %v332_v56, %v328_v50  ;;  %v4319_v36 = vld [vmem:[%s5377_s1 + $0x200] sm:$0xff]   ;;  %v4324_v42 = vld [vmem:[%s5377_s1 + $0x288] sm:$0xff]   ;;  %v4328_v46 = vld [vmem:[%s5377_s1 + $0x290] sm:$0xff]  }
  0x1c   : > { %3900 = vmatpush3.bf16.msra.mxu0 %v4273_v22  ;;  %v347_v63 = vor.u32 %v346_v57, %v342_v52  ;;  %v625_v22 = vcombine.high %v171_v19, %v171_v19  ;;  %v4320_v37 = vld [vmem:[%s5377_s1 + $0x280] sm:$0xff]   ;;  %v4329_v47 = vld [vmem:[%s5377_s1 + $0x258] sm:$0xff]   ;;  %v4337_v55 = vld [vmem:[%s5377_s1 + $0x268] sm:$0xff]  }
  0x1d   : > { %3922 = vmatpush3.bf16.msra.mxu1 %v4274_v23  ;;  %3901 = vmatprep.subr.bf16.mxu0 %v4275_v24  ;;  %v4308_v23 = vld [vmem:[%s5377_s1 + $0x70] sm:$0xff]   ;;  %v4330_v48 = vld [vmem:[%s5377_s1 + $0x2d8] sm:$0xff]   ;;  %v4333_v51 = vld [vmem:[%s5377_s1 + $0x260] sm:$0xff]  }
  0x1e   : > { %3923 = vmatprep.subr.bf16.mxu1 %v4276_v25  ;;  %576 = vmatprep.mubr.bf16.mxu0 %v333_v62  ;;  %v4309_v24 = vld [vmem:[%s5377_s1 + $0xf0] sm:$0xff]   ;;  %v640_v25 = vcombine.high %v632_v21, %v632_v21  ;;  %v4331_v49 = vld [vmem:[%s5377_s1 + $0x218] sm:$0xff]   ;;  %v4334_v52 = vld [vmem:[%s5377_s1 + $0x2e0] sm:$0xff]  }
  0x1f   : > { %616 = vmatprep.mubr.bf16.mxu1 %v347_v63  ;;  %v4332_v50 = vld [vmem:[%s5377_s1 + $0x298] sm:$0xff]   ;;  %v4335_v53 = vld [vmem:[%s5377_s1 + $0x220] sm:$0xff]   ;;  %v4338_v56 = vld [vmem:[%s5377_s1 + $0x2e8] sm:$0xff]  }
  0x20   : > { %3902 = vmatpush3.bf16.msra.mxu0 %v4277_v26  ;;  %v639_v26 = vrot.slane %v625_v22, %v4666_v41  ;;  %v4336_v54 = vld [vmem:[%s5377_s1 + $0x2a0] sm:$0xff]   ;;  %v4339_v57 = vld [vmem:[%s5377_s1 + $0x228] sm:$0xff]   ;;  %v4342_v63 = vld [vmem:[%s5377_s1 + $0x2f0] sm:$0xff]  }
  0x21   : > { %3924 = vmatpush3.bf16.msra.mxu1 %v4278_v27  ;;  %3903 = vmatprep.subr.bf16.mxu0 %v4279_v29  ;;  %v4310_v27 = vld [vmem:[%s5377_s1 + $0x30] sm:$0xff]   ;;  %v4363_v22 = vld [vmem:[%s5377_s1 + $0x3d8] sm:$0xff]  }
  0x22   : > { %3925 = vmatprep.subr.bf16.mxu1 %v4280_v30  ;;  %v641_v29 = vcombine.high %v639_v26, %v639_v26  ;;  %v4312_v30 = vld [vmem:[%s5377_s1 + $0x78] sm:$0xff]   ;;  %v4360_v19 = vld [vmem:[%s5377_s1 + $0x310] sm:$0xff]  }
  0x24   : > { %3904 = vmatpush3.bf16.msra.mxu0 %v4281_v31  ;;  %v4313_v31 = vld [vmem:[%s5377_s1 + $0xf8] sm:$0xff]  }
  0x25   : > { %3926 = vmatpush3.bf16.msra.mxu1 %v4282_v32  ;;  %3933 = vmatprep.subr.bf16.mxu0 %v4284_v35  ;;  %v4314_v32 = vld [vmem:[%s5377_s1 + $0x38] sm:$0xff]   ;;  %v4318_v35 = vld [vmem:[%s5377_s1 + $0x2c0] sm:$0xff]  }
  0x26   : > { %3955 = vmatprep.subr.bf16.mxu1 %v4285_v38  ;;  %v4321_v38 = vld [vmem:[%s5377_s1 + $0x248] sm:$0xff]  }
  0x27   : > { %577 = vmatmul.mubr.bf16.vlgmr.msra.gmra.mrb[0].mxu0 %v326_v59  ;;  %v3367_v59 = vld [vmem:[%s4651_s27 + $0x8] sm:$0x55] }
  0x28   : > { %617 = vmatmul.mubr.bf16.vlgmr.msra.gmra.mrb[0].mxu1 %v340_v60  ;;  %3934 = vmatpush3.bf16.msra.mxu0 %v4286_v58  ;;  %v4340_v58 = vld [vmem:[%s5377_s1 + $0x2a8] sm:$0xff]   ;;  %v4341_v60 = vld [vmem:[%s5377_s1 + $0x270] sm:$0xff]   ;;  %v986_v62 = vcombine.high %v3367_v59, %v3367_v59 }
  0x29   : > { %3956 = vmatpush3.bf16.msra.mxu1 %v4287_v61  ;;  %3935 = vmatprep.subr.bf16.mxu0 %v4288_v0  ;;  %v993_v61 = vrot.slane %v3367_v59, %v4666_v41  ;;  %v4343_v0 = vld [vmem:[%s5377_s1 + $0x230] sm:$0xff]  }
  0x2a   : > { %3957 = vmatprep.subr.bf16.mxu1 %v4289_v1  ;;  %870 = vmatprep.mubr.bf16.mxu0 %v640_v25  ;;  %v4366_v25 = vld [vmem:[%s5377_s1 + $0x360] sm:$0xff]  }
  0x2b   : > { %910 = vmatprep.mubr.bf16.mxu1 %v641_v29  ;;  %v1001_v1 = vcombine.high %v993_v61, %v993_v61  ;;  %v4370_v29 = vld [vmem:[%s5377_s1 + $0x368] sm:$0xff]  }
  0x2c   : > { %3936 = vmatpush3.bf16.msra.mxu0 %v4290_v2  ;;  %v1000_v2 = vrot.slane %v986_v62, %v4666_v41  ;;  %v4384_v62 = vld [vmem:[%s5377_s1 + $0x1c0] sm:$0xff]  }
  0x2d   : > { %3958 = vmatpush3.bf16.msra.mxu1 %v4291_v3  ;;  %3937 = vmatprep.subr.bf16.mxu0 %v4292_v4  ;;  %v4344_v3 = vld [vmem:[%s5377_s1 + $0x2b0] sm:$0xff]   ;;  %v4345_v4 = vld [vmem:[%s5377_s1 + $0x278] sm:$0xff]  }
  0x2e   : > { %3959 = vmatprep.subr.bf16.mxu1 %v4293_v5  ;;  %v1002_v5 = vcombine.high %v1000_v2, %v1000_v2 }
  0x30   : > { %3938 = vmatpush3.bf16.msra.mxu0 %v4294_v6  ;;  %v4346_v6 = vld [vmem:[%s5377_s1 + $0x2f8] sm:$0xff]  }
  0x31   : > { %3960 = vmatpush3.bf16.msra.mxu1 %v4295_v7  ;;  %3939 = vmatprep.subr.bf16.mxu0 %v4296_v8  ;;  %v4347_v7 = vld [vmem:[%s5377_s1 + $0x238] sm:$0xff]  }
  0x32   : > { %3961 = vmatprep.subr.bf16.mxu1 %v4297_v9  ;;  %v4348_v8 = vld [vmem:[%s5377_s1 + $0x2b8] sm:$0xff]   ;;  %v4350_v9 = vld [vmem:[%s5377_s1 + $0x340] sm:$0xff]  }
  0x34   : > { %3940 = vmatpush3.bf16.msra.mxu0 %v4298_v10  ;;  %v4351_v10 = vld [vmem:[%s5377_s1 + $0x3c0] sm:$0xff]  }
  0x35   : > { %3962 = vmatpush3.bf16.msra.mxu1 %v4299_v11  ;;  %3941 = vmatprep.subr.bf16.mxu0 %v4300_v12  ;;  %v4352_v11 = vld [vmem:[%s5377_s1 + $0x300] sm:$0xff]  }
  0x36   : > { %3963 = vmatprep.subr.bf16.mxu1 %v4301_v13  ;;  %v4353_v12 = vld [vmem:[%s5377_s1 + $0x380] sm:$0xff]   ;;  %v4354_v13 = vld [vmem:[%s5377_s1 + $0x348] sm:$0xff]  }
  0x38   : > { %3942 = vmatpush3.bf16.msra.mxu0 %v4302_v14  ;;  %v4355_v14 = vld [vmem:[%s5377_s1 + $0x3c8] sm:$0xff]  }
  0x39   : > { %3964 = vmatpush3.bf16.msra.mxu1 %v4303_v15  ;;  %3943 = vmatprep.subr.bf16.mxu0 %v4304_v16  ;;  %v4356_v15 = vld [vmem:[%s5377_s1 + $0x308] sm:$0xff]  }
  0x3a   : > { %3965 = vmatprep.subr.bf16.mxu1 %v4305_v17  ;;  %v4357_v16 = vld [vmem:[%s5377_s1 + $0x388] sm:$0xff]   ;;  %v4358_v17 = vld [vmem:[%s5377_s1 + $0x350] sm:$0xff]  }
  0x3c   : > { %3944 = vmatpush3.bf16.msra.mxu0 %v4306_v18  ;;  %v4359_v18 = vld [vmem:[%s5377_s1 + $0x3d0] sm:$0xff]  }
  0x3d   : > { %3966 = vmatpush3.bf16.msra.mxu1 %v4307_v20  ;;  %3945 = vmatprep.subr.bf16.mxu0 %v4308_v23  ;;  %v4361_v20 = vld [vmem:[%s5377_s1 + $0x390] sm:$0xff]   ;;  %v4364_v23 = vld [vmem:[%s5377_s1 + $0x318] sm:$0xff]  }
  0x3e   : > { %3967 = vmatprep.subr.bf16.mxu1 %v4309_v24  ;;  %v4365_v24 = vld [vmem:[%s5377_s1 + $0x398] sm:$0xff]  }
  0x40   : > { %3946 = vmatpush3.bf16.msra.mxu0 %v4310_v27  ;;  %v4368_v27 = vld [vmem:[%s5377_s1 + $0x320] sm:$0xff]  }
  0x41   : > { %3968 = vmatpush3.bf16.msra.mxu1 %v4311_v28  ;;  %3947 = vmatprep.subr.bf16.mxu0 %v4312_v30  ;;  %v4369_v28 = vld [vmem:[%s5377_s1 + $0x3a0] sm:$0xff]   ;;  %v4371_v30 = vld [vmem:[%s5377_s1 + $0x3e8] sm:$0xff]  }
  0x42   : > { %3969 = vmatprep.subr.bf16.mxu1 %v4313_v31  ;;  %v4372_v31 = vld [vmem:[%s5377_s1 + $0x328] sm:$0xff]  }
  0x44   : > { %3948 = vmatpush3.bf16.msra.mxu0 %v4314_v32  ;;  %v4373_v32 = vld [vmem:[%s5377_s1 + $0x3a8] sm:$0xff]  }
  0x45   : > { %3970 = vmatpush3.bf16.msra.mxu1 %v4315_v33  ;;  %3977 = vmatprep.subr.bf16.mxu0 %v4317_v34  ;;  %v3464_v33 = vld [vmem:[%s4651_s27 + $0x8] sm:$0xff]  ;;  %v4374_v34 = vld [vmem:[%s5377_s1 + $0x370] sm:$0xff]  }
  0x46   : > { %3999 = vmatprep.subr.bf16.mxu1 %v4318_v35  ;;  %v1354_v35 = vrot.slane %v3464_v33, %v4666_v41 }
  0x47   : > { %871 = vmatmul.mubr.bf16.vlgmr.msra.gmra.mrb[4].mxu0 %v632_v21  ;;  %v4362_v21 = vld [vmem:[%s5377_s1 + $0x358] sm:$0xff]  }
  0x48   : > { %911 = vmatmul.mubr.bf16.vlgmr.msra.gmra.mrb[4].mxu1 %v639_v26  ;;  %3978 = vmatpush3.bf16.msra.mxu0 %v4319_v36  ;;  %v4367_v26 = vld [vmem:[%s5377_s1 + $0x3e0] sm:$0xff]   ;;  %v1347_v36 = vcombine.high %v3464_v33, %v3464_v33 }
  0x49   : > { %4000 = vmatpush3.bf16.msra.mxu1 %v4320_v37  ;;  %3979 = vmatprep.subr.bf16.mxu0 %v4321_v38  ;;  %v4375_v37 = vld [vmem:[%s5377_s1 + $0x3f0] sm:$0xff]   ;;  %v4416_v33 = vld [vmem:[%s5377_s1 + $0xc0] sm:$0xff]  }
  0x4a   : > { %4001 = vmatprep.subr.bf16.mxu1 %v4322_v39  ;;  %1231 = vmatprep.mubr.bf16.mxu0 %v1001_v1  ;;  %v4376_v38 = vld [vmem:[%s5377_s1 + $0x330] sm:$0xff]  }
  0x4b   : > { %1271 = vmatprep.mubr.bf16.mxu1 %v1002_v5  ;;  %v4377_v39 = vld [vmem:[%s5377_s1 + $0x3b0] sm:$0xff]   ;;  %v4388_v5 = vld [vmem:[%s5377_s1 + $0x1c8] sm:$0xff]  }
  0x4c   : > { %3980 = vmatpush3.bf16.msra.mxu0 %v4323_v40  ;;  %v1362_v40 = vcombine.high %v1354_v35, %v1354_v35 }
  0x4d   : > { %4002 = vmatpush3.bf16.msra.mxu1 %v4324_v42  ;;  %3981 = vmatprep.subr.bf16.mxu0 %v4325_v43  ;;  %v1361_v42 = vrot.slane %v1347_v36, %v4666_v41  ;;  %v1367_v43 = vshll.u32 %v1354_v35, 16  ;;  %v4419_v36 = vld [vmem:[%s5377_s1 + $0x48] sm:$0xff]  }
  0x4e   : > { %4003 = vmatprep.subr.bf16.mxu1 %v4326_v44  ;;  %v4378_v44 = vld [vmem:[%s5377_s1 + $0x378] sm:$0xff]  }
  0x50   : > { %3982 = vmatpush3.bf16.msra.mxu0 %v4327_v45  ;;  %v4379_v45 = vld [vmem:[%s5377_s1 + $0x3f8] sm:$0xff]  }
  0x51   : > { %4004 = vmatpush3.bf16.msra.mxu1 %v4328_v46  ;;  %3983 = vmatprep.subr.bf16.mxu0 %v4329_v47  ;;  %v1372_v46 = vshrl.u32 %v1362_v40, 16  ;;  %v1374_v47 = vshll.u32 %v1362_v40, 16  ;;  %v4423_v40 = vld [vmem:[%s5377_s1 + $0x50] sm:$0xff]  }
  0x52   : > { %4005 = vmatprep.subr.bf16.mxu1 %v4330_v48  ;;  %v1363_v48 = vcombine.high %v1361_v42, %v1361_v42 }
  0x54   : > { %3984 = vmatpush3.bf16.msra.mxu0 %v4331_v49  ;;  %v1365_v49 = vshrl.u32 %v1354_v35, 16  ;;  %v4418_v35 = vld [vmem:[%s5377_s1 + $0x80] sm:$0xff]  }
  0x55   : > { %4006 = vmatpush3.bf16.msra.mxu1 %v4332_v50  ;;  %3985 = vmatprep.subr.bf16.mxu0 %v4333_v51  ;;  %v1381_v50 = vshll.u32 %v1361_v42, 16  ;;  %v4380_v51 = vld [vmem:[%s5377_s1 + $0x338] sm:$0xff]  }
  0x56   : > { %4007 = vmatprep.subr.bf16.mxu1 %v4334_v52  ;;  %v4381_v52 = vld [vmem:[%s5377_s1 + $0x3b8] sm:$0xff]  }
  0x58   : > { %3986 = vmatpush3.bf16.msra.mxu0 %v4335_v53  ;;  %v1376_v53 = vrot.slane %v1374_v47, 1  ;;  %v4429_v47 = vld [vmem:[%s5377_s1 + $0x18] sm:$0xff]  }
  0x59   : > { %4008 = vmatpush3.bf16.msra.mxu1 %v4336_v54  ;;  %3987 = vmatprep.subr.bf16.mxu0 %v4337_v55  ;;  %v1386_v54 = vshrl.u32 %v1363_v48, 16  ;;  %v1388_v55 = vshll.u32 %v1363_v48, 16  ;;  %v4430_v48 = vld [vmem:[%s5377_s1 + $0x98] sm:$0xff]  }
  0x5a   : > { %4009 = vmatprep.subr.bf16.mxu1 %v4338_v56  ;;  %v1369_v56 = vrot.slane %v1367_v43, 1  ;;  %v1377_v59 = vor.u32 %v1376_v53, %v1372_v46  ;;  %v4425_v43 = vld [vmem:[%s5377_s1 + $0x10] sm:$0xff]   ;;  %v4428_v46 = vld [vmem:[%s5377_s1 + $0xd8] sm:$0xff]   ;;  %v4435_v53 = vld [vmem:[%s5377_s1 + $0x68] sm:$0xff]  }
  0x5c   : > { %3988 = vmatpush3.bf16.msra.mxu0 %v4339_v57  ;;  %v1379_v57 = vshrl.u32 %v1361_v42, 16  ;;  %v4970_v1 = vor.u32 %v1369_v56, %v1365_v49  ;;  %v4424_v42 = vld [vmem:[%s5377_s1 + $0xd0] sm:$0xff]   ;;  %v4431_v49 = vld [vmem:[%s5377_s1 + $0x60] sm:$0xff]   ;;  %v4438_v56 = vld [vmem:[%s5377_s1 + $0xa8] sm:$0xff]  }
  0x5d   : > { %4010 = vmatpush3.bf16.msra.mxu1 %v4340_v58  ;;  %3989 = vmatprep.subr.bf16.mxu0 %v4341_v60  ;;  %v1383_v58 = vrot.slane %v1381_v50, 1  ;;  %v1390_v60 = vrot.slane %v1388_v55, 1  ;;  %v4432_v50 = vld [vmem:[%s5377_s1 + $0xe0] sm:$0xff]   ;;  %v4437_v55 = vld [vmem:[%s5377_s1 + $0x28] sm:$0xff]  }
  0x5e   : > { %4011 = vmatprep.subr.bf16.mxu1 %v4342_v63 }
  0x5f   : > { %v1391_v63 = vor.u32 %v1390_v60, %v1386_v54  ;;  %v4436_v54 = vld [vmem:[%s5377_s1 + $0xe8] sm:$0xff]  }
  0x60   : > { %3990 = vmatpush3.bf16.msra.mxu0 %v4343_v0  ;;  %v4385_v0 = vld [vmem:[%s5377_s1 + $0x100] sm:$0xff]  }
  0x61   : > { %4012 = vmatpush3.bf16.msra.mxu1 %v4344_v3  ;;  %3991 = vmatprep.subr.bf16.mxu0 %v4345_v4  ;;  %v4386_v3 = vld [vmem:[%s5377_s1 + $0x180] sm:$0xff]   ;;  %v4387_v4 = vld [vmem:[%s5377_s1 + $0x148] sm:$0xff]  }
  0x62   : > { %4013 = vmatprep.subr.bf16.mxu1 %v4346_v6  ;;  %v4389_v6 = vld [vmem:[%s5377_s1 + $0x108] sm:$0xff]  }
  0x64   : > { %3992 = vmatpush3.bf16.msra.mxu0 %v4347_v7  ;;  %v4390_v7 = vld [vmem:[%s5377_s1 + $0x188] sm:$0xff]  }
  0x65   : > { %4014 = vmatpush3.bf16.msra.mxu1 %v4348_v8  ;;  %4021 = vmatprep.subr.bf16.mxu0 %v4350_v9  ;;  %v4391_v8 = vld [vmem:[%s5377_s1 + $0x150] sm:$0xff]  }
  0x66   : > { %4043 = vmatprep.subr.bf16.mxu1 %v4351_v10  ;;  %v4392_v9 = vld [vmem:[%s5377_s1 + $0x1d0] sm:$0xff]  }
  0x67   : > { %1232 = vmatmul.mubr.bf16.vlgmr.msra.gmra.mrb[8].mxu0 %v993_v61  ;;  %v4383_v61 = vld [vmem:[%s5377_s1 + $0x140] sm:$0xff]   ;;  %v4393_v10 = vld [vmem:[%s5377_s1 + $0x110] sm:$0xff]  }
  0x68   : > { %1272 = vmatmul.mubr.bf16.vlgmr.msra.gmra.mrb[8].mxu1 %v1000_v2  ;;  %4022 = vmatpush3.bf16.msra.mxu0 %v4352_v11  ;;  %v4972_v2 = vor.u32 %v1383_v58, %v1379_v57  ;;  %v4394_v11 = vld [vmem:[%s5377_s1 + $0x190] sm:$0xff]   ;;  %v3562_v58 = vld [vmem:[%s4651_s27 + $0x8] sm:$0x55] }
  0x69   : > { %4044 = vmatpush3.bf16.msra.mxu1 %v4353_v12  ;;  %4023 = vmatprep.subr.bf16.mxu0 %v4354_v13  ;;  %v4395_v12 = vld [vmem:[%s5377_s1 + $0x158] sm:$0xff]   ;;  %v4439_v57 = vld [vmem:[%s5377_s1 + $0x70] sm:$0xff]   ;;  %v2139_v60 = vrot.slane %v3562_v58, %v4666_v41 }
  0x6a   : > { %4045 = vmatprep.subr.bf16.mxu1 %v4355_v14  ;;  %1620 = vmatprep.mubr.bf16.mxu0 %v1377_v59  ;;  %v4396_v13 = vld [vmem:[%s5377_s1 + $0x1d8] sm:$0xff]  }
  0x6b   : > { %1660 = vmatprep.mubr.bf16.mxu1 %v1391_v63  ;;  %v4397_v14 = vld [vmem:[%s5377_s1 + $0x118] sm:$0xff]  }
  0x6c   : > { %4024 = vmatpush3.bf16.msra.mxu0 %v4356_v15  ;;  %v4398_v15 = vld [vmem:[%s5377_s1 + $0x198] sm:$0xff]  }
  0x6d   : > { %4046 = vmatpush3.bf16.msra.mxu1 %v4357_v16  ;;  %4025 = vmatprep.subr.bf16.mxu0 %v4358_v17  ;;  %v4399_v16 = vld [vmem:[%s5377_s1 + $0x160] sm:$0xff]  }
  0x6e   : > { %4047 = vmatprep.subr.bf16.mxu1 %v4359_v18  ;;  %v4400_v17 = vld [vmem:[%s5377_s1 + $0x1e0] sm:$0xff]  }
  0x6f   : > { %v4401_v18 = vld [vmem:[%s5377_s1 + $0x120] sm:$0xff]  }
  0x70   : > { %4026 = vmatpush3.bf16.msra.mxu0 %v4360_v19  ;;  %v4402_v19 = vld [vmem:[%s5377_s1 + $0x1a0] sm:$0xff]  }
  0x71   : > { %4048 = vmatpush3.bf16.msra.mxu1 %v4361_v20  ;;  %4027 = vmatprep.subr.bf16.mxu0 %v4362_v21  ;;  %v4403_v20 = vld [vmem:[%s5377_s1 + $0x168] sm:$0xff]  }
  0x72   : > { %4049 = vmatprep.subr.bf16.mxu1 %v4363_v22  ;;  %v4404_v21 = vld [vmem:[%s5377_s1 + $0x1e8] sm:$0xff]  }
  0x73   : > { %v4405_v22 = vld [vmem:[%s5377_s1 + $0x128] sm:$0xff]  }
  0x74   : > { %4028 = vmatpush3.bf16.msra.mxu0 %v4364_v23  ;;  %v4406_v23 = vld [vmem:[%s5377_s1 + $0x1a8] sm:$0xff]  }
  0x75   : > { %4050 = vmatpush3.bf16.msra.mxu1 %v4365_v24  ;;  %4029 = vmatprep.subr.bf16.mxu0 %v4366_v25  ;;  %v4407_v24 = vld [vmem:[%s5377_s1 + $0x170] sm:$0xff]  }
  0x76   : > { %4051 = vmatprep.subr.bf16.mxu1 %v4367_v26  ;;  %v4408_v25 = vld [vmem:[%s5377_s1 + $0x1f0] sm:$0xff]  }
  0x77   : > { %v4409_v26 = vld [vmem:[%s5377_s1 + $0x130] sm:$0xff]  }
  0x78   : > { %4030 = vmatpush3.bf16.msra.mxu0 %v4368_v27  ;;  %v4410_v27 = vld [vmem:[%s5377_s1 + $0x1b0] sm:$0xff]  }
  0x79   : > { %4052 = vmatpush3.bf16.msra.mxu1 %v4369_v28  ;;  %4031 = vmatprep.subr.bf16.mxu0 %v4370_v29  ;;  %v4411_v28 = vld [vmem:[%s5377_s1 + $0x178] sm:$0xff]  }
  0x7a   : > { %4053 = vmatprep.subr.bf16.mxu1 %v4371_v30  ;;  %v4412_v29 = vld [vmem:[%s5377_s1 + $0x1f8] sm:$0xff]  }
  0x7b   : > { %v4413_v30 = vld [vmem:[%s5377_s1 + $0x138] sm:$0xff]  }
  0x7c   : > { %4032 = vmatpush3.bf16.msra.mxu0 %v4372_v31  ;;  %v4414_v31 = vld [vmem:[%s5377_s1 + $0x1b8] sm:$0xff]  }
  0x7d   : > { %4054 = vmatpush3.bf16.msra.mxu1 %v4373_v32  ;;  %4033 = vmatprep.subr.bf16.mxu0 %v4374_v34  ;;  %v4415_v32 = vld [vmem:[%s5377_s1 + $0x40] sm:$0xff]  }
  0x7e   : > { %4055 = vmatprep.subr.bf16.mxu1 %v4375_v37  ;;  %v4417_v34 = vld [vmem:[%s5377_s1] sm:$0xff]   ;;  %v4420_v37 = vld [vmem:[%s5377_s1 + $0xc8] sm:$0xff]  }
  0x80   : > { %4034 = vmatpush3.bf16.msra.mxu0 %v4376_v38  ;;  %v4421_v38 = vld [vmem:[%s5377_s1 + $0x8] sm:$0xff]  }
  0x81   : > { %4056 = vmatpush3.bf16.msra.mxu1 %v4377_v39  ;;  %4035 = vmatprep.subr.bf16.mxu0 %v4378_v44  ;;  %v4422_v39 = vld [vmem:[%s5377_s1 + $0x88] sm:$0xff]   ;;  %v4426_v44 = vld [vmem:[%s5377_s1 + $0x90] sm:$0xff]  }
  0x82   : > { %4057 = vmatprep.subr.bf16.mxu1 %v4379_v45  ;;  %v4427_v45 = vld [vmem:[%s5377_s1 + $0x58] sm:$0xff]  }
  0x84   : > { %4036 = vmatpush3.bf16.msra.mxu0 %v4380_v51  ;;  %v4433_v51 = vld [vmem:[%s5377_s1 + $0x20] sm:$0xff]  }
  0x85   : > { %4058 = vmatpush3.bf16.msra.mxu1 %v4381_v52  ;;  %4065 = vmatprep.subr.bf16.mxu0 %v4383_v61  ;;  %v4434_v52 = vld [vmem:[%s5377_s1 + $0xa0] sm:$0xff]   ;;  %v2132_v61 = vcombine.high %v3562_v58, %v3562_v58  ;;  %v4493_v58 = vld [vmem:[%s5377_s1 + $0x358] sm:$0xff]  }
  0x86   : > { %4087 = vmatprep.subr.bf16.mxu1 %v4384_v62  ;;  %v4441_v62 = vld [vmem:[%s5377_s1 + $0x30] sm:$0xff]  }
  0x87   : > { %1621 = vmatmul.mubr.bf16.vlgmr.msra.gmra.mrb[12].mxu0 %v4970_v1 }
  0x88   : > { %1661 = vmatmul.mubr.bf16.vlgmr.msra.gmra.mrb[12].mxu1 %v4972_v2  ;;  %4066 = vmatpush3.bf16.msra.mxu0 %v4385_v0  ;;  %v2147_v0 = vcombine.high %v2139_v60, %v2139_v60 }
  0x89   : > { %4088 = vmatpush3.bf16.msra.mxu1 %v4386_v3  ;;  %4067 = vmatprep.subr.bf16.mxu0 %v4387_v4  ;;  %v4444_v3 = vld [vmem:[%s5377_s1 + $0xf8] sm:$0xff]  }
  0x8a   : > { %4089 = vmatprep.subr.bf16.mxu1 %v4388_v5  ;;  %2083 = vmatprep.mubr.bf16.mxu0 %v1377_v59  ;;  %v4440_v59 = vld [vmem:[%s5377_s1 + $0xf0] sm:$0xff]   ;;  %v4445_v5 = vld [vmem:[%s5377_s1 + $0x38] sm:$0xff]  }
  0x8b   : > { %2123 = vmatprep.mubr.bf16.mxu1 %v1391_v63  ;;  %v4442_v63 = vld [vmem:[%s5377_s1 + $0xb0] sm:$0xff]  }
  0x8c   : > { %4068 = vmatpush3.bf16.msra.mxu0 %v4389_v6  ;;  %v4446_v6 = vld [vmem:[%s5377_s1 + $0xb8] sm:$0xff]  }
  0x8d   : > { %4090 = vmatpush3.bf16.msra.mxu1 %v4390_v7  ;;  %4069 = vmatprep.subr.bf16.mxu0 %v4391_v8  ;;  %v4448_v7 = vld [vmem:[%s5377_s1 + $0x240] sm:$0xff]  }
  0x8e   : > { %4091 = vmatprep.subr.bf16.mxu1 %v4392_v9  ;;  %v4449_v8 = vld [vmem:[%s5377_s1 + $0x2c0] sm:$0xff]  }
  0x8f   : > { %v4450_v9 = vld [vmem:[%s5377_s1 + $0x200] sm:$0xff]  }
  0x90   : > { %4070 = vmatpush3.bf16.msra.mxu0 %v4393_v10  ;;  %v4451_v10 = vld [vmem:[%s5377_s1 + $0x280] sm:$0xff]  }
  0x91   : > { %4092 = vmatpush3.bf16.msra.mxu1 %v4394_v11  ;;  %4071 = vmatprep.subr.bf16.mxu0 %v4395_v12  ;;  %v4452_v11 = vld [vmem:[%s5377_s1 + $0x248] sm:$0xff]  }
  0x92   : > { %4093 = vmatprep.subr.bf16.mxu1 %v4396_v13  ;;  %v4453_v12 = vld [vmem:[%s5377_s1 + $0x2c8] sm:$0xff]  }
  0x93   : > { %v4454_v13 = vld [vmem:[%s5377_s1 + $0x208] sm:$0xff]  }
  0x94   : > { %4072 = vmatpush3.bf16.msra.mxu0 %v4397_v14  ;;  %v4455_v14 = vld [vmem:[%s5377_s1 + $0x288] sm:$0xff]  }
  0x95   : > { %4094 = vmatpush3.bf16.msra.mxu1 %v4398_v15  ;;  %4073 = vmatprep.subr.bf16.mxu0 %v4399_v16  ;;  %v4456_v15 = vld [vmem:[%s5377_s1 + $0x250] sm:$0xff]  }
  0x96   : > { %4095 = vmatprep.subr.bf16.mxu1 %v4400_v17  ;;  %v4457_v16 = vld [vmem:[%s5377_s1 + $0x2d0] sm:$0xff]  }
  0x97   : > { %v4458_v17 = vld [vmem:[%s5377_s1 + $0x210] sm:$0xff]  }
  0x98   : > { %4074 = vmatpush3.bf16.msra.mxu0 %v4401_v18  ;;  %v4459_v18 = vld [vmem:[%s5377_s1 + $0x290] sm:$0xff]  }
  0x99   : > { %4096 = vmatpush3.bf16.msra.mxu1 %v4402_v19  ;;  %4075 = vmatprep.subr.bf16.mxu0 %v4403_v20  ;;  %v4460_v19 = vld [vmem:[%s5377_s1 + $0x258] sm:$0xff]  }
  0x9a   : > { %4097 = vmatprep.subr.bf16.mxu1 %v4404_v21  ;;  %v4461_v20 = vld [vmem:[%s5377_s1 + $0x2d8] sm:$0xff]  }
  0x9b   : > { %v4462_v21 = vld [vmem:[%s5377_s1 + $0x218] sm:$0xff]  }
  0x9c   : > { %4076 = vmatpush3.bf16.msra.mxu0 %v4405_v22  ;;  %v4463_v22 = vld [vmem:[%s5377_s1 + $0x298] sm:$0xff]  }
  0x9d   : > { %4098 = vmatpush3.bf16.msra.mxu1 %v4406_v23  ;;  %4077 = vmatprep.subr.bf16.mxu0 %v4407_v24  ;;  %v4464_v23 = vld [vmem:[%s5377_s1 + $0x260] sm:$0xff]  }
  0x9e   : > { %4099 = vmatprep.subr.bf16.mxu1 %v4408_v25  ;;  %v4465_v24 = vld [vmem:[%s5377_s1 + $0x2e0] sm:$0xff]  }
  0x9f   : > { %v4466_v25 = vld [vmem:[%s5377_s1 + $0x220] sm:$0xff]  }
  0xa0   : > { %4078 = vmatpush3.bf16.msra.mxu0 %v4409_v26  ;;  %v4467_v26 = vld [vmem:[%s5377_s1 + $0x2a0] sm:$0xff]  }
  0xa1   : > { %4100 = vmatpush3.bf16.msra.mxu1 %v4410_v27  ;;  %4079 = vmatprep.subr.bf16.mxu0 %v4411_v28  ;;  %v4468_v27 = vld [vmem:[%s5377_s1 + $0x268] sm:$0xff]  }
  0xa2   : > { %4101 = vmatprep.subr.bf16.mxu1 %v4412_v29  ;;  %v4469_v28 = vld [vmem:[%s5377_s1 + $0x2e8] sm:$0xff]  }
  0xa3   : > { %v4470_v29 = vld [vmem:[%s5377_s1 + $0x228] sm:$0xff]  }
  0xa4   : > { %4080 = vmatpush3.bf16.msra.mxu0 %v4413_v30  ;;  %v4471_v30 = vld [vmem:[%s5377_s1 + $0x2a8] sm:$0xff]  }
  0xa5   : > { %4102 = vmatpush3.bf16.msra.mxu1 %v4414_v31  ;;  %4109 = vmatprep.subr.bf16.mxu0 %v4415_v32  ;;  %v4472_v31 = vld [vmem:[%s5377_s1 + $0x270] sm:$0xff]  }
  0xa6   : > { %4131 = vmatprep.subr.bf16.mxu1 %v4416_v33  ;;  %v4473_v32 = vld [vmem:[%s5377_s1 + $0x2f0] sm:$0xff]  }
  0xa7   : > { %2084 = vmatmul.mubr.bf16.vlgmr.msra.gmra.mrb[16].mxu0 %v4970_v1  ;;  %v2146_v1 = vrot.slane %v2132_v61, %v4666_v41  ;;  %v3692_v33 = vld [vmem:[%s4651_s27 + $0x10] sm:$0x55]  ;;  %v4496_v61 = vld [vmem:[%s5377_s1 + $0x398] sm:$0xff]  }
  0xa8   : > { %2124 = vmatmul.mubr.bf16.vlgmr.msra.gmra.mrb[16].mxu1 %v4972_v2  ;;  %4110 = vmatpush3.bf16.msra.mxu0 %v4417_v34  ;;  %v4443_v2 = vld [vmem:[%s5377_s1 + $0x78] sm:$0xff]   ;;  %v4474_v34 = vld [vmem:[%s5377_s1 + $0x230] sm:$0xff]  }
  0xa9   : > { %4132 = vmatpush3.bf16.msra.mxu1 %v4418_v35  ;;  %4111 = vmatprep.subr.bf16.mxu0 %v4419_v36  ;;  %v2148_v4 = vcombine.high %v2146_v1, %v2146_v1  ;;  %v2499_v35 = vrot.slane %v3692_v33, %v4666_v41  ;;  %v2492_v36 = vcombine.high %v3692_v33, %v3692_v33 }
  0xaa   : > { %4133 = vmatprep.subr.bf16.mxu1 %v4420_v37  ;;  %2377 = vmatprep.mubr.bf16.mxu0 %v2147_v0  ;;  %v4475_v37 = vld [vmem:[%s5377_s1 + $0x2b0] sm:$0xff]   ;;  %v4499_v0 = vld [vmem:[%s5377_s1 + $0x320] sm:$0xff]  }
  0xab   : > { %2417 = vmatprep.mubr.bf16.mxu1 %v2148_v4  ;;  %v4503_v4 = vld [vmem:[%s5377_s1 + $0x328] sm:$0xff]  }
  0xac   : > { %4112 = vmatpush3.bf16.msra.mxu0 %v4421_v38  ;;  %v4476_v38 = vld [vmem:[%s5377_s1 + $0x278] sm:$0xff]  }
  0xad   : > { %4134 = vmatpush3.bf16.msra.mxu1 %v4422_v39  ;;  %4113 = vmatprep.subr.bf16.mxu0 %v4423_v40  ;;  %v2507_v39 = vcombine.high %v2499_v35, %v2499_v35  ;;  %v2506_v40 = vrot.slane %v2492_v36, %v4666_v41  ;;  %v4512_v36 = vld [vmem:[%s5377_s1 + $0x3b8] sm:$0xff]  }
  0xae   : > { %4135 = vmatprep.subr.bf16.mxu1 %v4424_v42  ;;  %v4477_v42 = vld [vmem:[%s5377_s1 + $0x2f8] sm:$0xff]  }
  0xb0   : > { %4114 = vmatpush3.bf16.msra.mxu0 %v4425_v43  ;;  %v4478_v43 = vld [vmem:[%s5377_s1 + $0x238] sm:$0xff]  }
  0xb1   : > { %4136 = vmatpush3.bf16.msra.mxu1 %v4426_v44  ;;  %4115 = vmatprep.subr.bf16.mxu0 %v4427_v45  ;;  %v2508_v44 = vcombine.high %v2506_v40, %v2506_v40  ;;  %v4479_v45 = vld [vmem:[%s5377_s1 + $0x2b8] sm:$0xff]  }
  0xb2   : > { %4137 = vmatprep.subr.bf16.mxu1 %v4428_v46  ;;  %v4481_v46 = vld [vmem:[%s5377_s1 + $0x340] sm:$0xff]  }
  0xb4   : > { %4116 = vmatpush3.bf16.msra.mxu0 %v4429_v47  ;;  %v4482_v47 = vld [vmem:[%s5377_s1 + $0x3c0] sm:$0xff]  }
  0xb5   : > { %4138 = vmatpush3.bf16.msra.mxu1 %v4430_v48  ;;  %4117 = vmatprep.subr.bf16.mxu0 %v4431_v49  ;;  %v4483_v48 = vld [vmem:[%s5377_s1 + $0x300] sm:$0xff]  }
  0xb6   : > { %4139 = vmatprep.subr.bf16.mxu1 %v4432_v50  ;;  %v4484_v49 = vld [vmem:[%s5377_s1 + $0x380] sm:$0xff]   ;;  %v4485_v50 = vld [vmem:[%s5377_s1 + $0x348] sm:$0xff]  }
  0xb8   : > { %4118 = vmatpush3.bf16.msra.mxu0 %v4433_v51  ;;  %v4486_v51 = vld [vmem:[%s5377_s1 + $0x3c8] sm:$0xff]  }
  0xb9   : > { %4140 = vmatpush3.bf16.msra.mxu1 %v4434_v52  ;;  %4119 = vmatprep.subr.bf16.mxu0 %v4435_v53  ;;  %v4487_v52 = vld [vmem:[%s5377_s1 + $0x308] sm:$0xff]  }
  0xba   : > { %4141 = vmatprep.subr.bf16.mxu1 %v4436_v54  ;;  %v4488_v53 = vld [vmem:[%s5377_s1 + $0x388] sm:$0xff]   ;;  %v4489_v54 = vld [vmem:[%s5377_s1 + $0x350] sm:$0xff]  }
  0xbc   : > { %4120 = vmatpush3.bf16.msra.mxu0 %v4437_v55  ;;  %v4490_v55 = vld [vmem:[%s5377_s1 + $0x3d0] sm:$0xff]  }
  0xbd   : > { %4142 = vmatpush3.bf16.msra.mxu1 %v4438_v56  ;;  %4121 = vmatprep.subr.bf16.mxu0 %v4439_v57  ;;  %v4491_v56 = vld [vmem:[%s5377_s1 + $0x310] sm:$0xff]  }
  0xbe   : > { %4143 = vmatprep.subr.bf16.mxu1 %v4440_v59  ;;  %v4492_v57 = vld [vmem:[%s5377_s1 + $0x390] sm:$0xff]   ;;  %v4494_v59 = vld [vmem:[%s5377_s1 + $0x3d8] sm:$0xff]  }
  0xc0   : > { %4122 = vmatpush3.bf16.msra.mxu0 %v4441_v62  ;;  %v4497_v62 = vld [vmem:[%s5377_s1 + $0x360] sm:$0xff]  }
  0xc1   : > { %4144 = vmatpush3.bf16.msra.mxu1 %v4442_v63  ;;  %4123 = vmatprep.subr.bf16.mxu0 %v4443_v2  ;;  %v4498_v63 = vld [vmem:[%s5377_s1 + $0x3e0] sm:$0xff]   ;;  %v4501_v2 = vld [vmem:[%s5377_s1 + $0x368] sm:$0xff]  }
  0xc2   : > { %4145 = vmatprep.subr.bf16.mxu1 %v4444_v3  ;;  %v4502_v3 = vld [vmem:[%s5377_s1 + $0x3e8] sm:$0xff]  }
  0xc4   : > { %4124 = vmatpush3.bf16.msra.mxu0 %v4445_v5  ;;  %v4504_v5 = vld [vmem:[%s5377_s1 + $0x3a8] sm:$0xff]  }
  0xc5   : > { %4146 = vmatpush3.bf16.msra.mxu1 %v4446_v6  ;;  %4153 = vmatprep.subr.bf16.mxu0 %v4448_v7  ;;  %v4505_v6 = vld [vmem:[%s5377_s1 + $0x370] sm:$0xff]  }
  0xc6   : > { %4175 = vmatprep.subr.bf16.mxu1 %v4449_v8  ;;  %v4506_v7 = vld [vmem:[%s5377_s1 + $0x3f0] sm:$0xff]  }
  0xc7   : > { %2378 = vmatmul.mubr.bf16.vlgmr.msra.gmra.mrb[20].mxu0 %v2139_v60  ;;  %v4495_v60 = vld [vmem:[%s5377_s1 + $0x318] sm:$0xff]   ;;  %v3789_v8 = vld [vmem:[%s4651_s27 + $0x10] sm:$0xff] }
  0xc8   : > { %2418 = vmatmul.mubr.bf16.vlgmr.msra.gmra.mrb[20].mxu1 %v2146_v1  ;;  %4154 = vmatpush3.bf16.msra.mxu0 %v4450_v9  ;;  %v4500_v1 = vld [vmem:[%s5377_s1 + $0x3a0] sm:$0xff]  }
  0xc9   : > { %4176 = vmatpush3.bf16.msra.mxu1 %v4451_v10  ;;  %4155 = vmatprep.subr.bf16.mxu0 %v4452_v11  ;;  %v2859_v11 = vrot.slane %v3789_v8, %v4666_v41 }
  0xca   : > { %4177 = vmatprep.subr.bf16.mxu1 %v4453_v12  ;;  %2737 = vmatprep.mubr.bf16.mxu0 %v2507_v39  ;;  %v2852_v12 = vcombine.high %v3789_v8, %v3789_v8 }
  0xcb   : > { %2777 = vmatprep.mubr.bf16.mxu1 %v2508_v44 }
  0xcc   : > { %4156 = vmatpush3.bf16.msra.mxu0 %v4454_v13 }
  0xcd   : > { %4178 = vmatpush3.bf16.msra.mxu1 %v4455_v14  ;;  %4157 = vmatprep.subr.bf16.mxu0 %v4456_v15 }
  0xce   : > { %4179 = vmatprep.subr.bf16.mxu1 %v4457_v16 }
  0xd0   : > { %4158 = vmatpush3.bf16.msra.mxu0 %v4458_v17 }
  0xd1   : > { %4180 = vmatpush3.bf16.msra.mxu1 %v4459_v18  ;;  %4159 = vmatprep.subr.bf16.mxu0 %v4460_v19  ;;  %v4507_v19 = vld [vmem:[%s5377_s1 + $0x330] sm:$0xff]  }
  0xd2   : > { %4181 = vmatprep.subr.bf16.mxu1 %v4461_v20  ;;  %v4508_v20 = vld [vmem:[%s5377_s1 + $0x3b0] sm:$0xff]  }
  0xd4   : > { %4160 = vmatpush3.bf16.msra.mxu0 %v4462_v21  ;;  %v2867_v21 = vcombine.high %v2859_v11, %v2859_v11 }
  0xd5   : > { %4182 = vmatpush3.bf16.msra.mxu1 %v4463_v22  ;;  %4161 = vmatprep.subr.bf16.mxu0 %v4464_v23 }
  0xd6   : > { %4183 = vmatprep.subr.bf16.mxu1 %v4465_v24  ;;  %v4509_v24 = vld [vmem:[%s5377_s1 + $0x378] sm:$0xff]  }
  0xd8   : > { %4162 = vmatpush3.bf16.msra.mxu0 %v4466_v25  ;;  %v4510_v25 = vld [vmem:[%s5377_s1 + $0x3f8] sm:$0xff]  }
  0xd9   : > { %4184 = vmatpush3.bf16.msra.mxu1 %v4467_v26  ;;  %4163 = vmatprep.subr.bf16.mxu0 %v4468_v27  ;;  %v2866_v26 = vrot.slane %v2852_v12, %v4666_v41  ;;  %v2872_v27 = vshll.u32 %v2859_v11, 16 }
  0xda   : > { %4185 = vmatprep.subr.bf16.mxu1 %v4469_v28 }
  0xdb   : > { %v2874_v33 = vrot.slane %v2872_v27, 1  ;;  %v2884_v41 = vshrl.u32 %v2866_v26, 16 }
  0xdc   : > { %4164 = vmatpush3.bf16.msra.mxu0 %v4470_v29  ;;  %v2877_v29 = vshrl.u32 %v2867_v21, 16 }
  0xdd   : > { %4186 = vmatpush3.bf16.msra.mxu1 %v4471_v30  ;;  %4165 = vmatprep.subr.bf16.mxu0 %v4472_v31  ;;  %v2879_v30 = vshll.u32 %v2867_v21, 16  ;;  %v2868_v31 = vcombine.high %v2866_v26, %v2866_v26 }
  0xde   : > { %4187 = vmatprep.subr.bf16.mxu1 %v4473_v32  ;;  %v2870_v32 = vshrl.u32 %v2859_v11, 16 }
  0xdf   : > { %v2893_v39 = vshll.u32 %v2868_v31, 16 }
  0xe0   : > { %4166 = vmatpush3.bf16.msra.mxu0 %v4474_v34  ;;  %v2886_v34 = vshll.u32 %v2866_v26, 16  ;;  %v2875_v44 = vor.u32 %v2874_v33, %v2870_v32 }
  0xe1   : > { %4188 = vmatpush3.bf16.msra.mxu1 %v4475_v37  ;;  %4167 = vmatprep.subr.bf16.mxu0 %v4476_v38  ;;  %v2881_v37 = vrot.slane %v2879_v30, 1  ;;  %v2891_v38 = vshrl.u32 %v2868_v31, 16 }
  0xe2   : > { %4189 = vmatprep.subr.bf16.mxu1 %v4477_v42 }
  0xe3   : > { %v2882_v42 = vor.u32 %v2881_v37, %v2877_v29 }
  0xe4   : > { %4168 = vmatpush3.bf16.msra.mxu0 %v4478_v43  ;;  %v2895_v43 = vrot.slane %v2893_v39, 1 }
  0xe5   : > { %4190 = vmatpush3.bf16.msra.mxu1 %v4479_v45  ;;  %4197 = vmatprep.subr.bf16.mxu0 %v4481_v46 }
  0xe6   : > { %4219 = vmatprep.subr.bf16.mxu1 %v4482_v47  ;;  %v2896_v46 = vor.u32 %v2895_v43, %v2891_v38 }
  0xe7   : > { %2738 = vmatmul.mubr.bf16.vlgmr.msra.gmra.mrb[24].mxu0 %v2499_v35  ;;  %v4511_v35 = vld [vmem:[%s5377_s1 + $0x338] sm:$0xff]  }
  0xe8   : > { %2778 = vmatmul.mubr.bf16.vlgmr.msra.gmra.mrb[24].mxu1 %v2506_v40  ;;  %4198 = vmatpush3.bf16.msra.mxu0 %v4483_v48  ;;  %v2888_v40 = vrot.slane %v2886_v34, 1 }
  0xe9   : > { %4220 = vmatpush3.bf16.msra.mxu1 %v4484_v49  ;;  %4199 = vmatprep.subr.bf16.mxu0 %v4485_v50 }
  0xea   : > { %4221 = vmatprep.subr.bf16.mxu1 %v4486_v51  ;;  %v2889_v45 = vor.u32 %v2888_v40, %v2884_v41  ;;  %3125 = vmatprep.mubr.bf16.mxu0 %v2882_v42 }
  0xeb   : > { %3165 = vmatprep.mubr.bf16.mxu1 %v2896_v46 }
  0xec   : > { %4200 = vmatpush3.bf16.msra.mxu0 %v4487_v52 }
  0xed   : > { %4222 = vmatpush3.bf16.msra.mxu1 %v4488_v53  ;;  %4201 = vmatprep.subr.bf16.mxu0 %v4489_v54 }
  0xee   : > { %4223 = vmatprep.subr.bf16.mxu1 %v4490_v55 }
  0xf0   : > { %4202 = vmatpush3.bf16.msra.mxu0 %v4491_v56 }
  0xf1   : > { %4224 = vmatpush3.bf16.msra.mxu1 %v4492_v57  ;;  %4203 = vmatprep.subr.bf16.mxu0 %v4493_v58 }
  0xf2   : > { %4225 = vmatprep.subr.bf16.mxu1 %v4494_v59 }
  0xf4   : > { %4204 = vmatpush3.bf16.msra.mxu0 %v4495_v60 }
  0xf5   : > { %4226 = vmatpush3.bf16.msra.mxu1 %v4496_v61  ;;  %4205 = vmatprep.subr.bf16.mxu0 %v4497_v62 }
  0xf6   : > { %4227 = vmatprep.subr.bf16.mxu1 %v4498_v63 }
  0xf8   : > { %4206 = vmatpush3.bf16.msra.mxu0 %v4499_v0 }
  0xf9   : > { %4228 = vmatpush3.bf16.msra.mxu1 %v4500_v1  ;;  %4207 = vmatprep.subr.bf16.mxu0 %v4501_v2 }
  0xfa   : > { %4229 = vmatprep.subr.bf16.mxu1 %v4502_v3  ;;  %v3905_v9 = vpop.f32.mrb[0].mxu0 }
  0xfb   : > { %v3927_v10 = vpop.f32.mrb[0].mxu1  ;;  %v3906_v13 = vpop.f32.mrb[1].mxu0 }
  0xfc   : > { %v3928_v14 = vpop.f32.mrb[1].mxu1  ;;  %v3907_v15 = vadd.f32 %v3906_v13, %v3905_v9  ;;  %v3908_v17 = vpop.f32.mrb[2].mxu0  ;;  %4208 = vmatpush3.bf16.msra.mxu0 %v4503_v4 }
  0xfd   : > { %v3929_v16 = vadd.f32 %v3928_v14, %v3927_v10  ;;  %v3930_v18 = vpop.f32.mrb[2].mxu1  ;;  %4230 = vmatpush3.bf16.msra.mxu1 %v4504_v5  ;;  %v3909_v22 = vpop.f32.mrb[3].mxu0  ;;  %4209 = vmatprep.subr.bf16.mxu0 %v4505_v6 }
  0xfe   : > { %v3931_v23 = vpop.f32.mrb[3].mxu1  ;;  %4231 = vmatprep.subr.bf16.mxu1 %v4506_v7  ;;  %v3561_v18 = vld [vmem:[%s5378_s2] ss:$0 sm:$0xff] }
  0xff   : > { %v619_v28 = vadd.f32 %v3929_v16, %v3907_v15 }
 0x100   : > { %4210 = vmatpush3.bf16.msra.mxu0 %v4507_v19 }
 0x101   : > { %4232 = vmatpush3.bf16.msra.mxu1 %v4508_v20  ;;  %4211 = vmatprep.subr.bf16.mxu0 %v4509_v24 }
 0x102   : > { %4233 = vmatprep.subr.bf16.mxu1 %v4510_v25 }
 0x104   : > { %4212 = vmatpush3.bf16.msra.mxu0 %v4511_v35 }
 0x105   : > { %4234 = vmatpush3.bf16.msra.mxu1 %v4512_v36 }
 0x107   : > { %3126 = vmatmul.mubr.bf16.vlgmr.msra.gmra.mrb[28].mxu0 %v2875_v44 }
 0x108   : > { %3166 = vmatmul.mubr.bf16.vlgmr.msra.gmra.mrb[28].mxu1 %v2889_v45 }
 0x11a   : > { %v3949_v47 = vpop.f32.mrb[4].mxu0 }
 0x11b   : > { %v3971_v48 = vpop.f32.mrb[4].mxu1  ;;  %v3950_v49 = vpop.f32.mrb[5].mxu0 }
 0x11c   : > { %v3972_v50 = vpop.f32.mrb[5].mxu1  ;;  %v3951_v51 = vadd.f32 %v3950_v49, %v3949_v47  ;;  %v3952_v53 = vpop.f32.mrb[6].mxu0 }
 0x11d   : > { %v3973_v52 = vadd.f32 %v3972_v50, %v3971_v48  ;;  %v3974_v54 = vpop.f32.mrb[6].mxu1  ;;  %v3953_v55 = vpop.f32.mrb[7].mxu0 }
 0x11e   : > { %v3975_v56 = vpop.f32.mrb[7].mxu1  ;;  %v873_v57 = vadd.f32 %v3951_v51, %v619_v28 }
 0x120   : > { %v913_v58 = vadd.f32 %v3973_v52, %v873_v57 }
 0x13a   : > { %v3993_v59 = vpop.f32.mrb[8].mxu0 }
 0x13b   : > { %v4015_v60 = vpop.f32.mrb[8].mxu1  ;;  %v3994_v61 = vpop.f32.mrb[9].mxu0 }
 0x13c   : > { %v4016_v62 = vpop.f32.mrb[9].mxu1  ;;  %v3995_v63 = vadd.f32 %v3994_v61, %v3993_v59  ;;  %v3996_v1 = vpop.f32.mrb[10].mxu0 }
 0x13d   : > { %v4017_v0 = vadd.f32 %v4016_v62, %v4015_v60  ;;  %v4018_v2 = vpop.f32.mrb[10].mxu1  ;;  %v3997_v3 = vpop.f32.mrb[11].mxu0 }
 0x13e   : > { %v4019_v4 = vpop.f32.mrb[11].mxu1 }
 0x13f   : > { %v1274_v5 = vadd.f32 %v4017_v0, %v3995_v63 }
 0x141   : > { %v1279_v6 = vadd.f32 %v1274_v5, %v913_v58 }
 0x15a   : > { %v4037_v7 = vpop.f32.mrb[12].mxu0 }
 0x15b   : > { %v4059_v8 = vpop.f32.mrb[12].mxu1  ;;  %v4038_v9 = vpop.f32.mrb[13].mxu0 }
 0x15c   : > { %v4060_v10 = vpop.f32.mrb[13].mxu1  ;;  %v4039_v11 = vadd.f32 %v4038_v9, %v4037_v7  ;;  %v4040_v13 = vpop.f32.mrb[14].mxu0 }
 0x15d   : > { %v4061_v12 = vadd.f32 %v4060_v10, %v4059_v8  ;;  %v4062_v14 = vpop.f32.mrb[14].mxu1  ;;  %v4041_v15 = vpop.f32.mrb[15].mxu0 }
 0x15e   : > { %v4063_v16 = vpop.f32.mrb[15].mxu1 }
 0x15f   : > { %v1663_v17 = vadd.f32 %v4061_v12, %v4039_v11 }
 0x161   : > { %v1668_v19 = vadd.f32 %v1663_v17, %v1279_v6 }
 0x163   : > { %v1675_v20 = vadd.f32 %v3561_v18, %v1668_v19 }
 0x165   : > { %v1676_v21 = vmax.f32 %v1675_v20, 0.0 }
 0x167   : > { %v1677_v22 = vpack.c.bf16 %v1676_v21, %v1676_v21 }
 0x169   : > { %1678 = vst [vmem:[%s5369_s28] sm:$0x1] %v1677_v22 }
 0x17a   : > { %v4081_v23 = vpop.f32.mrb[16].mxu0 }
 0x17b   : > { %v4103_v24 = vpop.f32.mrb[16].mxu1  ;;  %v4082_v25 = vpop.f32.mrb[17].mxu0 }
 0x17c   : > { %v4104_v26 = vpop.f32.mrb[17].mxu1  ;;  %v4083_v27 = vadd.f32 %v4082_v25, %v4081_v23  ;;  %v4084_v29 = vpop.f32.mrb[18].mxu0 }
 0x17d   : > { %v4105_v28 = vadd.f32 %v4104_v26, %v4103_v24  ;;  %v4106_v30 = vpop.f32.mrb[18].mxu1  ;;  %v4085_v31 = vpop.f32.mrb[19].mxu0 }
 0x17e   : > { %v4107_v32 = vpop.f32.mrb[19].mxu1 }
 0x17f   : > { %v2126_v33 = vadd.f32 %v4105_v28, %v4083_v27 }
 0x19a   : > { %v4125_v34 = vpop.f32.mrb[20].mxu0 }
 0x19b   : > { %v4147_v35 = vpop.f32.mrb[20].mxu1  ;;  %v4126_v36 = vpop.f32.mrb[21].mxu0 }
 0x19c   : > { %v4148_v37 = vpop.f32.mrb[21].mxu1  ;;  %v4127_v41 = vadd.f32 %v4126_v36, %v4125_v34  ;;  %v4128_v39 = vpop.f32.mrb[22].mxu0 }
 0x19d   : > { %v4149_v38 = vadd.f32 %v4148_v37, %v4147_v35  ;;  %v4150_v40 = vpop.f32.mrb[22].mxu1  ;;  %v4129_v42 = vpop.f32.mrb[23].mxu0 }
 0x19e   : > { %v4151_v43 = vpop.f32.mrb[23].mxu1  ;;  %v2380_v44 = vadd.f32 %v4127_v41, %v2126_v33 }
 0x1a0   : > { %v2420_v45 = vadd.f32 %v4149_v38, %v2380_v44 }
 0x1ba   : > { %v4169_v46 = vpop.f32.mrb[24].mxu0 }
 0x1bb   : > { %v4191_v47 = vpop.f32.mrb[24].mxu1  ;;  %v4170_v48 = vpop.f32.mrb[25].mxu0 }
 0x1bc   : > { %v4192_v49 = vpop.f32.mrb[25].mxu1  ;;  %v4171_v50 = vadd.f32 %v4170_v48, %v4169_v46  ;;  %v4172_v52 = vpop.f32.mrb[26].mxu0 }
 0x1bd   : > { %v4193_v51 = vadd.f32 %v4192_v49, %v4191_v47  ;;  %v4194_v53 = vpop.f32.mrb[26].mxu1  ;;  %v4173_v54 = vpop.f32.mrb[27].mxu0 }
 0x1be   : > { %v4195_v55 = vpop.f32.mrb[27].mxu1 }
 0x1bf   : > { %v2780_v56 = vadd.f32 %v4193_v51, %v4171_v50 }
 0x1c1   : > { %v2785_v57 = vadd.f32 %v2780_v56, %v2420_v45 }
 0x1da   : > { %v4213_v58 = vpop.f32.mrb[28].mxu0 }
 0x1db   : > { %v4235_v59 = vpop.f32.mrb[28].mxu1  ;;  %v4214_v60 = vpop.f32.mrb[29].mxu0 }
 0x1dc   : > { %v4215_v61 = vadd.f32 %v4214_v60, %v4213_v58  ;;  %v4236_v62 = vpop.f32.mrb[29].mxu1  ;;  %v4216_v63 = vpop.f32.mrb[30].mxu0 }
 0x1dd   : > { %v4237_v0 = vadd.f32 %v4236_v62, %v4235_v59  ;;  %v4238_v1 = vpop.f32.mrb[30].mxu1  ;;  %v4217_v2 = vpop.f32.mrb[31].mxu0 }
 0x1de   : > { %v4239_v3 = vpop.f32.mrb[31].mxu1 }
 0x1df   : > { %v3168_v4 = vadd.f32 %v4237_v0, %v4215_v61 }
 0x1e1   : > { %v3173_v5 = vadd.f32 %v3168_v4, %v2785_v57 }
 0x1e3   : > { %v3174_v6 = vadd.f32 %v3561_v18, %v3173_v5 }
 0x1e5   : > { %v3175_v7 = vmax.f32 %v3174_v6, 0.0 }
 0x1e7   : > { %v3176_v8 = vpack.c.bf16 %v3175_v7, %v3175_v7 }
 0x1e9   : > { %3886 = vst [vmem:[%s5369_s28 + $0x1] sm:$0x1] %v3176_v8 }
 0x1ea PF: > { %s13_s12 = sadd.s32 1, %s4520_s12  }
 0x1eb   : > { %p10_p4 = scmp.ge.s32.totalorder %s13_s12, 4  }
 0x1ed   :  { %12 = sbr.rel (!%p10_p4) target bundleno = 1 (0x1), region = 68 }

// kernel: encoder_forward.5
= control target key start
LH: loop header
LB: loop body
LE: loop exit
PB: predicated region body
PF: predicated region fallthrough
CT: control target
= control target key end

     0   :  { %s8829_s12 = smov 0   ;;  %s10459_s0 = inlined_call_operand.vmem [shape: bf16[2,5,5,512], index: 0, kind: input, shape index: {}]   ;;  %s10460_s1 = inlined_call_operand.vmem [shape: bf16[2,2,512,128], index: 1, kind: input, shape index: {}]   ;;  %s10461_s2 = inlined_call_operand.vmem [shape: f32[1,128], index: 2, kind: input, shape index: {}]   ;;  %s10462_s3 = inlined_call_operand.vmem [shape: bf16[2,4,4,128], index: 3, kind: output, shape index: {}]  }
   0x1 LB: > { %s6124_s13 = sadd.s32 4294967295, %s8807_s12   ;;  %p6128_p0 = scmp.ge.s32.totalorder %s8807_s12, 1  ;;  %s8807_s12 = sphi %s8829_s12, %s13_s12  }
   0x2   : > { %p137_p1 = scmp.lt.s32.totalorder %s8807_s12, 3 }
   0x4   : > { %p138_p2 = pnand %p6128_p0, %p137_p1 }
   0x5   : > { %v8224_v0 = vld [vmem:[%s10460_s1 + $0x140] sm:$0xff] (!%p138_p2)   ;;  %v8228_v4 = vld [vmem:[%s10460_s1 + $0x148] sm:$0xff] (!%p138_p2)   ;;  %v8232_v8 = vld [vmem:[%s10460_s1 + $0x150] sm:$0xff] (!%p138_p2)   ;;  %p161_p3 = scmp.lt.s32.totalorder (!%p138_p2), %s6124_s13, 1 }
   0x6   : > { %141 = sbr.rel (%p138_p2) target bundleno = 748 (0x2ec), region = 32  ;;  %v8225_v1 = vld [vmem:[%s10460_s1 + $0x1c0] sm:$0xff] (!%p138_p2)   ;;  %7511 = vmatprep.subr.bf16.mxu0 (!%p138_p2), %v8224_v0  ;;  %v8229_v5 = vld [vmem:[%s10460_s1 + $0x1c8] sm:$0xff] (!%p138_p2)   ;;  %v8233_v9 = vld [vmem:[%s10460_s1 + $0x1d0] sm:$0xff] (!%p138_p2)  }
   0x7   : > { %v8226_v2 = vld [vmem:[%s10460_s1 + $0x100] sm:$0xff] (!%p138_p2)   ;;  %7533 = vmatprep.subr.bf16.mxu1 (!%p138_p2), %v8225_v1  ;;  %v8230_v6 = vld [vmem:[%s10460_s1 + $0x108] sm:$0xff] (!%p138_p2)   ;;  %v8234_v10 = vld [vmem:[%s10460_s1 + $0x110] sm:$0xff] (!%p138_p2)  }
   0x8   : > { %v8227_v3 = vld [vmem:[%s10460_s1 + $0x180] sm:$0xff] (!%p138_p2)   ;;  %7512 = vmatpush3.bf16.msra.mxu0 (!%p138_p2), %v8226_v2  ;;  %v8231_v7 = vld [vmem:[%s10460_s1 + $0x188] sm:$0xff] (!%p138_p2)   ;;  %v8235_v11 = vld [vmem:[%s10460_s1 + $0x190] sm:$0xff] (!%p138_p2)  }
   0x9   : > { %7534 = vmatpush3.bf16.msra.mxu1 (!%p138_p2), %v8227_v3  ;;  %7513 = vmatprep.subr.bf16.mxu0 (!%p138_p2), %v8228_v4  ;;  %v8236_v12 = vld [vmem:[%s10460_s1 + $0x158] sm:$0xff] (!%p138_p2)   ;;  %v8240_v16 = vld [vmem:[%s10460_s1 + $0x160] sm:$0xff] (!%p138_p2)   ;;  %v8244_v20 = vld [vmem:[%s10460_s1 + $0x168] sm:$0xff] (!%p138_p2)  }
   0xa   : > { %7535 = vmatprep.subr.bf16.mxu1 (!%p138_p2), %v8229_v5  ;;  %v8237_v13 = vld [vmem:[%s10460_s1 + $0x1d8] sm:$0xff] (!%p138_p2)   ;;  %v8241_v17 = vld [vmem:[%s10460_s1 + $0x1e0] sm:$0xff] (!%p138_p2)   ;;  %v8245_v21 = vld [vmem:[%s10460_s1 + $0x1e8] sm:$0xff] (!%p138_p2)  }
   0xb   : > { %v8238_v14 = vld [vmem:[%s10460_s1 + $0x118] sm:$0xff] (!%p138_p2)   ;;  %v8242_v18 = vld [vmem:[%s10460_s1 + $0x120] sm:$0xff] (!%p138_p2)   ;;  %v8246_v22 = vld [vmem:[%s10460_s1 + $0x128] sm:$0xff] (!%p138_p2)  }
   0xc   : > { %7514 = vmatpush3.bf16.msra.mxu0 (!%p138_p2), %v8230_v6  ;;  %v8239_v15 = vld [vmem:[%s10460_s1 + $0x198] sm:$0xff] (!%p138_p2)   ;;  %v8243_v19 = vld [vmem:[%s10460_s1 + $0x1a0] sm:$0xff] (!%p138_p2)   ;;  %v8247_v23 = vld [vmem:[%s10460_s1 + $0x1a8] sm:$0xff] (!%p138_p2)  }
   0xd   : > { %7536 = vmatpush3.bf16.msra.mxu1 %v8231_v7  ;;  %7515 = vmatprep.subr.bf16.mxu0 %v8232_v8  ;;  %s10464_s13 = smov (!%p161_p3, %s6124_s13), 1  ;;  %v8248_v24 = vld [vmem:[%s10460_s1 + $0x170] sm:$0xff]   ;;  %v8252_v28 = vld [vmem:[%s10460_s1 + $0x178] sm:$0xff]   ;;  %v8260_v38 = vld [vmem:[%s10460_s1 + $0x40] sm:$0xff]  }
   0xe   : > { %7537 = vmatprep.subr.bf16.mxu1 %v8233_v9  ;;  %v8249_v25 = vld [vmem:[%s10460_s1 + $0x1f0] sm:$0xff]   ;;  %s8215_s16 = smul.u32 80, %s10464_s13  ;;  %v8253_v29 = vld [vmem:[%s10460_s1 + $0x1f8] sm:$0xff]   ;;  %v8261_v39 = vld [vmem:[%s10460_s1 + $0xc0] sm:$0xff]   ;;  %s7510_s11 = sshll.u32 %s10464_s13, 3 }
   0xf   : > { %v8250_v26 = vld [vmem:[%s10460_s1 + $0x130] sm:$0xff]   ;;  %v8254_v30 = vld [vmem:[%s10460_s1 + $0x138] sm:$0xff]   ;;  %v8262_v50 = vld [vmem:[%s10460_s1] sm:$0xff]   ;;  %s9932_s21 = scalar_lea.vmem %s10462_s3, %s7510_s11 }
  0x10   : > { %7516 = vmatpush3.bf16.msra.mxu0 %v8234_v10  ;;  %v8251_v27 = vld [vmem:[%s10460_s1 + $0x1b0] sm:$0xff]   ;;  %s8937_s27 = scalar_lea.vmem %s10459_s0, %s8215_s16  ;;  %v8255_v31 = vld [vmem:[%s10460_s1 + $0x1b8] sm:$0xff]   ;;  %v8263_v51 = vld [vmem:[%s10460_s1 + $0x80] sm:$0xff]  }
  0x11   : > { %7538 = vmatpush3.bf16.msra.mxu1 %v8235_v11  ;;  %7517 = vmatprep.subr.bf16.mxu0 %v8236_v12  ;;  %v239_v32 = vld [vmem:[%s8937_s27] sm:$0x77]  ;;  %v240_v33 = vld [vmem:[%s8937_s27 + $0x8] sm:$0x77]  ;;  %v8268_v62 = vld [vmem:[%s10460_s1 + $0x50] sm:$0xff]  }
  0x12   : > { %7539 = vmatprep.subr.bf16.mxu1 %v8237_v13  ;;  %v6196_v34 = vcombine.low %v239_v32, %v239_v32  ;;  %v6197_v35 = vcombine.high %v239_v32, %v239_v32  ;;  %v6198_v36 = vcombine.low %v240_v33, %v240_v33  ;;  %v6199_v37 = vcombine.high %v240_v33, %v240_v33  ;;  %v8264_v56 = vld [vmem:[%s10460_s1 + $0x48] sm:$0xff]   ;;  %v8269_v63 = vld [vmem:[%s10460_s1 + $0xd0] sm:$0xff]   ;;  %v8272_v2 = vld [vmem:[%s10460_s1 + $0x58] sm:$0xff]  }
  0x13   : > { %v8265_v59 = vld [vmem:[%s10460_s1 + $0xc8] sm:$0xff]   ;;  %v8270_v0 = vld [vmem:[%s10460_s1 + $0x10] sm:$0xff]   ;;  %v8273_v3 = vld [vmem:[%s10460_s1 + $0xd8] sm:$0xff]  }
  0x14   : > { %7518 = vmatpush3.bf16.msra.mxu0 %v8238_v14  ;;  %v324_v40 = vshrl.u32 %v6197_v35, 16  ;;  %v326_v41 = vshll.u32 %v6197_v35, 16  ;;  %v338_v42 = vshrl.u32 %v6199_v37, 16  ;;  %v340_v43 = vshll.u32 %v6199_v37, 16  ;;  %v8266_v60 = vld [vmem:[%s10460_s1 + $0x8] sm:$0xff]   ;;  %v8271_v1 = vld [vmem:[%s10460_s1 + $0x90] sm:$0xff]  }
  0x15   : > { %7540 = vmatpush3.bf16.msra.mxu1 %v8239_v15  ;;  %7519 = vmatprep.subr.bf16.mxu0 %v8240_v16  ;;  %v317_v44 = vshrl.u32 %v6196_v34, 16  ;;  %v319_v45 = vshll.u32 %v6196_v34, 16  ;;  %v331_v46 = vshrl.u32 %v6198_v36, 16  ;;  %v333_v47 = vshll.u32 %v6198_v36, 16  ;;  %v8267_v61 = vld [vmem:[%s10460_s1 + $0x88] sm:$0xff]   ;;  %v8274_v4 = vld [vmem:[%s10460_s1 + $0x18] sm:$0xff]  }
  0x16   : > { %7541 = vmatprep.subr.bf16.mxu1 %v8241_v17  ;;  %v328_v48 = vrot.slane %v326_v41, 1  ;;  %v342_v49 = vrot.slane %v340_v43, 1  ;;  %v8275_v5 = vld [vmem:[%s10460_s1 + $0x98] sm:$0xff]   ;;  %v8276_v6 = vld [vmem:[%s10460_s1 + $0x60] sm:$0xff]   ;;  %v8280_v10 = vld [vmem:[%s10460_s1 + $0x68] sm:$0xff]  }
  0x17   : > { %v321_v52 = vrot.slane %v319_v45, 1  ;;  %v335_v53 = vrot.slane %v333_v47, 1  ;;  %v8277_v7 = vld [vmem:[%s10460_s1 + $0xe0] sm:$0xff]   ;;  %v8281_v11 = vld [vmem:[%s10460_s1 + $0xe8] sm:$0xff]   ;;  %v8284_v14 = vld [vmem:[%s10460_s1 + $0x70] sm:$0xff]  }
  0x18   : > { %7520 = vmatpush3.bf16.msra.mxu0 %v8242_v18  ;;  %v329_v54 = vor.u32 %v328_v48, %v324_v40  ;;  %v343_v55 = vor.u32 %v342_v49, %v338_v42  ;;  %v8278_v8 = vld [vmem:[%s10460_s1 + $0x20] sm:$0xff]   ;;  %v8282_v12 = vld [vmem:[%s10460_s1 + $0x28] sm:$0xff]   ;;  %v8285_v15 = vld [vmem:[%s10460_s1 + $0xf0] sm:$0xff]  }
  0x19   : > { %7542 = vmatpush3.bf16.msra.mxu1 %v8243_v19  ;;  %7521 = vmatprep.subr.bf16.mxu0 %v8244_v20  ;;  %v322_v57 = vor.u32 %v321_v52, %v317_v44  ;;  %v336_v58 = vor.u32 %v335_v53, %v331_v46  ;;  %v8279_v9 = vld [vmem:[%s10460_s1 + $0xa0] sm:$0xff]   ;;  %v8283_v13 = vld [vmem:[%s10460_s1 + $0xa8] sm:$0xff]   ;;  %v8286_v16 = vld [vmem:[%s10460_s1 + $0x30] sm:$0xff]  }
  0x1a   : > { %7543 = vmatprep.subr.bf16.mxu1 %v8245_v21  ;;  %572 = vmatprep.mubr.bf16.mxu0 %v329_v54  ;;  %v8287_v17 = vld [vmem:[%s10460_s1 + $0xb0] sm:$0xff]   ;;  %v8288_v18 = vld [vmem:[%s10460_s1 + $0x78] sm:$0xff]   ;;  %v8300_v32 = vld [vmem:[%s10460_s1 + $0x248] sm:$0xff]  }
  0x1b   : > { %612 = vmatprep.mubr.bf16.mxu1 %v343_v55  ;;  %v8289_v19 = vld [vmem:[%s10460_s1 + $0xf8] sm:$0xff]   ;;  %v8301_v33 = vld [vmem:[%s10460_s1 + $0x2c8] sm:$0xff]   ;;  %v8304_v36 = vld [vmem:[%s10460_s1 + $0x250] sm:$0xff]  }
  0x1c   : > { %7522 = vmatpush3.bf16.msra.mxu0 %v8246_v22  ;;  %v8290_v20 = vld [vmem:[%s10460_s1 + $0x38] sm:$0xff]   ;;  %v173_v22 = vld [vmem:[%s8937_s27] sm:$0x33]  ;;  %v8302_v34 = vld [vmem:[%s10460_s1 + $0x208] sm:$0xff]  }
  0x1d   : > { %7544 = vmatpush3.bf16.msra.mxu1 %v8247_v23  ;;  %7523 = vmatprep.subr.bf16.mxu0 %v8248_v24  ;;  %v8291_v21 = vld [vmem:[%s10460_s1 + $0xb8] sm:$0xff]   ;;  %v174_v23 = vld [vmem:[%s8937_s27 + $0x8] sm:$0x33]  ;;  %v6233_v24 = vcombine.high %v173_v22, %v173_v22  ;;  %v8305_v37 = vld [vmem:[%s10460_s1 + $0x2d0] sm:$0xff]  }
  0x1e   : > { %7545 = vmatprep.subr.bf16.mxu1 %v8249_v25  ;;  %v8296_v25 = vld [vmem:[%s10460_s1 + $0x240] sm:$0xff]   ;;  %v8303_v35 = vld [vmem:[%s10460_s1 + $0x288] sm:$0xff]   ;;  %v8308_v40 = vld [vmem:[%s10460_s1 + $0x258] sm:$0xff]  }
  0x1f   : > { %v8309_v41 = vld [vmem:[%s10460_s1 + $0x2d8] sm:$0xff]   ;;  %v8312_v44 = vld [vmem:[%s10460_s1 + $0x260] sm:$0xff]   ;;  %v8316_v48 = vld [vmem:[%s10460_s1 + $0x268] sm:$0xff]  }
  0x20   : > { %7524 = vmatpush3.bf16.msra.mxu0 %v8250_v26  ;;  %v6235_v26 = vcombine.high %v174_v23, %v174_v23  ;;  %v8310_v42 = vld [vmem:[%s10460_s1 + $0x218] sm:$0xff]   ;;  %v8313_v45 = vld [vmem:[%s10460_s1 + $0x2e0] sm:$0xff]   ;;  %v8317_v49 = vld [vmem:[%s10460_s1 + $0x2e8] sm:$0xff]  }
  0x21   : > { %7546 = vmatpush3.bf16.msra.mxu1 %v8251_v27  ;;  %7525 = vmatprep.subr.bf16.mxu0 %v8252_v28  ;;  %v8297_v27 = vld [vmem:[%s10460_s1 + $0x2c0] sm:$0xff]   ;;  %v8311_v43 = vld [vmem:[%s10460_s1 + $0x298] sm:$0xff]   ;;  %v8320_v52 = vld [vmem:[%s10460_s1 + $0x270] sm:$0xff]  }
  0x22   : > { %7547 = vmatprep.subr.bf16.mxu1 %v8253_v29  ;;  %v8298_v28 = vld [vmem:[%s10460_s1 + $0x200] sm:$0xff]   ;;  %v6232_v29 = vcombine.low %v173_v22, %v173_v22  ;;  %v8321_v53 = vld [vmem:[%s10460_s1 + $0x2f0] sm:$0xff]   ;;  %v8352_v22 = vld [vmem:[%s10460_s1 + $0x368] sm:$0xff]  }
  0x23   : > { %v8314_v46 = vld [vmem:[%s10460_s1 + $0x220] sm:$0xff]   ;;  %v8322_v54 = vld [vmem:[%s10460_s1 + $0x230] sm:$0xff]  }
  0x24   : > { %7526 = vmatpush3.bf16.msra.mxu0 %v8254_v30  ;;  %v6234_v30 = vcombine.low %v174_v23, %v174_v23  ;;  %v8315_v47 = vld [vmem:[%s10460_s1 + $0x2a0] sm:$0xff]   ;;  %v8323_v55 = vld [vmem:[%s10460_s1 + $0x2b0] sm:$0xff]   ;;  %v8353_v23 = vld [vmem:[%s10460_s1 + $0x3e8] sm:$0xff]  }
  0x25   : > { %7548 = vmatpush3.bf16.msra.mxu1 %v8255_v31  ;;  %7555 = vmatprep.subr.bf16.mxu0 %v8260_v38  ;;  %v8299_v31 = vld [vmem:[%s10460_s1 + $0x280] sm:$0xff]   ;;  %v8306_v38 = vld [vmem:[%s10460_s1 + $0x210] sm:$0xff]  }
  0x26   : > { %7577 = vmatprep.subr.bf16.mxu1 %v8261_v39  ;;  %v8307_v39 = vld [vmem:[%s10460_s1 + $0x290] sm:$0xff]  }
  0x27   : > { %573 = vmatmul.mubr.bf16.vlgmr.msra.gmra.mrb[0].mxu0 %v322_v57  ;;  %v8325_v57 = vld [vmem:[%s10460_s1 + $0x2f8] sm:$0xff]  }
  0x28   : > { %613 = vmatmul.mubr.bf16.vlgmr.msra.gmra.mrb[0].mxu1 %v336_v58  ;;  %7556 = vmatpush3.bf16.msra.mxu0 %v8262_v50  ;;  %v8318_v50 = vld [vmem:[%s10460_s1 + $0x228] sm:$0xff]   ;;  %v8326_v58 = vld [vmem:[%s10460_s1 + $0x238] sm:$0xff]  }
  0x29   : > { %7578 = vmatpush3.bf16.msra.mxu1 %v8263_v51  ;;  %7557 = vmatprep.subr.bf16.mxu0 %v8264_v56  ;;  %v8319_v51 = vld [vmem:[%s10460_s1 + $0x2a8] sm:$0xff]   ;;  %v8324_v56 = vld [vmem:[%s10460_s1 + $0x278] sm:$0xff]  }
  0x2a   : > { %7579 = vmatprep.subr.bf16.mxu1 %v8265_v59  ;;  %858 = vmatprep.mubr.bf16.mxu0 %v6233_v24  ;;  %v8327_v59 = vld [vmem:[%s10460_s1 + $0x2b8] sm:$0xff]   ;;  %v8354_v24 = vld [vmem:[%s10460_s1 + $0x328] sm:$0xff]  }
  0x2b   : > { %898 = vmatprep.mubr.bf16.mxu1 %v6235_v26  ;;  %v8356_v26 = vld [vmem:[%s10460_s1 + $0x370] sm:$0xff]  }
  0x2c   : > { %7558 = vmatpush3.bf16.msra.mxu0 %v8266_v60  ;;  %v6268_v60 = vld [vmem:[%s8937_s27 + $0x10] sm:$0x33] }
  0x2d   : > { %7580 = vmatpush3.bf16.msra.mxu1 %v8267_v61  ;;  %7559 = vmatprep.subr.bf16.mxu0 %v8268_v62  ;;  %v6269_v61 = vld [vmem:[%s8937_s27 + $0x18] sm:$0x33]  ;;  %v6335_v62 = vcombine.high %v6268_v60, %v6268_v60 }
  0x2e   : > { %7581 = vmatprep.subr.bf16.mxu1 %v8269_v63  ;;  %v8332_v63 = vld [vmem:[%s10460_s1 + $0x340] sm:$0xff]  }
  0x30   : > { %7560 = vmatpush3.bf16.msra.mxu0 %v8270_v0  ;;  %v6337_v0 = vcombine.high %v6269_v61, %v6269_v61 }
  0x31   : > { %7582 = vmatpush3.bf16.msra.mxu1 %v8271_v1  ;;  %7561 = vmatprep.subr.bf16.mxu0 %v8272_v2  ;;  %v8333_v1 = vld [vmem:[%s10460_s1 + $0x3c0] sm:$0xff]   ;;  %v6334_v2 = vcombine.low %v6268_v60, %v6268_v60 }
  0x32   : > { %7583 = vmatprep.subr.bf16.mxu1 %v8273_v3  ;;  %v6336_v3 = vcombine.low %v6269_v61, %v6269_v61  ;;  %v8373_v61 = vld [vmem:[%s10460_s1 + $0x1c8] sm:$0xff]  }
  0x34   : > { %7562 = vmatpush3.bf16.msra.mxu0 %v8274_v4  ;;  %v8334_v4 = vld [vmem:[%s10460_s1 + $0x300] sm:$0xff]  }
  0x35   : > { %7584 = vmatpush3.bf16.msra.mxu1 %v8275_v5  ;;  %7563 = vmatprep.subr.bf16.mxu0 %v8276_v6  ;;  %v8335_v5 = vld [vmem:[%s10460_s1 + $0x380] sm:$0xff]   ;;  %v8336_v6 = vld [vmem:[%s10460_s1 + $0x348] sm:$0xff]  }
  0x36   : > { %7585 = vmatprep.subr.bf16.mxu1 %v8277_v7  ;;  %v8337_v7 = vld [vmem:[%s10460_s1 + $0x3c8] sm:$0xff]  }
  0x38   : > { %7564 = vmatpush3.bf16.msra.mxu0 %v8278_v8  ;;  %v8338_v8 = vld [vmem:[%s10460_s1 + $0x308] sm:$0xff]  }
  0x39   : > { %7586 = vmatpush3.bf16.msra.mxu1 %v8279_v9  ;;  %7565 = vmatprep.subr.bf16.mxu0 %v8280_v10  ;;  %v8339_v9 = vld [vmem:[%s10460_s1 + $0x388] sm:$0xff]   ;;  %v8340_v10 = vld [vmem:[%s10460_s1 + $0x350] sm:$0xff]  }
  0x3a   : > { %7587 = vmatprep.subr.bf16.mxu1 %v8281_v11  ;;  %v8341_v11 = vld [vmem:[%s10460_s1 + $0x3d0] sm:$0xff]  }
  0x3c   : > { %7566 = vmatpush3.bf16.msra.mxu0 %v8282_v12  ;;  %v8342_v12 = vld [vmem:[%s10460_s1 + $0x310] sm:$0xff]  }
  0x3d   : > { %7588 = vmatpush3.bf16.msra.mxu1 %v8283_v13  ;;  %7567 = vmatprep.subr.bf16.mxu0 %v8284_v14  ;;  %v8343_v13 = vld [vmem:[%s10460_s1 + $0x390] sm:$0xff]   ;;  %v8344_v14 = vld [vmem:[%s10460_s1 + $0x358] sm:$0xff]  }
  0x3e   : > { %7589 = vmatprep.subr.bf16.mxu1 %v8285_v15  ;;  %v8345_v15 = vld [vmem:[%s10460_s1 + $0x3d8] sm:$0xff]  }
  0x40   : > { %7568 = vmatpush3.bf16.msra.mxu0 %v8286_v16  ;;  %v8346_v16 = vld [vmem:[%s10460_s1 + $0x318] sm:$0xff]  }
  0x41   : > { %7590 = vmatpush3.bf16.msra.mxu1 %v8287_v17  ;;  %7569 = vmatprep.subr.bf16.mxu0 %v8288_v18  ;;  %v8347_v17 = vld [vmem:[%s10460_s1 + $0x398] sm:$0xff]   ;;  %v8348_v18 = vld [vmem:[%s10460_s1 + $0x360] sm:$0xff]  }
  0x42   : > { %7591 = vmatprep.subr.bf16.mxu1 %v8289_v19  ;;  %v8349_v19 = vld [vmem:[%s10460_s1 + $0x3e0] sm:$0xff]  }
  0x44   : > { %7570 = vmatpush3.bf16.msra.mxu0 %v8290_v20  ;;  %v8350_v20 = vld [vmem:[%s10460_s1 + $0x320] sm:$0xff]  }
  0x45   : > { %7592 = vmatpush3.bf16.msra.mxu1 %v8291_v21  ;;  %7599 = vmatprep.subr.bf16.mxu0 %v8296_v25  ;;  %v8351_v21 = vld [vmem:[%s10460_s1 + $0x3a0] sm:$0xff]   ;;  %v8355_v25 = vld [vmem:[%s10460_s1 + $0x3a8] sm:$0xff]  }
  0x46   : > { %7621 = vmatprep.subr.bf16.mxu1 %v8297_v27  ;;  %v8357_v27 = vld [vmem:[%s10460_s1 + $0x3f0] sm:$0xff]  }
  0x47   : > { %859 = vmatmul.mubr.bf16.vlgmr.msra.gmra.mrb[4].mxu0 %v6232_v29  ;;  %v8359_v29 = vld [vmem:[%s10460_s1 + $0x3b0] sm:$0xff]  }
  0x48   : > { %899 = vmatmul.mubr.bf16.vlgmr.msra.gmra.mrb[4].mxu1 %v6234_v30  ;;  %7600 = vmatpush3.bf16.msra.mxu0 %v8298_v28  ;;  %v8358_v28 = vld [vmem:[%s10460_s1 + $0x330] sm:$0xff]   ;;  %v8360_v30 = vld [vmem:[%s10460_s1 + $0x378] sm:$0xff]  }
  0x49   : > { %7622 = vmatpush3.bf16.msra.mxu1 %v8299_v31  ;;  %7601 = vmatprep.subr.bf16.mxu0 %v8300_v32  ;;  %v8361_v31 = vld [vmem:[%s10460_s1 + $0x3f8] sm:$0xff]  }
  0x4a   : > { %7623 = vmatprep.subr.bf16.mxu1 %v8301_v33  ;;  %1212 = vmatprep.mubr.bf16.mxu0 %v6335_v62  ;;  %v8362_v32 = vld [vmem:[%s10460_s1 + $0x338] sm:$0xff]   ;;  %v8374_v62 = vld [vmem:[%s10460_s1 + $0x108] sm:$0xff]  }
  0x4b   : > { %1252 = vmatprep.mubr.bf16.mxu1 %v6337_v0  ;;  %v8363_v33 = vld [vmem:[%s10460_s1 + $0x3b8] sm:$0xff]   ;;  %v8376_v0 = vld [vmem:[%s10460_s1 + $0x150] sm:$0xff]  }
  0x4c   : > { %7602 = vmatpush3.bf16.msra.mxu0 %v8302_v34  ;;  %v6370_v34 = vld [vmem:[%s8937_s27 + $0x10] sm:$0x77] }
  0x4d   : > { %7624 = vmatpush3.bf16.msra.mxu1 %v8303_v35  ;;  %7603 = vmatprep.subr.bf16.mxu0 %v8304_v36  ;;  %v6436_v35 = vcombine.low %v6370_v34, %v6370_v34  ;;  %v6437_v36 = vcombine.high %v6370_v34, %v6370_v34 }
  0x4e   : > { %7625 = vmatprep.subr.bf16.mxu1 %v8305_v37  ;;  %v6371_v37 = vld [vmem:[%s8937_s27 + $0x18] sm:$0x77] }
  0x50   : > { %7604 = vmatpush3.bf16.msra.mxu0 %v8306_v38  ;;  %v6438_v38 = vcombine.low %v6371_v37, %v6371_v37 }
  0x51   : > { %7626 = vmatpush3.bf16.msra.mxu1 %v8307_v39  ;;  %7605 = vmatprep.subr.bf16.mxu0 %v8308_v40  ;;  %v6439_v39 = vcombine.high %v6371_v37, %v6371_v37  ;;  %v8368_v40 = vld [vmem:[%s10460_s1 + $0x140] sm:$0xff]  }
  0x52   : > { %7627 = vmatprep.subr.bf16.mxu1 %v8309_v41  ;;  %v1346_v41 = vshrl.u32 %v6437_v36, 16 }
  0x54   : > { %7606 = vmatpush3.bf16.msra.mxu0 %v8310_v42  ;;  %v1348_v42 = vshll.u32 %v6437_v36, 16 }
  0x55   : > { %7628 = vmatpush3.bf16.msra.mxu1 %v8311_v43  ;;  %7607 = vmatprep.subr.bf16.mxu0 %v8312_v44  ;;  %v1339_v43 = vshrl.u32 %v6436_v35, 16  ;;  %v1341_v44 = vshll.u32 %v6436_v35, 16  ;;  %v8405_v35 = vld [vmem:[%s10460_s1 + $0xc0] sm:$0xff]  }
  0x56   : > { %7629 = vmatprep.subr.bf16.mxu1 %v8313_v45  ;;  %v8369_v45 = vld [vmem:[%s10460_s1 + $0x1c0] sm:$0xff]  }
  0x58   : > { %7608 = vmatpush3.bf16.msra.mxu0 %v8314_v46  ;;  %v1360_v46 = vshrl.u32 %v6439_v39, 16 }
  0x59   : > { %7630 = vmatpush3.bf16.msra.mxu1 %v8315_v47  ;;  %7609 = vmatprep.subr.bf16.mxu0 %v8316_v48  ;;  %v1362_v47 = vshll.u32 %v6439_v39, 16  ;;  %v1353_v48 = vshrl.u32 %v6438_v38, 16 }
  0x5a   : > { %7631 = vmatprep.subr.bf16.mxu1 %v8317_v49  ;;  %v1355_v49 = vshll.u32 %v6438_v38, 16 }
  0x5c   : > { %7610 = vmatpush3.bf16.msra.mxu0 %v8318_v50  ;;  %v1350_v50 = vrot.slane %v1348_v42, 1  ;;  %v8406_v42 = vld [vmem:[%s10460_s1] sm:$0xff]  }
  0x5d   : > { %7632 = vmatpush3.bf16.msra.mxu1 %v8319_v51  ;;  %7611 = vmatprep.subr.bf16.mxu0 %v8320_v52  ;;  %v1343_v51 = vrot.slane %v1341_v44, 1  ;;  %v8370_v52 = vld [vmem:[%s10460_s1 + $0x100] sm:$0xff]  }
  0x5e   : > { %7633 = vmatprep.subr.bf16.mxu1 %v8321_v53  ;;  %v1364_v53 = vrot.slane %v1362_v47, 1 }
  0x60   : > { %7612 = vmatpush3.bf16.msra.mxu0 %v8322_v54  ;;  %v1357_v54 = vrot.slane %v1355_v49, 1 }
  0x61   : > { %7634 = vmatpush3.bf16.msra.mxu1 %v8323_v55  ;;  %7613 = vmatprep.subr.bf16.mxu0 %v8324_v56  ;;  %v8371_v55 = vld [vmem:[%s10460_s1 + $0x180] sm:$0xff]   ;;  %v8372_v56 = vld [vmem:[%s10460_s1 + $0x148] sm:$0xff]  }
  0x62   : > { %7635 = vmatprep.subr.bf16.mxu1 %v8325_v57  ;;  %v1351_v57 = vor.u32 %v1350_v50, %v1346_v41  ;;  %v1358_v60 = vor.u32 %v1357_v54, %v1353_v48  ;;  %v8412_v54 = vld [vmem:[%s10460_s1 + $0x50] sm:$0xff]  }
  0x64   : > { %7614 = vmatpush3.bf16.msra.mxu0 %v8326_v58  ;;  %v1344_v58 = vor.u32 %v1343_v51, %v1339_v43  ;;  %v8409_v51 = vld [vmem:[%s10460_s1 + $0xc8] sm:$0xff]  }
  0x65   : > { %7636 = vmatpush3.bf16.msra.mxu1 %v8327_v59  ;;  %7643 = vmatprep.subr.bf16.mxu0 %v8332_v63  ;;  %v1365_v59 = vor.u32 %v1364_v53, %v1360_v46  ;;  %v8375_v63 = vld [vmem:[%s10460_s1 + $0x188] sm:$0xff]  }
  0x66   : > { %7665 = vmatprep.subr.bf16.mxu1 %v8333_v1  ;;  %v8377_v1 = vld [vmem:[%s10460_s1 + $0x1d0] sm:$0xff]   ;;  %v8408_v46 = vld [vmem:[%s10460_s1 + $0x48] sm:$0xff]  }
  0x67   : > { %1213 = vmatmul.mubr.bf16.vlgmr.msra.gmra.mrb[8].mxu0 %v6334_v2  ;;  %v8378_v2 = vld [vmem:[%s10460_s1 + $0x110] sm:$0xff]   ;;  %v8411_v53 = vld [vmem:[%s10460_s1 + $0x88] sm:$0xff]  }
  0x68   : > { %1253 = vmatmul.mubr.bf16.vlgmr.msra.gmra.mrb[8].mxu1 %v6336_v3  ;;  %7644 = vmatpush3.bf16.msra.mxu0 %v8334_v4  ;;  %v8379_v3 = vld [vmem:[%s10460_s1 + $0x190] sm:$0xff]   ;;  %v8380_v4 = vld [vmem:[%s10460_s1 + $0x158] sm:$0xff]  }
  0x69   : > { %7666 = vmatpush3.bf16.msra.mxu1 %v8335_v5  ;;  %7645 = vmatprep.subr.bf16.mxu0 %v8336_v6  ;;  %v8381_v5 = vld [vmem:[%s10460_s1 + $0x1d8] sm:$0xff]  }
  0x6a   : > { %7667 = vmatprep.subr.bf16.mxu1 %v8337_v7  ;;  %1594 = vmatprep.mubr.bf16.mxu0 %v1351_v57  ;;  %v8382_v6 = vld [vmem:[%s10460_s1 + $0x118] sm:$0xff]   ;;  %v8415_v57 = vld [vmem:[%s10460_s1 + $0x90] sm:$0xff]  }
  0x6b   : > { %1634 = vmatprep.mubr.bf16.mxu1 %v1365_v59  ;;  %v8383_v7 = vld [vmem:[%s10460_s1 + $0x198] sm:$0xff]  }
  0x6c   : > { %7646 = vmatpush3.bf16.msra.mxu0 %v8338_v8  ;;  %v8384_v8 = vld [vmem:[%s10460_s1 + $0x160] sm:$0xff]   ;;  %v8417_v59 = vld [vmem:[%s10460_s1 + $0xd8] sm:$0xff]  }
  0x6d   : > { %7668 = vmatpush3.bf16.msra.mxu1 %v8339_v9  ;;  %7647 = vmatprep.subr.bf16.mxu0 %v8340_v10  ;;  %v8385_v9 = vld [vmem:[%s10460_s1 + $0x1e0] sm:$0xff]  }
  0x6e   : > { %7669 = vmatprep.subr.bf16.mxu1 %v8341_v11  ;;  %v8386_v10 = vld [vmem:[%s10460_s1 + $0x120] sm:$0xff]  }
  0x6f   : > { %v8387_v11 = vld [vmem:[%s10460_s1 + $0x1a0] sm:$0xff]  }
  0x70   : > { %7648 = vmatpush3.bf16.msra.mxu0 %v8342_v12  ;;  %v8388_v12 = vld [vmem:[%s10460_s1 + $0x168] sm:$0xff]  }
  0x71   : > { %7670 = vmatpush3.bf16.msra.mxu1 %v8343_v13  ;;  %7649 = vmatprep.subr.bf16.mxu0 %v8344_v14  ;;  %v8389_v13 = vld [vmem:[%s10460_s1 + $0x1e8] sm:$0xff]  }
  0x72   : > { %7671 = vmatprep.subr.bf16.mxu1 %v8345_v15  ;;  %v8390_v14 = vld [vmem:[%s10460_s1 + $0x128] sm:$0xff]  }
  0x73   : > { %v8391_v15 = vld [vmem:[%s10460_s1 + $0x1a8] sm:$0xff]  }
  0x74   : > { %7650 = vmatpush3.bf16.msra.mxu0 %v8346_v16  ;;  %v8392_v16 = vld [vmem:[%s10460_s1 + $0x170] sm:$0xff]  }
  0x75   : > { %7672 = vmatpush3.bf16.msra.mxu1 %v8347_v17  ;;  %7651 = vmatprep.subr.bf16.mxu0 %v8348_v18  ;;  %v8393_v17 = vld [vmem:[%s10460_s1 + $0x1f0] sm:$0xff]  }
  0x76   : > { %7673 = vmatprep.subr.bf16.mxu1 %v8349_v19  ;;  %v8394_v18 = vld [vmem:[%s10460_s1 + $0x130] sm:$0xff]  }
  0x77   : > { %v8395_v19 = vld [vmem:[%s10460_s1 + $0x1b0] sm:$0xff]  }
  0x78   : > { %7652 = vmatpush3.bf16.msra.mxu0 %v8350_v20  ;;  %v8396_v20 = vld [vmem:[%s10460_s1 + $0x178] sm:$0xff]  }
  0x79   : > { %7674 = vmatpush3.bf16.msra.mxu1 %v8351_v21  ;;  %7653 = vmatprep.subr.bf16.mxu0 %v8352_v22  ;;  %v8397_v21 = vld [vmem:[%s10460_s1 + $0x1f8] sm:$0xff]  }
  0x7a   : > { %7675 = vmatprep.subr.bf16.mxu1 %v8353_v23  ;;  %v8398_v22 = vld [vmem:[%s10460_s1 + $0x138] sm:$0xff]  }
  0x7b   : > { %v8399_v23 = vld [vmem:[%s10460_s1 + $0x1b8] sm:$0xff]  }
  0x7c   : > { %7654 = vmatpush3.bf16.msra.mxu0 %v8354_v24  ;;  %v6475_v24 = vld [vmem:[%s8937_s27 + $0x10] sm:$0x77] }
  0x7d   : > { %7676 = vmatpush3.bf16.msra.mxu1 %v8355_v25  ;;  %7655 = vmatprep.subr.bf16.mxu0 %v8356_v26  ;;  %v6541_v25 = vcombine.low %v6475_v24, %v6475_v24  ;;  %v6542_v26 = vcombine.high %v6475_v24, %v6475_v24  ;;  %v8444_v24 = vld [vmem:[%s10460_s1 + $0x248] sm:$0xff]  }
  0x7e   : > { %7677 = vmatprep.subr.bf16.mxu1 %v8357_v27  ;;  %v6476_v27 = vld [vmem:[%s8937_s27 + $0x18] sm:$0x77] }
  0x7f   : > { %v1798_v34 = vshll.u32 %v6541_v25, 16 }
  0x80   : > { %7656 = vmatpush3.bf16.msra.mxu0 %v8358_v28  ;;  %v6543_v28 = vcombine.low %v6476_v27, %v6476_v27 }
  0x81   : > { %7678 = vmatpush3.bf16.msra.mxu1 %v8359_v29  ;;  %7657 = vmatprep.subr.bf16.mxu0 %v8360_v30  ;;  %v6544_v29 = vcombine.high %v6476_v27, %v6476_v27  ;;  %v8404_v30 = vld [vmem:[%s10460_s1 + $0x40] sm:$0xff]   ;;  %v1800_v41 = vrot.slane %v1798_v34, 1  ;;  %v8447_v27 = vld [vmem:[%s10460_s1 + $0x288] sm:$0xff]   ;;  %v8454_v34 = vld [vmem:[%s10460_s1 + $0x218] sm:$0xff]  }
  0x82   : > { %7679 = vmatprep.subr.bf16.mxu1 %v8361_v31  ;;  %v1803_v31 = vshrl.u32 %v6542_v26, 16  ;;  %v1810_v38 = vshrl.u32 %v6543_v28, 16  ;;  %v1812_v39 = vshll.u32 %v6543_v28, 16  ;;  %v8448_v28 = vld [vmem:[%s10460_s1 + $0x250] sm:$0xff]  }
  0x83   : > { %v1817_v36 = vshrl.u32 %v6544_v29, 16  ;;  %v1819_v37 = vshll.u32 %v6544_v29, 16  ;;  %v8449_v29 = vld [vmem:[%s10460_s1 + $0x2d0] sm:$0xff]  }
  0x84   : > { %7658 = vmatpush3.bf16.msra.mxu0 %v8362_v32  ;;  %v1805_v32 = vshll.u32 %v6542_v26, 16  ;;  %v1814_v44 = vrot.slane %v1812_v39, 1  ;;  %v8446_v26 = vld [vmem:[%s10460_s1 + $0x208] sm:$0xff]   ;;  %v8459_v39 = vld [vmem:[%s10460_s1 + $0x2a0] sm:$0xff]  }
  0x85   : > { %7680 = vmatpush3.bf16.msra.mxu1 %v8363_v33  ;;  %7687 = vmatprep.subr.bf16.mxu0 %v8368_v40  ;;  %v1796_v33 = vshrl.u32 %v6541_v25, 16  ;;  %v1821_v43 = vrot.slane %v1819_v37, 1  ;;  %v8445_v25 = vld [vmem:[%s10460_s1 + $0x2c8] sm:$0xff]   ;;  %v8457_v37 = vld [vmem:[%s10460_s1 + $0x2e0] sm:$0xff]  }
  0x86   : > { %7709 = vmatprep.subr.bf16.mxu1 %v8369_v45  ;;  %v1807_v40 = vrot.slane %v1805_v32, 1  ;;  %v8407_v45 = vld [vmem:[%s10460_s1 + $0x80] sm:$0xff]   ;;  %v1815_v50 = vor.u32 %v1814_v44, %v1810_v38  ;;  %v8452_v32 = vld [vmem:[%s10460_s1 + $0x258] sm:$0xff]   ;;  %v8464_v44 = vld [vmem:[%s10460_s1 + $0x270] sm:$0xff]  }
  0x87   : > { %1595 = vmatmul.mubr.bf16.vlgmr.msra.gmra.mrb[12].mxu0 %v1344_v58  ;;  %v1801_v48 = vor.u32 %v1800_v41, %v1796_v33  ;;  %v1822_v49 = vor.u32 %v1821_v43, %v1817_v36  ;;  %v8416_v58 = vld [vmem:[%s10460_s1 + $0x58] sm:$0xff]   ;;  %v8456_v36 = vld [vmem:[%s10460_s1 + $0x260] sm:$0xff]   ;;  %v8461_v41 = vld [vmem:[%s10460_s1 + $0x2e8] sm:$0xff]  }
  0x88   : > { %1635 = vmatmul.mubr.bf16.vlgmr.msra.gmra.mrb[12].mxu1 %v1358_v60  ;;  %7688 = vmatpush3.bf16.msra.mxu0 %v8370_v52  ;;  %v1808_v47 = vor.u32 %v1807_v40, %v1803_v31  ;;  %v8410_v52 = vld [vmem:[%s10460_s1 + $0x8] sm:$0xff]   ;;  %v8418_v60 = vld [vmem:[%s10460_s1 + $0x18] sm:$0xff]   ;;  %v8451_v31 = vld [vmem:[%s10460_s1 + $0x290] sm:$0xff]  }
  0x89   : > { %7710 = vmatpush3.bf16.msra.mxu1 %v8371_v55  ;;  %7689 = vmatprep.subr.bf16.mxu0 %v8372_v56  ;;  %v8413_v55 = vld [vmem:[%s10460_s1 + $0xd0] sm:$0xff]   ;;  %v8453_v33 = vld [vmem:[%s10460_s1 + $0x2d8] sm:$0xff]   ;;  %v8458_v38 = vld [vmem:[%s10460_s1 + $0x220] sm:$0xff]  }
  0x8a   : > { %7711 = vmatprep.subr.bf16.mxu1 %v8373_v61  ;;  %2051 = vmatprep.mubr.bf16.mxu0 %v1808_v47  ;;  %v8414_v56 = vld [vmem:[%s10460_s1 + $0x10] sm:$0xff]   ;;  %v8419_v61 = vld [vmem:[%s10460_s1 + $0x98] sm:$0xff]   ;;  %v8460_v40 = vld [vmem:[%s10460_s1 + $0x268] sm:$0xff]  }
  0x8b   : > { %2091 = vmatprep.mubr.bf16.mxu1 %v1822_v49  ;;  %v8463_v43 = vld [vmem:[%s10460_s1 + $0x2a8] sm:$0xff]   ;;  %v8467_v47 = vld [vmem:[%s10460_s1 + $0x2b0] sm:$0xff]   ;;  %v8469_v49 = vld [vmem:[%s10460_s1 + $0x2f8] sm:$0xff]  }
  0x8c   : > { %7690 = vmatpush3.bf16.msra.mxu0 %v8374_v62  ;;  %v8420_v62 = vld [vmem:[%s10460_s1 + $0x60] sm:$0xff]  }
  0x8d   : > { %7712 = vmatpush3.bf16.msra.mxu1 %v8375_v63  ;;  %7691 = vmatprep.subr.bf16.mxu0 %v8376_v0  ;;  %v8421_v63 = vld [vmem:[%s10460_s1 + $0xe0] sm:$0xff]  }
  0x8e   : > { %7713 = vmatprep.subr.bf16.mxu1 %v8377_v1  ;;  %v8422_v0 = vld [vmem:[%s10460_s1 + $0x20] sm:$0xff]  }
  0x8f   : > { %v8423_v1 = vld [vmem:[%s10460_s1 + $0xa0] sm:$0xff]  }
  0x90   : > { %7692 = vmatpush3.bf16.msra.mxu0 %v8378_v2  ;;  %v8424_v2 = vld [vmem:[%s10460_s1 + $0x68] sm:$0xff]  }
  0x91   : > { %7714 = vmatpush3.bf16.msra.mxu1 %v8379_v3  ;;  %7693 = vmatprep.subr.bf16.mxu0 %v8380_v4  ;;  %v8425_v3 = vld [vmem:[%s10460_s1 + $0xe8] sm:$0xff]  }
  0x92   : > { %7715 = vmatprep.subr.bf16.mxu1 %v8381_v5  ;;  %v8426_v4 = vld [vmem:[%s10460_s1 + $0x28] sm:$0xff]  }
  0x93   : > { %v8427_v5 = vld [vmem:[%s10460_s1 + $0xa8] sm:$0xff]  }
  0x94   : > { %7694 = vmatpush3.bf16.msra.mxu0 %v8382_v6  ;;  %v8428_v6 = vld [vmem:[%s10460_s1 + $0x70] sm:$0xff]  }
  0x95   : > { %7716 = vmatpush3.bf16.msra.mxu1 %v8383_v7  ;;  %7695 = vmatprep.subr.bf16.mxu0 %v8384_v8  ;;  %v8429_v7 = vld [vmem:[%s10460_s1 + $0xf0] sm:$0xff]  }
  0x96   : > { %7717 = vmatprep.subr.bf16.mxu1 %v8385_v9  ;;  %v8430_v8 = vld [vmem:[%s10460_s1 + $0x30] sm:$0xff]  }
  0x97   : > { %v8431_v9 = vld [vmem:[%s10460_s1 + $0xb0] sm:$0xff]  }
  0x98   : > { %7696 = vmatpush3.bf16.msra.mxu0 %v8386_v10  ;;  %v8432_v10 = vld [vmem:[%s10460_s1 + $0x78] sm:$0xff]  }
  0x99   : > { %7718 = vmatpush3.bf16.msra.mxu1 %v8387_v11  ;;  %7697 = vmatprep.subr.bf16.mxu0 %v8388_v12  ;;  %v8433_v11 = vld [vmem:[%s10460_s1 + $0xf8] sm:$0xff]  }
  0x9a   : > { %7719 = vmatprep.subr.bf16.mxu1 %v8389_v13  ;;  %v8434_v12 = vld [vmem:[%s10460_s1 + $0x38] sm:$0xff]  }
  0x9b   : > { %v8435_v13 = vld [vmem:[%s10460_s1 + $0xb8] sm:$0xff]  }
  0x9c   : > { %7698 = vmatpush3.bf16.msra.mxu0 %v8390_v14  ;;  %v6473_v14 = vld [vmem:[%s8937_s27 + $0x10] sm:$0x33] }
  0x9d   : > { %7720 = vmatpush3.bf16.msra.mxu1 %v8391_v15  ;;  %7699 = vmatprep.subr.bf16.mxu0 %v8392_v16  ;;  %v6578_v15 = vcombine.high %v6473_v14, %v6473_v14  ;;  %v6474_v16 = vld [vmem:[%s8937_s27 + $0x18] sm:$0x33] }
  0x9e   : > { %7721 = vmatprep.subr.bf16.mxu1 %v8393_v17  ;;  %v6580_v17 = vcombine.high %v6474_v16, %v6474_v16 }
  0xa0   : > { %7700 = vmatpush3.bf16.msra.mxu0 %v8394_v18  ;;  %v8440_v18 = vld [vmem:[%s10460_s1 + $0x240] sm:$0xff]  }
  0xa1   : > { %7722 = vmatpush3.bf16.msra.mxu1 %v8395_v19  ;;  %7701 = vmatprep.subr.bf16.mxu0 %v8396_v20  ;;  %v8441_v19 = vld [vmem:[%s10460_s1 + $0x2c0] sm:$0xff]   ;;  %v6577_v20 = vcombine.low %v6473_v14, %v6473_v14 }
  0xa2   : > { %7723 = vmatprep.subr.bf16.mxu1 %v8397_v21  ;;  %v8442_v21 = vld [vmem:[%s10460_s1 + $0x200] sm:$0xff]  }
  0xa4   : > { %7702 = vmatpush3.bf16.msra.mxu0 %v8398_v22  ;;  %v6579_v22 = vcombine.low %v6474_v16, %v6474_v16 }
  0xa5   : > { %7724 = vmatpush3.bf16.msra.mxu1 %v8399_v23  ;;  %7731 = vmatprep.subr.bf16.mxu0 %v8404_v30  ;;  %v8443_v23 = vld [vmem:[%s10460_s1 + $0x280] sm:$0xff]   ;;  %v8450_v30 = vld [vmem:[%s10460_s1 + $0x210] sm:$0xff]  }
  0xa6   : > { %7753 = vmatprep.subr.bf16.mxu1 %v8405_v35  ;;  %v8455_v35 = vld [vmem:[%s10460_s1 + $0x298] sm:$0xff]  }
  0xa7   : > { %2052 = vmatmul.mubr.bf16.vlgmr.msra.gmra.mrb[16].mxu0 %v1801_v48  ;;  %v8468_v48 = vld [vmem:[%s10460_s1 + $0x278] sm:$0xff]  }
  0xa8   : > { %2092 = vmatmul.mubr.bf16.vlgmr.msra.gmra.mrb[16].mxu1 %v1815_v50  ;;  %7732 = vmatpush3.bf16.msra.mxu0 %v8406_v42  ;;  %v8462_v42 = vld [vmem:[%s10460_s1 + $0x228] sm:$0xff]   ;;  %v8470_v50 = vld [vmem:[%s10460_s1 + $0x238] sm:$0xff]  }
  0xa9   : > { %7754 = vmatpush3.bf16.msra.mxu1 %v8407_v45  ;;  %7733 = vmatprep.subr.bf16.mxu0 %v8408_v46  ;;  %v8465_v45 = vld [vmem:[%s10460_s1 + $0x2f0] sm:$0xff]  }
  0xaa   : > { %7755 = vmatprep.subr.bf16.mxu1 %v8409_v51  ;;  %2337 = vmatprep.mubr.bf16.mxu0 %v6578_v15  ;;  %v8466_v46 = vld [vmem:[%s10460_s1 + $0x230] sm:$0xff]   ;;  %v8471_v51 = vld [vmem:[%s10460_s1 + $0x2b8] sm:$0xff]  }
  0xab   : > { %2377 = vmatprep.mubr.bf16.mxu1 %v6580_v17 }
  0xac   : > { %7734 = vmatpush3.bf16.msra.mxu0 %v8410_v52  ;;  %v6613_v52 = vld [vmem:[%s8937_s27 + $0x20] sm:$0x33] }
  0xad   : > { %7756 = vmatpush3.bf16.msra.mxu1 %v8411_v53  ;;  %7735 = vmatprep.subr.bf16.mxu0 %v8412_v54  ;;  %v6614_v53 = vld [vmem:[%s8937_s27 + $0x28] sm:$0x33]  ;;  %v6680_v54 = vcombine.high %v6613_v52, %v6613_v52 }
  0xae   : > { %7757 = vmatprep.subr.bf16.mxu1 %v8413_v55  ;;  %v8476_v55 = vld [vmem:[%s10460_s1 + $0x340] sm:$0xff]  }
  0xb0   : > { %7736 = vmatpush3.bf16.msra.mxu0 %v8414_v56  ;;  %v6682_v56 = vcombine.high %v6614_v53, %v6614_v53 }
  0xb1   : > { %7758 = vmatpush3.bf16.msra.mxu1 %v8415_v57  ;;  %7737 = vmatprep.subr.bf16.mxu0 %v8416_v58  ;;  %v8477_v57 = vld [vmem:[%s10460_s1 + $0x3c0] sm:$0xff]   ;;  %v6679_v58 = vcombine.low %v6613_v52, %v6613_v52 }
  0xb2   : > { %7759 = vmatprep.subr.bf16.mxu1 %v8417_v59  ;;  %v8478_v59 = vld [vmem:[%s10460_s1 + $0x300] sm:$0xff]  }
  0xb4   : > { %7738 = vmatpush3.bf16.msra.mxu0 %v8418_v60  ;;  %v6681_v60 = vcombine.low %v6614_v53, %v6614_v53 }
  0xb5   : > { %7760 = vmatpush3.bf16.msra.mxu1 %v8419_v61  ;;  %7739 = vmatprep.subr.bf16.mxu0 %v8420_v62  ;;  %v8479_v61 = vld [vmem:[%s10460_s1 + $0x380] sm:$0xff]   ;;  %v8480_v62 = vld [vmem:[%s10460_s1 + $0x348] sm:$0xff]  }
  0xb6   : > { %7761 = vmatprep.subr.bf16.mxu1 %v8421_v63  ;;  %v8481_v63 = vld [vmem:[%s10460_s1 + $0x3c8] sm:$0xff]  }
  0xb8   : > { %7740 = vmatpush3.bf16.msra.mxu0 %v8422_v0  ;;  %v8482_v0 = vld [vmem:[%s10460_s1 + $0x308] sm:$0xff]  }
  0xb9   : > { %7762 = vmatpush3.bf16.msra.mxu1 %v8423_v1  ;;  %7741 = vmatprep.subr.bf16.mxu0 %v8424_v2  ;;  %v8483_v1 = vld [vmem:[%s10460_s1 + $0x388] sm:$0xff]   ;;  %v8484_v2 = vld [vmem:[%s10460_s1 + $0x350] sm:$0xff]  }
  0xba   : > { %7763 = vmatprep.subr.bf16.mxu1 %v8425_v3  ;;  %v8485_v3 = vld [vmem:[%s10460_s1 + $0x3d0] sm:$0xff]  }
  0xbc   : > { %7742 = vmatpush3.bf16.msra.mxu0 %v8426_v4  ;;  %v8486_v4 = vld [vmem:[%s10460_s1 + $0x310] sm:$0xff]  }
  0xbd   : > { %7764 = vmatpush3.bf16.msra.mxu1 %v8427_v5  ;;  %7743 = vmatprep.subr.bf16.mxu0 %v8428_v6  ;;  %v8487_v5 = vld [vmem:[%s10460_s1 + $0x390] sm:$0xff]   ;;  %v8488_v6 = vld [vmem:[%s10460_s1 + $0x358] sm:$0xff]  }
  0xbe   : > { %7765 = vmatprep.subr.bf16.mxu1 %v8429_v7  ;;  %v8489_v7 = vld [vmem:[%s10460_s1 + $0x3d8] sm:$0xff]  }
  0xc0   : > { %7744 = vmatpush3.bf16.msra.mxu0 %v8430_v8  ;;  %v8490_v8 = vld [vmem:[%s10460_s1 + $0x318] sm:$0xff]  }
  0xc1   : > { %7766 = vmatpush3.bf16.msra.mxu1 %v8431_v9  ;;  %7745 = vmatprep.subr.bf16.mxu0 %v8432_v10  ;;  %v8491_v9 = vld [vmem:[%s10460_s1 + $0x398] sm:$0xff]   ;;  %v8492_v10 = vld [vmem:[%s10460_s1 + $0x360] sm:$0xff]  }
  0xc2   : > { %7767 = vmatprep.subr.bf16.mxu1 %v8433_v11  ;;  %v8493_v11 = vld [vmem:[%s10460_s1 + $0x3e0] sm:$0xff]  }
  0xc4   : > { %7746 = vmatpush3.bf16.msra.mxu0 %v8434_v12  ;;  %v8494_v12 = vld [vmem:[%s10460_s1 + $0x320] sm:$0xff]  }
  0xc5   : > { %7768 = vmatpush3.bf16.msra.mxu1 %v8435_v13  ;;  %7775 = vmatprep.subr.bf16.mxu0 %v8440_v18  ;;  %v8495_v13 = vld [vmem:[%s10460_s1 + $0x3a0] sm:$0xff]   ;;  %v8496_v18 = vld [vmem:[%s10460_s1 + $0x368] sm:$0xff]  }
  0xc6   : > { %7797 = vmatprep.subr.bf16.mxu1 %v8441_v19  ;;  %v8497_v19 = vld [vmem:[%s10460_s1 + $0x3e8] sm:$0xff]  }
  0xc7   : > { %2338 = vmatmul.mubr.bf16.vlgmr.msra.gmra.mrb[20].mxu0 %v6577_v20 }
  0xc8   : > { %2378 = vmatmul.mubr.bf16.vlgmr.msra.gmra.mrb[20].mxu1 %v6579_v22  ;;  %7776 = vmatpush3.bf16.msra.mxu0 %v8442_v21 }
  0xc9   : > { %7798 = vmatpush3.bf16.msra.mxu1 %v8443_v23  ;;  %7777 = vmatprep.subr.bf16.mxu0 %v8444_v24  ;;  %v8498_v24 = vld [vmem:[%s10460_s1 + $0x328] sm:$0xff]  }
  0xca   : > { %7799 = vmatprep.subr.bf16.mxu1 %v8445_v25  ;;  %2690 = vmatprep.mubr.bf16.mxu0 %v6680_v54 }
  0xcb   : > { %2730 = vmatprep.mubr.bf16.mxu1 %v6682_v56 }
  0xcc   : > { %7778 = vmatpush3.bf16.msra.mxu0 %v8446_v26 }
  0xcd   : > { %7800 = vmatpush3.bf16.msra.mxu1 %v8447_v27  ;;  %7779 = vmatprep.subr.bf16.mxu0 %v8448_v28  ;;  %v8499_v27 = vld [vmem:[%s10460_s1 + $0x3a8] sm:$0xff]  }
  0xce   : > { %7801 = vmatprep.subr.bf16.mxu1 %v8449_v29  ;;  %v8500_v29 = vld [vmem:[%s10460_s1 + $0x370] sm:$0xff]  }
  0xd0   : > { %7780 = vmatpush3.bf16.msra.mxu0 %v8450_v30  ;;  %v8501_v30 = vld [vmem:[%s10460_s1 + $0x3f0] sm:$0xff]  }
  0xd1   : > { %7802 = vmatpush3.bf16.msra.mxu1 %v8451_v31  ;;  %7781 = vmatprep.subr.bf16.mxu0 %v8452_v32  ;;  %v8502_v31 = vld [vmem:[%s10460_s1 + $0x330] sm:$0xff]  }
  0xd2   : > { %7803 = vmatprep.subr.bf16.mxu1 %v8453_v33  ;;  %v8503_v32 = vld [vmem:[%s10460_s1 + $0x3b0] sm:$0xff]   ;;  %v8504_v33 = vld [vmem:[%s10460_s1 + $0x378] sm:$0xff]  }
  0xd4   : > { %7782 = vmatpush3.bf16.msra.mxu0 %v8454_v34  ;;  %v8505_v34 = vld [vmem:[%s10460_s1 + $0x3f8] sm:$0xff]  }
  0xd5   : > { %7804 = vmatpush3.bf16.msra.mxu1 %v8455_v35  ;;  %7783 = vmatprep.subr.bf16.mxu0 %v8456_v36  ;;  %v8506_v35 = vld [vmem:[%s10460_s1 + $0x338] sm:$0xff]  }
  0xd6   : > { %7805 = vmatprep.subr.bf16.mxu1 %v8457_v37  ;;  %v8507_v36 = vld [vmem:[%s10460_s1 + $0x3b8] sm:$0xff]   ;;  %v6715_v37 = vld [vmem:[%s8937_s27 + $0x20] sm:$0x77] }
  0xd8   : > { %7784 = vmatpush3.bf16.msra.mxu0 %v8458_v38  ;;  %v6781_v38 = vcombine.low %v6715_v37, %v6715_v37 }
  0xd9   : > { %7806 = vmatpush3.bf16.msra.mxu1 %v8459_v39  ;;  %7785 = vmatprep.subr.bf16.mxu0 %v8460_v40  ;;  %v6782_v39 = vcombine.high %v6715_v37, %v6715_v37  ;;  %v6716_v40 = vld [vmem:[%s8937_s27 + $0x28] sm:$0x77]  ;;  %v8542_v37 = vld [vmem:[%s10460_s1 + $0x138] sm:$0xff]  }
  0xda   : > { %7807 = vmatprep.subr.bf16.mxu1 %v8461_v41  ;;  %v6783_v41 = vcombine.low %v6716_v40, %v6716_v40 }
  0xdc   : > { %7786 = vmatpush3.bf16.msra.mxu0 %v8462_v42  ;;  %v6784_v42 = vcombine.high %v6716_v40, %v6716_v40  ;;  %v2832_v52 = vshll.u32 %v6783_v41, 16 }
  0xdd   : > { %7808 = vmatpush3.bf16.msra.mxu1 %v8463_v43  ;;  %7787 = vmatprep.subr.bf16.mxu0 %v8464_v44  ;;  %v8512_v43 = vld [vmem:[%s10460_s1 + $0x140] sm:$0xff]   ;;  %v2823_v44 = vshrl.u32 %v6782_v39, 16 }
  0xde   : > { %7809 = vmatprep.subr.bf16.mxu1 %v8465_v45  ;;  %v2825_v45 = vshll.u32 %v6782_v39, 16  ;;  %v2834_v56 = vrot.slane %v2832_v52, 1  ;;  %v6820_v39 = vld [vmem:[%s8937_s27 + $0x20] sm:$0x77] }
  0xdf   : > { %v6886_v40 = vcombine.low %v6820_v39, %v6820_v39 }
  0xe0   : > { %7788 = vmatpush3.bf16.msra.mxu0 %v8466_v46  ;;  %v2816_v46 = vshrl.u32 %v6781_v38, 16  ;;  %v2827_v53 = vrot.slane %v2825_v45, 1  ;;  %v8548_v45 = vld [vmem:[%s10460_s1 + $0x40] sm:$0xff]  }
  0xe1   : > { %7810 = vmatpush3.bf16.msra.mxu1 %v8467_v47  ;;  %7789 = vmatprep.subr.bf16.mxu0 %v8468_v48  ;;  %v2818_v47 = vshll.u32 %v6781_v38, 16  ;;  %v8513_v48 = vld [vmem:[%s10460_s1 + $0x1c0] sm:$0xff]   ;;  %v8543_v38 = vld [vmem:[%s10460_s1 + $0x1b8] sm:$0xff]  }
  0xe2   : > { %7811 = vmatprep.subr.bf16.mxu1 %v8469_v49  ;;  %v2837_v49 = vshrl.u32 %v6784_v42, 16 }
  0xe3   : > { %v2820_v54 = vrot.slane %v2818_v47, 1 }
  0xe4   : > { %7790 = vmatpush3.bf16.msra.mxu0 %v8470_v50  ;;  %v2839_v50 = vshll.u32 %v6784_v42, 16  ;;  %v6821_v42 = vld [vmem:[%s8937_s27 + $0x28] sm:$0x77] }
  0xe5   : > { %7812 = vmatpush3.bf16.msra.mxu1 %v8471_v51  ;;  %7819 = vmatprep.subr.bf16.mxu0 %v8476_v55  ;;  %v2830_v51 = vshrl.u32 %v6783_v41, 16  ;;  %v6887_v41 = vcombine.high %v6820_v39, %v6820_v39  ;;  %v8578_v39 = vld [vmem:[%s10460_s1 + $0x38] sm:$0xff]  }
  0xe6   : > { %7841 = vmatprep.subr.bf16.mxu1 %v8477_v57  ;;  %v2841_v55 = vrot.slane %v2839_v50, 1  ;;  %v8514_v57 = vld [vmem:[%s10460_s1 + $0x100] sm:$0xff]  }
  0xe7   : > { %2691 = vmatmul.mubr.bf16.vlgmr.msra.gmra.mrb[24].mxu0 %v6679_v58  ;;  %v8515_v58 = vld [vmem:[%s10460_s1 + $0x180] sm:$0xff]   ;;  %v3277_v47 = vshll.u32 %v6887_v41, 16 }
  0xe8   : > { %2731 = vmatmul.mubr.bf16.vlgmr.msra.gmra.mrb[24].mxu1 %v6681_v60  ;;  %7820 = vmatpush3.bf16.msra.mxu0 %v8478_v59  ;;  %v2828_v59 = vor.u32 %v2827_v53, %v2823_v44  ;;  %v2821_v60 = vor.u32 %v2820_v54, %v2816_v46  ;;  %v6889_v44 = vcombine.high %v6821_v42, %v6821_v42  ;;  %v3275_v46 = vshrl.u32 %v6887_v41, 16  ;;  %v8549_v50 = vld [vmem:[%s10460_s1 + $0xc0] sm:$0xff]  }
  0xe9   : > { %7842 = vmatpush3.bf16.msra.mxu1 %v8479_v61  ;;  %7821 = vmatprep.subr.bf16.mxu0 %v8480_v62  ;;  %v2842_v61 = vor.u32 %v2841_v55, %v2837_v49  ;;  %v2835_v62 = vor.u32 %v2834_v56, %v2830_v51  ;;  %v3270_v49 = vshll.u32 %v6886_v40, 16  ;;  %v3279_v55 = vrot.slane %v3277_v47, 1  ;;  %v6818_v41 = vld [vmem:[%s8937_s27 + $0x20] sm:$0x33] }
  0xea   : > { %7843 = vmatprep.subr.bf16.mxu1 %v8481_v63  ;;  %v8516_v63 = vld [vmem:[%s10460_s1 + $0x148] sm:$0xff]   ;;  %3071 = vmatprep.mubr.bf16.mxu0 %v2828_v59  ;;  %v3289_v51 = vshrl.u32 %v6889_v44, 16  ;;  %v3291_v52 = vshll.u32 %v6889_v44, 16  ;;  %v6922_v47 = vcombine.low %v6818_v41, %v6818_v41 }
  0xeb   : > { %3111 = vmatprep.mubr.bf16.mxu1 %v2842_v61  ;;  %v3272_v56 = vrot.slane %v3270_v49, 1  ;;  %v8552_v61 = vld [vmem:[%s10460_s1 + $0x48] sm:$0xff]  }
  0xec   : > { %7822 = vmatpush3.bf16.msra.mxu0 %v8482_v0  ;;  %v8517_v0 = vld [vmem:[%s10460_s1 + $0x1c8] sm:$0xff]  }
  0xed   : > { %7844 = vmatpush3.bf16.msra.mxu1 %v8483_v1  ;;  %7823 = vmatprep.subr.bf16.mxu0 %v8484_v2  ;;  %v8518_v1 = vld [vmem:[%s10460_s1 + $0x108] sm:$0xff]  }
  0xee   : > { %7845 = vmatprep.subr.bf16.mxu1 %v8485_v3  ;;  %v8519_v2 = vld [vmem:[%s10460_s1 + $0x188] sm:$0xff]   ;;  %v8520_v3 = vld [vmem:[%s10460_s1 + $0x150] sm:$0xff]  }
  0xf0   : > { %7824 = vmatpush3.bf16.msra.mxu0 %v8486_v4  ;;  %v8521_v4 = vld [vmem:[%s10460_s1 + $0x1d0] sm:$0xff]  }
  0xf1   : > { %7846 = vmatpush3.bf16.msra.mxu1 %v8487_v5  ;;  %7825 = vmatprep.subr.bf16.mxu0 %v8488_v6  ;;  %v8522_v5 = vld [vmem:[%s10460_s1 + $0x110] sm:$0xff]  }
  0xf2   : > { %7847 = vmatprep.subr.bf16.mxu1 %v8489_v7  ;;  %v8523_v6 = vld [vmem:[%s10460_s1 + $0x190] sm:$0xff]   ;;  %v8524_v7 = vld [vmem:[%s10460_s1 + $0x158] sm:$0xff]  }
  0xf4   : > { %7826 = vmatpush3.bf16.msra.mxu0 %v8490_v8  ;;  %v8525_v8 = vld [vmem:[%s10460_s1 + $0x1d8] sm:$0xff]  }
  0xf5   : > { %7848 = vmatpush3.bf16.msra.mxu1 %v8491_v9  ;;  %7827 = vmatprep.subr.bf16.mxu0 %v8492_v10  ;;  %v8526_v9 = vld [vmem:[%s10460_s1 + $0x118] sm:$0xff]  }
  0xf6   : > { %7849 = vmatprep.subr.bf16.mxu1 %v8493_v11  ;;  %v8527_v10 = vld [vmem:[%s10460_s1 + $0x198] sm:$0xff]   ;;  %v8528_v11 = vld [vmem:[%s10460_s1 + $0x160] sm:$0xff]  }
  0xf8   : > { %7828 = vmatpush3.bf16.msra.mxu0 %v8494_v12 }
  0xf9   : > { %7850 = vmatpush3.bf16.msra.mxu1 %v8495_v13  ;;  %7829 = vmatprep.subr.bf16.mxu0 %v8496_v18  ;;  %v8529_v13 = vld [vmem:[%s10460_s1 + $0x1e0] sm:$0xff]  }
  0xfa   : > { %v7527_v14 = vpop.f32.mrb[0].mxu0  ;;  %7851 = vmatprep.subr.bf16.mxu1 %v8497_v19 }
  0xfb   : > { %v7549_v15 = vpop.f32.mrb[0].mxu1  ;;  %v7528_v16 = vpop.f32.mrb[1].mxu0 }
  0xfc   : > { %v7550_v17 = vpop.f32.mrb[1].mxu1  ;;  %v7529_v20 = vadd.f32 %v7528_v16, %v7527_v14  ;;  %v7530_v22 = vpop.f32.mrb[2].mxu0  ;;  %7830 = vmatpush3.bf16.msra.mxu0 %v8498_v24  ;;  %v8531_v16 = vld [vmem:[%s10460_s1 + $0x1a0] sm:$0xff]  }
  0xfd   : > { %v7551_v21 = vadd.f32 %v7550_v17, %v7549_v15  ;;  %v7552_v23 = vpop.f32.mrb[2].mxu1  ;;  %v7531_v25 = vpop.f32.mrb[3].mxu0  ;;  %7852 = vmatpush3.bf16.msra.mxu1 %v8499_v27  ;;  %7831 = vmatprep.subr.bf16.mxu0 %v8500_v29  ;;  %v8530_v15 = vld [vmem:[%s10460_s1 + $0x120] sm:$0xff]   ;;  %v8533_v22 = vld [vmem:[%s10460_s1 + $0x1e8] sm:$0xff]  }
  0xfe   : > { %v7553_v28 = vpop.f32.mrb[3].mxu1  ;;  %7853 = vmatprep.subr.bf16.mxu1 %v8501_v30  ;;  %v8534_v27 = vld [vmem:[%s10460_s1 + $0x128] sm:$0xff]  }
  0xff   : > { %v9604_v26 = vadd.f32 %v7551_v21, %v7529_v20  ;;  %v8532_v21 = vld [vmem:[%s10460_s1 + $0x168] sm:$0xff]  }
 0x100   : > { %7832 = vmatpush3.bf16.msra.mxu0 %v8502_v31  ;;  %v8535_v28 = vld [vmem:[%s10460_s1 + $0x1a8] sm:$0xff]   ;;  %v8536_v31 = vld [vmem:[%s10460_s1 + $0x170] sm:$0xff]  }
 0x101   : > { %7854 = vmatpush3.bf16.msra.mxu1 %v8503_v32  ;;  %7833 = vmatprep.subr.bf16.mxu0 %v8504_v33  ;;  %v8538_v33 = vld [vmem:[%s10460_s1 + $0x130] sm:$0xff]  }
 0x102   : > { %7855 = vmatprep.subr.bf16.mxu1 %v8505_v34  ;;  %v8539_v34 = vld [vmem:[%s10460_s1 + $0x1b0] sm:$0xff]  }
 0x104   : > { %7834 = vmatpush3.bf16.msra.mxu0 %v8506_v35  ;;  %v8540_v35 = vld [vmem:[%s10460_s1 + $0x178] sm:$0xff]  }
 0x105   : > { %7856 = vmatpush3.bf16.msra.mxu1 %v8507_v36  ;;  %7863 = vmatprep.subr.bf16.mxu0 %v8512_v43  ;;  %v8541_v36 = vld [vmem:[%s10460_s1 + $0x1f8] sm:$0xff]   ;;  %v6888_v43 = vcombine.low %v6821_v42, %v6821_v42  ;;  %v6923_v42 = vcombine.high %v6818_v41, %v6818_v41  ;;  %v8624_v41 = vld [vmem:[%s10460_s1 + $0x348] sm:$0xff]  }
 0x106   : > { %7885 = vmatprep.subr.bf16.mxu1 %v8513_v48  ;;  %v3268_v48 = vshrl.u32 %v6886_v40, 16  ;;  %v8579_v40 = vld [vmem:[%s10460_s1 + $0xb8] sm:$0xff]  }
 0x107   : > { %3072 = vmatmul.mubr.bf16.vlgmr.msra.gmra.mrb[28].mxu0 %v2821_v60  ;;  %v3282_v53 = vshrl.u32 %v6888_v43, 16  ;;  %v3284_v54 = vshll.u32 %v6888_v43, 16  ;;  %v8551_v60 = vld [vmem:[%s10460_s1 + $0x80] sm:$0xff]   ;;  %v6819_v43 = vld [vmem:[%s8937_s27 + $0x28] sm:$0x33] }
 0x108   : > { %3112 = vmatmul.mubr.bf16.vlgmr.msra.gmra.mrb[28].mxu1 %v2835_v62  ;;  %7864 = vmatpush3.bf16.msra.mxu0 %v8514_v57  ;;  %v8550_v57 = vld [vmem:[%s10460_s1] sm:$0xff]   ;;  %v3280_v62 = vor.u32 %v3279_v55, %v3275_v46  ;;  %v6925_v44 = vcombine.high %v6819_v43, %v6819_v43  ;;  %v6924_v49 = vcombine.low %v6819_v43, %v6819_v43  ;;  %v8592_v55 = vld [vmem:[%s10460_s1 + $0x250] sm:$0xff]   ;;  %v8626_v43 = vld [vmem:[%s10460_s1 + $0x308] sm:$0xff]  }
 0x109   : > { %7886 = vmatpush3.bf16.msra.mxu1 %v8515_v58  ;;  %7865 = vmatprep.subr.bf16.mxu0 %v8516_v63  ;;  %v3293_v58 = vrot.slane %v3291_v52, 1  ;;  %v3286_v59 = vrot.slane %v3284_v54, 1  ;;  %v3273_v63 = vor.u32 %v3272_v56, %v3268_v48  ;;  %v8585_v46 = vld [vmem:[%s10460_s1 + $0x2c0] sm:$0xff]   ;;  %v8589_v52 = vld [vmem:[%s10460_s1 + $0x2c8] sm:$0xff]   ;;  %v8593_v56 = vld [vmem:[%s10460_s1 + $0x2d0] sm:$0xff]  }
 0x10a   : > { %7887 = vmatprep.subr.bf16.mxu1 %v8517_v0  ;;  %3523 = vmatprep.mubr.bf16.mxu0 %v3280_v62  ;;  %v8586_v48 = vld [vmem:[%s10460_s1 + $0x200] sm:$0xff]   ;;  %v8591_v54 = vld [vmem:[%s10460_s1 + $0x288] sm:$0xff]   ;;  %v8599_v62 = vld [vmem:[%s10460_s1 + $0x298] sm:$0xff]  }
 0x10b   : > { %v3294_v0 = vor.u32 %v3293_v58, %v3289_v51  ;;  %v8588_v51 = vld [vmem:[%s10460_s1 + $0x248] sm:$0xff]   ;;  %v8595_v58 = vld [vmem:[%s10460_s1 + $0x290] sm:$0xff]  }
 0x10c   : > { %7866 = vmatpush3.bf16.msra.mxu0 %v8518_v1  ;;  %v3287_v1 = vor.u32 %v3286_v59, %v3282_v53  ;;  %v8590_v53 = vld [vmem:[%s10460_s1 + $0x208] sm:$0xff]   ;;  %v8596_v59 = vld [vmem:[%s10460_s1 + $0x258] sm:$0xff]  }
 0x10d   : > { %7888 = vmatpush3.bf16.msra.mxu1 %v8519_v2  ;;  %7867 = vmatprep.subr.bf16.mxu0 %v8520_v3  ;;  %v8553_v2 = vld [vmem:[%s10460_s1 + $0xc8] sm:$0xff]  }
 0x10e   : > { %7889 = vmatprep.subr.bf16.mxu1 %v8521_v4  ;;  %v8554_v3 = vld [vmem:[%s10460_s1 + $0x8] sm:$0xff]   ;;  %3563 = vmatprep.mubr.bf16.mxu1 %v3294_v0  ;;  %v8601_v0 = vld [vmem:[%s10460_s1 + $0x2e0] sm:$0xff]  }
 0x10f   : > { %v8555_v4 = vld [vmem:[%s10460_s1 + $0x88] sm:$0xff]  }
 0x110   : > { %7868 = vmatpush3.bf16.msra.mxu0 %v8522_v5  ;;  %v8556_v5 = vld [vmem:[%s10460_s1 + $0x50] sm:$0xff]  }
 0x111   : > { %7890 = vmatpush3.bf16.msra.mxu1 %v8523_v6  ;;  %7869 = vmatprep.subr.bf16.mxu0 %v8524_v7  ;;  %v8557_v6 = vld [vmem:[%s10460_s1 + $0xd0] sm:$0xff]  }
 0x112   : > { %7891 = vmatprep.subr.bf16.mxu1 %v8525_v8  ;;  %v8558_v7 = vld [vmem:[%s10460_s1 + $0x10] sm:$0xff]  }
 0x113   : > { %v8559_v8 = vld [vmem:[%s10460_s1 + $0x90] sm:$0xff]  }
 0x114   : > { %7870 = vmatpush3.bf16.msra.mxu0 %v8526_v9  ;;  %v8560_v9 = vld [vmem:[%s10460_s1 + $0x58] sm:$0xff]  }
 0x115   : > { %7892 = vmatpush3.bf16.msra.mxu1 %v8527_v10  ;;  %7871 = vmatprep.subr.bf16.mxu0 %v8528_v11  ;;  %v8561_v10 = vld [vmem:[%s10460_s1 + $0xd8] sm:$0xff]  }
 0x116   : > { %7893 = vmatprep.subr.bf16.mxu1 %v8529_v13  ;;  %v8562_v11 = vld [vmem:[%s10460_s1 + $0x18] sm:$0xff]  }
 0x118   : > { %7872 = vmatpush3.bf16.msra.mxu0 %v8530_v15 }
 0x119   : > { %7894 = vmatpush3.bf16.msra.mxu1 %v8531_v16  ;;  %7873 = vmatprep.subr.bf16.mxu0 %v8532_v21  ;;  %v8565_v16 = vld [vmem:[%s10460_s1 + $0xe0] sm:$0xff]  }
 0x11a   : > { %v7571_v12 = vpop.f32.mrb[4].mxu0  ;;  %7895 = vmatprep.subr.bf16.mxu1 %v8533_v22  ;;  %v8567_v21 = vld [vmem:[%s10460_s1 + $0xa0] sm:$0xff]  }
 0x11b   : > { %v7593_v14 = vpop.f32.mrb[4].mxu1  ;;  %v7572_v17 = vpop.f32.mrb[5].mxu0 }
 0x11c   : > { %v7594_v18 = vpop.f32.mrb[5].mxu1  ;;  %v7573_v19 = vadd.f32 %v7572_v17, %v7571_v12  ;;  %v7574_v23 = vpop.f32.mrb[6].mxu0  ;;  %7874 = vmatpush3.bf16.msra.mxu0 %v8534_v27  ;;  %v8563_v12 = vld [vmem:[%s10460_s1 + $0x98] sm:$0xff]  }
 0x11d   : > { %v7595_v20 = vadd.f32 %v7594_v18, %v7593_v14  ;;  %v7596_v24 = vpop.f32.mrb[6].mxu1  ;;  %v7575_v29 = vpop.f32.mrb[7].mxu0  ;;  %7896 = vmatpush3.bf16.msra.mxu1 %v8535_v28  ;;  %7875 = vmatprep.subr.bf16.mxu0 %v8536_v31  ;;  %v8564_v14 = vld [vmem:[%s10460_s1 + $0x60] sm:$0xff]   ;;  %v8569_v28 = vld [vmem:[%s10460_s1 + $0xe8] sm:$0xff]  }
 0x11e   : > { %v861_v25 = vadd.f32 %v7573_v19, %v9604_v26  ;;  %v7597_v30 = vpop.f32.mrb[7].mxu1  ;;  %v8537_v26 = vld [vmem:[%s10460_s1 + $0x1f0] sm:$0xff]   ;;  %v8566_v18 = vld [vmem:[%s10460_s1 + $0x20] sm:$0xff]   ;;  %v8568_v24 = vld [vmem:[%s10460_s1 + $0x68] sm:$0xff]  }
 0x11f   : > { %7897 = vmatprep.subr.bf16.mxu1 %v8537_v26  ;;  %v8570_v30 = vld [vmem:[%s10460_s1 + $0x28] sm:$0xff]  }
 0x120   : > { %v9711_v32 = vadd.f32 %v7595_v20, %v861_v25  ;;  %7876 = vmatpush3.bf16.msra.mxu0 %v8538_v33  ;;  %v8571_v33 = vld [vmem:[%s10460_s1 + $0xa8] sm:$0xff]  }
 0x121   : > { %7898 = vmatpush3.bf16.msra.mxu1 %v8539_v34  ;;  %7877 = vmatprep.subr.bf16.mxu0 %v8540_v35  ;;  %v8572_v34 = vld [vmem:[%s10460_s1 + $0x70] sm:$0xff]  }
 0x122   : > { %7899 = vmatprep.subr.bf16.mxu1 %v8541_v36  ;;  %v8573_v35 = vld [vmem:[%s10460_s1 + $0xf0] sm:$0xff]  }
 0x123   : > { %v8575_v36 = vld [vmem:[%s10460_s1 + $0xb0] sm:$0xff]  }
 0x124   : > { %7878 = vmatpush3.bf16.msra.mxu0 %v8542_v37  ;;  %v8576_v37 = vld [vmem:[%s10460_s1 + $0x78] sm:$0xff]  }
 0x125   : > { %7900 = vmatpush3.bf16.msra.mxu1 %v8543_v38  ;;  %7907 = vmatprep.subr.bf16.mxu0 %v8548_v45  ;;  %v8577_v38 = vld [vmem:[%s10460_s1 + $0xf8] sm:$0xff]   ;;  %v8584_v45 = vld [vmem:[%s10460_s1 + $0x240] sm:$0xff]  }
 0x126   : > { %7929 = vmatprep.subr.bf16.mxu1 %v8549_v50  ;;  %v8587_v50 = vld [vmem:[%s10460_s1 + $0x280] sm:$0xff]  }
 0x127   : > { %3524 = vmatmul.mubr.bf16.vlgmr.msra.gmra.mrb[32].mxu0 %v3273_v63  ;;  %v8600_v63 = vld [vmem:[%s10460_s1 + $0x260] sm:$0xff]  }
 0x128   : > { %3564 = vmatmul.mubr.bf16.vlgmr.msra.gmra.mrb[32].mxu1 %v3287_v1  ;;  %7908 = vmatpush3.bf16.msra.mxu0 %v8550_v57  ;;  %v8594_v57 = vld [vmem:[%s10460_s1 + $0x210] sm:$0xff]  }
 0x129   : > { %7930 = vmatpush3.bf16.msra.mxu1 %v8551_v60  ;;  %7909 = vmatprep.subr.bf16.mxu0 %v8552_v61  ;;  %v8597_v60 = vld [vmem:[%s10460_s1 + $0x2d8] sm:$0xff]  }
 0x12a   : > { %7931 = vmatprep.subr.bf16.mxu1 %v8553_v2  ;;  %3809 = vmatprep.mubr.bf16.mxu0 %v6923_v42  ;;  %v8598_v61 = vld [vmem:[%s10460_s1 + $0x218] sm:$0xff]   ;;  %v8625_v42 = vld [vmem:[%s10460_s1 + $0x3c8] sm:$0xff]  }
 0x12b   : > { %3849 = vmatprep.mubr.bf16.mxu1 %v6925_v44  ;;  %v8627_v44 = vld [vmem:[%s10460_s1 + $0x388] sm:$0xff]  }
 0x12c   : > { %7910 = vmatpush3.bf16.msra.mxu0 %v8554_v3  ;;  %v8602_v3 = vld [vmem:[%s10460_s1 + $0x220] sm:$0xff]  }
 0x12d   : > { %7932 = vmatpush3.bf16.msra.mxu1 %v8555_v4  ;;  %7911 = vmatprep.subr.bf16.mxu0 %v8556_v5  ;;  %v8603_v4 = vld [vmem:[%s10460_s1 + $0x2a0] sm:$0xff]  }
 0x12e   : > { %7933 = vmatprep.subr.bf16.mxu1 %v8557_v6 }
 0x130   : > { %7912 = vmatpush3.bf16.msra.mxu0 %v8558_v7  ;;  %v8604_v7 = vld [vmem:[%s10460_s1 + $0x268] sm:$0xff]  }
 0x131   : > { %7934 = vmatpush3.bf16.msra.mxu1 %v8559_v8  ;;  %7913 = vmatprep.subr.bf16.mxu0 %v8560_v9 }
 0x132   : > { %7935 = vmatprep.subr.bf16.mxu1 %v8561_v10  ;;  %v6472_v10 = vld [vmem:[%s10461_s2] ss:$0 sm:$0xff] }
 0x134   : > { %7914 = vmatpush3.bf16.msra.mxu0 %v8562_v11  ;;  %v8605_v11 = vld [vmem:[%s10460_s1 + $0x2e8] sm:$0xff]  }
 0x135   : > { %7936 = vmatpush3.bf16.msra.mxu1 %v8563_v12  ;;  %7915 = vmatprep.subr.bf16.mxu0 %v8564_v14  ;;  %v8606_v14 = vld [vmem:[%s10460_s1 + $0x228] sm:$0xff]  }
 0x136   : > { %7937 = vmatprep.subr.bf16.mxu1 %v8565_v16  ;;  %v8607_v16 = vld [vmem:[%s10460_s1 + $0x2a8] sm:$0xff]  }
 0x138   : > { %7916 = vmatpush3.bf16.msra.mxu0 %v8566_v18 }
 0x139   : > { %7938 = vmatpush3.bf16.msra.mxu1 %v8567_v21  ;;  %7917 = vmatprep.subr.bf16.mxu0 %v8568_v24  ;;  %v8609_v21 = vld [vmem:[%s10460_s1 + $0x2f0] sm:$0xff]  }
 0x13a   : > { %v7615_v13 = vpop.f32.mrb[8].mxu0  ;;  %7939 = vmatprep.subr.bf16.mxu1 %v8569_v28  ;;  %v8611_v24 = vld [vmem:[%s10460_s1 + $0x2b0] sm:$0xff]   ;;  %v8613_v28 = vld [vmem:[%s10460_s1 + $0x2f8] sm:$0xff]  }
 0x13b   : > { %v7637_v15 = vpop.f32.mrb[8].mxu1  ;;  %v7616_v17 = vpop.f32.mrb[9].mxu0 }
 0x13c   : > { %v7617_v19 = vadd.f32 %v7616_v17, %v7615_v13  ;;  %v7638_v20 = vpop.f32.mrb[9].mxu1  ;;  %v7618_v23 = vpop.f32.mrb[10].mxu0  ;;  %7918 = vmatpush3.bf16.msra.mxu0 %v8570_v30  ;;  %v8614_v30 = vld [vmem:[%s10460_s1 + $0x238] sm:$0xff]  }
 0x13d   : > { %v7639_v22 = vadd.f32 %v7638_v20, %v7637_v15  ;;  %v7640_v25 = vpop.f32.mrb[10].mxu1  ;;  %v7619_v29 = vpop.f32.mrb[11].mxu0  ;;  %7940 = vmatpush3.bf16.msra.mxu1 %v8571_v33  ;;  %7919 = vmatprep.subr.bf16.mxu0 %v8572_v34  ;;  %v8610_v23 = vld [vmem:[%s10460_s1 + $0x230] sm:$0xff]   ;;  %v6959_v34 = vld [vmem:[%s8937_s27 + $0x38] sm:$0x33] }
 0x13e   : > { %v7641_v31 = vpop.f32.mrb[11].mxu1  ;;  %7941 = vmatprep.subr.bf16.mxu1 %v8573_v35  ;;  %v7027_v35 = vcombine.high %v6959_v34, %v6959_v34 }
 0x13f   : > { %v1255_v27 = vadd.f32 %v7639_v22, %v7617_v19  ;;  %v8608_v19 = vld [vmem:[%s10460_s1 + $0x270] sm:$0xff]   ;;  %v8615_v31 = vld [vmem:[%s10460_s1 + $0x2b8] sm:$0xff]  }
 0x141   : > { %v9806_v26 = vadd.f32 %v1255_v27, %v9711_v32  ;;  %v8574_v32 = vld [vmem:[%s10460_s1 + $0x30] sm:$0xff]   ;;  %7942 = vmatpush3.bf16.msra.mxu1 %v8575_v36  ;;  %v8612_v27 = vld [vmem:[%s10460_s1 + $0x278] sm:$0xff]  }
 0x142   : > { %7920 = vmatpush3.bf16.msra.mxu0 %v8574_v32  ;;  %7943 = vmatprep.subr.bf16.mxu1 %v8577_v38  ;;  %v8620_v32 = vld [vmem:[%s10460_s1 + $0x340] sm:$0xff]   ;;  %v7026_v38 = vcombine.low %v6959_v34, %v6959_v34 }
 0x143   : > { %7921 = vmatprep.subr.bf16.mxu0 %v8576_v37  ;;  %v8621_v37 = vld [vmem:[%s10460_s1 + $0x3c0] sm:$0xff]  }
 0x145   : > { %7944 = vmatpush3.bf16.msra.mxu1 %v8579_v40  ;;  %v8623_v40 = vld [vmem:[%s10460_s1 + $0x380] sm:$0xff]  }
 0x146   : > { %7922 = vmatpush3.bf16.msra.mxu0 %v8578_v39  ;;  %7973 = vmatprep.subr.bf16.mxu1 %v8585_v46  ;;  %v8622_v39 = vld [vmem:[%s10460_s1 + $0x300] sm:$0xff]   ;;  %v8629_v46 = vld [vmem:[%s10460_s1 + $0x3d0] sm:$0xff]  }
 0x147   : > { %7951 = vmatprep.subr.bf16.mxu0 %v8584_v45  ;;  %v8628_v45 = vld [vmem:[%s10460_s1 + $0x350] sm:$0xff]  }
 0x148   : > { %3850 = vmatmul.mubr.bf16.vlgmr.msra.gmra.mrb[36].mxu1 %v6924_v49  ;;  %v8632_v49 = vld [vmem:[%s10460_s1 + $0x358] sm:$0xff]  }
 0x149   : > { %3810 = vmatmul.mubr.bf16.vlgmr.msra.gmra.mrb[36].mxu0 %v6922_v47  ;;  %7974 = vmatpush3.bf16.msra.mxu1 %v8587_v50  ;;  %v8630_v47 = vld [vmem:[%s10460_s1 + $0x310] sm:$0xff]   ;;  %v8633_v50 = vld [vmem:[%s10460_s1 + $0x3d8] sm:$0xff]  }
 0x14a   : > { %7952 = vmatpush3.bf16.msra.mxu0 %v8586_v48  ;;  %7975 = vmatprep.subr.bf16.mxu1 %v8589_v52  ;;  %v8631_v48 = vld [vmem:[%s10460_s1 + $0x390] sm:$0xff]   ;;  %v8635_v52 = vld [vmem:[%s10460_s1 + $0x398] sm:$0xff]  }
 0x14b   : > { %7953 = vmatprep.subr.bf16.mxu0 %v8588_v51  ;;  %4202 = vmatprep.mubr.bf16.mxu1 %v7027_v35  ;;  %v8634_v51 = vld [vmem:[%s10460_s1 + $0x318] sm:$0xff]   ;;  %v8658_v35 = vld [vmem:[%s10460_s1 + $0x100] sm:$0xff]  }
 0x14d   : > { %7976 = vmatpush3.bf16.msra.mxu1 %v8591_v54  ;;  %v8637_v54 = vld [vmem:[%s10460_s1 + $0x3e0] sm:$0xff]  }
 0x14e   : > { %7954 = vmatpush3.bf16.msra.mxu0 %v8590_v53  ;;  %7977 = vmatprep.subr.bf16.mxu1 %v8593_v56  ;;  %v8636_v53 = vld [vmem:[%s10460_s1 + $0x360] sm:$0xff]  }
 0x14f   : > { %7955 = vmatprep.subr.bf16.mxu0 %v8592_v55  ;;  %v8638_v55 = vld [vmem:[%s10460_s1 + $0x320] sm:$0xff]  }
 0x151   : > { %7978 = vmatpush3.bf16.msra.mxu1 %v8595_v58 }
 0x152   : > { %7956 = vmatpush3.bf16.msra.mxu0 %v8594_v57  ;;  %7979 = vmatprep.subr.bf16.mxu1 %v8597_v60  ;;  %v8639_v57 = vld [vmem:[%s10460_s1 + $0x3a0] sm:$0xff]   ;;  %v8640_v60 = vld [vmem:[%s10460_s1 + $0x368] sm:$0xff]  }
 0x153   : > { %7957 = vmatprep.subr.bf16.mxu0 %v8596_v59 }
 0x155   : > { %7980 = vmatpush3.bf16.msra.mxu1 %v8599_v62 }
 0x156   : > { %7958 = vmatpush3.bf16.msra.mxu0 %v8598_v61  ;;  %7981 = vmatprep.subr.bf16.mxu1 %v8601_v0 }
 0x157   : > { %7959 = vmatprep.subr.bf16.mxu0 %v8600_v63  ;;  %v8641_v63 = vld [vmem:[%s10460_s1 + $0x3e8] sm:$0xff]  }
 0x159   : > { %7982 = vmatpush3.bf16.msra.mxu1 %v8603_v4 }
 0x15a   : > { %v7659_v1 = vpop.f32.mrb[12].mxu0  ;;  %7960 = vmatpush3.bf16.msra.mxu0 %v8602_v3  ;;  %7983 = vmatprep.subr.bf16.mxu1 %v8605_v11  ;;  %v8642_v3 = vld [vmem:[%s10460_s1 + $0x328] sm:$0xff]   ;;  %v8647_v11 = vld [vmem:[%s10460_s1 + $0x3b0] sm:$0xff]  }
 0x15b   : > { %v7681_v2 = vpop.f32.mrb[12].mxu1  ;;  %v7660_v5 = vpop.f32.mrb[13].mxu0  ;;  %7961 = vmatprep.subr.bf16.mxu0 %v8604_v7 }
 0x15c   : > { %v7682_v6 = vpop.f32.mrb[13].mxu1  ;;  %v7661_v8 = vadd.f32 %v7660_v5, %v7659_v1  ;;  %v7662_v12 = vpop.f32.mrb[14].mxu0 }
 0x15d   : > { %v7683_v9 = vadd.f32 %v7682_v6, %v7681_v2  ;;  %v7684_v13 = vpop.f32.mrb[14].mxu1  ;;  %v7663_v17 = vpop.f32.mrb[15].mxu0  ;;  %7984 = vmatpush3.bf16.msra.mxu1 %v8607_v16  ;;  %v8643_v6 = vld [vmem:[%s10460_s1 + $0x3a8] sm:$0xff]   ;;  %v8648_v12 = vld [vmem:[%s10460_s1 + $0x378] sm:$0xff]   ;;  %v7060_v16 = vld [vmem:[%s8937_s27 + $0x30] sm:$0x77] }
 0x15e   : > { %v7685_v18 = vpop.f32.mrb[15].mxu1  ;;  %7962 = vmatpush3.bf16.msra.mxu0 %v8606_v14  ;;  %7985 = vmatprep.subr.bf16.mxu1 %v8609_v21  ;;  %v8649_v13 = vld [vmem:[%s10460_s1 + $0x3f8] sm:$0xff]   ;;  %v7126_v17 = vcombine.low %v7060_v16, %v7060_v16 }
 0x15f   : > { %v1637_v15 = vadd.f32 %v7683_v9, %v7661_v8  ;;  %7963 = vmatprep.subr.bf16.mxu0 %v8608_v19  ;;  %v8644_v8 = vld [vmem:[%s10460_s1 + $0x370] sm:$0xff]   ;;  %v8650_v14 = vld [vmem:[%s10460_s1 + $0x338] sm:$0xff]   ;;  %v7127_v18 = vcombine.high %v7060_v16, %v7060_v16 }
 0x160   : > { %v8645_v9 = vld [vmem:[%s10460_s1 + $0x3f0] sm:$0xff]   ;;  %v7061_v19 = vld [vmem:[%s8937_s27 + $0x38] sm:$0x77] }
 0x161   : > { %v1642_v20 = vadd.f32 %v1637_v15, %v9806_v26  ;;  %v6958_v26 = vld [vmem:[%s8937_s27 + $0x30] sm:$0x33]  ;;  %7986 = vmatpush3.bf16.msra.mxu1 %v8611_v24  ;;  %v8651_v15 = vld [vmem:[%s10460_s1 + $0x3b8] sm:$0xff]   ;;  %v7129_v21 = vcombine.high %v7061_v19, %v7061_v19  ;;  %v4297_v24 = vshll.u32 %v7127_v18, 16 }
 0x162   : > { %7964 = vmatpush3.bf16.msra.mxu0 %v8610_v23  ;;  %v7025_v33 = vcombine.high %v6958_v26, %v6958_v26  ;;  %7987 = vmatprep.subr.bf16.mxu1 %v8613_v28  ;;  %v7024_v36 = vcombine.low %v6958_v26, %v6958_v26  ;;  %v4295_v23 = vshrl.u32 %v7127_v18, 16  ;;  %v8657_v28 = vld [vmem:[%s10460_s1 + $0x1c0] sm:$0xff]   ;;  %v8686_v16 = vld [vmem:[%s10460_s1 + $0x138] sm:$0xff]   ;;  %v7165_v18 = vld [vmem:[%s8937_s27 + $0x30] sm:$0x77] }
 0x163   : > { %v1649_v22 = vadd.f32 %v6472_v10, %v1642_v20  ;;  %7965 = vmatprep.subr.bf16.mxu0 %v8612_v27  ;;  %v8646_v10 = vld [vmem:[%s10460_s1 + $0x330] sm:$0xff]   ;;  %v7128_v20 = vcombine.low %v7061_v19, %v7061_v19  ;;  %v4290_v27 = vshll.u32 %v7126_v17, 16  ;;  %v7231_v19 = vcombine.low %v7165_v18, %v7165_v18 }
 0x164   : > { %4162 = vmatprep.mubr.bf16.mxu0 %v7025_v33  ;;  %v4299_v33 = vrot.slane %v4297_v24, 1  ;;  %v8692_v24 = vld [vmem:[%s10460_s1 + $0x40] sm:$0xff]  }
 0x165   : > { %v1650_v25 = vmax.f32 %v1649_v22, 0.0  ;;  %7988 = vmatpush3.bf16.msra.mxu1 %v8615_v31  ;;  %v8656_v22 = vld [vmem:[%s10460_s1 + $0x140] sm:$0xff]   ;;  %v4302_v31 = vshrl.u32 %v7128_v20, 16  ;;  %v4304_v26 = vshll.u32 %v7128_v20, 16  ;;  %v4292_v34 = vrot.slane %v4290_v27, 1 }
 0x166   : > { %7966 = vmatpush3.bf16.msra.mxu0 %v8614_v30  ;;  %8017 = vmatprep.subr.bf16.mxu1 %v8621_v37  ;;  %v4311_v30 = vshll.u32 %v7129_v21, 16  ;;  %v8659_v37 = vld [vmem:[%s10460_s1 + $0x180] sm:$0xff]   ;;  %v7232_v20 = vcombine.high %v7165_v18, %v7165_v18  ;;  %v8722_v18 = vld [vmem:[%s10460_s1 + $0x38] sm:$0xff]  }
 0x167   : > { %v1651_v29 = vpack.c.bf16 %v1650_v25, %v1650_v25  ;;  %7995 = vmatprep.subr.bf16.mxu0 %v8620_v32  ;;  %v4288_v25 = vshrl.u32 %v7126_v17, 16  ;;  %v8687_v17 = vld [vmem:[%s10460_s1 + $0x1b8] sm:$0xff]  }
 0x168   : > { %4203 = vmatmul.mubr.bf16.vlgmr.msra.gmra.mrb[40].mxu1 %v7026_v38  ;;  %v4313_v32 = vrot.slane %v4311_v30, 1  ;;  %v8660_v38 = vld [vmem:[%s10460_s1 + $0x148] sm:$0xff]   ;;  %v4749_v27 = vshll.u32 %v7232_v20, 16  ;;  %v8693_v30 = vld [vmem:[%s10460_s1 + $0xc0] sm:$0xff]  }
 0x169   : > { %1652 = vst [vmem:[%s9932_s21] sm:$0x3] %v1651_v29  ;;  %4163 = vmatmul.mubr.bf16.vlgmr.msra.gmra.mrb[40].mxu0 %v7024_v36  ;;  %8018 = vmatpush3.bf16.msra.mxu1 %v8623_v40  ;;  %v4309_v29 = vshrl.u32 %v7129_v21, 16  ;;  %v4306_v36 = vrot.slane %v4304_v26, 1  ;;  %v4293_v40 = vor.u32 %v4292_v34, %v4288_v25  ;;  %v7166_v21 = vld [vmem:[%s8937_s27 + $0x38] sm:$0x77]  ;;  %v4747_v25 = vshrl.u32 %v7232_v20, 16 }
 0x16a   : > { %7996 = vmatpush3.bf16.msra.mxu0 %v8622_v39  ;;  %8019 = vmatprep.subr.bf16.mxu1 %v8625_v42  ;;  %v4300_v39 = vor.u32 %v4299_v33, %v4295_v23  ;;  %v7234_v23 = vcombine.high %v7166_v21, %v7166_v21  ;;  %v7163_v20 = vld [vmem:[%s8937_s27 + $0x30] sm:$0x33] }
 0x16b   : > { %7997 = vmatprep.subr.bf16.mxu0 %v8624_v41  ;;  %v4314_v41 = vor.u32 %v4313_v32, %v4309_v29  ;;  %v4307_v42 = vor.u32 %v4306_v36, %v4302_v31  ;;  %v4742_v29 = vshll.u32 %v7231_v19, 16  ;;  %v8694_v36 = vld [vmem:[%s10460_s1] sm:$0xff]  }
 0x16c   : > { %4543 = vmatprep.mubr.bf16.mxu0 %v4300_v39  ;;  %v4761_v31 = vshrl.u32 %v7234_v23, 16  ;;  %v4763_v26 = vshll.u32 %v7234_v23, 16  ;;  %v8695_v39 = vld [vmem:[%s10460_s1 + $0x80] sm:$0xff]  }
 0x16d   : > { %8020 = vmatpush3.bf16.msra.mxu1 %v8627_v44  ;;  %v8662_v44 = vld [vmem:[%s10460_s1 + $0x108] sm:$0xff]   ;;  %4583 = vmatprep.mubr.bf16.mxu1 %v4314_v41  ;;  %v4744_v32 = vrot.slane %v4742_v29, 1 }
 0x16e   : > { %7998 = vmatpush3.bf16.msra.mxu0 %v8626_v43  ;;  %8021 = vmatprep.subr.bf16.mxu1 %v8629_v46  ;;  %v8661_v43 = vld [vmem:[%s10460_s1 + $0x1c8] sm:$0xff]   ;;  %v8664_v46 = vld [vmem:[%s10460_s1 + $0x150] sm:$0xff]  }
 0x16f   : > { %7999 = vmatprep.subr.bf16.mxu0 %v8628_v45  ;;  %v8663_v45 = vld [vmem:[%s10460_s1 + $0x188] sm:$0xff]  }
 0x171   : > { %8022 = vmatpush3.bf16.msra.mxu1 %v8631_v48  ;;  %v8666_v48 = vld [vmem:[%s10460_s1 + $0x110] sm:$0xff]  }
 0x172   : > { %8000 = vmatpush3.bf16.msra.mxu0 %v8630_v47  ;;  %8023 = vmatprep.subr.bf16.mxu1 %v8633_v50  ;;  %v8665_v47 = vld [vmem:[%s10460_s1 + $0x1d0] sm:$0xff]   ;;  %v8668_v50 = vld [vmem:[%s10460_s1 + $0x158] sm:$0xff]  }
 0x173   : > { %8001 = vmatprep.subr.bf16.mxu0 %v8632_v49  ;;  %v8667_v49 = vld [vmem:[%s10460_s1 + $0x190] sm:$0xff]  }
 0x175   : > { %8024 = vmatpush3.bf16.msra.mxu1 %v8635_v52  ;;  %v8670_v52 = vld [vmem:[%s10460_s1 + $0x118] sm:$0xff]  }
 0x176   : > { %8002 = vmatpush3.bf16.msra.mxu0 %v8634_v51  ;;  %8025 = vmatprep.subr.bf16.mxu1 %v8637_v54  ;;  %v8669_v51 = vld [vmem:[%s10460_s1 + $0x1d8] sm:$0xff]   ;;  %v8672_v54 = vld [vmem:[%s10460_s1 + $0x160] sm:$0xff]  }
 0x177   : > { %8003 = vmatprep.subr.bf16.mxu0 %v8636_v53  ;;  %v8671_v53 = vld [vmem:[%s10460_s1 + $0x198] sm:$0xff]  }
 0x179   : > { %8026 = vmatpush3.bf16.msra.mxu1 %v8639_v57 }
 0x17a   : > { %v7703_v56 = vpop.f32.mrb[16].mxu0  ;;  %8004 = vmatpush3.bf16.msra.mxu0 %v8638_v55  ;;  %8027 = vmatprep.subr.bf16.mxu1 %v8641_v63 }
 0x17b   : > { %v7725_v58 = vpop.f32.mrb[16].mxu1  ;;  %v7704_v59 = vpop.f32.mrb[17].mxu0  ;;  %8005 = vmatprep.subr.bf16.mxu0 %v8640_v60  ;;  %v8675_v60 = vld [vmem:[%s10460_s1 + $0x1a0] sm:$0xff]  }
 0x17c   : > { %v7705_v61 = vadd.f32 %v7704_v59, %v7703_v56  ;;  %v7726_v62 = vpop.f32.mrb[17].mxu1  ;;  %v7706_v1 = vpop.f32.mrb[18].mxu0  ;;  %v8673_v56 = vld [vmem:[%s10460_s1 + $0x1e0] sm:$0xff]  }
 0x17d   : > { %v7727_v0 = vadd.f32 %v7726_v62, %v7725_v58  ;;  %v7728_v2 = vpop.f32.mrb[18].mxu1  ;;  %v7707_v4 = vpop.f32.mrb[19].mxu0  ;;  %8028 = vmatpush3.bf16.msra.mxu1 %v8643_v6  ;;  %v8674_v58 = vld [vmem:[%s10460_s1 + $0x120] sm:$0xff]   ;;  %v8678_v6 = vld [vmem:[%s10460_s1 + $0x128] sm:$0xff]  }
 0x17e   : > { %v7729_v7 = vpop.f32.mrb[19].mxu1  ;;  %8006 = vmatpush3.bf16.msra.mxu0 %v8642_v3  ;;  %8029 = vmatprep.subr.bf16.mxu1 %v8645_v9  ;;  %v8677_v3 = vld [vmem:[%s10460_s1 + $0x1e8] sm:$0xff]  }
 0x17f   : > { %v10015_v5 = vadd.f32 %v7727_v0, %v7705_v61  ;;  %8007 = vmatprep.subr.bf16.mxu0 %v8644_v8  ;;  %v8676_v0 = vld [vmem:[%s10460_s1 + $0x168] sm:$0xff]  }
 0x180   : > { %v8679_v9 = vld [vmem:[%s10460_s1 + $0x1a8] sm:$0xff]  }
 0x181   : > { %8030 = vmatpush3.bf16.msra.mxu1 %v8647_v11  ;;  %v8681_v11 = vld [vmem:[%s10460_s1 + $0x1f0] sm:$0xff]  }
 0x182   : > { %8008 = vmatpush3.bf16.msra.mxu0 %v8646_v10  ;;  %8031 = vmatprep.subr.bf16.mxu1 %v8649_v13  ;;  %v8683_v13 = vld [vmem:[%s10460_s1 + $0x1b0] sm:$0xff]  }
 0x183   : > { %8009 = vmatprep.subr.bf16.mxu0 %v8648_v12  ;;  %v8682_v12 = vld [vmem:[%s10460_s1 + $0x130] sm:$0xff]  }
 0x185   : > { %8032 = vmatpush3.bf16.msra.mxu1 %v8651_v15  ;;  %v8685_v15 = vld [vmem:[%s10460_s1 + $0x1f8] sm:$0xff]  }
 0x186   : > { %8010 = vmatpush3.bf16.msra.mxu0 %v8650_v14  ;;  %8061 = vmatprep.subr.bf16.mxu1 %v8657_v28  ;;  %v8684_v14 = vld [vmem:[%s10460_s1 + $0x178] sm:$0xff]   ;;  %v4740_v28 = vshrl.u32 %v7231_v19, 16 }
 0x187   : > { %8039 = vmatprep.subr.bf16.mxu0 %v8656_v22  ;;  %v7233_v22 = vcombine.low %v7166_v21, %v7166_v21  ;;  %v8723_v19 = vld [vmem:[%s10460_s1 + $0xb8] sm:$0xff]   ;;  %v7268_v21 = vcombine.high %v7163_v20, %v7163_v20 }
 0x188   : > { %4584 = vmatmul.mubr.bf16.vlgmr.msra.gmra.mrb[44].mxu1 %v4307_v42  ;;  %v4745_v42 = vor.u32 %v4744_v32, %v4740_v28  ;;  %v8730_v28 = vld [vmem:[%s10460_s1 + $0x200] sm:$0xff]   ;;  %v8737_v32 = vld [vmem:[%s10460_s1 + $0x2d0] sm:$0xff]  }
 0x189   : > { %4544 = vmatmul.mubr.bf16.vlgmr.msra.gmra.mrb[44].mxu0 %v4293_v40  ;;  %8062 = vmatpush3.bf16.msra.mxu1 %v8659_v37  ;;  %v4754_v33 = vshrl.u32 %v7233_v22, 16  ;;  %v4756_v34 = vshll.u32 %v7233_v22, 16  ;;  %v4765_v37 = vrot.slane %v4763_v26, 1  ;;  %v8696_v40 = vld [vmem:[%s10460_s1 + $0x48] sm:$0xff]   ;;  %v7164_v22 = vld [vmem:[%s8937_s27 + $0x38] sm:$0x33] }
 0x18a   : > { %8040 = vmatpush3.bf16.msra.mxu0 %v8658_v35  ;;  %8063 = vmatprep.subr.bf16.mxu1 %v8661_v43  ;;  %v4751_v35 = vrot.slane %v4749_v27, 1  ;;  %v7270_v23 = vcombine.high %v7164_v22, %v7164_v22  ;;  %v7267_v27 = vcombine.low %v7163_v20, %v7163_v20  ;;  %v7269_v29 = vcombine.low %v7164_v22, %v7164_v22  ;;  %v8733_v26 = vld [vmem:[%s10460_s1 + $0x2c8] sm:$0xff]  }
 0x18b   : > { %8041 = vmatprep.subr.bf16.mxu0 %v8660_v38  ;;  %v4758_v38 = vrot.slane %v4756_v34, 1  ;;  %v4766_v43 = vor.u32 %v4765_v37, %v4761_v31  ;;  %v8732_v31 = vld [vmem:[%s10460_s1 + $0x248] sm:$0xff]   ;;  %v8739_v37 = vld [vmem:[%s10460_s1 + $0x290] sm:$0xff]  }
 0x18c   : > { %v4752_v41 = vor.u32 %v4751_v35, %v4747_v25  ;;  %v8729_v25 = vld [vmem:[%s10460_s1 + $0x2c0] sm:$0xff]   ;;  %v8735_v34 = vld [vmem:[%s10460_s1 + $0x288] sm:$0xff]   ;;  %v8736_v35 = vld [vmem:[%s10460_s1 + $0x250] sm:$0xff]  }
 0x18d   : > { %8064 = vmatpush3.bf16.msra.mxu1 %v8663_v45  ;;  %v8697_v45 = vld [vmem:[%s10460_s1 + $0xc8] sm:$0xff]   ;;  %5035 = vmatprep.mubr.bf16.mxu1 %v4766_v43  ;;  %v8745_v43 = vld [vmem:[%s10460_s1 + $0x2e0] sm:$0xff]  }
 0x18e   : > { %8042 = vmatpush3.bf16.msra.mxu0 %v8662_v44  ;;  %8065 = vmatprep.subr.bf16.mxu1 %v8665_v47  ;;  %v4759_v44 = vor.u32 %v4758_v38, %v4754_v33  ;;  %v8699_v47 = vld [vmem:[%s10460_s1 + $0x88] sm:$0xff]   ;;  %v8740_v38 = vld [vmem:[%s10460_s1 + $0x258] sm:$0xff]  }
 0x18f   : > { %8043 = vmatprep.subr.bf16.mxu0 %v8664_v46  ;;  %4995 = vmatprep.mubr.bf16.mxu0 %v4752_v41  ;;  %v8698_v46 = vld [vmem:[%s10460_s1 + $0x8] sm:$0xff]   ;;  %v8743_v41 = vld [vmem:[%s10460_s1 + $0x298] sm:$0xff]  }
 0x190   : > { %v8734_v33 = vld [vmem:[%s10460_s1 + $0x208] sm:$0xff]  }
 0x191   : > { %8066 = vmatpush3.bf16.msra.mxu1 %v8667_v49  ;;  %v8701_v49 = vld [vmem:[%s10460_s1 + $0xd0] sm:$0xff]   ;;  %v8768_v20 = vld [vmem:[%s10460_s1 + $0x348] sm:$0xff]  }
 0x192   : > { %8044 = vmatpush3.bf16.msra.mxu0 %v8666_v48  ;;  %8067 = vmatprep.subr.bf16.mxu1 %v8669_v51  ;;  %v8700_v48 = vld [vmem:[%s10460_s1 + $0x50] sm:$0xff]   ;;  %v8770_v22 = vld [vmem:[%s10460_s1 + $0x308] sm:$0xff]  }
 0x193   : > { %8045 = vmatprep.subr.bf16.mxu0 %v8668_v50  ;;  %v8702_v50 = vld [vmem:[%s10460_s1 + $0x10] sm:$0xff]  }
 0x194   : > { %v8703_v51 = vld [vmem:[%s10460_s1 + $0x90] sm:$0xff]  }
 0x195   : > { %8068 = vmatpush3.bf16.msra.mxu1 %v8671_v53  ;;  %v8705_v53 = vld [vmem:[%s10460_s1 + $0xd8] sm:$0xff]  }
 0x196   : > { %8046 = vmatpush3.bf16.msra.mxu0 %v8670_v52  ;;  %8069 = vmatprep.subr.bf16.mxu1 %v8673_v56  ;;  %v8704_v52 = vld [vmem:[%s10460_s1 + $0x58] sm:$0xff]  }
 0x197   : > { %8047 = vmatprep.subr.bf16.mxu0 %v8672_v54  ;;  %v8706_v54 = vld [vmem:[%s10460_s1 + $0x18] sm:$0xff]  }
 0x198   : > { %v8707_v56 = vld [vmem:[%s10460_s1 + $0x98] sm:$0xff]  }
 0x199   : > { %8070 = vmatpush3.bf16.msra.mxu1 %v8675_v60  ;;  %v8709_v60 = vld [vmem:[%s10460_s1 + $0xe0] sm:$0xff]  }
 0x19a   : > { %v7747_v55 = vpop.f32.mrb[20].mxu0  ;;  %8048 = vmatpush3.bf16.msra.mxu0 %v8674_v58  ;;  %8071 = vmatprep.subr.bf16.mxu1 %v8677_v3  ;;  %v8708_v58 = vld [vmem:[%s10460_s1 + $0x60] sm:$0xff]  }
 0x19b   : > { %v7769_v57 = vpop.f32.mrb[20].mxu1  ;;  %v7748_v59 = vpop.f32.mrb[21].mxu0  ;;  %8049 = vmatprep.subr.bf16.mxu0 %v8676_v0 }
 0x19c   : > { %v7749_v61 = vadd.f32 %v7748_v59, %v7747_v55  ;;  %v7770_v62 = vpop.f32.mrb[21].mxu1  ;;  %v7750_v1 = vpop.f32.mrb[22].mxu0 }
 0x19d   : > { %v7771_v63 = vadd.f32 %v7770_v62, %v7769_v57  ;;  %v7772_v4 = vpop.f32.mrb[22].mxu1  ;;  %v7751_v7 = vpop.f32.mrb[23].mxu0  ;;  %8072 = vmatpush3.bf16.msra.mxu1 %v8679_v9  ;;  %v8713_v9 = vld [vmem:[%s10460_s1 + $0xe8] sm:$0xff]  }
 0x19e   : > { %v2340_v2 = vadd.f32 %v7749_v61, %v10015_v5  ;;  %v7773_v10 = vpop.f32.mrb[23].mxu1  ;;  %v8680_v5 = vld [vmem:[%s10460_s1 + $0x170] sm:$0xff]   ;;  %8050 = vmatpush3.bf16.msra.mxu0 %v8678_v6  ;;  %8073 = vmatprep.subr.bf16.mxu1 %v8681_v11  ;;  %v8712_v6 = vld [vmem:[%s10460_s1 + $0x68] sm:$0xff]  }
 0x19f   : > { %8051 = vmatprep.subr.bf16.mxu0 %v8680_v5  ;;  %v8714_v11 = vld [vmem:[%s10460_s1 + $0x28] sm:$0xff]  }
 0x1a0   : > { %v10116_v8 = vadd.f32 %v7771_v63, %v2340_v2  ;;  %v8710_v63 = vld [vmem:[%s10460_s1 + $0x20] sm:$0xff]  }
 0x1a1   : > { %8074 = vmatpush3.bf16.msra.mxu1 %v8683_v13  ;;  %v8711_v2 = vld [vmem:[%s10460_s1 + $0xa0] sm:$0xff]   ;;  %v8716_v13 = vld [vmem:[%s10460_s1 + $0x70] sm:$0xff]  }
 0x1a2   : > { %8052 = vmatpush3.bf16.msra.mxu0 %v8682_v12  ;;  %8075 = vmatprep.subr.bf16.mxu1 %v8685_v15  ;;  %v8715_v12 = vld [vmem:[%s10460_s1 + $0xa8] sm:$0xff]   ;;  %v8719_v15 = vld [vmem:[%s10460_s1 + $0xb0] sm:$0xff]  }
 0x1a3   : > { %8053 = vmatprep.subr.bf16.mxu0 %v8684_v14  ;;  %v8718_v14 = vld [vmem:[%s10460_s1 + $0x30] sm:$0xff]  }
 0x1a5   : > { %8076 = vmatpush3.bf16.msra.mxu1 %v8687_v17  ;;  %v8721_v17 = vld [vmem:[%s10460_s1 + $0xf8] sm:$0xff]  }
 0x1a6   : > { %8054 = vmatpush3.bf16.msra.mxu0 %v8686_v16  ;;  %8105 = vmatprep.subr.bf16.mxu1 %v8693_v30  ;;  %v8720_v16 = vld [vmem:[%s10460_s1 + $0x78] sm:$0xff]   ;;  %v8731_v30 = vld [vmem:[%s10460_s1 + $0x280] sm:$0xff]  }
 0x1a7   : > { %8083 = vmatprep.subr.bf16.mxu0 %v8692_v24  ;;  %v8728_v24 = vld [vmem:[%s10460_s1 + $0x240] sm:$0xff]  }
 0x1a8   : > { %5036 = vmatmul.mubr.bf16.vlgmr.msra.gmra.mrb[48].mxu1 %v4759_v44 }
 0x1a9   : > { %4996 = vmatmul.mubr.bf16.vlgmr.msra.gmra.mrb[48].mxu0 %v4745_v42  ;;  %8106 = vmatpush3.bf16.msra.mxu1 %v8695_v39  ;;  %v8741_v39 = vld [vmem:[%s10460_s1 + $0x2d8] sm:$0xff]   ;;  %v8744_v42 = vld [vmem:[%s10460_s1 + $0x260] sm:$0xff]  }
 0x1aa   : > { %8084 = vmatpush3.bf16.msra.mxu0 %v8694_v36  ;;  %8107 = vmatprep.subr.bf16.mxu1 %v8697_v45  ;;  %v8738_v36 = vld [vmem:[%s10460_s1 + $0x210] sm:$0xff]   ;;  %v8746_v45 = vld [vmem:[%s10460_s1 + $0x220] sm:$0xff]  }
 0x1ab   : > { %8085 = vmatprep.subr.bf16.mxu0 %v8696_v40  ;;  %5281 = vmatprep.mubr.bf16.mxu0 %v7268_v21  ;;  %v8742_v40 = vld [vmem:[%s10460_s1 + $0x218] sm:$0xff]   ;;  %v8769_v21 = vld [vmem:[%s10460_s1 + $0x3c8] sm:$0xff]  }
 0x1ac   : > { %5321 = vmatprep.mubr.bf16.mxu1 %v7270_v23  ;;  %v8771_v23 = vld [vmem:[%s10460_s1 + $0x388] sm:$0xff]  }
 0x1ad   : > { %8108 = vmatpush3.bf16.msra.mxu1 %v8699_v47  ;;  %v8747_v47 = vld [vmem:[%s10460_s1 + $0x2a0] sm:$0xff]  }
 0x1ae   : > { %8086 = vmatpush3.bf16.msra.mxu0 %v8698_v46  ;;  %8109 = vmatprep.subr.bf16.mxu1 %v8701_v49 }
 0x1af   : > { %8087 = vmatprep.subr.bf16.mxu0 %v8700_v48 }
 0x1b1   : > { %8110 = vmatpush3.bf16.msra.mxu1 %v8703_v51 }
 0x1b2   : > { %8088 = vmatpush3.bf16.msra.mxu0 %v8702_v50  ;;  %8111 = vmatprep.subr.bf16.mxu1 %v8705_v53  ;;  %v8748_v50 = vld [vmem:[%s10460_s1 + $0x268] sm:$0xff]  }
 0x1b3   : > { %8089 = vmatprep.subr.bf16.mxu0 %v8704_v52  ;;  %v8749_v53 = vld [vmem:[%s10460_s1 + $0x2e8] sm:$0xff]  }
 0x1b5   : > { %8112 = vmatpush3.bf16.msra.mxu1 %v8707_v56  ;;  %v8750_v56 = vld [vmem:[%s10460_s1 + $0x228] sm:$0xff]  }
 0x1b6   : > { %8090 = vmatpush3.bf16.msra.mxu0 %v8706_v54  ;;  %8113 = vmatprep.subr.bf16.mxu1 %v8709_v60 }
 0x1b7   : > { %8091 = vmatprep.subr.bf16.mxu0 %v8708_v58  ;;  %v8751_v58 = vld [vmem:[%s10460_s1 + $0x2a8] sm:$0xff]  }
 0x1b9   : > { %8114 = vmatpush3.bf16.msra.mxu1 %v8711_v2  ;;  %v8754_v2 = vld [vmem:[%s10460_s1 + $0x230] sm:$0xff]  }
 0x1ba   : > { %v7791_v55 = vpop.f32.mrb[24].mxu0  ;;  %8092 = vmatpush3.bf16.msra.mxu0 %v8710_v63  ;;  %8115 = vmatprep.subr.bf16.mxu1 %v8713_v9  ;;  %v8753_v63 = vld [vmem:[%s10460_s1 + $0x2f0] sm:$0xff]  }
 0x1bb   : > { %v7813_v57 = vpop.f32.mrb[24].mxu1  ;;  %v7792_v59 = vpop.f32.mrb[25].mxu0  ;;  %8093 = vmatprep.subr.bf16.mxu0 %v8712_v6  ;;  %v8756_v6 = vld [vmem:[%s10460_s1 + $0x278] sm:$0xff]  }
 0x1bc   : > { %v7793_v61 = vadd.f32 %v7792_v59, %v7791_v55  ;;  %v7814_v62 = vpop.f32.mrb[25].mxu1  ;;  %v7794_v1 = vpop.f32.mrb[26].mxu0 }
 0x1bd   : > { %v7815_v0 = vadd.f32 %v7814_v62, %v7813_v57  ;;  %v7816_v3 = vpop.f32.mrb[26].mxu1  ;;  %v7795_v7 = vpop.f32.mrb[27].mxu0  ;;  %8116 = vmatpush3.bf16.msra.mxu1 %v8715_v12  ;;  %v7304_v12 = vld [vmem:[%s8937_s27 + $0x48] sm:$0x33] }
 0x1be   : > { %v7817_v10 = vpop.f32.mrb[27].mxu1  ;;  %8094 = vmatpush3.bf16.msra.mxu0 %v8714_v11  ;;  %v8755_v3 = vld [vmem:[%s10460_s1 + $0x2b0] sm:$0xff]   ;;  %v8757_v7 = vld [vmem:[%s10460_s1 + $0x2f8] sm:$0xff]   ;;  %v7303_v11 = vld [vmem:[%s8937_s27 + $0x40] sm:$0x33] }
 0x1bf   : > { %v2733_v4 = vadd.f32 %v7815_v0, %v7793_v61  ;;  %8095 = vmatprep.subr.bf16.mxu0 %v8716_v13  ;;  %v8752_v61 = vld [vmem:[%s10460_s1 + $0x270] sm:$0xff]   ;;  %v10330_v0 = vld [vmem:[%s10461_s2] ss:$0 sm:$0xff]  ;;  %v8758_v10 = vld [vmem:[%s10460_s1 + $0x238] sm:$0xff]   ;;  %v7370_v13 = vcombine.high %v7303_v11, %v7303_v11 }
 0x1c1   : > { %v10214_v5 = vadd.f32 %v2733_v4, %v10116_v8  ;;  %v8717_v8 = vld [vmem:[%s10460_s1 + $0xf0] sm:$0xff]  }
 0x1c2   : > { %8117 = vmatprep.subr.bf16.mxu1 %v8717_v8  ;;  %8096 = vmatpush3.bf16.msra.mxu0 %v8718_v14  ;;  %v8764_v8 = vld [vmem:[%s10460_s1 + $0x340] sm:$0xff]   ;;  %v7372_v14 = vcombine.high %v7304_v12, %v7304_v12 }
 0x1c3   : > { %8118 = vmatpush3.bf16.msra.mxu1 %v8719_v15  ;;  %8097 = vmatprep.subr.bf16.mxu0 %v8720_v16  ;;  %v8765_v15 = vld [vmem:[%s10460_s1 + $0x3c0] sm:$0xff]   ;;  %v7369_v16 = vcombine.low %v7303_v11, %v7303_v11 }
 0x1c4   : > { %8119 = vmatprep.subr.bf16.mxu1 %v8721_v17  ;;  %v8766_v17 = vld [vmem:[%s10460_s1 + $0x300] sm:$0xff]  }
 0x1c6   : > { %8098 = vmatpush3.bf16.msra.mxu0 %v8722_v18  ;;  %v7371_v18 = vcombine.low %v7304_v12, %v7304_v12 }
 0x1c7   : > { %8120 = vmatpush3.bf16.msra.mxu1 %v8723_v19  ;;  %8127 = vmatprep.subr.bf16.mxu0 %v8728_v24  ;;  %v8767_v19 = vld [vmem:[%s10460_s1 + $0x380] sm:$0xff]   ;;  %v8772_v24 = vld [vmem:[%s10460_s1 + $0x350] sm:$0xff]  }
 0x1c8   : > { %8149 = vmatprep.subr.bf16.mxu1 %v8729_v25  ;;  %v8773_v25 = vld [vmem:[%s10460_s1 + $0x3d0] sm:$0xff]  }
 0x1c9   : > { %5282 = vmatmul.mubr.bf16.vlgmr.msra.gmra.mrb[52].mxu0 %v7267_v27  ;;  %v8774_v27 = vld [vmem:[%s10460_s1 + $0x310] sm:$0xff]  }
 0x1ca   : > { %5322 = vmatmul.mubr.bf16.vlgmr.msra.gmra.mrb[52].mxu1 %v7269_v29  ;;  %8128 = vmatpush3.bf16.msra.mxu0 %v8730_v28  ;;  %v8775_v28 = vld [vmem:[%s10460_s1 + $0x390] sm:$0xff]   ;;  %v8776_v29 = vld [vmem:[%s10460_s1 + $0x358] sm:$0xff]  }
 0x1cb   : > { %8150 = vmatpush3.bf16.msra.mxu1 %v8731_v30  ;;  %8129 = vmatprep.subr.bf16.mxu0 %v8732_v31  ;;  %v8777_v30 = vld [vmem:[%s10460_s1 + $0x3d8] sm:$0xff]  }
 0x1cc   : > { %8151 = vmatprep.subr.bf16.mxu1 %v8733_v26  ;;  %5634 = vmatprep.mubr.bf16.mxu0 %v7370_v13  ;;  %v8778_v31 = vld [vmem:[%s10460_s1 + $0x318] sm:$0xff]  }
 0x1cd   : > { %5674 = vmatprep.mubr.bf16.mxu1 %v7372_v14  ;;  %v8779_v26 = vld [vmem:[%s10460_s1 + $0x398] sm:$0xff]  }
 0x1ce   : > { %8130 = vmatpush3.bf16.msra.mxu0 %v8734_v33  ;;  %v8780_v33 = vld [vmem:[%s10460_s1 + $0x360] sm:$0xff]  }
 0x1cf   : > { %8152 = vmatpush3.bf16.msra.mxu1 %v8735_v34  ;;  %8131 = vmatprep.subr.bf16.mxu0 %v8736_v35  ;;  %v8781_v34 = vld [vmem:[%s10460_s1 + $0x3e0] sm:$0xff]  }
 0x1d0   : > { %8153 = vmatprep.subr.bf16.mxu1 %v8737_v32  ;;  %v8782_v35 = vld [vmem:[%s10460_s1 + $0x320] sm:$0xff]  }
 0x1d1   : > { %v8783_v32 = vld [vmem:[%s10460_s1 + $0x3a0] sm:$0xff]  }
 0x1d2   : > { %8132 = vmatpush3.bf16.msra.mxu0 %v8738_v36 }
 0x1d3   : > { %8154 = vmatpush3.bf16.msra.mxu1 %v8739_v37  ;;  %8133 = vmatprep.subr.bf16.mxu0 %v8740_v38 }
 0x1d4   : > { %8155 = vmatprep.subr.bf16.mxu1 %v8741_v39 }
 0x1d6   : > { %8134 = vmatpush3.bf16.msra.mxu0 %v8742_v40 }
 0x1d7   : > { %8156 = vmatpush3.bf16.msra.mxu1 %v8743_v41  ;;  %8135 = vmatprep.subr.bf16.mxu0 %v8744_v42  ;;  %v8784_v41 = vld [vmem:[%s10460_s1 + $0x368] sm:$0xff]  }
 0x1d8   : > { %8157 = vmatprep.subr.bf16.mxu1 %v8745_v43  ;;  %v8785_v43 = vld [vmem:[%s10460_s1 + $0x3e8] sm:$0xff]  }
 0x1da   : > { %v7835_v44 = vpop.f32.mrb[28].mxu0  ;;  %8136 = vmatpush3.bf16.msra.mxu0 %v8746_v45 }
 0x1db   : > { %v7857_v46 = vpop.f32.mrb[28].mxu1  ;;  %v7836_v48 = vpop.f32.mrb[29].mxu0  ;;  %8158 = vmatpush3.bf16.msra.mxu1 %v8747_v47  ;;  %8137 = vmatprep.subr.bf16.mxu0 %v8748_v50 }
 0x1dc   : > { %v7858_v49 = vpop.f32.mrb[29].mxu1  ;;  %v7837_v51 = vadd.f32 %v7836_v48, %v7835_v44  ;;  %v7838_v54 = vpop.f32.mrb[30].mxu0  ;;  %8159 = vmatprep.subr.bf16.mxu1 %v8749_v53  ;;  %v8787_v48 = vld [vmem:[%s10460_s1 + $0x3a8] sm:$0xff]   ;;  %v8790_v53 = vld [vmem:[%s10460_s1 + $0x330] sm:$0xff]  }
 0x1dd   : > { %v7859_v52 = vadd.f32 %v7858_v49, %v7857_v46  ;;  %v7860_v55 = vpop.f32.mrb[30].mxu1  ;;  %v7839_v59 = vpop.f32.mrb[31].mxu0  ;;  %v8786_v46 = vld [vmem:[%s10460_s1 + $0x328] sm:$0xff]   ;;  %v8791_v54 = vld [vmem:[%s10460_s1 + $0x3b0] sm:$0xff]  }
 0x1de   : > { %v7861_v60 = vpop.f32.mrb[31].mxu1  ;;  %8138 = vmatpush3.bf16.msra.mxu0 %v8750_v56  ;;  %v8792_v55 = vld [vmem:[%s10460_s1 + $0x378] sm:$0xff]   ;;  %v7405_v59 = vld [vmem:[%s8937_s27 + $0x40] sm:$0x77] }
 0x1df   : > { %v3114_v57 = vadd.f32 %v7859_v52, %v7837_v51  ;;  %8160 = vmatpush3.bf16.msra.mxu1 %v8751_v58  ;;  %8139 = vmatprep.subr.bf16.mxu0 %v8752_v61  ;;  %v8788_v51 = vld [vmem:[%s10460_s1 + $0x370] sm:$0xff]   ;;  %v8793_v56 = vld [vmem:[%s10460_s1 + $0x3f8] sm:$0xff]   ;;  %v7406_v60 = vld [vmem:[%s8937_s27 + $0x48] sm:$0x77]  ;;  %v7471_v61 = vcombine.low %v7405_v59, %v7405_v59 }
 0x1e0   : > { %8161 = vmatprep.subr.bf16.mxu1 %v8753_v63  ;;  %v8789_v52 = vld [vmem:[%s10460_s1 + $0x3f0] sm:$0xff]   ;;  %v8795_v58 = vld [vmem:[%s10460_s1 + $0x3b8] sm:$0xff]   ;;  %v7473_v63 = vcombine.low %v7406_v60, %v7406_v60 }
 0x1e1   : > { %v3119_v62 = vadd.f32 %v3114_v57, %v10214_v5  ;;  %v8759_v5 = vld [vmem:[%s10460_s1 + $0x2b8] sm:$0xff]  }
 0x1e2   : > { %8140 = vmatpush3.bf16.msra.mxu0 %v8754_v2  ;;  %v8794_v57 = vld [vmem:[%s10460_s1 + $0x338] sm:$0xff]  }
 0x1e3   : > { %v3120_v1 = vadd.f32 %v10330_v0, %v3119_v62  ;;  %8162 = vmatpush3.bf16.msra.mxu1 %v8755_v3  ;;  %8141 = vmatprep.subr.bf16.mxu0 %v8756_v6  ;;  %v7472_v62 = vcombine.high %v7405_v59, %v7405_v59 }
 0x1e4   : > { %8163 = vmatprep.subr.bf16.mxu1 %v8757_v7  ;;  %v5760_v7 = vshrl.u32 %v7471_v61, 16 }
 0x1e5   : > { %v3121_v4 = vmax.f32 %v3120_v1, 0.0  ;;  %v7474_v1 = vcombine.high %v7406_v60, %v7406_v60  ;;  %v5767_v2 = vshrl.u32 %v7472_v62, 16  ;;  %v5769_v3 = vshll.u32 %v7472_v62, 16 }
 0x1e6   : > { %8142 = vmatpush3.bf16.msra.mxu0 %v8758_v10  ;;  %v5774_v10 = vshrl.u32 %v7473_v63, 16 }
 0x1e7   : > { %v3122_v9 = vpack.c.bf16 %v3121_v4, %v3121_v4  ;;  %8164 = vmatpush3.bf16.msra.mxu1 %v8759_v5  ;;  %8171 = vmatprep.subr.bf16.mxu0 %v8764_v8  ;;  %v5781_v4 = vshrl.u32 %v7474_v1, 16  ;;  %v5783_v6 = vshll.u32 %v7474_v1, 16  ;;  %v5776_v5 = vshll.u32 %v7473_v63, 16 }
 0x1e8   : > { %8193 = vmatprep.subr.bf16.mxu1 %v8765_v15  ;;  %v5771_v11 = vrot.slane %v5769_v3, 1 }
 0x1e9   : > { %6817 = vst [vmem:[%s9932_s21 + $0x2] sm:$0x3] %v3122_v9  ;;  %5635 = vmatmul.mubr.bf16.vlgmr.msra.gmra.mrb[56].mxu0 %v7369_v16  ;;  %v5762_v9 = vshll.u32 %v7471_v61, 16  ;;  %v5785_v12 = vrot.slane %v5783_v6, 1  ;;  %v5778_v8 = vrot.slane %v5776_v5, 1 }
 0x1ea   : > { %5675 = vmatmul.mubr.bf16.vlgmr.msra.gmra.mrb[56].mxu1 %v7371_v18  ;;  %8172 = vmatpush3.bf16.msra.mxu0 %v8766_v17  ;;  %v5772_v14 = vor.u32 %v5771_v11, %v5767_v2 }
 0x1eb   : > { %8194 = vmatpush3.bf16.msra.mxu1 %v8767_v19  ;;  %8173 = vmatprep.subr.bf16.mxu0 %v8768_v20  ;;  %v5764_v13 = vrot.slane %v5762_v9, 1  ;;  %v5786_v15 = vor.u32 %v5785_v12, %v5781_v4  ;;  %v5779_v17 = vor.u32 %v5778_v8, %v5774_v10 }
 0x1ec   : > { %8195 = vmatprep.subr.bf16.mxu1 %v8769_v21  ;;  %6015 = vmatprep.mubr.bf16.mxu0 %v5772_v14 }
 0x1ed   : > { %v5765_v16 = vor.u32 %v5764_v13, %v5760_v7  ;;  %6055 = vmatprep.mubr.bf16.mxu1 %v5786_v15 }
 0x1ee   : > { %8174 = vmatpush3.bf16.msra.mxu0 %v8770_v22 }
 0x1ef   : > { %8196 = vmatpush3.bf16.msra.mxu1 %v8771_v23  ;;  %8175 = vmatprep.subr.bf16.mxu0 %v8772_v24 }
 0x1f0   : > { %8197 = vmatprep.subr.bf16.mxu1 %v8773_v25 }
 0x1f2   : > { %8176 = vmatpush3.bf16.msra.mxu0 %v8774_v27 }
 0x1f3   : > { %8198 = vmatpush3.bf16.msra.mxu1 %v8775_v28  ;;  %8177 = vmatprep.subr.bf16.mxu0 %v8776_v29 }
 0x1f4   : > { %8199 = vmatprep.subr.bf16.mxu1 %v8777_v30 }
 0x1f6   : > { %8178 = vmatpush3.bf16.msra.mxu0 %v8778_v31 }
 0x1f7   : > { %8200 = vmatpush3.bf16.msra.mxu1 %v8779_v26  ;;  %8179 = vmatprep.subr.bf16.mxu0 %v8780_v33 }
 0x1f8   : > { %8201 = vmatprep.subr.bf16.mxu1 %v8781_v34 }
 0x1fa   : > { %v7879_v36 = vpop.f32.mrb[32].mxu0  ;;  %8180 = vmatpush3.bf16.msra.mxu0 %v8782_v35 }
 0x1fb   : > { %v7901_v37 = vpop.f32.mrb[32].mxu1  ;;  %v7880_v38 = vpop.f32.mrb[33].mxu0  ;;  %8202 = vmatpush3.bf16.msra.mxu1 %v8783_v32  ;;  %8181 = vmatprep.subr.bf16.mxu0 %v8784_v41 }
 0x1fc   : > { %v7881_v39 = vadd.f32 %v7880_v38, %v7879_v36  ;;  %v7902_v40 = vpop.f32.mrb[33].mxu1  ;;  %v7882_v44 = vpop.f32.mrb[34].mxu0  ;;  %8203 = vmatprep.subr.bf16.mxu1 %v8785_v43 }
 0x1fd   : > { %v7903_v42 = vadd.f32 %v7902_v40, %v7901_v37  ;;  %v7904_v45 = vpop.f32.mrb[34].mxu1  ;;  %v7883_v49 = vpop.f32.mrb[35].mxu0 }
 0x1fe   : > { %v7905_v50 = vpop.f32.mrb[35].mxu1  ;;  %8182 = vmatpush3.bf16.msra.mxu0 %v8786_v46 }
 0x1ff   : > { %v3566_v47 = vadd.f32 %v7903_v42, %v7881_v39  ;;  %8204 = vmatpush3.bf16.msra.mxu1 %v8787_v48  ;;  %8183 = vmatprep.subr.bf16.mxu0 %v8788_v51 }
 0x200   : > { %8205 = vmatprep.subr.bf16.mxu1 %v8789_v52 }
 0x202   : > { %8184 = vmatpush3.bf16.msra.mxu0 %v8790_v53 }
 0x203   : > { %8206 = vmatpush3.bf16.msra.mxu1 %v8791_v54  ;;  %8185 = vmatprep.subr.bf16.mxu0 %v8792_v55 }
 0x204   : > { %8207 = vmatprep.subr.bf16.mxu1 %v8793_v56 }
 0x206   : > { %8186 = vmatpush3.bf16.msra.mxu0 %v8794_v57 }
 0x207   : > { %8208 = vmatpush3.bf16.msra.mxu1 %v8795_v58 }
 0x209   : > { %6016 = vmatmul.mubr.bf16.vlgmr.msra.gmra.mrb[60].mxu0 %v5765_v16 }
 0x20a   : > { %6056 = vmatmul.mubr.bf16.vlgmr.msra.gmra.mrb[60].mxu1 %v5779_v17 }
 0x21b   : > { %v7945_v19 = vpop.f32.mrb[36].mxu1 }
 0x21c   : > { %v7923_v18 = vpop.f32.mrb[36].mxu0  ;;  %v7946_v22 = vpop.f32.mrb[37].mxu1 }
 0x21d   : > { %v7924_v20 = vpop.f32.mrb[37].mxu0  ;;  %v7947_v24 = vadd.f32 %v7946_v22, %v7945_v19  ;;  %v7948_v25 = vpop.f32.mrb[38].mxu1 }
 0x21e   : > { %v7925_v21 = vadd.f32 %v7924_v20, %v7923_v18  ;;  %v7926_v23 = vpop.f32.mrb[38].mxu0  ;;  %v7949_v29 = vpop.f32.mrb[39].mxu1 }
 0x21f   : > { %v7927_v27 = vpop.f32.mrb[39].mxu0 }
 0x220   : > { %v3812_v28 = vadd.f32 %v7925_v21, %v3566_v47 }
 0x222   : > { %v3852_v30 = vadd.f32 %v7947_v24, %v3812_v28 }
 0x23b   : > { %v7989_v26 = vpop.f32.mrb[40].mxu1 }
 0x23c   : > { %v7967_v31 = vpop.f32.mrb[40].mxu0  ;;  %v7990_v35 = vpop.f32.mrb[41].mxu1 }
 0x23d   : > { %v7968_v33 = vpop.f32.mrb[41].mxu0  ;;  %v7991_v36 = vadd.f32 %v7990_v35, %v7989_v26  ;;  %v7992_v37 = vpop.f32.mrb[42].mxu1 }
 0x23e   : > { %v7969_v34 = vadd.f32 %v7968_v33, %v7967_v31  ;;  %v7970_v32 = vpop.f32.mrb[42].mxu0  ;;  %v7993_v39 = vpop.f32.mrb[43].mxu1 }
 0x23f   : > { %v7971_v38 = vpop.f32.mrb[43].mxu0 }
 0x240   : > { %v4205_v40 = vadd.f32 %v7991_v36, %v7969_v34 }
 0x242   : > { %v4210_v41 = vadd.f32 %v4205_v40, %v3852_v30 }
 0x25b   : > { %v8033_v43 = vpop.f32.mrb[44].mxu1 }
 0x25c   : > { %v8011_v42 = vpop.f32.mrb[44].mxu0  ;;  %v8034_v46 = vpop.f32.mrb[45].mxu1 }
 0x25d   : > { %v8012_v44 = vpop.f32.mrb[45].mxu0  ;;  %v8035_v48 = vadd.f32 %v8034_v46, %v8033_v43  ;;  %v8036_v49 = vpop.f32.mrb[46].mxu1 }
 0x25e   : > { %v8013_v45 = vadd.f32 %v8012_v44, %v8011_v42  ;;  %v8014_v47 = vpop.f32.mrb[46].mxu0  ;;  %v8037_v51 = vpop.f32.mrb[47].mxu1 }
 0x25f   : > { %v8015_v50 = vpop.f32.mrb[47].mxu0 }
 0x260   : > { %v4586_v52 = vadd.f32 %v8035_v48, %v8013_v45 }
 0x262   : > { %v4591_v53 = vadd.f32 %v4586_v52, %v4210_v41 }
 0x264   : > { %v4592_v54 = vadd.f32 %v10330_v0, %v4591_v53 }
 0x266   : > { %v4593_v55 = vmax.f32 %v4592_v54, 0.0 }
 0x268   : > { %v4594_v56 = vpack.c.bf16 %v4593_v55, %v4593_v55 }
 0x26a   : > { %7162 = vst [vmem:[%s9932_s21 + $0x4] sm:$0x3] %v4594_v56 }
 0x27b   : > { %v8077_v58 = vpop.f32.mrb[48].mxu1 }
 0x27c   : > { %v8055_v57 = vpop.f32.mrb[48].mxu0  ;;  %v8078_v61 = vpop.f32.mrb[49].mxu1 }
 0x27d   : > { %v8056_v59 = vpop.f32.mrb[49].mxu0  ;;  %v8079_v63 = vadd.f32 %v8078_v61, %v8077_v58  ;;  %v8080_v1 = vpop.f32.mrb[50].mxu1 }
 0x27e   : > { %v8057_v60 = vadd.f32 %v8056_v59, %v8055_v57  ;;  %v8058_v62 = vpop.f32.mrb[50].mxu0  ;;  %v8081_v3 = vpop.f32.mrb[51].mxu1 }
 0x27f   : > { %v8059_v2 = vpop.f32.mrb[51].mxu0 }
 0x280   : > { %v5038_v4 = vadd.f32 %v8079_v63, %v8057_v60 }
 0x29c   : > { %v8099_v6 = vpop.f32.mrb[52].mxu0 }
 0x29d   : > { %v8121_v7 = vpop.f32.mrb[52].mxu1  ;;  %v8100_v9 = vpop.f32.mrb[53].mxu0 }
 0x29e   : > { %v8101_v10 = vadd.f32 %v8100_v9, %v8099_v6  ;;  %v8122_v5 = vpop.f32.mrb[53].mxu1  ;;  %v8102_v11 = vpop.f32.mrb[54].mxu0 }
 0x29f   : > { %v8123_v12 = vadd.f32 %v8122_v5, %v8121_v7  ;;  %v8124_v13 = vpop.f32.mrb[54].mxu1  ;;  %v8103_v8 = vpop.f32.mrb[55].mxu0 }
 0x2a0   : > { %v5284_v14 = vadd.f32 %v8101_v10, %v5038_v4  ;;  %v8125_v15 = vpop.f32.mrb[55].mxu1 }
 0x2a2   : > { %v5324_v16 = vadd.f32 %v8123_v12, %v5284_v14 }
 0x2bc   : > { %v8143_v17 = vpop.f32.mrb[56].mxu0 }
 0x2bd   : > { %v8165_v18 = vpop.f32.mrb[56].mxu1  ;;  %v8144_v19 = vpop.f32.mrb[57].mxu0 }
 0x2be   : > { %v8145_v20 = vadd.f32 %v8144_v19, %v8143_v17  ;;  %v8166_v21 = vpop.f32.mrb[57].mxu1  ;;  %v8146_v22 = vpop.f32.mrb[58].mxu0 }
 0x2bf   : > { %v8167_v23 = vadd.f32 %v8166_v21, %v8165_v18  ;;  %v8168_v24 = vpop.f32.mrb[58].mxu1  ;;  %v8147_v25 = vpop.f32.mrb[59].mxu0 }
 0x2c0   : > { %v8169_v27 = vpop.f32.mrb[59].mxu1 }
 0x2c1   : > { %v5677_v28 = vadd.f32 %v8167_v23, %v8145_v20 }
 0x2c3   : > { %v5682_v29 = vadd.f32 %v5677_v28, %v5324_v16 }
 0x2dc   : > { %v8187_v30 = vpop.f32.mrb[60].mxu0 }
 0x2dd   : > { %v8209_v31 = vpop.f32.mrb[60].mxu1  ;;  %v8188_v26 = vpop.f32.mrb[61].mxu0 }
 0x2de   : > { %v8210_v33 = vpop.f32.mrb[61].mxu1  ;;  %v8189_v34 = vadd.f32 %v8188_v26, %v8187_v30  ;;  %v8190_v32 = vpop.f32.mrb[62].mxu0 }
 0x2df   : > { %v8211_v35 = vadd.f32 %v8210_v33, %v8209_v31  ;;  %v8212_v36 = vpop.f32.mrb[62].mxu1  ;;  %v8191_v37 = vpop.f32.mrb[63].mxu0 }
 0x2e0   : > { %v8213_v38 = vpop.f32.mrb[63].mxu1 }
 0x2e1   : > { %v6058_v39 = vadd.f32 %v8211_v35, %v8189_v34 }
 0x2e3   : > { %v6063_v40 = vadd.f32 %v6058_v39, %v5682_v29 }
 0x2e5   : > { %v6064_v41 = vadd.f32 %v10330_v0, %v6063_v40 }
 0x2e7   : > { %v6065_v42 = vmax.f32 %v6064_v41, 0.0 }
 0x2e9   : > { %v6066_v43 = vpack.c.bf16 %v6065_v42, %v6065_v42 }
 0x2eb   : > { %7507 = vst [vmem:[%s9932_s21 + $0x6] sm:$0x3] %v6066_v43 }
 0x2ec PF: > { %s13_s12 = sadd.s32 1, %s8807_s12  }
 0x2ed   : > { %p10_p4 = scmp.ge.s32.totalorder %s13_s12, 4  }
 0x2ef   :  { %12 = sbr.rel (!%p10_p4) target bundleno = 1 (0x1), region = 72 }

</bundles_post_ra>
